<compile_context>
chip_gen: v7x
topology: tpu7x:2x2x1
jax: 0.10.0
libtpu: 0.0.40
codegen_flags: <defaults>
</compile_context>

<pallas_src>
import numpy as np
import jax
import jax.numpy as jnp
from jax import lax
from jax.experimental import pallas as pl
from jax.experimental.pallas import tpu as pltpu

VEC = 128          # vec_size, hard-wired by seq2seq.forward in the torch script
HID = 128          # hidden size (torch script uses 512; kept small & lane-aligned here)
G4 = 4 * HID       # fused gate width [r | z | n_x | n_h]


def _gru_from_gates(g, h):
    """PyTorch GRU gate algebra from pre-activations g=(1,4H)=[r|z|n_x|n_h], state h=(1,H).
    Elementwise math kept in f32 (v5e has no bf16 VPU/EUP path)."""
    rz = jax.nn.sigmoid(g[:, 0:2 * HID])                       # one sigmoid over both gates
    r = rz[:, 0:HID]
    z = rz[:, HID:2 * HID]
    n = jnp.tanh(g[:, 2 * HID:3 * HID] + r * g[:, 3 * HID:4 * HID])
    return n + z * (h - n)                                     # == (1-z)*n + z*h


def seq2seq_kernel(tf_ref, src_ref, trg_ref,
                   e0_wx, e0_wh, e0_b,
                   e1_w, e1_b,
                   d0_w, d0_b,
                   d1_w, d1_b,
                   outw_ref, outb_ref,
                   out_ref, gx_ref):
    L = src_ref.shape[0]   # static

    # ----------------- EncoderRNN: 2-layer GRU over src, zero init -----------------
    # TODO(synk): nn.GRU(dropout=0.5) only applies in training mode; eval semantics used.
    # Batch all layer-0 input projections in one MXU op; weights are loaded at use site
    # (never hoisted as values) to keep vreg pressure low.
    gx_ref[...] = jnp.dot(src_ref[...].astype(jnp.bfloat16), e0_wx[...],
                          preferred_element_type=jnp.float32) + e0_b[...]

    def enc_step(t, carry):
        h0, h1 = carry
        # layer 0: precomputed x-part (VMEM slice) + recurrent h-part (K=128 matmul)
        g0 = gx_ref[pl.ds(t, 1), :] + jnp.dot(
            h0.astype(jnp.bfloat16), e0_wh[...], preferred_element_type=jnp.float32)
        h0 = _gru_from_gates(g0, h0)
        # layer 1: fused [x|h] matmul, K = 2*HID = 256 (fills v6e/v7x MXU height)
        xh = jnp.concatenate([h0, h1], axis=1).astype(jnp.bfloat16)
        g1 = jnp.dot(xh, e1_w[...], preferred_element_type=jnp.float32) + e1_b[...]
        h1 = _gru_from_gates(g1, h1)
        return (h0, h1)

    zero_h = jnp.zeros((1, HID), jnp.float32)
    # torch: `hidden, cell = h_n` unpacks layer-0 / layer-1 final states.
    hidden, cell = lax.fori_loop(0, L, enc_step, (zero_h, zero_h), unroll=True)

    # ----------------- DecoderRNN loop with teacher forcing -----------------
    def dec_step(t, carry):
        hid, cel, dec_in = carry
        x = jnp.maximum(dec_in, 0.0)                                   # F.relu(input)
        # decoder layer 0 (init = "hidden"), fused K=256 matmul
        xh0 = jnp.concatenate([x, hid], axis=1).astype(jnp.bfloat16)
        g0 = jnp.dot(xh0, d0_w[...], preferred_element_type=jnp.float32) + d0_b[...]
        h0n = _gru_from_gates(g0, hid)
        # decoder layer 1 (init = "cell")
        xh1 = jnp.concatenate([h0n, cel], axis=1).astype(jnp.bfloat16)
        g1 = jnp.dot(xh1, d1_w[...], preferred_element_type=jnp.float32) + d1_b[...]
        h1n = _gru_from_gates(g1, cel)
        logits = jnp.dot(h1n.astype(jnp.bfloat16), outw_ref[...],
                         preferred_element_type=jnp.float32) + outb_ref[...]
        out = jax.nn.sigmoid(logits)                                   # (1, VEC)
        out_ref[pl.ds(t, 1), :] = out                                  # store row directly
        # teacher forcing: scalar decision read from SMEM (free scalar slots)
        nxt = jnp.where(tf_ref[t] > 0, trg_ref[pl.ds(t, 1), :], out)
        return (h0n, h1n, nxt)

    dec_in0 = trg_ref[pl.ds(0, 1), :]                                  # trg[0, :]
    lax.fori_loop(0, L, dec_step, (hidden, cell, dec_in0), unroll=True)


def _fuse_gru(w_ih, w_hh, b_ih, b_hh):
    """Pack a PyTorch-style GRU layer (gate order r,z,n) into the fused [r|z|n_x|n_h] layout."""
    in_dim = w_ih.shape[0]
    wx = jnp.concatenate([w_ih[:, :2 * HID], w_ih[:, 2 * HID:],
                          jnp.zeros((in_dim, HID), jnp.float32)], axis=1)     # (in, 4H)
    wh = jnp.concatenate([w_hh[:, :2 * HID],
                          jnp.zeros((HID, HID), jnp.float32),
                          w_hh[:, 2 * HID:]], axis=1)                         # (H, 4H)
    b = jnp.concatenate([b_ih[:, :2 * HID] + b_hh[:, :2 * HID],
                         b_ih[:, 2 * HID:], b_hh[:, 2 * HID:]], axis=1)       # (1, 4H)
    return wx, wh, b


def init_params(key):
    """Deterministic parameter init (PyTorch-style U(-1/sqrt(H), 1/sqrt(H)))."""
    bound = 1.0 / np.sqrt(HID)

    def gru_layer(k, in_dim):
        k1, k2, k3, k4 = jax.random.split(k, 4)
        return (jax.random.uniform(k1, (in_dim, 3 * HID), jnp.float32, -bound, bound),
                jax.random.uniform(k2, (HID, 3 * HID), jnp.float32, -bound, bound),
                jax.random.uniform(k3, (1, 3 * HID), jnp.float32, -bound, bound),
                jax.random.uniform(k4, (1, 3 * HID), jnp.float32, -bound, bound))

    ks = jax.random.split(key, 6)
    enc0 = gru_layer(ks[0], VEC)   # encoder layer 0: input VEC
    enc1 = gru_layer(ks[1], HID)   # encoder layer 1: input HID
    dec0 = gru_layer(ks[2], VEC)   # decoder layer 0: input VEC
    dec1 = gru_layer(ks[3], HID)   # decoder layer 1: input HID
    out_w = jax.random.uniform(ks[4], (HID, VEC), jnp.float32, -bound, bound)
    out_b = jax.random.uniform(ks[5], (1, VEC), jnp.float32, -bound, bound)
    return enc0, enc1, dec0, dec1, out_w, out_b


def seq2seq_forward(src, trg, params, tf_bits):
    length = int(round(src.size / VEC))
    src2 = src.reshape(-1, VEC).astype(jnp.float32)
    trg2 = trg.reshape(-1, VEC).astype(jnp.float32)
    enc0, enc1, dec0, dec1, out_w, out_b = params

    # Fuse each GRU layer; matmul weights go to bf16 (f32 accumulation in-kernel), biases
    # stay f32. Encoder layer-0 keeps its x/h halves separate so x projections batch.
    e0_wx, e0_wh, e0_b = _fuse_gru(*enc0)
    e1_wx, e1_wh, e1_b = _fuse_gru(*enc1)
    d0_wx, d0_wh, d0_b = _fuse_gru(*dec0)
    d1_wx, d1_wh, d1_b = _fuse_gru(*dec1)
    bf = jnp.bfloat16
    flat = (e0_wx.astype(bf), e0_wh.astype(bf), e0_b,
            jnp.concatenate([e1_wx, e1_wh], axis=0).astype(bf), e1_b,
            jnp.concatenate([d0_wx, d0_wh], axis=0).astype(bf), d0_b,
            jnp.concatenate([d1_wx, d1_wh], axis=0).astype(bf), d1_b,
            out_w.astype(bf), out_b)

    tf_vec = jnp.asarray(tf_bits, jnp.int32)           # (L,) 0/1 scalars → SMEM

    vmem = pl.BlockSpec(memory_space=pltpu.MemorySpace.VMEM)
    smem = pl.BlockSpec(memory_space=pltpu.MemorySpace.SMEM)
    # Note: at HID=512 (torch config), also raise pltpu.CompilerParams(vmem_limit_bytes=...)
    # — not needed at this small size.
    return pl.pallas_call(
        seq2seq_kernel,
        out_shape=jax.ShapeDtypeStruct((length, VEC), jnp.float32),
        in_specs=[smem] + [vmem] * (2 + len(flat)),
        out_specs=vmem,
        scratch_shapes=[pltpu.VMEM((length, G4), jnp.float32)],
    )(tf_vec, src2, trg2, *flat)


if __name__ == "__main__":
    key = jax.random.PRNGKey(0)
    k_src, k_trg, k_tf, k_par = jax.random.split(key, 4)

    L = 8  # sequence length (= src.numel() / vec_size)
    src = jax.random.normal(k_src, (L, VEC), jnp.float32)
    trg = jax.random.normal(k_trg, (L, VEC), jnp.float32)

    # TODO(synk): torch uses python random.random() per step for teacher forcing;
    # replaced with a deterministic Bernoulli(0.5) mask derived from PRNGKey(0).
    tf_bits = jax.random.bernoulli(k_tf, 0.5, (L,)).astype(jnp.int32)

    params = init_params(k_par)
    out = seq2seq_forward(src, trg, params, tf_bits)
    jax.block_until_ready(out)
    assert out.shape == (L, VEC) and out.dtype == jnp.float32
    print("KERNEL_OK")
</pallas_src>

<mosaic_0001>
module attributes {stable_mosaic.version = 11 : i64} {
  func.func @seq2seq_kernel(%arg0: memref<8xi32, #tpu.memory_space<smem>>, %arg1: memref<8x128xf32, #tpu.memory_space<vmem>>, %arg2: memref<8x128xf32, #tpu.memory_space<vmem>>, %arg3: memref<128x512xbf16, #tpu.memory_space<vmem>>, %arg4: memref<128x512xbf16, #tpu.memory_space<vmem>>, %arg5: memref<1x512xf32, #tpu.memory_space<vmem>>, %arg6: memref<256x512xbf16, #tpu.memory_space<vmem>>, %arg7: memref<1x512xf32, #tpu.memory_space<vmem>>, %arg8: memref<256x512xbf16, #tpu.memory_space<vmem>>, %arg9: memref<1x512xf32, #tpu.memory_space<vmem>>, %arg10: memref<256x512xbf16, #tpu.memory_space<vmem>>, %arg11: memref<1x512xf32, #tpu.memory_space<vmem>>, %arg12: memref<128x128xbf16, #tpu.memory_space<vmem>>, %arg13: memref<1x128xf32, #tpu.memory_space<vmem>>, %arg14: memref<8x128xf32, #tpu.memory_space<vmem>>, %arg15: memref<8x512xf32, #tpu.memory_space<vmem>>) attributes {dimension_semantics = [], scalar_prefetch = 0 : i64, scratch_operands = 1 : i64, tpu.core_type = #tpu.core_type<tc>} {
    %c0 = arith.constant 0 : index
    %c0_0 = arith.constant 0 : index
    %0 = vector.load %arg1[%c0, %c0_0] : memref<8x128xf32, #tpu.memory_space<vmem>>, vector<8x128xf32>
    %1 = arith.truncf %0 : vector<8x128xf32> to vector<8x128xbf16>
    %c0_1 = arith.constant 0 : index
    %c0_2 = arith.constant 0 : index
    %2 = vector.load %arg3[%c0_1, %c0_2] : memref<128x512xbf16, #tpu.memory_space<vmem>>, vector<128x512xbf16>
    %cst = arith.constant dense<0.000000e+00> : vector<8x512xf32>
    %3 = tpu.matmul %1, %2, %cst {dimension_numbers = #tpu.dot_dimension_numbers<[1], [0], [0], [1], [0, 0, 1, 1], [], []>} : vector<8x128xbf16>, vector<128x512xbf16>, vector<8x512xf32> -> vector<8x512xf32>
    %c0_3 = arith.constant 0 : index
    %c0_4 = arith.constant 0 : index
    %4 = vector.load %arg5[%c0_3, %c0_4] : memref<1x512xf32, #tpu.memory_space<vmem>>, vector<1x512xf32>
    %5 = vector.broadcast %4 : vector<1x512xf32> to vector<8x512xf32>
    %6 = arith.addf %3, %5 : vector<8x512xf32>
    %c0_5 = arith.constant 0 : index
    %c0_6 = arith.constant 0 : index
    %7 = vector.load %arg15[%c0_5, %c0_6] : memref<8x512xf32, #tpu.memory_space<vmem>>, vector<8x512xf32>
    tpu.vector_store %arg15[%c0_5, %c0_6], %6 {strides = array<i32>} : memref<8x512xf32, #tpu.memory_space<vmem>>, vector<8x512xf32>,
    %cst_7 = arith.constant 0.000000e+00 : f32
    %8 = vector.broadcast %cst_7 : f32 to vector<1x128xf32>
    %c0_i32 = arith.constant 0 : i32
    %9 = arith.index_cast %c0_i32 : i32 to index
    %c0_8 = arith.constant 0 : index
    %10 = vector.load %arg15[%9, %c0_8] : memref<8x512xf32, #tpu.memory_space<vmem>>, vector<1x512xf32>
    %11 = arith.truncf %8 : vector<1x128xf32> to vector<1x128xbf16>
    %c0_9 = arith.constant 0 : index
    %c0_10 = arith.constant 0 : index
    %12 = vector.load %arg4[%c0_9, %c0_10] : memref<128x512xbf16, #tpu.memory_space<vmem>>, vector<128x512xbf16>
    %cst_11 = arith.constant dense<0.000000e+00> : vector<1x512xf32>
    %13 = tpu.matmul %11, %12, %cst_11 {dimension_numbers = #tpu.dot_dimension_numbers<[1], [0], [0], [1], [0, 0, 1, 1], [], []>} : vector<1x128xbf16>, vector<128x512xbf16>, vector<1x512xf32> -> vector<1x512xf32>
    %14 = arith.addf %10, %13 : vector<1x512xf32>
    %15 = vector.extract_strided_slice %14 {offsets = [0, 0], sizes = [1, 256], strides = [1, 1]} : vector<1x512xf32> to vector<1x256xf32>
    %16 = arith.negf %15 : vector<1x256xf32>
    %17 = math.exp %16 : vector<1x256xf32>
    %cst_12 = arith.constant 1.000000e+00 : f32
    %18 = vector.broadcast %cst_12 : f32 to vector<1x256xf32>
    %19 = arith.addf %18, %17 : vector<1x256xf32>
    %20 = arith.divf %18, %19 : vector<1x256xf32>
    %21 = vector.extract_strided_slice %20 {offsets = [0, 0], sizes = [1, 128], strides = [1, 1]} : vector<1x256xf32> to vector<1x128xf32>
    %22 = vector.extract_strided_slice %20 {offsets = [0, 128], sizes = [1, 128], strides = [1, 1]} : vector<1x256xf32> to vector<1x128xf32>
    %23 = vector.extract_strided_slice %14 {offsets = [0, 256], sizes = [1, 128], strides = [1, 1]} : vector<1x512xf32> to vector<1x128xf32>
    %24 = vector.extract_strided_slice %14 {offsets = [0, 384], sizes = [1, 128], strides = [1, 1]} : vector<1x512xf32> to vector<1x128xf32>
    %25 = arith.mulf %21, %24 : vector<1x128xf32>
    %26 = arith.addf %23, %25 : vector<1x128xf32>
    %27 = math.tanh %26 : vector<1x128xf32>
    %28 = arith.subf %8, %27 : vector<1x128xf32>
    %29 = arith.mulf %22, %28 : vector<1x128xf32>
    %30 = arith.addf %27, %29 : vector<1x128xf32>
    %31 = tpu.concatenate %30, %8 in 1 : vector<1x128xf32>, vector<1x128xf32> -> vector<1x256xf32>
    %32 = arith.truncf %31 : vector<1x256xf32> to vector<1x256xbf16>
    %c0_13 = arith.constant 0 : index
    %c0_14 = arith.constant 0 : index
    %33 = vector.load %arg6[%c0_13, %c0_14] : memref<256x512xbf16, #tpu.memory_space<vmem>>, vector<256x512xbf16>
    %cst_15 = arith.constant dense<0.000000e+00> : vector<1x512xf32>
    %34 = tpu.matmul %32, %33, %cst_15 {dimension_numbers = #tpu.dot_dimension_numbers<[1], [0], [0], [1], [0, 0, 1, 1], [], []>} : vector<1x256xbf16>, vector<256x512xbf16>, vector<1x512xf32> -> vector<1x512xf32>
    %c0_16 = arith.constant 0 : index
    %c0_17 = arith.constant 0 : index
    %35 = vector.load %arg7[%c0_16, %c0_17] : memref<1x512xf32, #tpu.memory_space<vmem>>, vector<1x512xf32>
    %36 = arith.addf %34, %35 : vector<1x512xf32>
    %37 = vector.extract_strided_slice %36 {offsets = [0, 0], sizes = [1, 256], strides = [1, 1]} : vector<1x512xf32> to vector<1x256xf32>
    %38 = arith.negf %37 : vector<1x256xf32>
    %39 = math.exp %38 : vector<1x256xf32>
    %cst_18 = arith.constant 1.000000e+00 : f32
    %40 = vector.broadcast %cst_18 : f32 to vector<1x256xf32>
    %41 = arith.addf %40, %39 : vector<1x256xf32>
    %42 = arith.divf %40, %41 : vector<1x256xf32>
    %43 = vector.extract_strided_slice %42 {offsets = [0, 0], sizes = [1, 128], strides = [1, 1]} : vector<1x256xf32> to vector<1x128xf32>
    %44 = vector.extract_strided_slice %42 {offsets = [0, 128], sizes = [1, 128], strides = [1, 1]} : vector<1x256xf32> to vector<1x128xf32>
    %45 = vector.extract_strided_slice %36 {offsets = [0, 256], sizes = [1, 128], strides = [1, 1]} : vector<1x512xf32> to vector<1x128xf32>
    %46 = vector.extract_strided_slice %36 {offsets = [0, 384], sizes = [1, 128], strides = [1, 1]} : vector<1x512xf32> to vector<1x128xf32>
    %47 = arith.mulf %43, %46 : vector<1x128xf32>
    %48 = arith.addf %45, %47 : vector<1x128xf32>
    %49 = math.tanh %48 : vector<1x128xf32>
    %50 = arith.subf %8, %49 : vector<1x128xf32>
    %51 = arith.mulf %44, %50 : vector<1x128xf32>
    %52 = arith.addf %49, %51 : vector<1x128xf32>
    %c1_i32 = arith.constant 1 : i32
    %53 = arith.index_cast %c1_i32 : i32 to index
    %c0_19 = arith.constant 0 : index
    %54 = vector.load %arg15[%53, %c0_19] : memref<8x512xf32, #tpu.memory_space<vmem>>, vector<1x512xf32>
    %55 = arith.truncf %30 : vector<1x128xf32> to vector<1x128xbf16>
    %c0_20 = arith.constant 0 : index
    %c0_21 = arith.constant 0 : index
    %56 = vector.load %arg4[%c0_20, %c0_21] : memref<128x512xbf16, #tpu.memory_space<vmem>>, vector<128x512xbf16>
    %cst_22 = arith.constant dense<0.000000e+00> : vector<1x512xf32>
    %57 = tpu.matmul %55, %56, %cst_22 {dimension_numbers = #tpu.dot_dimension_numbers<[1], [0], [0], [1], [0, 0, 1, 1], [], []>} : vector<1x128xbf16>, vector<128x512xbf16>, vector<1x512xf32> -> vector<1x512xf32>
    %58 = arith.addf %54, %57 : vector<1x512xf32>
    %59 = vector.extract_strided_slice %58 {offsets = [0, 0], sizes = [1, 256], strides = [1, 1]} : vector<1x512xf32> to vector<1x256xf32>
    %60 = arith.negf %59 : vector<1x256xf32>
    %61 = math.exp %60 : vector<1x256xf32>
    %cst_23 = arith.constant 1.000000e+00 : f32
    %62 = vector.broadcast %cst_23 : f32 to vector<1x256xf32>
    %63 = arith.addf %62, %61 : vector<1x256xf32>
    %64 = arith.divf %62, %63 : vector<1x256xf32>
    %65 = vector.extract_strided_slice %64 {offsets = [0, 0], sizes = [1, 128], strides = [1, 1]} : vector<1x256xf32> to vector<1x128xf32>
    %66 = vector.extract_strided_slice %64 {offsets = [0, 128], sizes = [1, 128], strides = [1, 1]} : vector<1x256xf32> to vector<1x128xf32>
    %67 = vector.extract_strided_slice %58 {offsets = [0, 256], sizes = [1, 128], strides = [1, 1]} : vector<1x512xf32> to vector<1x128xf32>
    %68 = vector.extract_strided_slice %58 {offsets = [0, 384], sizes = [1, 128], strides = [1, 1]} : vector<1x512xf32> to vector<1x128xf32>
    %69 = arith.mulf %65, %68 : vector<1x128xf32>
    %70 = arith.addf %67, %69 : vector<1x128xf32>
    %71 = math.tanh %70 : vector<1x128xf32>
    %72 = arith.subf %30, %71 : vector<1x128xf32>
    %73 = arith.mulf %66, %72 : vector<1x128xf32>
    %74 = arith.addf %71, %73 : vector<1x128xf32>
    %75 = tpu.concatenate %74, %52 in 1 : vector<1x128xf32>, vector<1x128xf32> -> vector<1x256xf32>
    %76 = arith.truncf %75 : vector<1x256xf32> to vector<1x256xbf16>
    %c0_24 = arith.constant 0 : index
    %c0_25 = arith.constant 0 : index
    %77 = vector.load %arg6[%c0_24, %c0_25] : memref<256x512xbf16, #tpu.memory_space<vmem>>, vector<256x512xbf16>
    %cst_26 = arith.constant dense<0.000000e+00> : vector<1x512xf32>
    %78 = tpu.matmul %76, %77, %cst_26 {dimension_numbers = #tpu.dot_dimension_numbers<[1], [0], [0], [1], [0, 0, 1, 1], [], []>} : vector<1x256xbf16>, vector<256x512xbf16>, vector<1x512xf32> -> vector<1x512xf32>
    %c0_27 = arith.constant 0 : index
    %c0_28 = arith.constant 0 : index
    %79 = vector.load %arg7[%c0_27, %c0_28] : memref<1x512xf32, #tpu.memory_space<vmem>>, vector<1x512xf32>
    %80 = arith.addf %78, %79 : vector<1x512xf32>
    %81 = vector.extract_strided_slice %80 {offsets = [0, 0], sizes = [1, 256], strides = [1, 1]} : vector<1x512xf32> to vector<1x256xf32>
    %82 = arith.negf %81 : vector<1x256xf32>
    %83 = math.exp %82 : vector<1x256xf32>
    %cst_29 = arith.constant 1.000000e+00 : f32
    %84 = vector.broadcast %cst_29 : f32 to vector<1x256xf32>
    %85 = arith.addf %84, %83 : vector<1x256xf32>
    %86 = arith.divf %84, %85 : vector<1x256xf32>
    %87 = vector.extract_strided_slice %86 {offsets = [0, 0], sizes = [1, 128], strides = [1, 1]} : vector<1x256xf32> to vector<1x128xf32>
    %88 = vector.extract_strided_slice %86 {offsets = [0, 128], sizes = [1, 128], strides = [1, 1]} : vector<1x256xf32> to vector<1x128xf32>
    %89 = vector.extract_strided_slice %80 {offsets = [0, 256], sizes = [1, 128], strides = [1, 1]} : vector<1x512xf32> to vector<1x128xf32>
    %90 = vector.extract_strided_slice %80 {offsets = [0, 384], sizes = [1, 128], strides = [1, 1]} : vector<1x512xf32> to vector<1x128xf32>
    %91 = arith.mulf %87, %90 : vector<1x128xf32>
    %92 = arith.addf %89, %91 : vector<1x128xf32>
    %93 = math.tanh %92 : vector<1x128xf32>
    %94 = arith.subf %52, %93 : vector<1x128xf32>
    %95 = arith.mulf %88, %94 : vector<1x128xf32>
    %96 = arith.addf %93, %95 : vector<1x128xf32>
    %c2_i32 = arith.constant 2 : i32
    %97 = arith.index_cast %c2_i32 : i32 to index
    %c0_30 = arith.constant 0 : index
    %98 = vector.load %arg15[%97, %c0_30] : memref<8x512xf32, #tpu.memory_space<vmem>>, vector<1x512xf32>
    %99 = arith.truncf %74 : vector<1x128xf32> to vector<1x128xbf16>
    %c0_31 = arith.constant 0 : index
    %c0_32 = arith.constant 0 : index
    %100 = vector.load %arg4[%c0_31, %c0_32] : memref<128x512xbf16, #tpu.memory_space<vmem>>, vector<128x512xbf16>
    %cst_33 = arith.constant dense<0.000000e+00> : vector<1x512xf32>
    %101 = tpu.matmul %99, %100, %cst_33 {dimension_numbers = #tpu.dot_dimension_numbers<[1], [0], [0], [1], [0, 0, 1, 1], [], []>} : vector<1x128xbf16>, vector<128x512xbf16>, vector<1x512xf32> -> vector<1x512xf32>
    %102 = arith.addf %98, %101 : vector<1x512xf32>
    %103 = vector.extract_strided_slice %102 {offsets = [0, 0], sizes = [1, 256], strides = [1, 1]} : vector<1x512xf32> to vector<1x256xf32>
    %104 = arith.negf %103 : vector<1x256xf32>
    %105 = math.exp %104 : vector<1x256xf32>
    %cst_34 = arith.constant 1.000000e+00 : f32
    %106 = vector.broadcast %cst_34 : f32 to vector<1x256xf32>
    %107 = arith.addf %106, %105 : vector<1x256xf32>
    %108 = arith.divf %106, %107 : vector<1x256xf32>
    %109 = vector.extract_strided_slice %108 {offsets = [0, 0], sizes = [1, 128], strides = [1, 1]} : vector<1x256xf32> to vector<1x128xf32>
    %110 = vector.extract_strided_slice %108 {offsets = [0, 128], sizes = [1, 128], strides = [1, 1]} : vector<1x256xf32> to vector<1x128xf32>
    %111 = vector.extract_strided_slice %102 {offsets = [0, 256], sizes = [1, 128], strides = [1, 1]} : vector<1x512xf32> to vector<1x128xf32>
    %112 = vector.extract_strided_slice %102 {offsets = [0, 384], sizes = [1, 128], strides = [1, 1]} : vector<1x512xf32> to vector<1x128xf32>
    %113 = arith.mulf %109, %112 : vector<1x128xf32>
    %114 = arith.addf %111, %113 : vector<1x128xf32>
    %115 = math.tanh %114 : vector<1x128xf32>
    %116 = arith.subf %74, %115 : vector<1x128xf32>
    %117 = arith.mulf %110, %116 : vector<1x128xf32>
    %118 = arith.addf %115, %117 : vector<1x128xf32>
    %119 = tpu.concatenate %118, %96 in 1 : vector<1x128xf32>, vector<1x128xf32> -> vector<1x256xf32>
    %120 = arith.truncf %119 : vector<1x256xf32> to vector<1x256xbf16>
    %c0_35 = arith.constant 0 : index
    %c0_36 = arith.constant 0 : index
    %121 = vector.load %arg6[%c0_35, %c0_36] : memref<256x512xbf16, #tpu.memory_space<vmem>>, vector<256x512xbf16>
    %cst_37 = arith.constant dense<0.000000e+00> : vector<1x512xf32>
    %122 = tpu.matmul %120, %121, %cst_37 {dimension_numbers = #tpu.dot_dimension_numbers<[1], [0], [0], [1], [0, 0, 1, 1], [], []>} : vector<1x256xbf16>, vector<256x512xbf16>, vector<1x512xf32> -> vector<1x512xf32>
    %c0_38 = arith.constant 0 : index
    %c0_39 = arith.constant 0 : index
    %123 = vector.load %arg7[%c0_38, %c0_39] : memref<1x512xf32, #tpu.memory_space<vmem>>, vector<1x512xf32>
    %124 = arith.addf %122, %123 : vector<1x512xf32>
    %125 = vector.extract_strided_slice %124 {offsets = [0, 0], sizes = [1, 256], strides = [1, 1]} : vector<1x512xf32> to vector<1x256xf32>
    %126 = arith.negf %125 : vector<1x256xf32>
    %127 = math.exp %126 : vector<1x256xf32>
    %cst_40 = arith.constant 1.000000e+00 : f32
    %128 = vector.broadcast %cst_40 : f32 to vector<1x256xf32>
    %129 = arith.addf %128, %127 : vector<1x256xf32>
    %130 = arith.divf %128, %129 : vector<1x256xf32>
    %131 = vector.extract_strided_slice %130 {offsets = [0, 0], sizes = [1, 128], strides = [1, 1]} : vector<1x256xf32> to vector<1x128xf32>
    %132 = vector.extract_strided_slice %130 {offsets = [0, 128], sizes = [1, 128], strides = [1, 1]} : vector<1x256xf32> to vector<1x128xf32>
    %133 = vector.extract_strided_slice %124 {offsets = [0, 256], sizes = [1, 128], strides = [1, 1]} : vector<1x512xf32> to vector<1x128xf32>
    %134 = vector.extract_strided_slice %124 {offsets = [0, 384], sizes = [1, 128], strides = [1, 1]} : vector<1x512xf32> to vector<1x128xf32>
    %135 = arith.mulf %131, %134 : vector<1x128xf32>
    %136 = arith.addf %133, %135 : vector<1x128xf32>
    %137 = math.tanh %136 : vector<1x128xf32>
    %138 = arith.subf %96, %137 : vector<1x128xf32>
    %139 = arith.mulf %132, %138 : vector<1x128xf32>
    %140 = arith.addf %137, %139 : vector<1x128xf32>
    %c3_i32 = arith.constant 3 : i32
    %141 = arith.index_cast %c3_i32 : i32 to index
    %c0_41 = arith.constant 0 : index
    %142 = vector.load %arg15[%141, %c0_41] : memref<8x512xf32, #tpu.memory_space<vmem>>, vector<1x512xf32>
    %143 = arith.truncf %118 : vector<1x128xf32> to vector<1x128xbf16>
    %c0_42 = arith.constant 0 : index
    %c0_43 = arith.constant 0 : index
    %144 = vector.load %arg4[%c0_42, %c0_43] : memref<128x512xbf16, #tpu.memory_space<vmem>>, vector<128x512xbf16>
    %cst_44 = arith.constant dense<0.000000e+00> : vector<1x512xf32>
    %145 = tpu.matmul %143, %144, %cst_44 {dimension_numbers = #tpu.dot_dimension_numbers<[1], [0], [0], [1], [0, 0, 1, 1], [], []>} : vector<1x128xbf16>, vector<128x512xbf16>, vector<1x512xf32> -> vector<1x512xf32>
    %146 = arith.addf %142, %145 : vector<1x512xf32>
    %147 = vector.extract_strided_slice %146 {offsets = [0, 0], sizes = [1, 256], strides = [1, 1]} : vector<1x512xf32> to vector<1x256xf32>
    %148 = arith.negf %147 : vector<1x256xf32>
    %149 = math.exp %148 : vector<1x256xf32>
    %cst_45 = arith.constant 1.000000e+00 : f32
    %150 = vector.broadcast %cst_45 : f32 to vector<1x256xf32>
    %151 = arith.addf %150, %149 : vector<1x256xf32>
    %152 = arith.divf %150, %151 : vector<1x256xf32>
    %153 = vector.extract_strided_slice %152 {offsets = [0, 0], sizes = [1, 128], strides = [1, 1]} : vector<1x256xf32> to vector<1x128xf32>
    %154 = vector.extract_strided_slice %152 {offsets = [0, 128], sizes = [1, 128], strides = [1, 1]} : vector<1x256xf32> to vector<1x128xf32>
    %155 = vector.extract_strided_slice %146 {offsets = [0, 256], sizes = [1, 128], strides = [1, 1]} : vector<1x512xf32> to vector<1x128xf32>
    %156 = vector.extract_strided_slice %146 {offsets = [0, 384], sizes = [1, 128], strides = [1, 1]} : vector<1x512xf32> to vector<1x128xf32>
    %157 = arith.mulf %153, %156 : vector<1x128xf32>
    %158 = arith.addf %155, %157 : vector<1x128xf32>
    %159 = math.tanh %158 : vector<1x128xf32>
    %160 = arith.subf %118, %159 : vector<1x128xf32>
    %161 = arith.mulf %154, %160 : vector<1x128xf32>
    %162 = arith.addf %159, %161 : vector<1x128xf32>
    %163 = tpu.concatenate %162, %140 in 1 : vector<1x128xf32>, vector<1x128xf32> -> vector<1x256xf32>
    %164 = arith.truncf %163 : vector<1x256xf32> to vector<1x256xbf16>
    %c0_46 = arith.constant 0 : index
    %c0_47 = arith.constant 0 : index
    %165 = vector.load %arg6[%c0_46, %c0_47] : memref<256x512xbf16, #tpu.memory_space<vmem>>, vector<256x512xbf16>
    %cst_48 = arith.constant dense<0.000000e+00> : vector<1x512xf32>
    %166 = tpu.matmul %164, %165, %cst_48 {dimension_numbers = #tpu.dot_dimension_numbers<[1], [0], [0], [1], [0, 0, 1, 1], [], []>} : vector<1x256xbf16>, vector<256x512xbf16>, vector<1x512xf32> -> vector<1x512xf32>
    %c0_49 = arith.constant 0 : index
    %c0_50 = arith.constant 0 : index
    %167 = vector.load %arg7[%c0_49, %c0_50] : memref<1x512xf32, #tpu.memory_space<vmem>>, vector<1x512xf32>
    %168 = arith.addf %166, %167 : vector<1x512xf32>
    %169 = vector.extract_strided_slice %168 {offsets = [0, 0], sizes = [1, 256], strides = [1, 1]} : vector<1x512xf32> to vector<1x256xf32>
    %170 = arith.negf %169 : vector<1x256xf32>
    %171 = math.exp %170 : vector<1x256xf32>
    %cst_51 = arith.constant 1.000000e+00 : f32
    %172 = vector.broadcast %cst_51 : f32 to vector<1x256xf32>
    %173 = arith.addf %172, %171 : vector<1x256xf32>
    %174 = arith.divf %172, %173 : vector<1x256xf32>
    %175 = vector.extract_strided_slice %174 {offsets = [0, 0], sizes = [1, 128], strides = [1, 1]} : vector<1x256xf32> to vector<1x128xf32>
    %176 = vector.extract_strided_slice %174 {offsets = [0, 128], sizes = [1, 128], strides = [1, 1]} : vector<1x256xf32> to vector<1x128xf32>
    %177 = vector.extract_strided_slice %168 {offsets = [0, 256], sizes = [1, 128], strides = [1, 1]} : vector<1x512xf32> to vector<1x128xf32>
    %178 = vector.extract_strided_slice %168 {offsets = [0, 384], sizes = [1, 128], strides = [1, 1]} : vector<1x512xf32> to vector<1x128xf32>
    %179 = arith.mulf %175, %178 : vector<1x128xf32>
    %180 = arith.addf %177, %179 : vector<1x128xf32>
    %181 = math.tanh %180 : vector<1x128xf32>
    %182 = arith.subf %140, %181 : vector<1x128xf32>
    %183 = arith.mulf %176, %182 : vector<1x128xf32>
    %184 = arith.addf %181, %183 : vector<1x128xf32>
    %c4_i32 = arith.constant 4 : i32
    %185 = arith.index_cast %c4_i32 : i32 to index
    %c0_52 = arith.constant 0 : index
    %186 = vector.load %arg15[%185, %c0_52] : memref<8x512xf32, #tpu.memory_space<vmem>>, vector<1x512xf32>
    %187 = arith.truncf %162 : vector<1x128xf32> to vector<1x128xbf16>
    %c0_53 = arith.constant 0 : index
    %c0_54 = arith.constant 0 : index
    %188 = vector.load %arg4[%c0_53, %c0_54] : memref<128x512xbf16, #tpu.memory_space<vmem>>, vector<128x512xbf16>
    %cst_55 = arith.constant dense<0.000000e+00> : vector<1x512xf32>
    %189 = tpu.matmul %187, %188, %cst_55 {dimension_numbers = #tpu.dot_dimension_numbers<[1], [0], [0], [1], [0, 0, 1, 1], [], []>} : vector<1x128xbf16>, vector<128x512xbf16>, vector<1x512xf32> -> vector<1x512xf32>
    %190 = arith.addf %186, %189 : vector<1x512xf32>
    %191 = vector.extract_strided_slice %190 {offsets = [0, 0], sizes = [1, 256], strides = [1, 1]} : vector<1x512xf32> to vector<1x256xf32>
    %192 = arith.negf %191 : vector<1x256xf32>
    %193 = math.exp %192 : vector<1x256xf32>
    %cst_56 = arith.constant 1.000000e+00 : f32
    %194 = vector.broadcast %cst_56 : f32 to vector<1x256xf32>
    %195 = arith.addf %194, %193 : vector<1x256xf32>
    %196 = arith.divf %194, %195 : vector<1x256xf32>
    %197 = vector.extract_strided_slice %196 {offsets = [0, 0], sizes = [1, 128], strides = [1, 1]} : vector<1x256xf32> to vector<1x128xf32>
    %198 = vector.extract_strided_slice %196 {offsets = [0, 128], sizes = [1, 128], strides = [1, 1]} : vector<1x256xf32> to vector<1x128xf32>
    %199 = vector.extract_strided_slice %190 {offsets = [0, 256], sizes = [1, 128], strides = [1, 1]} : vector<1x512xf32> to vector<1x128xf32>
    %200 = vector.extract_strided_slice %190 {offsets = [0, 384], sizes = [1, 128], strides = [1, 1]} : vector<1x512xf32> to vector<1x128xf32>
    %201 = arith.mulf %197, %200 : vector<1x128xf32>
    %202 = arith.addf %199, %201 : vector<1x128xf32>
    %203 = math.tanh %202 : vector<1x128xf32>
    %204 = arith.subf %162, %203 : vector<1x128xf32>
    %205 = arith.mulf %198, %204 : vector<1x128xf32>
    %206 = arith.addf %203, %205 : vector<1x128xf32>
    %207 = tpu.concatenate %206, %184 in 1 : vector<1x128xf32>, vector<1x128xf32> -> vector<1x256xf32>
    %208 = arith.truncf %207 : vector<1x256xf32> to vector<1x256xbf16>
    %c0_57 = arith.constant 0 : index
    %c0_58 = arith.constant 0 : index
    %209 = vector.load %arg6[%c0_57, %c0_58] : memref<256x512xbf16, #tpu.memory_space<vmem>>, vector<256x512xbf16>
    %cst_59 = arith.constant dense<0.000000e+00> : vector<1x512xf32>
    %210 = tpu.matmul %208, %209, %cst_59 {dimension_numbers = #tpu.dot_dimension_numbers<[1], [0], [0], [1], [0, 0, 1, 1], [], []>} : vector<1x256xbf16>, vector<256x512xbf16>, vector<1x512xf32> -> vector<1x512xf32>
    %c0_60 = arith.constant 0 : index
    %c0_61 = arith.constant 0 : index
    %211 = vector.load %arg7[%c0_60, %c0_61] : memref<1x512xf32, #tpu.memory_space<vmem>>, vector<1x512xf32>
    %212 = arith.addf %210, %211 : vector<1x512xf32>
    %213 = vector.extract_strided_slice %212 {offsets = [0, 0], sizes = [1, 256], strides = [1, 1]} : vector<1x512xf32> to vector<1x256xf32>
    %214 = arith.negf %213 : vector<1x256xf32>
    %215 = math.exp %214 : vector<1x256xf32>
    %cst_62 = arith.constant 1.000000e+00 : f32
    %216 = vector.broadcast %cst_62 : f32 to vector<1x256xf32>
    %217 = arith.addf %216, %215 : vector<1x256xf32>
    %218 = arith.divf %216, %217 : vector<1x256xf32>
    %219 = vector.extract_strided_slice %218 {offsets = [0, 0], sizes = [1, 128], strides = [1, 1]} : vector<1x256xf32> to vector<1x128xf32>
    %220 = vector.extract_strided_slice %218 {offsets = [0, 128], sizes = [1, 128], strides = [1, 1]} : vector<1x256xf32> to vector<1x128xf32>
    %221 = vector.extract_strided_slice %212 {offsets = [0, 256], sizes = [1, 128], strides = [1, 1]} : vector<1x512xf32> to vector<1x128xf32>
    %222 = vector.extract_strided_slice %212 {offsets = [0, 384], sizes = [1, 128], strides = [1, 1]} : vector<1x512xf32> to vector<1x128xf32>
    %223 = arith.mulf %219, %222 : vector<1x128xf32>
    %224 = arith.addf %221, %223 : vector<1x128xf32>
    %225 = math.tanh %224 : vector<1x128xf32>
    %226 = arith.subf %184, %225 : vector<1x128xf32>
    %227 = arith.mulf %220, %226 : vector<1x128xf32>
    %228 = arith.addf %225, %227 : vector<1x128xf32>
    %c5_i32 = arith.constant 5 : i32
    %229 = arith.index_cast %c5_i32 : i32 to index
    %c0_63 = arith.constant 0 : index
    %230 = vector.load %arg15[%229, %c0_63] : memref<8x512xf32, #tpu.memory_space<vmem>>, vector<1x512xf32>
    %231 = arith.truncf %206 : vector<1x128xf32> to vector<1x128xbf16>
    %c0_64 = arith.constant 0 : index
    %c0_65 = arith.constant 0 : index
    %232 = vector.load %arg4[%c0_64, %c0_65] : memref<128x512xbf16, #tpu.memory_space<vmem>>, vector<128x512xbf16>
    %cst_66 = arith.constant dense<0.000000e+00> : vector<1x512xf32>
    %233 = tpu.matmul %231, %232, %cst_66 {dimension_numbers = #tpu.dot_dimension_numbers<[1], [0], [0], [1], [0, 0, 1, 1], [], []>} : vector<1x128xbf16>, vector<128x512xbf16>, vector<1x512xf32> -> vector<1x512xf32>
    %234 = arith.addf %230, %233 : vector<1x512xf32>
    %235 = vector.extract_strided_slice %234 {offsets = [0, 0], sizes = [1, 256], strides = [1, 1]} : vector<1x512xf32> to vector<1x256xf32>
    %236 = arith.negf %235 : vector<1x256xf32>
    %237 = math.exp %236 : vector<1x256xf32>
    %cst_67 = arith.constant 1.000000e+00 : f32
    %238 = vector.broadcast %cst_67 : f32 to vector<1x256xf32>
    %239 = arith.addf %238, %237 : vector<1x256xf32>
    %240 = arith.divf %238, %239 : vector<1x256xf32>
    %241 = vector.extract_strided_slice %240 {offsets = [0, 0], sizes = [1, 128], strides = [1, 1]} : vector<1x256xf32> to vector<1x128xf32>
    %242 = vector.extract_strided_slice %240 {offsets = [0, 128], sizes = [1, 128], strides = [1, 1]} : vector<1x256xf32> to vector<1x128xf32>
    %243 = vector.extract_strided_slice %234 {offsets = [0, 256], sizes = [1, 128], strides = [1, 1]} : vector<1x512xf32> to vector<1x128xf32>
    %244 = vector.extract_strided_slice %234 {offsets = [0, 384], sizes = [1, 128], strides = [1, 1]} : vector<1x512xf32> to vector<1x128xf32>
    %245 = arith.mulf %241, %244 : vector<1x128xf32>
    %246 = arith.addf %243, %245 : vector<1x128xf32>
    %247 = math.tanh %246 : vector<1x128xf32>
    %248 = arith.subf %206, %247 : vector<1x128xf32>
    %249 = arith.mulf %242, %248 : vector<1x128xf32>
    %250 = arith.addf %247, %249 : vector<1x128xf32>
    %251 = tpu.concatenate %250, %228 in 1 : vector<1x128xf32>, vector<1x128xf32> -> vector<1x256xf32>
    %252 = arith.truncf %251 : vector<1x256xf32> to vector<1x256xbf16>
    %c0_68 = arith.constant 0 : index
    %c0_69 = arith.constant 0 : index
    %253 = vector.load %arg6[%c0_68, %c0_69] : memref<256x512xbf16, #tpu.memory_space<vmem>>, vector<256x512xbf16>
    %cst_70 = arith.constant dense<0.000000e+00> : vector<1x512xf32>
    %254 = tpu.matmul %252, %253, %cst_70 {dimension_numbers = #tpu.dot_dimension_numbers<[1], [0], [0], [1], [0, 0, 1, 1], [], []>} : vector<1x256xbf16>, vector<256x512xbf16>, vector<1x512xf32> -> vector<1x512xf32>
    %c0_71 = arith.constant 0 : index
    %c0_72 = arith.constant 0 : index
    %255 = vector.load %arg7[%c0_71, %c0_72] : memref<1x512xf32, #tpu.memory_space<vmem>>, vector<1x512xf32>
    %256 = arith.addf %254, %255 : vector<1x512xf32>
    %257 = vector.extract_strided_slice %256 {offsets = [0, 0], sizes = [1, 256], strides = [1, 1]} : vector<1x512xf32> to vector<1x256xf32>
    %258 = arith.negf %257 : vector<1x256xf32>
    %259 = math.exp %258 : vector<1x256xf32>
    %cst_73 = arith.constant 1.000000e+00 : f32
    %260 = vector.broadcast %cst_73 : f32 to vector<1x256xf32>
    %261 = arith.addf %260, %259 : vector<1x256xf32>
    %262 = arith.divf %260, %261 : vector<1x256xf32>
    %263 = vector.extract_strided_slice %262 {offsets = [0, 0], sizes = [1, 128], strides = [1, 1]} : vector<1x256xf32> to vector<1x128xf32>
    %264 = vector.extract_strided_slice %262 {offsets = [0, 128], sizes = [1, 128], strides = [1, 1]} : vector<1x256xf32> to vector<1x128xf32>
    %265 = vector.extract_strided_slice %256 {offsets = [0, 256], sizes = [1, 128], strides = [1, 1]} : vector<1x512xf32> to vector<1x128xf32>
    %266 = vector.extract_strided_slice %256 {offsets = [0, 384], sizes = [1, 128], strides = [1, 1]} : vector<1x512xf32> to vector<1x128xf32>
    %267 = arith.mulf %263, %266 : vector<1x128xf32>
    %268 = arith.addf %265, %267 : vector<1x128xf32>
    %269 = math.tanh %268 : vector<1x128xf32>
    %270 = arith.subf %228, %269 : vector<1x128xf32>
    %271 = arith.mulf %264, %270 : vector<1x128xf32>
    %272 = arith.addf %269, %271 : vector<1x128xf32>
    %c6_i32 = arith.constant 6 : i32
    %273 = arith.index_cast %c6_i32 : i32 to index
    %c0_74 = arith.constant 0 : index
    %274 = vector.load %arg15[%273, %c0_74] : memref<8x512xf32, #tpu.memory_space<vmem>>, vector<1x512xf32>
    %275 = arith.truncf %250 : vector<1x128xf32> to vector<1x128xbf16>
    %c0_75 = arith.constant 0 : index
    %c0_76 = arith.constant 0 : index
    %276 = vector.load %arg4[%c0_75, %c0_76] : memref<128x512xbf16, #tpu.memory_space<vmem>>, vector<128x512xbf16>
    %cst_77 = arith.constant dense<0.000000e+00> : vector<1x512xf32>
    %277 = tpu.matmul %275, %276, %cst_77 {dimension_numbers = #tpu.dot_dimension_numbers<[1], [0], [0], [1], [0, 0, 1, 1], [], []>} : vector<1x128xbf16>, vector<128x512xbf16>, vector<1x512xf32> -> vector<1x512xf32>
    %278 = arith.addf %274, %277 : vector<1x512xf32>
    %279 = vector.extract_strided_slice %278 {offsets = [0, 0], sizes = [1, 256], strides = [1, 1]} : vector<1x512xf32> to vector<1x256xf32>
    %280 = arith.negf %279 : vector<1x256xf32>
    %281 = math.exp %280 : vector<1x256xf32>
    %cst_78 = arith.constant 1.000000e+00 : f32
    %282 = vector.broadcast %cst_78 : f32 to vector<1x256xf32>
    %283 = arith.addf %282, %281 : vector<1x256xf32>
    %284 = arith.divf %282, %283 : vector<1x256xf32>
    %285 = vector.extract_strided_slice %284 {offsets = [0, 0], sizes = [1, 128], strides = [1, 1]} : vector<1x256xf32> to vector<1x128xf32>
    %286 = vector.extract_strided_slice %284 {offsets = [0, 128], sizes = [1, 128], strides = [1, 1]} : vector<1x256xf32> to vector<1x128xf32>
    %287 = vector.extract_strided_slice %278 {offsets = [0, 256], sizes = [1, 128], strides = [1, 1]} : vector<1x512xf32> to vector<1x128xf32>
    %288 = vector.extract_strided_slice %278 {offsets = [0, 384], sizes = [1, 128], strides = [1, 1]} : vector<1x512xf32> to vector<1x128xf32>
    %289 = arith.mulf %285, %288 : vector<1x128xf32>
    %290 = arith.addf %287, %289 : vector<1x128xf32>
    %291 = math.tanh %290 : vector<1x128xf32>
    %292 = arith.subf %250, %291 : vector<1x128xf32>
    %293 = arith.mulf %286, %292 : vector<1x128xf32>
    %294 = arith.addf %291, %293 : vector<1x128xf32>
    %295 = tpu.concatenate %294, %272 in 1 : vector<1x128xf32>, vector<1x128xf32> -> vector<1x256xf32>
    %296 = arith.truncf %295 : vector<1x256xf32> to vector<1x256xbf16>
    %c0_79 = arith.constant 0 : index
    %c0_80 = arith.constant 0 : index
    %297 = vector.load %arg6[%c0_79, %c0_80] : memref<256x512xbf16, #tpu.memory_space<vmem>>, vector<256x512xbf16>
    %cst_81 = arith.constant dense<0.000000e+00> : vector<1x512xf32>
    %298 = tpu.matmul %296, %297, %cst_81 {dimension_numbers = #tpu.dot_dimension_numbers<[1], [0], [0], [1], [0, 0, 1, 1], [], []>} : vector<1x256xbf16>, vector<256x512xbf16>, vector<1x512xf32> -> vector<1x512xf32>
    %c0_82 = arith.constant 0 : index
    %c0_83 = arith.constant 0 : index
    %299 = vector.load %arg7[%c0_82, %c0_83] : memref<1x512xf32, #tpu.memory_space<vmem>>, vector<1x512xf32>
    %300 = arith.addf %298, %299 : vector<1x512xf32>
    %301 = vector.extract_strided_slice %300 {offsets = [0, 0], sizes = [1, 256], strides = [1, 1]} : vector<1x512xf32> to vector<1x256xf32>
    %302 = arith.negf %301 : vector<1x256xf32>
    %303 = math.exp %302 : vector<1x256xf32>
    %cst_84 = arith.constant 1.000000e+00 : f32
    %304 = vector.broadcast %cst_84 : f32 to vector<1x256xf32>
    %305 = arith.addf %304, %303 : vector<1x256xf32>
    %306 = arith.divf %304, %305 : vector<1x256xf32>
    %307 = vector.extract_strided_slice %306 {offsets = [0, 0], sizes = [1, 128], strides = [1, 1]} : vector<1x256xf32> to vector<1x128xf32>
    %308 = vector.extract_strided_slice %306 {offsets = [0, 128], sizes = [1, 128], strides = [1, 1]} : vector<1x256xf32> to vector<1x128xf32>
    %309 = vector.extract_strided_slice %300 {offsets = [0, 256], sizes = [1, 128], strides = [1, 1]} : vector<1x512xf32> to vector<1x128xf32>
    %310 = vector.extract_strided_slice %300 {offsets = [0, 384], sizes = [1, 128], strides = [1, 1]} : vector<1x512xf32> to vector<1x128xf32>
    %311 = arith.mulf %307, %310 : vector<1x128xf32>
    %312 = arith.addf %309, %311 : vector<1x128xf32>
    %313 = math.tanh %312 : vector<1x128xf32>
    %314 = arith.subf %272, %313 : vector<1x128xf32>
    %315 = arith.mulf %308, %314 : vector<1x128xf32>
    %316 = arith.addf %313, %315 : vector<1x128xf32>
    %c7_i32 = arith.constant 7 : i32
    %317 = arith.index_cast %c7_i32 : i32 to index
    %c0_85 = arith.constant 0 : index
    %318 = vector.load %arg15[%317, %c0_85] : memref<8x512xf32, #tpu.memory_space<vmem>>, vector<1x512xf32>
    %319 = arith.truncf %294 : vector<1x128xf32> to vector<1x128xbf16>
    %c0_86 = arith.constant 0 : index
    %c0_87 = arith.constant 0 : index
    %320 = vector.load %arg4[%c0_86, %c0_87] : memref<128x512xbf16, #tpu.memory_space<vmem>>, vector<128x512xbf16>
    %cst_88 = arith.constant dense<0.000000e+00> : vector<1x512xf32>
    %321 = tpu.matmul %319, %320, %cst_88 {dimension_numbers = #tpu.dot_dimension_numbers<[1], [0], [0], [1], [0, 0, 1, 1], [], []>} : vector<1x128xbf16>, vector<128x512xbf16>, vector<1x512xf32> -> vector<1x512xf32>
    %322 = arith.addf %318, %321 : vector<1x512xf32>
    %323 = vector.extract_strided_slice %322 {offsets = [0, 0], sizes = [1, 256], strides = [1, 1]} : vector<1x512xf32> to vector<1x256xf32>
    %324 = arith.negf %323 : vector<1x256xf32>
    %325 = math.exp %324 : vector<1x256xf32>
    %cst_89 = arith.constant 1.000000e+00 : f32
    %326 = vector.broadcast %cst_89 : f32 to vector<1x256xf32>
    %327 = arith.addf %326, %325 : vector<1x256xf32>
    %328 = arith.divf %326, %327 : vector<1x256xf32>
    %329 = vector.extract_strided_slice %328 {offsets = [0, 0], sizes = [1, 128], strides = [1, 1]} : vector<1x256xf32> to vector<1x128xf32>
    %330 = vector.extract_strided_slice %328 {offsets = [0, 128], sizes = [1, 128], strides = [1, 1]} : vector<1x256xf32> to vector<1x128xf32>
    %331 = vector.extract_strided_slice %322 {offsets = [0, 256], sizes = [1, 128], strides = [1, 1]} : vector<1x512xf32> to vector<1x128xf32>
    %332 = vector.extract_strided_slice %322 {offsets = [0, 384], sizes = [1, 128], strides = [1, 1]} : vector<1x512xf32> to vector<1x128xf32>
    %333 = arith.mulf %329, %332 : vector<1x128xf32>
    %334 = arith.addf %331, %333 : vector<1x128xf32>
    %335 = math.tanh %334 : vector<1x128xf32>
    %336 = arith.subf %294, %335 : vector<1x128xf32>
    %337 = arith.mulf %330, %336 : vector<1x128xf32>
    %338 = arith.addf %335, %337 : vector<1x128xf32>
    %339 = tpu.concatenate %338, %316 in 1 : vector<1x128xf32>, vector<1x128xf32> -> vector<1x256xf32>
    %340 = arith.truncf %339 : vector<1x256xf32> to vector<1x256xbf16>
    %c0_90 = arith.constant 0 : index
    %c0_91 = arith.constant 0 : index
    %341 = vector.load %arg6[%c0_90, %c0_91] : memref<256x512xbf16, #tpu.memory_space<vmem>>, vector<256x512xbf16>
    %cst_92 = arith.constant dense<0.000000e+00> : vector<1x512xf32>
    %342 = tpu.matmul %340, %341, %cst_92 {dimension_numbers = #tpu.dot_dimension_numbers<[1], [0], [0], [1], [0, 0, 1, 1], [], []>} : vector<1x256xbf16>, vector<256x512xbf16>, vector<1x512xf32> -> vector<1x512xf32>
    %c0_93 = arith.constant 0 : index
    %c0_94 = arith.constant 0 : index
    %343 = vector.load %arg7[%c0_93, %c0_94] : memref<1x512xf32, #tpu.memory_space<vmem>>, vector<1x512xf32>
    %344 = arith.addf %342, %343 : vector<1x512xf32>
    %345 = vector.extract_strided_slice %344 {offsets = [0, 0], sizes = [1, 256], strides = [1, 1]} : vector<1x512xf32> to vector<1x256xf32>
    %346 = arith.negf %345 : vector<1x256xf32>
    %347 = math.exp %346 : vector<1x256xf32>
    %cst_95 = arith.constant 1.000000e+00 : f32
    %348 = vector.broadcast %cst_95 : f32 to vector<1x256xf32>
    %349 = arith.addf %348, %347 : vector<1x256xf32>
    %350 = arith.divf %348, %349 : vector<1x256xf32>
    %351 = vector.extract_strided_slice %350 {offsets = [0, 0], sizes = [1, 128], strides = [1, 1]} : vector<1x256xf32> to vector<1x128xf32>
    %352 = vector.extract_strided_slice %350 {offsets = [0, 128], sizes = [1, 128], strides = [1, 1]} : vector<1x256xf32> to vector<1x128xf32>
    %353 = vector.extract_strided_slice %344 {offsets = [0, 256], sizes = [1, 128], strides = [1, 1]} : vector<1x512xf32> to vector<1x128xf32>
    %354 = vector.extract_strided_slice %344 {offsets = [0, 384], sizes = [1, 128], strides = [1, 1]} : vector<1x512xf32> to vector<1x128xf32>
    %355 = arith.mulf %351, %354 : vector<1x128xf32>
    %356 = arith.addf %353, %355 : vector<1x128xf32>
    %357 = math.tanh %356 : vector<1x128xf32>
    %358 = arith.subf %316, %357 : vector<1x128xf32>
    %359 = arith.mulf %352, %358 : vector<1x128xf32>
    %360 = arith.addf %357, %359 : vector<1x128xf32>
    %c8_i32 = arith.constant 8 : i32
    %c0_96 = arith.constant 0 : index
    %c0_97 = arith.constant 0 : index
    %361 = vector.load %arg2[%c0_96, %c0_97] : memref<8x128xf32, #tpu.memory_space<vmem>>, vector<1x128xf32>
    %c0_i32_98 = arith.constant 0 : i32
    %cst_99 = arith.constant 0.000000e+00 : f32
    %362 = vector.broadcast %cst_99 : f32 to vector<1x128xf32>
    %363 = arith.maximumf %361, %362 : vector<1x128xf32>
    %364 = tpu.concatenate %363, %338 in 1 : vector<1x128xf32>, vector<1x128xf32> -> vector<1x256xf32>
    %365 = arith.truncf %364 : vector<1x256xf32> to vector<1x256xbf16>
    %c0_100 = arith.constant 0 : index
    %c0_101 = arith.constant 0 : index
    %366 = vector.load %arg8[%c0_100, %c0_101] : memref<256x512xbf16, #tpu.memory_space<vmem>>, vector<256x512xbf16>
    %cst_102 = arith.constant dense<0.000000e+00> : vector<1x512xf32>
    %367 = tpu.matmul %365, %366, %cst_102 {dimension_numbers = #tpu.dot_dimension_numbers<[1], [0], [0], [1], [0, 0, 1, 1], [], []>} : vector<1x256xbf16>, vector<256x512xbf16>, vector<1x512xf32> -> vector<1x512xf32>
    %c0_103 = arith.constant 0 : index
    %c0_104 = arith.constant 0 : index
    %368 = vector.load %arg9[%c0_103, %c0_104] : memref<1x512xf32, #tpu.memory_space<vmem>>, vector<1x512xf32>
    %369 = arith.addf %367, %368 : vector<1x512xf32>
    %370 = vector.extract_strided_slice %369 {offsets = [0, 0], sizes = [1, 256], strides = [1, 1]} : vector<1x512xf32> to vector<1x256xf32>
    %371 = arith.negf %370 : vector<1x256xf32>
    %372 = math.exp %371 : vector<1x256xf32>
    %cst_105 = arith.constant 1.000000e+00 : f32
    %373 = vector.broadcast %cst_105 : f32 to vector<1x256xf32>
    %374 = arith.addf %373, %372 : vector<1x256xf32>
    %375 = arith.divf %373, %374 : vector<1x256xf32>
    %376 = vector.extract_strided_slice %375 {offsets = [0, 0], sizes = [1, 128], strides = [1, 1]} : vector<1x256xf32> to vector<1x128xf32>
    %377 = vector.extract_strided_slice %375 {offsets = [0, 128], sizes = [1, 128], strides = [1, 1]} : vector<1x256xf32> to vector<1x128xf32>
    %378 = vector.extract_strided_slice %369 {offsets = [0, 256], sizes = [1, 128], strides = [1, 1]} : vector<1x512xf32> to vector<1x128xf32>
    %379 = vector.extract_strided_slice %369 {offsets = [0, 384], sizes = [1, 128], strides = [1, 1]} : vector<1x512xf32> to vector<1x128xf32>
    %380 = arith.mulf %376, %379 : vector<1x128xf32>
    %381 = arith.addf %378, %380 : vector<1x128xf32>
    %382 = math.tanh %381 : vector<1x128xf32>
    %383 = arith.subf %338, %382 : vector<1x128xf32>
    %384 = arith.mulf %377, %383 : vector<1x128xf32>
    %385 = arith.addf %382, %384 : vector<1x128xf32>
    %386 = tpu.concatenate %385, %360 in 1 : vector<1x128xf32>, vector<1x128xf32> -> vector<1x256xf32>
    %387 = arith.truncf %386 : vector<1x256xf32> to vector<1x256xbf16>
    %c0_106 = arith.constant 0 : index
    %c0_107 = arith.constant 0 : index
    %388 = vector.load %arg10[%c0_106, %c0_107] : memref<256x512xbf16, #tpu.memory_space<vmem>>, vector<256x512xbf16>
    %cst_108 = arith.constant dense<0.000000e+00> : vector<1x512xf32>
    %389 = tpu.matmul %387, %388, %cst_108 {dimension_numbers = #tpu.dot_dimension_numbers<[1], [0], [0], [1], [0, 0, 1, 1], [], []>} : vector<1x256xbf16>, vector<256x512xbf16>, vector<1x512xf32> -> vector<1x512xf32>
    %c0_109 = arith.constant 0 : index
    %c0_110 = arith.constant 0 : index
    %390 = vector.load %arg11[%c0_109, %c0_110] : memref<1x512xf32, #tpu.memory_space<vmem>>, vector<1x512xf32>
    %391 = arith.addf %389, %390 : vector<1x512xf32>
    %392 = vector.extract_strided_slice %391 {offsets = [0, 0], sizes = [1, 256], strides = [1, 1]} : vector<1x512xf32> to vector<1x256xf32>
    %393 = arith.negf %392 : vector<1x256xf32>
    %394 = math.exp %393 : vector<1x256xf32>
    %cst_111 = arith.constant 1.000000e+00 : f32
    %395 = vector.broadcast %cst_111 : f32 to vector<1x256xf32>
    %396 = arith.addf %395, %394 : vector<1x256xf32>
    %397 = arith.divf %395, %396 : vector<1x256xf32>
    %398 = vector.extract_strided_slice %397 {offsets = [0, 0], sizes = [1, 128], strides = [1, 1]} : vector<1x256xf32> to vector<1x128xf32>
    %399 = vector.extract_strided_slice %397 {offsets = [0, 128], sizes = [1, 128], strides = [1, 1]} : vector<1x256xf32> to vector<1x128xf32>
    %400 = vector.extract_strided_slice %391 {offsets = [0, 256], sizes = [1, 128], strides = [1, 1]} : vector<1x512xf32> to vector<1x128xf32>
    %401 = vector.extract_strided_slice %391 {offsets = [0, 384], sizes = [1, 128], strides = [1, 1]} : vector<1x512xf32> to vector<1x128xf32>
    %402 = arith.mulf %398, %401 : vector<1x128xf32>
    %403 = arith.addf %400, %402 : vector<1x128xf32>
    %404 = math.tanh %403 : vector<1x128xf32>
    %405 = arith.subf %360, %404 : vector<1x128xf32>
    %406 = arith.mulf %399, %405 : vector<1x128xf32>
    %407 = arith.addf %404, %406 : vector<1x128xf32>
    %408 = arith.truncf %407 : vector<1x128xf32> to vector<1x128xbf16>
    %c0_112 = arith.constant 0 : index
    %c0_113 = arith.constant 0 : index
    %409 = vector.load %arg12[%c0_112, %c0_113] : memref<128x128xbf16, #tpu.memory_space<vmem>>, vector<128x128xbf16>
    %cst_114 = arith.constant dense<0.000000e+00> : vector<1x128xf32>
    %410 = tpu.matmul %408, %409, %cst_114 {dimension_numbers = #tpu.dot_dimension_numbers<[1], [0], [0], [1], [0, 0, 1, 1], [], []>} : vector<1x128xbf16>, vector<128x128xbf16>, vector<1x128xf32> -> vector<1x128xf32>
    %c0_115 = arith.constant 0 : index
    %c0_116 = arith.constant 0 : index
    %411 = vector.load %arg13[%c0_115, %c0_116] : memref<1x128xf32, #tpu.memory_space<vmem>>, vector<1x128xf32>
    %412 = arith.addf %410, %411 : vector<1x128xf32>
    %413 = arith.negf %412 : vector<1x128xf32>
    %414 = math.exp %413 : vector<1x128xf32>
    %cst_117 = arith.constant 1.000000e+00 : f32
    %415 = vector.broadcast %cst_117 : f32 to vector<1x128xf32>
    %416 = arith.addf %415, %414 : vector<1x128xf32>
    %417 = arith.divf %415, %416 : vector<1x128xf32>
    %418 = arith.index_cast %c0_i32_98 : i32 to index
    %c0_118 = arith.constant 0 : index
    %419 = vector.load %arg14[%418, %c0_118] : memref<8x128xf32, #tpu.memory_space<vmem>>, vector<1x128xf32>
    tpu.vector_store %arg14[%418, %c0_118], %417 {strides = array<i32>} : memref<8x128xf32, #tpu.memory_space<vmem>>, vector<1x128xf32>,
    %420 = arith.index_cast %c0_i32_98 : i32 to index
    %421 = memref.load %arg0[%420] : memref<8xi32, #tpu.memory_space<smem>>
    %c0_i32_119 = arith.constant 0 : i32
    %422 = arith.cmpi sgt, %421, %c0_i32_119 : i32
    %423 = arith.index_cast %c0_i32_98 : i32 to index
    %c0_120 = arith.constant 0 : index
    %424 = vector.load %arg2[%423, %c0_120] : memref<8x128xf32, #tpu.memory_space<vmem>>, vector<1x128xf32>
    %425 = arith.select %422, %424, %417 : vector<1x128xf32>
    %c1_i32_121 = arith.constant 1 : i32
    %cst_122 = arith.constant 0.000000e+00 : f32
    %426 = vector.broadcast %cst_122 : f32 to vector<1x128xf32>
    %427 = arith.maximumf %425, %426 : vector<1x128xf32>
    %428 = tpu.concatenate %427, %385 in 1 : vector<1x128xf32>, vector<1x128xf32> -> vector<1x256xf32>
    %429 = arith.truncf %428 : vector<1x256xf32> to vector<1x256xbf16>
    %c0_123 = arith.constant 0 : index
    %c0_124 = arith.constant 0 : index
    %430 = vector.load %arg8[%c0_123, %c0_124] : memref<256x512xbf16, #tpu.memory_space<vmem>>, vector<256x512xbf16>
    %cst_125 = arith.constant dense<0.000000e+00> : vector<1x512xf32>
    %431 = tpu.matmul %429, %430, %cst_125 {dimension_numbers = #tpu.dot_dimension_numbers<[1], [0], [0], [1], [0, 0, 1, 1], [], []>} : vector<1x256xbf16>, vector<256x512xbf16>, vector<1x512xf32> -> vector<1x512xf32>
    %c0_126 = arith.constant 0 : index
    %c0_127 = arith.constant 0 : index
    %432 = vector.load %arg9[%c0_126, %c0_127] : memref<1x512xf32, #tpu.memory_space<vmem>>, vector<1x512xf32>
    %433 = arith.addf %431, %432 : vector<1x512xf32>
    %434 = vector.extract_strided_slice %433 {offsets = [0, 0], sizes = [1, 256], strides = [1, 1]} : vector<1x512xf32> to vector<1x256xf32>
    %435 = arith.negf %434 : vector<1x256xf32>
    %436 = math.exp %435 : vector<1x256xf32>
    %cst_128 = arith.constant 1.000000e+00 : f32
    %437 = vector.broadcast %cst_128 : f32 to vector<1x256xf32>
    %438 = arith.addf %437, %436 : vector<1x256xf32>
    %439 = arith.divf %437, %438 : vector<1x256xf32>
    %440 = vector.extract_strided_slice %439 {offsets = [0, 0], sizes = [1, 128], strides = [1, 1]} : vector<1x256xf32> to vector<1x128xf32>
    %441 = vector.extract_strided_slice %439 {offsets = [0, 128], sizes = [1, 128], strides = [1, 1]} : vector<1x256xf32> to vector<1x128xf32>
    %442 = vector.extract_strided_slice %433 {offsets = [0, 256], sizes = [1, 128], strides = [1, 1]} : vector<1x512xf32> to vector<1x128xf32>
    %443 = vector.extract_strided_slice %433 {offsets = [0, 384], sizes = [1, 128], strides = [1, 1]} : vector<1x512xf32> to vector<1x128xf32>
    %444 = arith.mulf %440, %443 : vector<1x128xf32>
    %445 = arith.addf %442, %444 : vector<1x128xf32>
    %446 = math.tanh %445 : vector<1x128xf32>
    %447 = arith.subf %385, %446 : vector<1x128xf32>
    %448 = arith.mulf %441, %447 : vector<1x128xf32>
    %449 = arith.addf %446, %448 : vector<1x128xf32>
    %450 = tpu.concatenate %449, %407 in 1 : vector<1x128xf32>, vector<1x128xf32> -> vector<1x256xf32>
    %451 = arith.truncf %450 : vector<1x256xf32> to vector<1x256xbf16>
    %c0_129 = arith.constant 0 : index
    %c0_130 = arith.constant 0 : index
    %452 = vector.load %arg10[%c0_129, %c0_130] : memref<256x512xbf16, #tpu.memory_space<vmem>>, vector<256x512xbf16>
    %cst_131 = arith.constant dense<0.000000e+00> : vector<1x512xf32>
    %453 = tpu.matmul %451, %452, %cst_131 {dimension_numbers = #tpu.dot_dimension_numbers<[1], [0], [0], [1], [0, 0, 1, 1], [], []>} : vector<1x256xbf16>, vector<256x512xbf16>, vector<1x512xf32> -> vector<1x512xf32>
    %c0_132 = arith.constant 0 : index
    %c0_133 = arith.constant 0 : index
    %454 = vector.load %arg11[%c0_132, %c0_133] : memref<1x512xf32, #tpu.memory_space<vmem>>, vector<1x512xf32>
    %455 = arith.addf %453, %454 : vector<1x512xf32>
    %456 = vector.extract_strided_slice %455 {offsets = [0, 0], sizes = [1, 256], strides = [1, 1]} : vector<1x512xf32> to vector<1x256xf32>
    %457 = arith.negf %456 : vector<1x256xf32>
    %458 = math.exp %457 : vector<1x256xf32>
    %cst_134 = arith.constant 1.000000e+00 : f32
    %459 = vector.broadcast %cst_134 : f32 to vector<1x256xf32>
    %460 = arith.addf %459, %458 : vector<1x256xf32>
    %461 = arith.divf %459, %460 : vector<1x256xf32>
    %462 = vector.extract_strided_slice %461 {offsets = [0, 0], sizes = [1, 128], strides = [1, 1]} : vector<1x256xf32> to vector<1x128xf32>
    %463 = vector.extract_strided_slice %461 {offsets = [0, 128], sizes = [1, 128], strides = [1, 1]} : vector<1x256xf32> to vector<1x128xf32>
    %464 = vector.extract_strided_slice %455 {offsets = [0, 256], sizes = [1, 128], strides = [1, 1]} : vector<1x512xf32> to vector<1x128xf32>
    %465 = vector.extract_strided_slice %455 {offsets = [0, 384], sizes = [1, 128], strides = [1, 1]} : vector<1x512xf32> to vector<1x128xf32>
    %466 = arith.mulf %462, %465 : vector<1x128xf32>
    %467 = arith.addf %464, %466 : vector<1x128xf32>
    %468 = math.tanh %467 : vector<1x128xf32>
    %469 = arith.subf %407, %468 : vector<1x128xf32>
    %470 = arith.mulf %463, %469 : vector<1x128xf32>
    %471 = arith.addf %468, %470 : vector<1x128xf32>
    %472 = arith.truncf %471 : vector<1x128xf32> to vector<1x128xbf16>
    %c0_135 = arith.constant 0 : index
    %c0_136 = arith.constant 0 : index
    %473 = vector.load %arg12[%c0_135, %c0_136] : memref<128x128xbf16, #tpu.memory_space<vmem>>, vector<128x128xbf16>
    %cst_137 = arith.constant dense<0.000000e+00> : vector<1x128xf32>
    %474 = tpu.matmul %472, %473, %cst_137 {dimension_numbers = #tpu.dot_dimension_numbers<[1], [0], [0], [1], [0, 0, 1, 1], [], []>} : vector<1x128xbf16>, vector<128x128xbf16>, vector<1x128xf32> -> vector<1x128xf32>
    %c0_138 = arith.constant 0 : index
    %c0_139 = arith.constant 0 : index
    %475 = vector.load %arg13[%c0_138, %c0_139] : memref<1x128xf32, #tpu.memory_space<vmem>>, vector<1x128xf32>
    %476 = arith.addf %474, %475 : vector<1x128xf32>
    %477 = arith.negf %476 : vector<1x128xf32>
    %478 = math.exp %477 : vector<1x128xf32>
    %cst_140 = arith.constant 1.000000e+00 : f32
    %479 = vector.broadcast %cst_140 : f32 to vector<1x128xf32>
    %480 = arith.addf %479, %478 : vector<1x128xf32>
    %481 = arith.divf %479, %480 : vector<1x128xf32>
    %482 = arith.index_cast %c1_i32_121 : i32 to index
    %c0_141 = arith.constant 0 : index
    %483 = vector.load %arg14[%482, %c0_141] : memref<8x128xf32, #tpu.memory_space<vmem>>, vector<1x128xf32>
    tpu.vector_store %arg14[%482, %c0_141], %481 {strides = array<i32>} : memref<8x128xf32, #tpu.memory_space<vmem>>, vector<1x128xf32>,
    %484 = arith.index_cast %c1_i32_121 : i32 to index
    %485 = memref.load %arg0[%484] : memref<8xi32, #tpu.memory_space<smem>>
    %c0_i32_142 = arith.constant 0 : i32
    %486 = arith.cmpi sgt, %485, %c0_i32_142 : i32
    %487 = arith.index_cast %c1_i32_121 : i32 to index
    %c0_143 = arith.constant 0 : index
    %488 = vector.load %arg2[%487, %c0_143] : memref<8x128xf32, #tpu.memory_space<vmem>>, vector<1x128xf32>
    %489 = arith.select %486, %488, %481 : vector<1x128xf32>
    %c2_i32_144 = arith.constant 2 : i32
    %cst_145 = arith.constant 0.000000e+00 : f32
    %490 = vector.broadcast %cst_145 : f32 to vector<1x128xf32>
    %491 = arith.maximumf %489, %490 : vector<1x128xf32>
    %492 = tpu.concatenate %491, %449 in 1 : vector<1x128xf32>, vector<1x128xf32> -> vector<1x256xf32>
    %493 = arith.truncf %492 : vector<1x256xf32> to vector<1x256xbf16>
    %c0_146 = arith.constant 0 : index
    %c0_147 = arith.constant 0 : index
    %494 = vector.load %arg8[%c0_146, %c0_147] : memref<256x512xbf16, #tpu.memory_space<vmem>>, vector<256x512xbf16>
    %cst_148 = arith.constant dense<0.000000e+00> : vector<1x512xf32>
    %495 = tpu.matmul %493, %494, %cst_148 {dimension_numbers = #tpu.dot_dimension_numbers<[1], [0], [0], [1], [0, 0, 1, 1], [], []>} : vector<1x256xbf16>, vector<256x512xbf16>, vector<1x512xf32> -> vector<1x512xf32>
    %c0_149 = arith.constant 0 : index
    %c0_150 = arith.constant 0 : index
    %496 = vector.load %arg9[%c0_149, %c0_150] : memref<1x512xf32, #tpu.memory_space<vmem>>, vector<1x512xf32>
    %497 = arith.addf %495, %496 : vector<1x512xf32>
    %498 = vector.extract_strided_slice %497 {offsets = [0, 0], sizes = [1, 256], strides = [1, 1]} : vector<1x512xf32> to vector<1x256xf32>
    %499 = arith.negf %498 : vector<1x256xf32>
    %500 = math.exp %499 : vector<1x256xf32>
    %cst_151 = arith.constant 1.000000e+00 : f32
    %501 = vector.broadcast %cst_151 : f32 to vector<1x256xf32>
    %502 = arith.addf %501, %500 : vector<1x256xf32>
    %503 = arith.divf %501, %502 : vector<1x256xf32>
    %504 = vector.extract_strided_slice %503 {offsets = [0, 0], sizes = [1, 128], strides = [1, 1]} : vector<1x256xf32> to vector<1x128xf32>
    %505 = vector.extract_strided_slice %503 {offsets = [0, 128], sizes = [1, 128], strides = [1, 1]} : vector<1x256xf32> to vector<1x128xf32>
    %506 = vector.extract_strided_slice %497 {offsets = [0, 256], sizes = [1, 128], strides = [1, 1]} : vector<1x512xf32> to vector<1x128xf32>
    %507 = vector.extract_strided_slice %497 {offsets = [0, 384], sizes = [1, 128], strides = [1, 1]} : vector<1x512xf32> to vector<1x128xf32>
    %508 = arith.mulf %504, %507 : vector<1x128xf32>
    %509 = arith.addf %506, %508 : vector<1x128xf32>
    %510 = math.tanh %509 : vector<1x128xf32>
    %511 = arith.subf %449, %510 : vector<1x128xf32>
    %512 = arith.mulf %505, %511 : vector<1x128xf32>
    %513 = arith.addf %510, %512 : vector<1x128xf32>
    %514 = tpu.concatenate %513, %471 in 1 : vector<1x128xf32>, vector<1x128xf32> -> vector<1x256xf32>
    %515 = arith.truncf %514 : vector<1x256xf32> to vector<1x256xbf16>
    %c0_152 = arith.constant 0 : index
    %c0_153 = arith.constant 0 : index
    %516 = vector.load %arg10[%c0_152, %c0_153] : memref<256x512xbf16, #tpu.memory_space<vmem>>, vector<256x512xbf16>
    %cst_154 = arith.constant dense<0.000000e+00> : vector<1x512xf32>
    %517 = tpu.matmul %515, %516, %cst_154 {dimension_numbers = #tpu.dot_dimension_numbers<[1], [0], [0], [1], [0, 0, 1, 1], [], []>} : vector<1x256xbf16>, vector<256x512xbf16>, vector<1x512xf32> -> vector<1x512xf32>
    %c0_155 = arith.constant 0 : index
    %c0_156 = arith.constant 0 : index
    %518 = vector.load %arg11[%c0_155, %c0_156] : memref<1x512xf32, #tpu.memory_space<vmem>>, vector<1x512xf32>
    %519 = arith.addf %517, %518 : vector<1x512xf32>
    %520 = vector.extract_strided_slice %519 {offsets = [0, 0], sizes = [1, 256], strides = [1, 1]} : vector<1x512xf32> to vector<1x256xf32>
    %521 = arith.negf %520 : vector<1x256xf32>
    %522 = math.exp %521 : vector<1x256xf32>
    %cst_157 = arith.constant 1.000000e+00 : f32
    %523 = vector.broadcast %cst_157 : f32 to vector<1x256xf32>
    %524 = arith.addf %523, %522 : vector<1x256xf32>
    %525 = arith.divf %523, %524 : vector<1x256xf32>
    %526 = vector.extract_strided_slice %525 {offsets = [0, 0], sizes = [1, 128], strides = [1, 1]} : vector<1x256xf32> to vector<1x128xf32>
    %527 = vector.extract_strided_slice %525 {offsets = [0, 128], sizes = [1, 128], strides = [1, 1]} : vector<1x256xf32> to vector<1x128xf32>
    %528 = vector.extract_strided_slice %519 {offsets = [0, 256], sizes = [1, 128], strides = [1, 1]} : vector<1x512xf32> to vector<1x128xf32>
    %529 = vector.extract_strided_slice %519 {offsets = [0, 384], sizes = [1, 128], strides = [1, 1]} : vector<1x512xf32> to vector<1x128xf32>
    %530 = arith.mulf %526, %529 : vector<1x128xf32>
    %531 = arith.addf %528, %530 : vector<1x128xf32>
    %532 = math.tanh %531 : vector<1x128xf32>
    %533 = arith.subf %471, %532 : vector<1x128xf32>
    %534 = arith.mulf %527, %533 : vector<1x128xf32>
    %535 = arith.addf %532, %534 : vector<1x128xf32>
    %536 = arith.truncf %535 : vector<1x128xf32> to vector<1x128xbf16>
    %c0_158 = arith.constant 0 : index
    %c0_159 = arith.constant 0 : index
    %537 = vector.load %arg12[%c0_158, %c0_159] : memref<128x128xbf16, #tpu.memory_space<vmem>>, vector<128x128xbf16>
    %cst_160 = arith.constant dense<0.000000e+00> : vector<1x128xf32>
    %538 = tpu.matmul %536, %537, %cst_160 {dimension_numbers = #tpu.dot_dimension_numbers<[1], [0], [0], [1], [0, 0, 1, 1], [], []>} : vector<1x128xbf16>, vector<128x128xbf16>, vector<1x128xf32> -> vector<1x128xf32>
    %c0_161 = arith.constant 0 : index
    %c0_162 = arith.constant 0 : index
    %539 = vector.load %arg13[%c0_161, %c0_162] : memref<1x128xf32, #tpu.memory_space<vmem>>, vector<1x128xf32>
    %540 = arith.addf %538, %539 : vector<1x128xf32>
    %541 = arith.negf %540 : vector<1x128xf32>
    %542 = math.exp %541 : vector<1x128xf32>
    %cst_163 = arith.constant 1.000000e+00 : f32
    %543 = vector.broadcast %cst_163 : f32 to vector<1x128xf32>
    %544 = arith.addf %543, %542 : vector<1x128xf32>
    %545 = arith.divf %543, %544 : vector<1x128xf32>
    %546 = arith.index_cast %c2_i32_144 : i32 to index
    %c0_164 = arith.constant 0 : index
    %547 = vector.load %arg14[%546, %c0_164] : memref<8x128xf32, #tpu.memory_space<vmem>>, vector<1x128xf32>
    tpu.vector_store %arg14[%546, %c0_164], %545 {strides = array<i32>} : memref<8x128xf32, #tpu.memory_space<vmem>>, vector<1x128xf32>,
    %548 = arith.index_cast %c2_i32_144 : i32 to index
    %549 = memref.load %arg0[%548] : memref<8xi32, #tpu.memory_space<smem>>
    %c0_i32_165 = arith.constant 0 : i32
    %550 = arith.cmpi sgt, %549, %c0_i32_165 : i32
    %551 = arith.index_cast %c2_i32_144 : i32 to index
    %c0_166 = arith.constant 0 : index
    %552 = vector.load %arg2[%551, %c0_166] : memref<8x128xf32, #tpu.memory_space<vmem>>, vector<1x128xf32>
    %553 = arith.select %550, %552, %545 : vector<1x128xf32>
    %c3_i32_167 = arith.constant 3 : i32
    %cst_168 = arith.constant 0.000000e+00 : f32
    %554 = vector.broadcast %cst_168 : f32 to vector<1x128xf32>
    %555 = arith.maximumf %553, %554 : vector<1x128xf32>
    %556 = tpu.concatenate %555, %513 in 1 : vector<1x128xf32>, vector<1x128xf32> -> vector<1x256xf32>
    %557 = arith.truncf %556 : vector<1x256xf32> to vector<1x256xbf16>
    %c0_169 = arith.constant 0 : index
    %c0_170 = arith.constant 0 : index
    %558 = vector.load %arg8[%c0_169, %c0_170] : memref<256x512xbf16, #tpu.memory_space<vmem>>, vector<256x512xbf16>
    %cst_171 = arith.constant dense<0.000000e+00> : vector<1x512xf32>
    %559 = tpu.matmul %557, %558, %cst_171 {dimension_numbers = #tpu.dot_dimension_numbers<[1], [0], [0], [1], [0, 0, 1, 1], [], []>} : vector<1x256xbf16>, vector<256x512xbf16>, vector<1x512xf32> -> vector<1x512xf32>
    %c0_172 = arith.constant 0 : index
    %c0_173 = arith.constant 0 : index
    %560 = vector.load %arg9[%c0_172, %c0_173] : memref<1x512xf32, #tpu.memory_space<vmem>>, vector<1x512xf32>
    %561 = arith.addf %559, %560 : vector<1x512xf32>
    %562 = vector.extract_strided_slice %561 {offsets = [0, 0], sizes = [1, 256], strides = [1, 1]} : vector<1x512xf32> to vector<1x256xf32>
    %563 = arith.negf %562 : vector<1x256xf32>
    %564 = math.exp %563 : vector<1x256xf32>
    %cst_174 = arith.constant 1.000000e+00 : f32
    %565 = vector.broadcast %cst_174 : f32 to vector<1x256xf32>
    %566 = arith.addf %565, %564 : vector<1x256xf32>
    %567 = arith.divf %565, %566 : vector<1x256xf32>
    %568 = vector.extract_strided_slice %567 {offsets = [0, 0], sizes = [1, 128], strides = [1, 1]} : vector<1x256xf32> to vector<1x128xf32>
    %569 = vector.extract_strided_slice %567 {offsets = [0, 128], sizes = [1, 128], strides = [1, 1]} : vector<1x256xf32> to vector<1x128xf32>
    %570 = vector.extract_strided_slice %561 {offsets = [0, 256], sizes = [1, 128], strides = [1, 1]} : vector<1x512xf32> to vector<1x128xf32>
    %571 = vector.extract_strided_slice %561 {offsets = [0, 384], sizes = [1, 128], strides = [1, 1]} : vector<1x512xf32> to vector<1x128xf32>
    %572 = arith.mulf %568, %571 : vector<1x128xf32>
    %573 = arith.addf %570, %572 : vector<1x128xf32>
    %574 = math.tanh %573 : vector<1x128xf32>
    %575 = arith.subf %513, %574 : vector<1x128xf32>
    %576 = arith.mulf %569, %575 : vector<1x128xf32>
    %577 = arith.addf %574, %576 : vector<1x128xf32>
    %578 = tpu.concatenate %577, %535 in 1 : vector<1x128xf32>, vector<1x128xf32> -> vector<1x256xf32>
    %579 = arith.truncf %578 : vector<1x256xf32> to vector<1x256xbf16>
    %c0_175 = arith.constant 0 : index
    %c0_176 = arith.constant 0 : index
    %580 = vector.load %arg10[%c0_175, %c0_176] : memref<256x512xbf16, #tpu.memory_space<vmem>>, vector<256x512xbf16>
    %cst_177 = arith.constant dense<0.000000e+00> : vector<1x512xf32>
    %581 = tpu.matmul %579, %580, %cst_177 {dimension_numbers = #tpu.dot_dimension_numbers<[1], [0], [0], [1], [0, 0, 1, 1], [], []>} : vector<1x256xbf16>, vector<256x512xbf16>, vector<1x512xf32> -> vector<1x512xf32>
    %c0_178 = arith.constant 0 : index
    %c0_179 = arith.constant 0 : index
    %582 = vector.load %arg11[%c0_178, %c0_179] : memref<1x512xf32, #tpu.memory_space<vmem>>, vector<1x512xf32>
    %583 = arith.addf %581, %582 : vector<1x512xf32>
    %584 = vector.extract_strided_slice %583 {offsets = [0, 0], sizes = [1, 256], strides = [1, 1]} : vector<1x512xf32> to vector<1x256xf32>
    %585 = arith.negf %584 : vector<1x256xf32>
    %586 = math.exp %585 : vector<1x256xf32>
    %cst_180 = arith.constant 1.000000e+00 : f32
    %587 = vector.broadcast %cst_180 : f32 to vector<1x256xf32>
    %588 = arith.addf %587, %586 : vector<1x256xf32>
    %589 = arith.divf %587, %588 : vector<1x256xf32>
    %590 = vector.extract_strided_slice %589 {offsets = [0, 0], sizes = [1, 128], strides = [1, 1]} : vector<1x256xf32> to vector<1x128xf32>
    %591 = vector.extract_strided_slice %589 {offsets = [0, 128], sizes = [1, 128], strides = [1, 1]} : vector<1x256xf32> to vector<1x128xf32>
    %592 = vector.extract_strided_slice %583 {offsets = [0, 256], sizes = [1, 128], strides = [1, 1]} : vector<1x512xf32> to vector<1x128xf32>
    %593 = vector.extract_strided_slice %583 {offsets = [0, 384], sizes = [1, 128], strides = [1, 1]} : vector<1x512xf32> to vector<1x128xf32>
    %594 = arith.mulf %590, %593 : vector<1x128xf32>
    %595 = arith.addf %592, %594 : vector<1x128xf32>
    %596 = math.tanh %595 : vector<1x128xf32>
    %597 = arith.subf %535, %596 : vector<1x128xf32>
    %598 = arith.mulf %591, %597 : vector<1x128xf32>
    %599 = arith.addf %596, %598 : vector<1x128xf32>
    %600 = arith.truncf %599 : vector<1x128xf32> to vector<1x128xbf16>
    %c0_181 = arith.constant 0 : index
    %c0_182 = arith.constant 0 : index
    %601 = vector.load %arg12[%c0_181, %c0_182] : memref<128x128xbf16, #tpu.memory_space<vmem>>, vector<128x128xbf16>
    %cst_183 = arith.constant dense<0.000000e+00> : vector<1x128xf32>
    %602 = tpu.matmul %600, %601, %cst_183 {dimension_numbers = #tpu.dot_dimension_numbers<[1], [0], [0], [1], [0, 0, 1, 1], [], []>} : vector<1x128xbf16>, vector<128x128xbf16>, vector<1x128xf32> -> vector<1x128xf32>
    %c0_184 = arith.constant 0 : index
    %c0_185 = arith.constant 0 : index
    %603 = vector.load %arg13[%c0_184, %c0_185] : memref<1x128xf32, #tpu.memory_space<vmem>>, vector<1x128xf32>
    %604 = arith.addf %602, %603 : vector<1x128xf32>
    %605 = arith.negf %604 : vector<1x128xf32>
    %606 = math.exp %605 : vector<1x128xf32>
    %cst_186 = arith.constant 1.000000e+00 : f32
    %607 = vector.broadcast %cst_186 : f32 to vector<1x128xf32>
    %608 = arith.addf %607, %606 : vector<1x128xf32>
    %609 = arith.divf %607, %608 : vector<1x128xf32>
    %610 = arith.index_cast %c3_i32_167 : i32 to index
    %c0_187 = arith.constant 0 : index
    %611 = vector.load %arg14[%610, %c0_187] : memref<8x128xf32, #tpu.memory_space<vmem>>, vector<1x128xf32>
    tpu.vector_store %arg14[%610, %c0_187], %609 {strides = array<i32>} : memref<8x128xf32, #tpu.memory_space<vmem>>, vector<1x128xf32>,
    %612 = arith.index_cast %c3_i32_167 : i32 to index
    %613 = memref.load %arg0[%612] : memref<8xi32, #tpu.memory_space<smem>>
    %c0_i32_188 = arith.constant 0 : i32
    %614 = arith.cmpi sgt, %613, %c0_i32_188 : i32
    %615 = arith.index_cast %c3_i32_167 : i32 to index
    %c0_189 = arith.constant 0 : index
    %616 = vector.load %arg2[%615, %c0_189] : memref<8x128xf32, #tpu.memory_space<vmem>>, vector<1x128xf32>
    %617 = arith.select %614, %616, %609 : vector<1x128xf32>
    %c4_i32_190 = arith.constant 4 : i32
    %cst_191 = arith.constant 0.000000e+00 : f32
    %618 = vector.broadcast %cst_191 : f32 to vector<1x128xf32>
    %619 = arith.maximumf %617, %618 : vector<1x128xf32>
    %620 = tpu.concatenate %619, %577 in 1 : vector<1x128xf32>, vector<1x128xf32> -> vector<1x256xf32>
    %621 = arith.truncf %620 : vector<1x256xf32> to vector<1x256xbf16>
    %c0_192 = arith.constant 0 : index
    %c0_193 = arith.constant 0 : index
    %622 = vector.load %arg8[%c0_192, %c0_193] : memref<256x512xbf16, #tpu.memory_space<vmem>>, vector<256x512xbf16>
    %cst_194 = arith.constant dense<0.000000e+00> : vector<1x512xf32>
    %623 = tpu.matmul %621, %622, %cst_194 {dimension_numbers = #tpu.dot_dimension_numbers<[1], [0], [0], [1], [0, 0, 1, 1], [], []>} : vector<1x256xbf16>, vector<256x512xbf16>, vector<1x512xf32> -> vector<1x512xf32>
    %c0_195 = arith.constant 0 : index
    %c0_196 = arith.constant 0 : index
    %624 = vector.load %arg9[%c0_195, %c0_196] : memref<1x512xf32, #tpu.memory_space<vmem>>, vector<1x512xf32>
    %625 = arith.addf %623, %624 : vector<1x512xf32>
    %626 = vector.extract_strided_slice %625 {offsets = [0, 0], sizes = [1, 256], strides = [1, 1]} : vector<1x512xf32> to vector<1x256xf32>
    %627 = arith.negf %626 : vector<1x256xf32>
    %628 = math.exp %627 : vector<1x256xf32>
    %cst_197 = arith.constant 1.000000e+00 : f32
    %629 = vector.broadcast %cst_197 : f32 to vector<1x256xf32>
    %630 = arith.addf %629, %628 : vector<1x256xf32>
    %631 = arith.divf %629, %630 : vector<1x256xf32>
    %632 = vector.extract_strided_slice %631 {offsets = [0, 0], sizes = [1, 128], strides = [1, 1]} : vector<1x256xf32> to vector<1x128xf32>
    %633 = vector.extract_strided_slice %631 {offsets = [0, 128], sizes = [1, 128], strides = [1, 1]} : vector<1x256xf32> to vector<1x128xf32>
    %634 = vector.extract_strided_slice %625 {offsets = [0, 256], sizes = [1, 128], strides = [1, 1]} : vector<1x512xf32> to vector<1x128xf32>
    %635 = vector.extract_strided_slice %625 {offsets = [0, 384], sizes = [1, 128], strides = [1, 1]} : vector<1x512xf32> to vector<1x128xf32>
    %636 = arith.mulf %632, %635 : vector<1x128xf32>
    %637 = arith.addf %634, %636 : vector<1x128xf32>
    %638 = math.tanh %637 : vector<1x128xf32>
    %639 = arith.subf %577, %638 : vector<1x128xf32>
    %640 = arith.mulf %633, %639 : vector<1x128xf32>
    %641 = arith.addf %638, %640 : vector<1x128xf32>
    %642 = tpu.concatenate %641, %599 in 1 : vector<1x128xf32>, vector<1x128xf32> -> vector<1x256xf32>
    %643 = arith.truncf %642 : vector<1x256xf32> to vector<1x256xbf16>
    %c0_198 = arith.constant 0 : index
    %c0_199 = arith.constant 0 : index
    %644 = vector.load %arg10[%c0_198, %c0_199] : memref<256x512xbf16, #tpu.memory_space<vmem>>, vector<256x512xbf16>
    %cst_200 = arith.constant dense<0.000000e+00> : vector<1x512xf32>
    %645 = tpu.matmul %643, %644, %cst_200 {dimension_numbers = #tpu.dot_dimension_numbers<[1], [0], [0], [1], [0, 0, 1, 1], [], []>} : vector<1x256xbf16>, vector<256x512xbf16>, vector<1x512xf32> -> vector<1x512xf32>
    %c0_201 = arith.constant 0 : index
    %c0_202 = arith.constant 0 : index
    %646 = vector.load %arg11[%c0_201, %c0_202] : memref<1x512xf32, #tpu.memory_space<vmem>>, vector<1x512xf32>
    %647 = arith.addf %645, %646 : vector<1x512xf32>
    %648 = vector.extract_strided_slice %647 {offsets = [0, 0], sizes = [1, 256], strides = [1, 1]} : vector<1x512xf32> to vector<1x256xf32>
    %649 = arith.negf %648 : vector<1x256xf32>
    %650 = math.exp %649 : vector<1x256xf32>
    %cst_203 = arith.constant 1.000000e+00 : f32
    %651 = vector.broadcast %cst_203 : f32 to vector<1x256xf32>
    %652 = arith.addf %651, %650 : vector<1x256xf32>
    %653 = arith.divf %651, %652 : vector<1x256xf32>
    %654 = vector.extract_strided_slice %653 {offsets = [0, 0], sizes = [1, 128], strides = [1, 1]} : vector<1x256xf32> to vector<1x128xf32>
    %655 = vector.extract_strided_slice %653 {offsets = [0, 128], sizes = [1, 128], strides = [1, 1]} : vector<1x256xf32> to vector<1x128xf32>
    %656 = vector.extract_strided_slice %647 {offsets = [0, 256], sizes = [1, 128], strides = [1, 1]} : vector<1x512xf32> to vector<1x128xf32>
    %657 = vector.extract_strided_slice %647 {offsets = [0, 384], sizes = [1, 128], strides = [1, 1]} : vector<1x512xf32> to vector<1x128xf32>
    %658 = arith.mulf %654, %657 : vector<1x128xf32>
    %659 = arith.addf %656, %658 : vector<1x128xf32>
    %660 = math.tanh %659 : vector<1x128xf32>
    %661 = arith.subf %599, %660 : vector<1x128xf32>
    %662 = arith.mulf %655, %661 : vector<1x128xf32>
    %663 = arith.addf %660, %662 : vector<1x128xf32>
    %664 = arith.truncf %663 : vector<1x128xf32> to vector<1x128xbf16>
    %c0_204 = arith.constant 0 : index
    %c0_205 = arith.constant 0 : index
    %665 = vector.load %arg12[%c0_204, %c0_205] : memref<128x128xbf16, #tpu.memory_space<vmem>>, vector<128x128xbf16>
    %cst_206 = arith.constant dense<0.000000e+00> : vector<1x128xf32>
    %666 = tpu.matmul %664, %665, %cst_206 {dimension_numbers = #tpu.dot_dimension_numbers<[1], [0], [0], [1], [0, 0, 1, 1], [], []>} : vector<1x128xbf16>, vector<128x128xbf16>, vector<1x128xf32> -> vector<1x128xf32>
    %c0_207 = arith.constant 0 : index
    %c0_208 = arith.constant 0 : index
    %667 = vector.load %arg13[%c0_207, %c0_208] : memref<1x128xf32, #tpu.memory_space<vmem>>, vector<1x128xf32>
    %668 = arith.addf %666, %667 : vector<1x128xf32>
    %669 = arith.negf %668 : vector<1x128xf32>
    %670 = math.exp %669 : vector<1x128xf32>
    %cst_209 = arith.constant 1.000000e+00 : f32
    %671 = vector.broadcast %cst_209 : f32 to vector<1x128xf32>
    %672 = arith.addf %671, %670 : vector<1x128xf32>
    %673 = arith.divf %671, %672 : vector<1x128xf32>
    %674 = arith.index_cast %c4_i32_190 : i32 to index
    %c0_210 = arith.constant 0 : index
    %675 = vector.load %arg14[%674, %c0_210] : memref<8x128xf32, #tpu.memory_space<vmem>>, vector<1x128xf32>
    tpu.vector_store %arg14[%674, %c0_210], %673 {strides = array<i32>} : memref<8x128xf32, #tpu.memory_space<vmem>>, vector<1x128xf32>,
    %676 = arith.index_cast %c4_i32_190 : i32 to index
    %677 = memref.load %arg0[%676] : memref<8xi32, #tpu.memory_space<smem>>
    %c0_i32_211 = arith.constant 0 : i32
    %678 = arith.cmpi sgt, %677, %c0_i32_211 : i32
    %679 = arith.index_cast %c4_i32_190 : i32 to index
    %c0_212 = arith.constant 0 : index
    %680 = vector.load %arg2[%679, %c0_212] : memref<8x128xf32, #tpu.memory_space<vmem>>, vector<1x128xf32>
    %681 = arith.select %678, %680, %673 : vector<1x128xf32>
    %c5_i32_213 = arith.constant 5 : i32
    %cst_214 = arith.constant 0.000000e+00 : f32
    %682 = vector.broadcast %cst_214 : f32 to vector<1x128xf32>
    %683 = arith.maximumf %681, %682 : vector<1x128xf32>
    %684 = tpu.concatenate %683, %641 in 1 : vector<1x128xf32>, vector<1x128xf32> -> vector<1x256xf32>
    %685 = arith.truncf %684 : vector<1x256xf32> to vector<1x256xbf16>
    %c0_215 = arith.constant 0 : index
    %c0_216 = arith.constant 0 : index
    %686 = vector.load %arg8[%c0_215, %c0_216] : memref<256x512xbf16, #tpu.memory_space<vmem>>, vector<256x512xbf16>
    %cst_217 = arith.constant dense<0.000000e+00> : vector<1x512xf32>
    %687 = tpu.matmul %685, %686, %cst_217 {dimension_numbers = #tpu.dot_dimension_numbers<[1], [0], [0], [1], [0, 0, 1, 1], [], []>} : vector<1x256xbf16>, vector<256x512xbf16>, vector<1x512xf32> -> vector<1x512xf32>
    %c0_218 = arith.constant 0 : index
    %c0_219 = arith.constant 0 : index
    %688 = vector.load %arg9[%c0_218, %c0_219] : memref<1x512xf32, #tpu.memory_space<vmem>>, vector<1x512xf32>
    %689 = arith.addf %687, %688 : vector<1x512xf32>
    %690 = vector.extract_strided_slice %689 {offsets = [0, 0], sizes = [1, 256], strides = [1, 1]} : vector<1x512xf32> to vector<1x256xf32>
    %691 = arith.negf %690 : vector<1x256xf32>
    %692 = math.exp %691 : vector<1x256xf32>
    %cst_220 = arith.constant 1.000000e+00 : f32
    %693 = vector.broadcast %cst_220 : f32 to vector<1x256xf32>
    %694 = arith.addf %693, %692 : vector<1x256xf32>
    %695 = arith.divf %693, %694 : vector<1x256xf32>
    %696 = vector.extract_strided_slice %695 {offsets = [0, 0], sizes = [1, 128], strides = [1, 1]} : vector<1x256xf32> to vector<1x128xf32>
    %697 = vector.extract_strided_slice %695 {offsets = [0, 128], sizes = [1, 128], strides = [1, 1]} : vector<1x256xf32> to vector<1x128xf32>
    %698 = vector.extract_strided_slice %689 {offsets = [0, 256], sizes = [1, 128], strides = [1, 1]} : vector<1x512xf32> to vector<1x128xf32>
    %699 = vector.extract_strided_slice %689 {offsets = [0, 384], sizes = [1, 128], strides = [1, 1]} : vector<1x512xf32> to vector<1x128xf32>
    %700 = arith.mulf %696, %699 : vector<1x128xf32>
    %701 = arith.addf %698, %700 : vector<1x128xf32>
    %702 = math.tanh %701 : vector<1x128xf32>
    %703 = arith.subf %641, %702 : vector<1x128xf32>
    %704 = arith.mulf %697, %703 : vector<1x128xf32>
    %705 = arith.addf %702, %704 : vector<1x128xf32>
    %706 = tpu.concatenate %705, %663 in 1 : vector<1x128xf32>, vector<1x128xf32> -> vector<1x256xf32>
    %707 = arith.truncf %706 : vector<1x256xf32> to vector<1x256xbf16>
    %c0_221 = arith.constant 0 : index
    %c0_222 = arith.constant 0 : index
    %708 = vector.load %arg10[%c0_221, %c0_222] : memref<256x512xbf16, #tpu.memory_space<vmem>>, vector<256x512xbf16>
    %cst_223 = arith.constant dense<0.000000e+00> : vector<1x512xf32>
    %709 = tpu.matmul %707, %708, %cst_223 {dimension_numbers = #tpu.dot_dimension_numbers<[1], [0], [0], [1], [0, 0, 1, 1], [], []>} : vector<1x256xbf16>, vector<256x512xbf16>, vector<1x512xf32> -> vector<1x512xf32>
    %c0_224 = arith.constant 0 : index
    %c0_225 = arith.constant 0 : index
    %710 = vector.load %arg11[%c0_224, %c0_225] : memref<1x512xf32, #tpu.memory_space<vmem>>, vector<1x512xf32>
    %711 = arith.addf %709, %710 : vector<1x512xf32>
    %712 = vector.extract_strided_slice %711 {offsets = [0, 0], sizes = [1, 256], strides = [1, 1]} : vector<1x512xf32> to vector<1x256xf32>
    %713 = arith.negf %712 : vector<1x256xf32>
    %714 = math.exp %713 : vector<1x256xf32>
    %cst_226 = arith.constant 1.000000e+00 : f32
    %715 = vector.broadcast %cst_226 : f32 to vector<1x256xf32>
    %716 = arith.addf %715, %714 : vector<1x256xf32>
    %717 = arith.divf %715, %716 : vector<1x256xf32>
    %718 = vector.extract_strided_slice %717 {offsets = [0, 0], sizes = [1, 128], strides = [1, 1]} : vector<1x256xf32> to vector<1x128xf32>
    %719 = vector.extract_strided_slice %717 {offsets = [0, 128], sizes = [1, 128], strides = [1, 1]} : vector<1x256xf32> to vector<1x128xf32>
    %720 = vector.extract_strided_slice %711 {offsets = [0, 256], sizes = [1, 128], strides = [1, 1]} : vector<1x512xf32> to vector<1x128xf32>
    %721 = vector.extract_strided_slice %711 {offsets = [0, 384], sizes = [1, 128], strides = [1, 1]} : vector<1x512xf32> to vector<1x128xf32>
    %722 = arith.mulf %718, %721 : vector<1x128xf32>
    %723 = arith.addf %720, %722 : vector<1x128xf32>
    %724 = math.tanh %723 : vector<1x128xf32>
    %725 = arith.subf %663, %724 : vector<1x128xf32>
    %726 = arith.mulf %719, %725 : vector<1x128xf32>
    %727 = arith.addf %724, %726 : vector<1x128xf32>
    %728 = arith.truncf %727 : vector<1x128xf32> to vector<1x128xbf16>
    %c0_227 = arith.constant 0 : index
    %c0_228 = arith.constant 0 : index
    %729 = vector.load %arg12[%c0_227, %c0_228] : memref<128x128xbf16, #tpu.memory_space<vmem>>, vector<128x128xbf16>
    %cst_229 = arith.constant dense<0.000000e+00> : vector<1x128xf32>
    %730 = tpu.matmul %728, %729, %cst_229 {dimension_numbers = #tpu.dot_dimension_numbers<[1], [0], [0], [1], [0, 0, 1, 1], [], []>} : vector<1x128xbf16>, vector<128x128xbf16>, vector<1x128xf32> -> vector<1x128xf32>
    %c0_230 = arith.constant 0 : index
    %c0_231 = arith.constant 0 : index
    %731 = vector.load %arg13[%c0_230, %c0_231] : memref<1x128xf32, #tpu.memory_space<vmem>>, vector<1x128xf32>
    %732 = arith.addf %730, %731 : vector<1x128xf32>
    %733 = arith.negf %732 : vector<1x128xf32>
    %734 = math.exp %733 : vector<1x128xf32>
    %cst_232 = arith.constant 1.000000e+00 : f32
    %735 = vector.broadcast %cst_232 : f32 to vector<1x128xf32>
    %736 = arith.addf %735, %734 : vector<1x128xf32>
    %737 = arith.divf %735, %736 : vector<1x128xf32>
    %738 = arith.index_cast %c5_i32_213 : i32 to index
    %c0_233 = arith.constant 0 : index
    %739 = vector.load %arg14[%738, %c0_233] : memref<8x128xf32, #tpu.memory_space<vmem>>, vector<1x128xf32>
    tpu.vector_store %arg14[%738, %c0_233], %737 {strides = array<i32>} : memref<8x128xf32, #tpu.memory_space<vmem>>, vector<1x128xf32>,
    %740 = arith.index_cast %c5_i32_213 : i32 to index
    %741 = memref.load %arg0[%740] : memref<8xi32, #tpu.memory_space<smem>>
    %c0_i32_234 = arith.constant 0 : i32
    %742 = arith.cmpi sgt, %741, %c0_i32_234 : i32
    %743 = arith.index_cast %c5_i32_213 : i32 to index
    %c0_235 = arith.constant 0 : index
    %744 = vector.load %arg2[%743, %c0_235] : memref<8x128xf32, #tpu.memory_space<vmem>>, vector<1x128xf32>
    %745 = arith.select %742, %744, %737 : vector<1x128xf32>
    %c6_i32_236 = arith.constant 6 : i32
    %cst_237 = arith.constant 0.000000e+00 : f32
    %746 = vector.broadcast %cst_237 : f32 to vector<1x128xf32>
    %747 = arith.maximumf %745, %746 : vector<1x128xf32>
    %748 = tpu.concatenate %747, %705 in 1 : vector<1x128xf32>, vector<1x128xf32> -> vector<1x256xf32>
    %749 = arith.truncf %748 : vector<1x256xf32> to vector<1x256xbf16>
    %c0_238 = arith.constant 0 : index
    %c0_239 = arith.constant 0 : index
    %750 = vector.load %arg8[%c0_238, %c0_239] : memref<256x512xbf16, #tpu.memory_space<vmem>>, vector<256x512xbf16>
    %cst_240 = arith.constant dense<0.000000e+00> : vector<1x512xf32>
    %751 = tpu.matmul %749, %750, %cst_240 {dimension_numbers = #tpu.dot_dimension_numbers<[1], [0], [0], [1], [0, 0, 1, 1], [], []>} : vector<1x256xbf16>, vector<256x512xbf16>, vector<1x512xf32> -> vector<1x512xf32>
    %c0_241 = arith.constant 0 : index
    %c0_242 = arith.constant 0 : index
    %752 = vector.load %arg9[%c0_241, %c0_242] : memref<1x512xf32, #tpu.memory_space<vmem>>, vector<1x512xf32>
    %753 = arith.addf %751, %752 : vector<1x512xf32>
    %754 = vector.extract_strided_slice %753 {offsets = [0, 0], sizes = [1, 256], strides = [1, 1]} : vector<1x512xf32> to vector<1x256xf32>
    %755 = arith.negf %754 : vector<1x256xf32>
    %756 = math.exp %755 : vector<1x256xf32>
    %cst_243 = arith.constant 1.000000e+00 : f32
    %757 = vector.broadcast %cst_243 : f32 to vector<1x256xf32>
    %758 = arith.addf %757, %756 : vector<1x256xf32>
    %759 = arith.divf %757, %758 : vector<1x256xf32>
    %760 = vector.extract_strided_slice %759 {offsets = [0, 0], sizes = [1, 128], strides = [1, 1]} : vector<1x256xf32> to vector<1x128xf32>
    %761 = vector.extract_strided_slice %759 {offsets = [0, 128], sizes = [1, 128], strides = [1, 1]} : vector<1x256xf32> to vector<1x128xf32>
    %762 = vector.extract_strided_slice %753 {offsets = [0, 256], sizes = [1, 128], strides = [1, 1]} : vector<1x512xf32> to vector<1x128xf32>
    %763 = vector.extract_strided_slice %753 {offsets = [0, 384], sizes = [1, 128], strides = [1, 1]} : vector<1x512xf32> to vector<1x128xf32>
    %764 = arith.mulf %760, %763 : vector<1x128xf32>
    %765 = arith.addf %762, %764 : vector<1x128xf32>
    %766 = math.tanh %765 : vector<1x128xf32>
    %767 = arith.subf %705, %766 : vector<1x128xf32>
    %768 = arith.mulf %761, %767 : vector<1x128xf32>
    %769 = arith.addf %766, %768 : vector<1x128xf32>
    %770 = tpu.concatenate %769, %727 in 1 : vector<1x128xf32>, vector<1x128xf32> -> vector<1x256xf32>
    %771 = arith.truncf %770 : vector<1x256xf32> to vector<1x256xbf16>
    %c0_244 = arith.constant 0 : index
    %c0_245 = arith.constant 0 : index
    %772 = vector.load %arg10[%c0_244, %c0_245] : memref<256x512xbf16, #tpu.memory_space<vmem>>, vector<256x512xbf16>
    %cst_246 = arith.constant dense<0.000000e+00> : vector<1x512xf32>
    %773 = tpu.matmul %771, %772, %cst_246 {dimension_numbers = #tpu.dot_dimension_numbers<[1], [0], [0], [1], [0, 0, 1, 1], [], []>} : vector<1x256xbf16>, vector<256x512xbf16>, vector<1x512xf32> -> vector<1x512xf32>
    %c0_247 = arith.constant 0 : index
    %c0_248 = arith.constant 0 : index
    %774 = vector.load %arg11[%c0_247, %c0_248] : memref<1x512xf32, #tpu.memory_space<vmem>>, vector<1x512xf32>
    %775 = arith.addf %773, %774 : vector<1x512xf32>
    %776 = vector.extract_strided_slice %775 {offsets = [0, 0], sizes = [1, 256], strides = [1, 1]} : vector<1x512xf32> to vector<1x256xf32>
    %777 = arith.negf %776 : vector<1x256xf32>
    %778 = math.exp %777 : vector<1x256xf32>
    %cst_249 = arith.constant 1.000000e+00 : f32
    %779 = vector.broadcast %cst_249 : f32 to vector<1x256xf32>
    %780 = arith.addf %779, %778 : vector<1x256xf32>
    %781 = arith.divf %779, %780 : vector<1x256xf32>
    %782 = vector.extract_strided_slice %781 {offsets = [0, 0], sizes = [1, 128], strides = [1, 1]} : vector<1x256xf32> to vector<1x128xf32>
    %783 = vector.extract_strided_slice %781 {offsets = [0, 128], sizes = [1, 128], strides = [1, 1]} : vector<1x256xf32> to vector<1x128xf32>
    %784 = vector.extract_strided_slice %775 {offsets = [0, 256], sizes = [1, 128], strides = [1, 1]} : vector<1x512xf32> to vector<1x128xf32>
    %785 = vector.extract_strided_slice %775 {offsets = [0, 384], sizes = [1, 128], strides = [1, 1]} : vector<1x512xf32> to vector<1x128xf32>
    %786 = arith.mulf %782, %785 : vector<1x128xf32>
    %787 = arith.addf %784, %786 : vector<1x128xf32>
    %788 = math.tanh %787 : vector<1x128xf32>
    %789 = arith.subf %727, %788 : vector<1x128xf32>
    %790 = arith.mulf %783, %789 : vector<1x128xf32>
    %791 = arith.addf %788, %790 : vector<1x128xf32>
    %792 = arith.truncf %791 : vector<1x128xf32> to vector<1x128xbf16>
    %c0_250 = arith.constant 0 : index
    %c0_251 = arith.constant 0 : index
    %793 = vector.load %arg12[%c0_250, %c0_251] : memref<128x128xbf16, #tpu.memory_space<vmem>>, vector<128x128xbf16>
    %cst_252 = arith.constant dense<0.000000e+00> : vector<1x128xf32>
    %794 = tpu.matmul %792, %793, %cst_252 {dimension_numbers = #tpu.dot_dimension_numbers<[1], [0], [0], [1], [0, 0, 1, 1], [], []>} : vector<1x128xbf16>, vector<128x128xbf16>, vector<1x128xf32> -> vector<1x128xf32>
    %c0_253 = arith.constant 0 : index
    %c0_254 = arith.constant 0 : index
    %795 = vector.load %arg13[%c0_253, %c0_254] : memref<1x128xf32, #tpu.memory_space<vmem>>, vector<1x128xf32>
    %796 = arith.addf %794, %795 : vector<1x128xf32>
    %797 = arith.negf %796 : vector<1x128xf32>
    %798 = math.exp %797 : vector<1x128xf32>
    %cst_255 = arith.constant 1.000000e+00 : f32
    %799 = vector.broadcast %cst_255 : f32 to vector<1x128xf32>
    %800 = arith.addf %799, %798 : vector<1x128xf32>
    %801 = arith.divf %799, %800 : vector<1x128xf32>
    %802 = arith.index_cast %c6_i32_236 : i32 to index
    %c0_256 = arith.constant 0 : index
    %803 = vector.load %arg14[%802, %c0_256] : memref<8x128xf32, #tpu.memory_space<vmem>>, vector<1x128xf32>
    tpu.vector_store %arg14[%802, %c0_256], %801 {strides = array<i32>} : memref<8x128xf32, #tpu.memory_space<vmem>>, vector<1x128xf32>,
    %804 = arith.index_cast %c6_i32_236 : i32 to index
    %805 = memref.load %arg0[%804] : memref<8xi32, #tpu.memory_space<smem>>
    %c0_i32_257 = arith.constant 0 : i32
    %806 = arith.cmpi sgt, %805, %c0_i32_257 : i32
    %807 = arith.index_cast %c6_i32_236 : i32 to index
    %c0_258 = arith.constant 0 : index
    %808 = vector.load %arg2[%807, %c0_258] : memref<8x128xf32, #tpu.memory_space<vmem>>, vector<1x128xf32>
    %809 = arith.select %806, %808, %801 : vector<1x128xf32>
    %c7_i32_259 = arith.constant 7 : i32
    %cst_260 = arith.constant 0.000000e+00 : f32
    %810 = vector.broadcast %cst_260 : f32 to vector<1x128xf32>
    %811 = arith.maximumf %809, %810 : vector<1x128xf32>
    %812 = tpu.concatenate %811, %769 in 1 : vector<1x128xf32>, vector<1x128xf32> -> vector<1x256xf32>
    %813 = arith.truncf %812 : vector<1x256xf32> to vector<1x256xbf16>
    %c0_261 = arith.constant 0 : index
    %c0_262 = arith.constant 0 : index
    %814 = vector.load %arg8[%c0_261, %c0_262] : memref<256x512xbf16, #tpu.memory_space<vmem>>, vector<256x512xbf16>
    %cst_263 = arith.constant dense<0.000000e+00> : vector<1x512xf32>
    %815 = tpu.matmul %813, %814, %cst_263 {dimension_numbers = #tpu.dot_dimension_numbers<[1], [0], [0], [1], [0, 0, 1, 1], [], []>} : vector<1x256xbf16>, vector<256x512xbf16>, vector<1x512xf32> -> vector<1x512xf32>
    %c0_264 = arith.constant 0 : index
    %c0_265 = arith.constant 0 : index
    %816 = vector.load %arg9[%c0_264, %c0_265] : memref<1x512xf32, #tpu.memory_space<vmem>>, vector<1x512xf32>
    %817 = arith.addf %815, %816 : vector<1x512xf32>
    %818 = vector.extract_strided_slice %817 {offsets = [0, 0], sizes = [1, 256], strides = [1, 1]} : vector<1x512xf32> to vector<1x256xf32>
    %819 = arith.negf %818 : vector<1x256xf32>
    %820 = math.exp %819 : vector<1x256xf32>
    %cst_266 = arith.constant 1.000000e+00 : f32
    %821 = vector.broadcast %cst_266 : f32 to vector<1x256xf32>
    %822 = arith.addf %821, %820 : vector<1x256xf32>
    %823 = arith.divf %821, %822 : vector<1x256xf32>
    %824 = vector.extract_strided_slice %823 {offsets = [0, 0], sizes = [1, 128], strides = [1, 1]} : vector<1x256xf32> to vector<1x128xf32>
    %825 = vector.extract_strided_slice %823 {offsets = [0, 128], sizes = [1, 128], strides = [1, 1]} : vector<1x256xf32> to vector<1x128xf32>
    %826 = vector.extract_strided_slice %817 {offsets = [0, 256], sizes = [1, 128], strides = [1, 1]} : vector<1x512xf32> to vector<1x128xf32>
    %827 = vector.extract_strided_slice %817 {offsets = [0, 384], sizes = [1, 128], strides = [1, 1]} : vector<1x512xf32> to vector<1x128xf32>
    %828 = arith.mulf %824, %827 : vector<1x128xf32>
    %829 = arith.addf %826, %828 : vector<1x128xf32>
    %830 = math.tanh %829 : vector<1x128xf32>
    %831 = arith.subf %769, %830 : vector<1x128xf32>
    %832 = arith.mulf %825, %831 : vector<1x128xf32>
    %833 = arith.addf %830, %832 : vector<1x128xf32>
    %834 = tpu.concatenate %833, %791 in 1 : vector<1x128xf32>, vector<1x128xf32> -> vector<1x256xf32>
    %835 = arith.truncf %834 : vector<1x256xf32> to vector<1x256xbf16>
    %c0_267 = arith.constant 0 : index
    %c0_268 = arith.constant 0 : index
    %836 = vector.load %arg10[%c0_267, %c0_268] : memref<256x512xbf16, #tpu.memory_space<vmem>>, vector<256x512xbf16>
    %cst_269 = arith.constant dense<0.000000e+00> : vector<1x512xf32>
    %837 = tpu.matmul %835, %836, %cst_269 {dimension_numbers = #tpu.dot_dimension_numbers<[1], [0], [0], [1], [0, 0, 1, 1], [], []>} : vector<1x256xbf16>, vector<256x512xbf16>, vector<1x512xf32> -> vector<1x512xf32>
    %c0_270 = arith.constant 0 : index
    %c0_271 = arith.constant 0 : index
    %838 = vector.load %arg11[%c0_270, %c0_271] : memref<1x512xf32, #tpu.memory_space<vmem>>, vector<1x512xf32>
    %839 = arith.addf %837, %838 : vector<1x512xf32>
    %840 = vector.extract_strided_slice %839 {offsets = [0, 0], sizes = [1, 256], strides = [1, 1]} : vector<1x512xf32> to vector<1x256xf32>
    %841 = arith.negf %840 : vector<1x256xf32>
    %842 = math.exp %841 : vector<1x256xf32>
    %cst_272 = arith.constant 1.000000e+00 : f32
    %843 = vector.broadcast %cst_272 : f32 to vector<1x256xf32>
    %844 = arith.addf %843, %842 : vector<1x256xf32>
    %845 = arith.divf %843, %844 : vector<1x256xf32>
    %846 = vector.extract_strided_slice %845 {offsets = [0, 0], sizes = [1, 128], strides = [1, 1]} : vector<1x256xf32> to vector<1x128xf32>
    %847 = vector.extract_strided_slice %845 {offsets = [0, 128], sizes = [1, 128], strides = [1, 1]} : vector<1x256xf32> to vector<1x128xf32>
    %848 = vector.extract_strided_slice %839 {offsets = [0, 256], sizes = [1, 128], strides = [1, 1]} : vector<1x512xf32> to vector<1x128xf32>
    %849 = vector.extract_strided_slice %839 {offsets = [0, 384], sizes = [1, 128], strides = [1, 1]} : vector<1x512xf32> to vector<1x128xf32>
    %850 = arith.mulf %846, %849 : vector<1x128xf32>
    %851 = arith.addf %848, %850 : vector<1x128xf32>
    %852 = math.tanh %851 : vector<1x128xf32>
    %853 = arith.subf %791, %852 : vector<1x128xf32>
    %854 = arith.mulf %847, %853 : vector<1x128xf32>
    %855 = arith.addf %852, %854 : vector<1x128xf32>
    %856 = arith.truncf %855 : vector<1x128xf32> to vector<1x128xbf16>
    %c0_273 = arith.constant 0 : index
    %c0_274 = arith.constant 0 : index
    %857 = vector.load %arg12[%c0_273, %c0_274] : memref<128x128xbf16, #tpu.memory_space<vmem>>, vector<128x128xbf16>
    %cst_275 = arith.constant dense<0.000000e+00> : vector<1x128xf32>
    %858 = tpu.matmul %856, %857, %cst_275 {dimension_numbers = #tpu.dot_dimension_numbers<[1], [0], [0], [1], [0, 0, 1, 1], [], []>} : vector<1x128xbf16>, vector<128x128xbf16>, vector<1x128xf32> -> vector<1x128xf32>
    %c0_276 = arith.constant 0 : index
    %c0_277 = arith.constant 0 : index
    %859 = vector.load %arg13[%c0_276, %c0_277] : memref<1x128xf32, #tpu.memory_space<vmem>>, vector<1x128xf32>
    %860 = arith.addf %858, %859 : vector<1x128xf32>
    %861 = arith.negf %860 : vector<1x128xf32>
    %862 = math.exp %861 : vector<1x128xf32>
    %cst_278 = arith.constant 1.000000e+00 : f32
    %863 = vector.broadcast %cst_278 : f32 to vector<1x128xf32>
    %864 = arith.addf %863, %862 : vector<1x128xf32>
    %865 = arith.divf %863, %864 : vector<1x128xf32>
    %866 = arith.index_cast %c7_i32_259 : i32 to index
    %c0_279 = arith.constant 0 : index
    %867 = vector.load %arg14[%866, %c0_279] : memref<8x128xf32, #tpu.memory_space<vmem>>, vector<1x128xf32>
    tpu.vector_store %arg14[%866, %c0_279], %865 {strides = array<i32>} : memref<8x128xf32, #tpu.memory_space<vmem>>, vector<1x128xf32>,
    %868 = arith.index_cast %c7_i32_259 : i32 to index
    %869 = memref.load %arg0[%868] : memref<8xi32, #tpu.memory_space<smem>>
    %c0_i32_280 = arith.constant 0 : i32
    %870 = arith.cmpi sgt, %869, %c0_i32_280 : i32
    %871 = arith.index_cast %c7_i32_259 : i32 to index
    %c0_281 = arith.constant 0 : index
    %872 = vector.load %arg2[%871, %c0_281] : memref<8x128xf32, #tpu.memory_space<vmem>>, vector<1x128xf32>
    %873 = arith.select %870, %872, %865 : vector<1x128xf32>
    %c8_i32_282 = arith.constant 8 : i32
    return
  }
}

</mosaic_0001>

<bundles_post_ra>
// kernel: tpu_custom_call.1
= control target key start
LH: loop header
LB: loop body
LE: loop exit
PB: predicated region body
PF: predicated region fallthrough
CT: control target
= control target key end

     0   :  { %19 = vsyncpa [#allocation6], 0  ;;  %s18026_s0 = inlined_call_operand.hbm [shape: s32[8], index: 0, kind: input, shape index: {}]   ;;  %s18027_s1 = inlined_call_operand.hbm [shape: f32[8,128], index: 1, kind: input, shape index: {}]   ;;  %s18028_s2 = inlined_call_operand.hbm [shape: f32[8,128], index: 2, kind: input, shape index: {}]   ;;  %s18029_s3 = inlined_call_operand.hbm [shape: bf16[128,512], index: 3, kind: input, shape index: {}]   ;;  %s18030_s4 = inlined_call_operand.hbm [shape: bf16[128,512], index: 4, kind: input, shape index: {}]   ;;  %s18031_s5 = inlined_call_operand.vmem [shape: f32[1,512], index: 5, kind: input, shape index: {}]   ;;  %s18032_s6 = inlined_call_operand.hbm [shape: bf16[256,512], index: 6, kind: input, shape index: {}]   ;;  %s18033_s7 = inlined_call_operand.vmem [shape: f32[1,512], index: 7, kind: input, shape index: {}]   ;;  %s18034_s8 = inlined_call_operand.hbm [shape: bf16[256,512], index: 8, kind: input, shape index: {}]   ;;  %s18035_s9 = inlined_call_operand.vmem [shape: f32[1,512], index: 9, kind: input, shape index: {}]   ;;  %s18036_s10 = inlined_call_operand.hbm [shape: bf16[256,512], index: 10, kind: input, shape index: {}]   ;;  %s18037_s11 = inlined_call_operand.vmem [shape: f32[1,512], index: 11, kind: input, shape index: {}]   ;;  %s18038_s12 = inlined_call_operand.hbm [shape: bf16[128,128], index: 12, kind: input, shape index: {}]   ;;  %s18039_s13 = inlined_call_operand.vmem [shape: f32[1,128], index: 13, kind: input, shape index: {}]   ;;  %s18040_s14 = inlined_call_operand.hbm [shape: f32[8,128], index: 14, kind: output, shape index: {}]  }
   0x1   :  { %20 = vsyncpa [#allocation4], 0 }
   0x2   :  { %21 = vsyncpa [#allocation9], 0 }
   0x3   :  { %22 = vsyncpa [#allocation12], 0 }
   0x4   :  { %23 = vsyncpa [#allocation15], 0 }
   0x5   :  { %24 = vsyncpa [#allocation18], 0 }
   0x6   :  { %25 = vsyncpa [#allocation5], 0  ;;  %s16148_s29 = smov [#allocation8]   ;;  %s15926_s17 = scalar_lea.hbm %s18028_s2, 128 }
   0x7   :  { %s50_s30 = sshll.u32 %s16148_s29, 4  ;;  %p15927_p0 = scmp.ne.s32.totalorder %s18028_s2, %s15926_s17  ;;  %s51_s30 = int_to_ptr.vmem [resolvable:$true] %s50_s30 }
   0x8   :  { %p15930_p1 = scmp.lt.u32.totalorder %s15926_s17, %s18028_s2 }
   0xa   :  { %p15932_p2 = pnand %p15930_p1, %p15927_p0 }
   0xc   :  { %15935 = shalt.err (!%p15932_p2)
}
   0xd   :  { %s15936_s22 = scalar_lea.vmem %s51_s30, 128  ;;  %p15941_p4 = scmp.lt.s32.totalorder %s51_s30, %s51_s30 }
   0xe   :  { %p15937_p3 = scmp.ne.s32.totalorder %s51_s30, %s15936_s22  ;;  %p15942_p5 = scmp.lt.s32.totalorder %s15936_s22, %s15936_s22 }
  0x10   :  { %p15943_p6 = por %p15942_p5, %p15941_p4 }
  0x12   :  { %p15944_p7 = pnand %p15943_p6, %p15937_p3 }
  0x14   :  { %15947 = shalt.err (!%p15944_p7)
}
  0x15   :  { %53 = dma.hbm_to_vmem [thread:$0]  %s18028_s2, 128, %s51_s30, [#allocation9]  }
  0x16   :  { %s16149_s25 = smov [#allocation11]   ;;  %s16150_s27 = smov [#allocation14]  }
  0x17   :  { %s71_s26 = sshll.u32 %s16149_s25, 4  ;;  %s99_s28 = sshll.u32 %s16150_s27, 4  ;;  %s72_s26 = int_to_ptr.vmem [resolvable:$true] %s71_s26  ;;  %s100_s28 = int_to_ptr.vmem [resolvable:$true] %s99_s28 }
  0x18   :  { %s15948_s16 = scalar_lea.hbm %s18030_s4, 4096 }
  0x19   :  { %p15949_p8 = scmp.ne.s32.totalorder %s18030_s4, %s15948_s16  ;;  %p15952_p9 = scmp.lt.u32.totalorder %s15948_s16, %s18030_s4 }
  0x1b   :  { %p15954_p10 = pnand %p15952_p9, %p15949_p8 }
  0x1d   :  { %15957 = shalt.err (!%p15954_p10)
}
  0x1e   :  { %s15958_s2 = scalar_lea.vmem %s72_s26, 4096  ;;  %p15963_p12 = scmp.lt.s32.totalorder %s72_s26, %s72_s26 }
  0x1f   :  { %p15959_p11 = scmp.ne.s32.totalorder %s72_s26, %s15958_s2  ;;  %p15964_p13 = scmp.lt.s32.totalorder %s15958_s2, %s15958_s2 }
  0x21   :  { %p15965_p0 = por %p15964_p13, %p15963_p12 }
  0x23   :  { %p15966_p1 = pnand %p15965_p0, %p15959_p11 }
  0x25   :  { %15969 = shalt.err (!%p15966_p1)
}
  0x26   :  { %s16151_s30 = smov 256   ;;  %s16152_s21 = smov 16  }
  0x27   :  { %77 = dma.hbm_to_vmem [thread:$0]  %s18030_s4, 4096, %s72_s26, [#allocation12], %s16151_s30, %s16151_s30, %s16152_s21  }
  0x28   :  { %s15970_s27 = scalar_lea.hbm %s18034_s8, 8192 }
  0x29   :  { %p15971_p2 = scmp.ne.s32.totalorder %s18034_s8, %s15970_s27  ;;  %p15974_p3 = scmp.lt.u32.totalorder %s15970_s27, %s18034_s8 }
  0x2b   :  { %p15976_p4 = pnand %p15974_p3, %p15971_p2 }
  0x2d   :  { %15979 = shalt.err (!%p15976_p4)
}
  0x2e   :  { %s15980_s18 = scalar_lea.vmem %s100_s28, 8192  ;;  %p15985_p6 = scmp.lt.s32.totalorder %s100_s28, %s100_s28 }
  0x2f   :  { %p15981_p5 = scmp.ne.s32.totalorder %s100_s28, %s15980_s18  ;;  %p15986_p7 = scmp.lt.s32.totalorder %s15980_s18, %s15980_s18 }
  0x31   :  { %p15987_p8 = por %p15986_p7, %p15985_p6 }
  0x33   :  { %p15988_p9 = pnand %p15987_p8, %p15981_p5 }
  0x35   :  { %15991 = shalt.err (!%p15988_p9)
}
  0x36   :  { %105 = dma.hbm_to_vmem [thread:$0]  %s18034_s8, 8192, %s100_s28, [#allocation15], %s16151_s30, %s16151_s30, %s16152_s21  }
  0x37   :  { %s15992_s2 = scalar_lea.hbm %s18026_s0, 16 }
  0x38   :  { %p15993_p10 = scmp.ne.s32.totalorder %s18026_s0, %s15992_s2  ;;  %p15996_p11 = scmp.lt.u32.totalorder %s15992_s2, %s18026_s0 }
  0x3a   :  { %p15998_p12 = pnand %p15996_p11, %p15993_p10 }
  0x3c   :  { %16001 = shalt.err (!%p15998_p12)
}
  0x3d   :  { %s16153_s27 = smov [#allocation3]   ;;  %s16154_s8 = smov [#allocation7]  }
  0x3e   :  { %33 = dma.hbm_to_smem %s18026_s0, 16, %s16153_s27, [#allocation6]  }
  0x3f   :  { %s40_s28 = sshll.u32 %s16154_s8, 4  ;;  %s16155_s16 = smov [#allocation10]   ;;  %s41_s28 = int_to_ptr.vmem [resolvable:$true] %s40_s28 }
  0x40   :  { %s59_s17 = sshll.u32 %s16155_s16, 4  ;;  %s16002_s26 = scalar_lea.hbm %s18027_s1, 128  ;;  %s16296_s17 = int_to_ptr.vmem [resolvable:$true] %s59_s17 }
  0x41   :  { %p16003_p13 = scmp.ne.s32.totalorder %s18027_s1, %s16002_s26  ;;  %p16006_p0 = scmp.lt.u32.totalorder %s16002_s26, %s18027_s1 }
  0x43   :  { %p16008_p1 = pnand %p16006_p0, %p16003_p13 }
  0x45   :  { %16011 = shalt.err (!%p16008_p1)
}
  0x46   :  { %s16012_s0 = scalar_lea.vmem %s41_s28, 128  ;;  %p16017_p3 = scmp.lt.s32.totalorder %s41_s28, %s41_s28 }
  0x47   :  { %p16013_p2 = scmp.ne.s32.totalorder %s41_s28, %s16012_s0  ;;  %p16018_p4 = scmp.lt.s32.totalorder %s16012_s0, %s16012_s0 }
  0x49   :  { %p16019_p5 = por %p16018_p4, %p16017_p3 }
  0x4b   :  { %p16020_p6 = pnand %p16019_p5, %p16013_p2 }
  0x4d   :  { %16023 = shalt.err (!%p16020_p6)
}
  0x4e   :  { %43 = dma.hbm_to_vmem [thread:$0]  %s18027_s1, 128, %s41_s28, [#allocation4]  }
  0x4f   :  { %s16024_s29 = scalar_lea.hbm %s18029_s3, 4096 }
  0x50   :  { %p16025_p7 = scmp.ne.s32.totalorder %s18029_s3, %s16024_s29  ;;  %p16028_p8 = scmp.lt.u32.totalorder %s16024_s29, %s18029_s3 }
  0x52   :  { %p16030_p9 = pnand %p16028_p8, %p16025_p7 }
  0x54   :  { %16033 = shalt.err (!%p16030_p9)
}
  0x55   :  { %s16034_s4 = scalar_lea.vmem %s16296_s17, 4096  ;;  %p16039_p11 = scmp.lt.s32.totalorder %s16296_s17, %s16296_s17 }
  0x56   :  { %p16035_p10 = scmp.ne.s32.totalorder %s16296_s17, %s16034_s4  ;;  %p16040_p12 = scmp.lt.s32.totalorder %s16034_s4, %s16034_s4 }
  0x58   :  { %p16041_p13 = por %p16040_p12, %p16039_p11 }
  0x5a   :  { %p16042_p0 = pnand %p16041_p13, %p16035_p10 }
  0x5c   :  { %16045 = shalt.err (!%p16042_p0)
}
  0x5d   :  { %65 = dma.hbm_to_vmem [thread:$0]  %s18029_s3, 4096, %s16296_s17, [#allocation9], %s16151_s30, %s16151_s30, %s16152_s21  }
  0x5e   :  { %s16156_s26 = smov [#allocation13]   ;;  %s16157_s20 = smov [#allocation16]  }
  0x5f   :  { %s85_s19 = sshll.u32 %s16156_s26, 4  ;;  %s113_s2 = sshll.u32 %s16157_s20, 4  ;;  %s86_s19 = int_to_ptr.vmem [resolvable:$true] %s85_s19  ;;  %s16330_s2 = int_to_ptr.vmem [resolvable:$true] %s113_s2 }
  0x60   :  { %s16046_s23 = scalar_lea.hbm %s18032_s6, 8192 }
  0x61   :  { %p16047_p1 = scmp.ne.s32.totalorder %s18032_s6, %s16046_s23  ;;  %p16050_p2 = scmp.lt.u32.totalorder %s16046_s23, %s18032_s6 }
  0x63   :  { %p16052_p3 = pnand %p16050_p2, %p16047_p1 }
  0x65   :  { %16055 = shalt.err (!%p16052_p3)
}
  0x66   :  { %s16056_s3 = scalar_lea.vmem %s86_s19, 8192  ;;  %p16061_p5 = scmp.lt.s32.totalorder %s86_s19, %s86_s19 }
  0x67   :  { %p16057_p4 = scmp.ne.s32.totalorder %s86_s19, %s16056_s3  ;;  %p16062_p6 = scmp.lt.s32.totalorder %s16056_s3, %s16056_s3 }
  0x69   :  { %p16063_p7 = por %p16062_p6, %p16061_p5 }
  0x6b   :  { %p16064_p8 = pnand %p16063_p7, %p16057_p4 }
  0x6d   :  { %16067 = shalt.err (!%p16064_p8)
}
  0x6e   :  { %91 = dma.hbm_to_vmem [thread:$0]  %s18032_s6, 8192, %s86_s19, [#allocation12], %s16151_s30, %s16151_s30, %s16152_s21  }
  0x6f   :  { %s16068_s18 = scalar_lea.hbm %s18036_s10, 8192 }
  0x70   :  { %p16069_p9 = scmp.ne.s32.totalorder %s18036_s10, %s16068_s18  ;;  %p16072_p10 = scmp.lt.u32.totalorder %s16068_s18, %s18036_s10 }
  0x72   :  { %p16074_p11 = pnand %p16072_p10, %p16069_p9 }
  0x74   :  { %16077 = shalt.err (!%p16074_p11)
}
  0x75   :  { %s16078_s20 = scalar_lea.vmem %s16330_s2, 8192  ;;  %p16083_p13 = scmp.lt.s32.totalorder %s16330_s2, %s16330_s2 }
  0x76   :  { %p16079_p12 = scmp.ne.s32.totalorder %s16330_s2, %s16078_s20  ;;  %p16084_p0 = scmp.lt.s32.totalorder %s16078_s20, %s16078_s20 }
  0x78   :  { %p16085_p1 = por %p16084_p0, %p16083_p13 }
  0x7a   :  { %p16086_p2 = pnand %p16085_p1, %p16079_p12 }
  0x7c   :  { %16089 = shalt.err (!%p16086_p2)
}
  0x7d   :  { %119 = dma.hbm_to_vmem [thread:$0]  %s18036_s10, 8192, %s16330_s2, [#allocation15], %s16151_s30, %s16151_s30, %s16152_s21  }
  0x7e   :  { %s16158_s22 = smov [#allocation17]   ;;  %s16090_s25 = scalar_lea.hbm %s18038_s12, 1024 }
  0x7f   :  { %s127_s0 = sshll.u32 %s16158_s22, 4  ;;  %p16091_p3 = scmp.ne.s32.totalorder %s18038_s12, %s16090_s25  ;;  %s128_s0 = int_to_ptr.vmem [resolvable:$true] %s127_s0 }
  0x80   :  { %p16094_p4 = scmp.lt.u32.totalorder %s16090_s25, %s18038_s12 }
  0x82   :  { %p16096_p5 = pnand %p16094_p4, %p16091_p3 }
  0x84   :  { %16099 = shalt.err (!%p16096_p5)
}
  0x85   :  { %s16100_s15 = scalar_lea.vmem %s128_s0, 1024  ;;  %p16105_p7 = scmp.lt.s32.totalorder %s128_s0, %s128_s0 }
  0x86   :  { %p16101_p6 = scmp.ne.s32.totalorder %s128_s0, %s16100_s15  ;;  %p16106_p8 = scmp.lt.s32.totalorder %s16100_s15, %s16100_s15 }
  0x88   :  { %p16107_p9 = por %p16106_p8, %p16105_p7 }
  0x8a   :  { %p16108_p10 = pnand %p16107_p9, %p16101_p6 }
  0x8c   :  { %16111 = shalt.err (!%p16108_p10)
}
  0x8d   :  { %s16159_s10 = smov 64   ;;  %s16160_s30 = smov 4  }
  0x8e   :  { %133 = dma.hbm_to_vmem [thread:$0]  %s18038_s12, 1024, %s128_s0, [#allocation18], %s16159_s10, %s16159_s10, %s16160_s30  }
  0x8f   :  { %16134 = dma.done.wait [#allocation6], 16  }
  0x90   :  { %16135 = vsyncadd [#allocation6], 4294967280 }
  0x91   :  { %16136 = dma.done.wait [#allocation4], 128  }
  0x92   :  { %16137 = vsyncadd [#allocation4], 4294967168 }
  0x93   :  { %16138 = dma.done.wait [#allocation9], 4224  }
  0x94   :  { %16139 = vsyncadd [#allocation9], 4294963072 }
  0x95   :  { %16140 = dma.done.wait [#allocation12], 12288  }
  0x96   :  { %16141 = vsyncadd [#allocation12], 4294955008 }
  0x97   :  { %16142 = dma.done.wait [#allocation15], 16384  }
  0x98   :  { %16143 = vsyncadd [#allocation15], 4294950912 }
  0x99   :  { %16144 = dma.done.wait [#allocation18], 1024  }
  0x9a   :  { %16145 = vsyncadd [#allocation18], 4294966272 }
  0x9b   :  { %163 = sfence }
  0x9c   :  { %v13584_v0 = vld [vmem:[#allocation10 + $0x4] ss:$16 sps:$4 sm:$0xff]   ;;  %v13586_v1 = vld [vmem:[#allocation10 + $0xc] ss:$16 sps:$4 sm:$0xff]   ;;  %v18041_v2 = vmov 0   ;;  %vm16165_vm0 = vmmov 0  }
  0x9d   :  { %413 = vmatprep.mubr.bf16.mxu0 %v18041_v2  ;;  %454 = vmatprep.mubr.bf16.mxu1 %v18041_v2  ;;  %v13588_v3 = vld [vmem:[#allocation10] ss:$16 sps:$4 sm:$0xff]   ;;  %v13589_v4 = vld [vmem:[#allocation10 + $0x8] ss:$16 sps:$4 sm:$0xff]   ;;  %v13590_v5 = vld [vmem:[#allocation10 + $0x24] ss:$16 sps:$4 sm:$0xff]  }
  0x9e   :  { %381 = vmatprep.subr.bf16.mxu0 %v13584_v0  ;;  %422 = vmatprep.subr.bf16.mxu1 %v13586_v1  ;;  %v13592_v6 = vld [vmem:[#allocation10 + $0x2c] ss:$16 sps:$4 sm:$0xff]   ;;  %v13594_v7 = vld [vmem:[#allocation10 + $0x20] ss:$16 sps:$4 sm:$0xff]   ;;  %v13595_v8 = vld [vmem:[#allocation10 + $0x28] ss:$16 sps:$4 sm:$0xff]  }
  0x9f   :  { %382 = vmatpush1.bf16.msra.mxu0 %v13588_v3  ;;  %423 = vmatpush1.bf16.msra.mxu1 %v13589_v4  ;;  %v13596_v9 = vld [vmem:[#allocation10 + $0x44] ss:$16 sps:$4 sm:$0xff]   ;;  %v13598_v10 = vld [vmem:[#allocation10 + $0x4c] ss:$16 sps:$4 sm:$0xff]   ;;  %v13600_v11 = vld [vmem:[#allocation10 + $0x40] ss:$16 sps:$4 sm:$0xff]  }
  0xa0   :  { %383 = vmatprep.subr.bf16.mxu0 %v13590_v5  ;;  %424 = vmatprep.subr.bf16.mxu1 %v13592_v6  ;;  %v13601_v12 = vld [vmem:[#allocation10 + $0x48] ss:$16 sps:$4 sm:$0xff]   ;;  %v13602_v13 = vld [vmem:[#allocation10 + $0x64] ss:$16 sps:$4 sm:$0xff]   ;;  %v13604_v14 = vld [vmem:[#allocation10 + $0x6c] ss:$16 sps:$4 sm:$0xff]  }
  0xa1   :  { %v13606_v15 = vld [vmem:[#allocation10 + $0x60] ss:$16 sps:$4 sm:$0xff]   ;;  %v13607_v16 = vld [vmem:[#allocation10 + $0x68] ss:$16 sps:$4 sm:$0xff]   ;;  %v13608_v17 = vld [vmem:[#allocation10 + $0x84] ss:$16 sps:$4 sm:$0xff]  }
  0xa2   :  { %v13610_v18 = vld [vmem:[#allocation10 + $0x8c] ss:$16 sps:$4 sm:$0xff]   ;;  %v13612_v19 = vld [vmem:[#allocation10 + $0x80] ss:$16 sps:$4 sm:$0xff]   ;;  %v13613_v20 = vld [vmem:[#allocation10 + $0x88] ss:$16 sps:$4 sm:$0xff]  }
  0xa3   :  { %384 = vmatpush1.bf16.msra.mxu0 %v13594_v7  ;;  %425 = vmatpush1.bf16.msra.mxu1 %v13595_v8  ;;  %v13614_v21 = vld [vmem:[#allocation10 + $0xa4] ss:$16 sps:$4 sm:$0xff]   ;;  %v13616_v22 = vld [vmem:[#allocation10 + $0xac] ss:$16 sps:$4 sm:$0xff]   ;;  %v13618_v23 = vld [vmem:[#allocation10 + $0xa0] ss:$16 sps:$4 sm:$0xff]  }
  0xa4   :  { %385 = vmatprep.subr.bf16.mxu0 %v13596_v9  ;;  %426 = vmatprep.subr.bf16.mxu1 %v13598_v10  ;;  %v13619_v24 = vld [vmem:[#allocation10 + $0xa8] ss:$16 sps:$4 sm:$0xff]   ;;  %v13620_v25 = vld [vmem:[#allocation10 + $0xc4] ss:$16 sps:$4 sm:$0xff]   ;;  %v13622_v26 = vld [vmem:[#allocation10 + $0xcc] ss:$16 sps:$4 sm:$0xff]  }
  0xa5   :  { %v13624_v27 = vld [vmem:[#allocation10 + $0xc0] ss:$16 sps:$4 sm:$0xff]   ;;  %v13625_v28 = vld [vmem:[#allocation10 + $0xc8] ss:$16 sps:$4 sm:$0xff]   ;;  %v13626_v29 = vld [vmem:[#allocation10 + $0xe4] ss:$16 sps:$4 sm:$0xff]  }
  0xa6   :  { %v13628_v30 = vld [vmem:[#allocation10 + $0xec] ss:$16 sps:$4 sm:$0xff]   ;;  %v13630_v31 = vld [vmem:[#allocation10 + $0xe0] ss:$16 sps:$4 sm:$0xff]   ;;  %v13631_v32 = vld [vmem:[#allocation10 + $0xe8] ss:$16 sps:$4 sm:$0xff]  }
  0xa7   :  { %386 = vmatpush1.bf16.msra.mxu0 %v13600_v11  ;;  %427 = vmatpush1.bf16.msra.mxu1 %v13601_v12  ;;  %v165_v33 = vld [vmem:[#allocation7] sm:$0xff]  ;;  %v13634_v35 = vld [vmem:[#allocation11 + $0xc] ss:$16 sps:$4 sm:$0xff]   ;;  %v13637_v38 = vld [vmem:[#allocation11 + $0x8] ss:$16 sps:$4 sm:$0xff]   ;;  %s4082_s20 = sld [smem:[#allocation3]] }
  0xa8   :  { %387 = vmatprep.subr.bf16.mxu0 %v13602_v13  ;;  %428 = vmatprep.subr.bf16.mxu1 %v13604_v14  ;;  %v13632_v34 = vld [vmem:[#allocation11 + $0x4] ss:$16 sps:$4 sm:$0xff]   ;;  %v166_v36 = vpack.c.bf16 %v165_v33, %v165_v33  ;;  %v13636_v37 = vld [vmem:[#allocation11] ss:$16 sps:$4 sm:$0xff]   ;;  %v13640_v40 = vld [vmem:[#allocation11 + $0x2c] ss:$16 sps:$4 sm:$0xff]  }
  0xa9   :  { %v13638_v39 = vld [vmem:[#allocation11 + $0x24] ss:$16 sps:$4 sm:$0xff]   ;;  %v13642_v41 = vld [vmem:[#allocation11 + $0x20] ss:$16 sps:$4 sm:$0xff]   ;;  %v13643_v42 = vld [vmem:[#allocation11 + $0x28] ss:$16 sps:$4 sm:$0xff]  }
  0xaa   :  { %v13644_v43 = vld [vmem:[#allocation11 + $0x44] ss:$16 sps:$4 sm:$0xff]   ;;  %v13646_v44 = vld [vmem:[#allocation11 + $0x4c] ss:$16 sps:$4 sm:$0xff]   ;;  %v13648_v45 = vld [vmem:[#allocation11 + $0x40] ss:$16 sps:$4 sm:$0xff]  }
  0xab   :  { %388 = vmatpush1.bf16.msra.mxu0 %v13606_v15  ;;  %429 = vmatpush1.bf16.msra.mxu1 %v13607_v16  ;;  %v13649_v46 = vld [vmem:[#allocation11 + $0x48] ss:$16 sps:$4 sm:$0xff]   ;;  %v13650_v47 = vld [vmem:[#allocation11 + $0x64] ss:$16 sps:$4 sm:$0xff]   ;;  %v13652_v48 = vld [vmem:[#allocation11 + $0x6c] ss:$16 sps:$4 sm:$0xff]  }
  0xac   :  { %389 = vmatprep.subr.bf16.mxu0 %v13608_v17  ;;  %430 = vmatprep.subr.bf16.mxu1 %v13610_v18  ;;  %v13654_v49 = vld [vmem:[#allocation11 + $0x60] ss:$16 sps:$4 sm:$0xff]   ;;  %v13655_v50 = vld [vmem:[#allocation11 + $0x68] ss:$16 sps:$4 sm:$0xff]   ;;  %v13656_v51 = vld [vmem:[#allocation11 + $0x84] ss:$16 sps:$4 sm:$0xff]  }
  0xad   :  { %v13658_v52 = vld [vmem:[#allocation11 + $0x8c] ss:$16 sps:$4 sm:$0xff]   ;;  %v13660_v53 = vld [vmem:[#allocation11 + $0x80] ss:$16 sps:$4 sm:$0xff]   ;;  %v13661_v54 = vld [vmem:[#allocation11 + $0x88] ss:$16 sps:$4 sm:$0xff]  }
  0xae   :  { %v13662_v55 = vld [vmem:[#allocation11 + $0xa4] ss:$16 sps:$4 sm:$0xff]   ;;  %v13664_v56 = vld [vmem:[#allocation11 + $0xac] ss:$16 sps:$4 sm:$0xff]   ;;  %v13666_v57 = vld [vmem:[#allocation11 + $0xa0] ss:$16 sps:$4 sm:$0xff]  }
  0xaf   :  { %390 = vmatpush1.bf16.msra.mxu0 %v13612_v19  ;;  %431 = vmatpush1.bf16.msra.mxu1 %v13613_v20  ;;  %v13667_v58 = vld [vmem:[#allocation11 + $0xa8] ss:$16 sps:$4 sm:$0xff]   ;;  %v13668_v59 = vld [vmem:[#allocation11 + $0xc4] ss:$16 sps:$4 sm:$0xff]   ;;  %v13670_v60 = vld [vmem:[#allocation11 + $0xcc] ss:$16 sps:$4 sm:$0xff]  }
  0xb0   :  { %391 = vmatprep.subr.bf16.mxu0 %v13614_v21  ;;  %432 = vmatprep.subr.bf16.mxu1 %v13616_v22  ;;  %v13672_v61 = vld [vmem:[#allocation11 + $0xc0] ss:$16 sps:$4 sm:$0xff]   ;;  %v13673_v62 = vld [vmem:[#allocation11 + $0xc8] ss:$16 sps:$4 sm:$0xff]   ;;  %v13674_v63 = vld [vmem:[#allocation11 + $0xe4] ss:$16 sps:$4 sm:$0xff]  }
  0xb1   :  { %v13676_v0 = vld [vmem:[#allocation11 + $0xec] ss:$16 sps:$4 sm:$0xff]   ;;  %v13678_v1 = vld [vmem:[#allocation11 + $0xe0] ss:$16 sps:$4 sm:$0xff]   ;;  %v13679_v3 = vld [vmem:[#allocation11 + $0xe8] ss:$16 sps:$4 sm:$0xff]  }
  0xb2   :  { %v13680_v4 = vld [vmem:[#allocation13 + $0x4] ss:$16 sps:$4 sm:$0xff]   ;;  %v13682_v5 = vld [vmem:[#allocation13 + $0xc] ss:$16 sps:$4 sm:$0xff]   ;;  %v13684_v6 = vld [vmem:[#allocation13] ss:$16 sps:$4 sm:$0xff]  }
  0xb3   :  { %392 = vmatpush1.bf16.msra.mxu0 %v13618_v23  ;;  %433 = vmatpush1.bf16.msra.mxu1 %v13619_v24  ;;  %v13685_v7 = vld [vmem:[#allocation13 + $0x8] ss:$16 sps:$4 sm:$0xff]   ;;  %v13686_v8 = vld [vmem:[#allocation13 + $0x24] ss:$16 sps:$4 sm:$0xff]   ;;  %v13688_v9 = vld [vmem:[#allocation13 + $0x2c] ss:$16 sps:$4 sm:$0xff]  }
  0xb4   :  { %393 = vmatprep.subr.bf16.mxu0 %v13620_v25  ;;  %434 = vmatprep.subr.bf16.mxu1 %v13622_v26  ;;  %v13690_v10 = vld [vmem:[#allocation13 + $0x20] ss:$16 sps:$4 sm:$0xff]   ;;  %v13691_v11 = vld [vmem:[#allocation13 + $0x28] ss:$16 sps:$4 sm:$0xff]   ;;  %v13692_v12 = vld [vmem:[#allocation13 + $0x44] ss:$16 sps:$4 sm:$0xff]  }
  0xb5   :  { %v13694_v13 = vld [vmem:[#allocation13 + $0x4c] ss:$16 sps:$4 sm:$0xff]   ;;  %v13696_v14 = vld [vmem:[#allocation13 + $0x40] ss:$16 sps:$4 sm:$0xff]   ;;  %v13697_v15 = vld [vmem:[#allocation13 + $0x48] ss:$16 sps:$4 sm:$0xff]  }
  0xb6   :  { %v13698_v16 = vld [vmem:[#allocation13 + $0x64] ss:$16 sps:$4 sm:$0xff]   ;;  %v13700_v17 = vld [vmem:[#allocation13 + $0x6c] ss:$16 sps:$4 sm:$0xff]   ;;  %v13702_v18 = vld [vmem:[#allocation13 + $0x60] ss:$16 sps:$4 sm:$0xff]  }
  0xb7   :  { %394 = vmatpush1.bf16.msra.mxu0 %v13624_v27  ;;  %435 = vmatpush1.bf16.msra.mxu1 %v13625_v28  ;;  %v13703_v19 = vld [vmem:[#allocation13 + $0x68] ss:$16 sps:$4 sm:$0xff]   ;;  %v13704_v20 = vld [vmem:[#allocation13 + $0x84] ss:$16 sps:$4 sm:$0xff]   ;;  %v13706_v21 = vld [vmem:[#allocation13 + $0x8c] ss:$16 sps:$4 sm:$0xff]  }
  0xb8   :  { %395 = vmatprep.subr.bf16.mxu0 %v13626_v29  ;;  %436 = vmatprep.subr.bf16.mxu1 %v13628_v30  ;;  %v13708_v22 = vld [vmem:[#allocation13 + $0x80] ss:$16 sps:$4 sm:$0xff]   ;;  %v13709_v23 = vld [vmem:[#allocation13 + $0x88] ss:$16 sps:$4 sm:$0xff]   ;;  %v13710_v24 = vld [vmem:[#allocation13 + $0xa4] ss:$16 sps:$4 sm:$0xff]  }
  0xb9   :  { %v13712_v25 = vld [vmem:[#allocation13 + $0xac] ss:$16 sps:$4 sm:$0xff]   ;;  %v13714_v26 = vld [vmem:[#allocation13 + $0xa0] ss:$16 sps:$4 sm:$0xff]   ;;  %v13715_v27 = vld [vmem:[#allocation13 + $0xa8] ss:$16 sps:$4 sm:$0xff]  }
  0xba   :  { %v13716_v28 = vld [vmem:[#allocation13 + $0xc4] ss:$16 sps:$4 sm:$0xff]   ;;  %v13718_v29 = vld [vmem:[#allocation13 + $0xcc] ss:$16 sps:$4 sm:$0xff]   ;;  %v13720_v30 = vld [vmem:[#allocation13 + $0xc0] ss:$16 sps:$4 sm:$0xff]  }
  0xbb   :  { %396 = vmatpush1.bf16.msra.mxu0 %v13630_v31  ;;  %437 = vmatpush1.bf16.msra.mxu1 %v13631_v32  ;;  %v13721_v31 = vld [vmem:[#allocation13 + $0xc8] ss:$16 sps:$4 sm:$0xff]   ;;  %v13722_v32 = vld [vmem:[#allocation13 + $0xe4] ss:$16 sps:$4 sm:$0xff]   ;;  %v13724_v33 = vld [vmem:[#allocation13 + $0xec] ss:$16 sps:$4 sm:$0xff]  }
  0xbc   :  { %660 = vmatprep.subr.bf16.mxu0 %v13632_v34  ;;  %701 = vmatprep.subr.bf16.mxu1 %v13634_v35  ;;  %v13726_v34 = vld [vmem:[#allocation13 + $0xe0] ss:$16 sps:$4 sm:$0xff]   ;;  %v13727_v35 = vld [vmem:[#allocation13 + $0xe8] ss:$16 sps:$4 sm:$0xff]   ;;  %p4083_p11 = scmp.gt.s32.totalorder %s4082_s20, 0  ;;  %s12481_s27 = sld [smem:[#allocation3 + $0x1]] }
  0xbd   :  { %s12623_s2 = sld [smem:[#allocation3 + $0x2]]  ;;  %s12765_s1 = sld [smem:[#allocation3 + $0x3]] }
  0xbe   :  { %414 = vmatmul.mubr.bf16.vlgmr.msra.gmra.mrb[0].mxu0 %v166_v36  ;;  %455 = vmatmul.mubr.bf16.vlgmr.msra.gmra.mrb[0].mxu1 %v166_v36  ;;  %v13728_v36 = vld [vmem:[#allocation13 + $0x104] ss:$16 sps:$4 sm:$0xff]   ;;  %s4085_s6 = scalar_select %p4083_p11, 1, 0 }
  0xbf   :  { %661 = vmatpush1.bf16.msra.mxu0 %v13636_v37  ;;  %702 = vmatpush1.bf16.msra.mxu1 %v13637_v38  ;;  %v13730_v37 = vld [vmem:[#allocation13 + $0x10c] ss:$16 sps:$4 sm:$0xff]   ;;  %v13732_v38 = vld [vmem:[#allocation13 + $0x100] ss:$16 sps:$4 sm:$0xff]   ;;  %s12907_s23 = sld [smem:[#allocation3 + $0x4]]  ;;  %s13049_s10 = sld [smem:[#allocation3 + $0x5]] }
  0xc0   :  { %662 = vmatprep.subr.bf16.mxu0 %v13638_v39  ;;  %703 = vmatprep.subr.bf16.mxu1 %v13640_v40  ;;  %v13733_v39 = vld [vmem:[#allocation13 + $0x108] ss:$16 sps:$4 sm:$0xff]   ;;  %v13734_v40 = vld [vmem:[#allocation13 + $0x124] ss:$16 sps:$4 sm:$0xff]   ;;  %s16166_s20 = smov [#allocation19]  }
  0xc1   :  { %692 = vmatprep.mubr.bf16.mxu0 %v18041_v2  ;;  %733 = vmatprep.mubr.bf16.mxu1 %v18041_v2 }
  0xc2   :  { %p5218_p12 = scmp.gt.s32.totalorder %s12481_s27, 0 }
  0xc3   :  { %663 = vmatpush1.bf16.msra.mxu0 %v13642_v41  ;;  %704 = vmatpush1.bf16.msra.mxu1 %v13643_v42  ;;  %v13736_v41 = vld [vmem:[#allocation13 + $0x12c] ss:$16 sps:$4 sm:$0xff]   ;;  %v13738_v42 = vld [vmem:[#allocation13 + $0x120] ss:$16 sps:$4 sm:$0xff]   ;;  %p6353_p13 = scmp.gt.s32.totalorder %s12623_s2, 0  ;;  %p7488_p0 = scmp.gt.s32.totalorder %s12765_s1, 0 }
  0xc4   :  { %664 = vmatprep.subr.bf16.mxu0 %v13644_v43  ;;  %705 = vmatprep.subr.bf16.mxu1 %v13646_v44  ;;  %v13739_v43 = vld [vmem:[#allocation13 + $0x128] ss:$16 sps:$4 sm:$0xff]   ;;  %v13740_v44 = vld [vmem:[#allocation13 + $0x144] ss:$16 sps:$4 sm:$0xff]   ;;  %s5220_s29 = scalar_select %p5218_p12, 1, 0 }
  0xc5   :  { %s6355_s12 = scalar_select %p6353_p13, 1, 0 }
  0xc6   :  { %s7490_s28 = scalar_select %p7488_p0, 1, 0 }
  0xc7   :  { %665 = vmatpush1.bf16.msra.mxu0 %v13648_v45  ;;  %706 = vmatpush1.bf16.msra.mxu1 %v13649_v46  ;;  %v13742_v45 = vld [vmem:[#allocation13 + $0x14c] ss:$16 sps:$4 sm:$0xff]   ;;  %v13744_v46 = vld [vmem:[#allocation13 + $0x140] ss:$16 sps:$4 sm:$0xff]   ;;  %p8623_p1 = scmp.gt.s32.totalorder %s12907_s23, 0  ;;  %p9758_p2 = scmp.gt.s32.totalorder %s13049_s10, 0 }
  0xc8   :  { %666 = vmatprep.subr.bf16.mxu0 %v13650_v47  ;;  %707 = vmatprep.subr.bf16.mxu1 %v13652_v48  ;;  %v13745_v47 = vld [vmem:[#allocation13 + $0x148] ss:$16 sps:$4 sm:$0xff]   ;;  %v13746_v48 = vld [vmem:[#allocation13 + $0x164] ss:$16 sps:$4 sm:$0xff]  }
  0xc9   :  { %s8625_s24 = scalar_select %p8623_p1, 1, 0 }
  0xca   :  { %s9760_s30 = scalar_select %p9758_p2, 1, 0 }
  0xcb   :  { %667 = vmatpush1.bf16.msra.mxu0 %v13654_v49  ;;  %708 = vmatpush1.bf16.msra.mxu1 %v13655_v50  ;;  %v13748_v49 = vld [vmem:[#allocation13 + $0x16c] ss:$16 sps:$4 sm:$0xff]   ;;  %v13750_v50 = vld [vmem:[#allocation13 + $0x160] ss:$16 sps:$4 sm:$0xff]  }
  0xcc   :  { %668 = vmatprep.subr.bf16.mxu0 %v13656_v51  ;;  %709 = vmatprep.subr.bf16.mxu1 %v13658_v52  ;;  %v13751_v51 = vld [vmem:[#allocation13 + $0x168] ss:$16 sps:$4 sm:$0xff]   ;;  %v13752_v52 = vld [vmem:[#allocation13 + $0x184] ss:$16 sps:$4 sm:$0xff]  }
  0xcf   :  { %669 = vmatpush1.bf16.msra.mxu0 %v13660_v53  ;;  %710 = vmatpush1.bf16.msra.mxu1 %v13661_v54  ;;  %v13754_v53 = vld [vmem:[#allocation13 + $0x18c] ss:$16 sps:$4 sm:$0xff]   ;;  %v13756_v54 = vld [vmem:[#allocation13 + $0x180] ss:$16 sps:$4 sm:$0xff]  }
  0xd0   :  { %670 = vmatprep.subr.bf16.mxu0 %v13662_v55  ;;  %711 = vmatprep.subr.bf16.mxu1 %v13664_v56  ;;  %v13757_v55 = vld [vmem:[#allocation13 + $0x188] ss:$16 sps:$4 sm:$0xff]   ;;  %v13758_v56 = vld [vmem:[#allocation13 + $0x1a4] ss:$16 sps:$4 sm:$0xff]  }
  0xd3   :  { %671 = vmatpush1.bf16.msra.mxu0 %v13666_v57  ;;  %712 = vmatpush1.bf16.msra.mxu1 %v13667_v58  ;;  %v13760_v57 = vld [vmem:[#allocation13 + $0x1ac] ss:$16 sps:$4 sm:$0xff]   ;;  %v13762_v58 = vld [vmem:[#allocation13 + $0x1a0] ss:$16 sps:$4 sm:$0xff]  }
  0xd4   :  { %672 = vmatprep.subr.bf16.mxu0 %v13668_v59  ;;  %713 = vmatprep.subr.bf16.mxu1 %v13670_v60  ;;  %v13763_v59 = vld [vmem:[#allocation13 + $0x1a8] ss:$16 sps:$4 sm:$0xff]   ;;  %v13764_v60 = vld [vmem:[#allocation13 + $0x1c4] ss:$16 sps:$4 sm:$0xff]  }
  0xd7   :  { %673 = vmatpush1.bf16.msra.mxu0 %v13672_v61  ;;  %714 = vmatpush1.bf16.msra.mxu1 %v13673_v62  ;;  %v13766_v61 = vld [vmem:[#allocation13 + $0x1cc] ss:$16 sps:$4 sm:$0xff]   ;;  %v13768_v62 = vld [vmem:[#allocation13 + $0x1c0] ss:$16 sps:$4 sm:$0xff]  }
  0xd8   :  { %674 = vmatprep.subr.bf16.mxu0 %v13674_v63  ;;  %715 = vmatprep.subr.bf16.mxu1 %v13676_v0  ;;  %v13769_v63 = vld [vmem:[#allocation13 + $0x1c8] ss:$16 sps:$4 sm:$0xff]   ;;  %v13770_v0 = vld [vmem:[#allocation13 + $0x1e4] ss:$16 sps:$4 sm:$0xff]  }
  0xdb   :  { %675 = vmatpush1.bf16.msra.mxu0 %v13678_v1  ;;  %716 = vmatpush1.bf16.msra.mxu1 %v13679_v3  ;;  %v13772_v1 = vld [vmem:[#allocation13 + $0x1ec] ss:$16 sps:$4 sm:$0xff]   ;;  %v16162_v3 = vmov 0.0|0.0  }
  0xdc   :  { %1200 = vmatprep.subr.bf16.mxu0 %v13680_v4  ;;  %1241 = vmatprep.subr.bf16.mxu1 %v13682_v5  ;;  %v13774_v4 = vld [vmem:[#allocation13 + $0x1e0] ss:$16 sps:$4 sm:$0xff]   ;;  %v13775_v5 = vld [vmem:[#allocation13 + $0x1e8] ss:$16 sps:$4 sm:$0xff]  }
  0xde   :  { %693 = vmatmul.mubr.bf16.vlgmr.msra.gmra.mrb[4].mxu0 %v18041_v2  ;;  %734 = vmatmul.mubr.bf16.vlgmr.msra.gmra.mrb[4].mxu1 %v18041_v2 }
  0xdf   :  { %1201 = vmatpush1.bf16.msra.mxu0 %v13684_v6  ;;  %1242 = vmatpush1.bf16.msra.mxu1 %v13685_v7  ;;  %v15660_v6 = vld [vmem:[#allocation11 + $0x4] ss:$16 sps:$4 sm:$0xff]   ;;  %v15661_v7 = vld [vmem:[#allocation11 + $0xc] ss:$16 sps:$4 sm:$0xff]  }
  0xe0   :  { %1202 = vmatprep.subr.bf16.mxu0 %v13686_v8  ;;  %1243 = vmatprep.subr.bf16.mxu1 %v13688_v9  ;;  %v201_v8 = vlaneseq }
  0xe1   :  { %1232 = vmatprep.mubr.bf16.mxu0 %v16162_v3  ;;  %1273 = vmatprep.mubr.bf16.mxu1 %v16162_v3  ;;  %v15663_v3 = vld [vmem:[#allocation11 + $0x8] ss:$16 sps:$4 sm:$0xff]  }
  0xe2   :  { %v202_v9 = vshrl.u32 %v201_v8, 7  ;;  %v15668_v8 = vld [vmem:[#allocation11 + $0x44] ss:$16 sps:$4 sm:$0xff]  }
  0xe3   :  { %1203 = vmatpush1.bf16.msra.mxu0 %v13690_v10  ;;  %1244 = vmatpush1.bf16.msra.mxu1 %v13691_v11  ;;  %v199_v10 = vld [vmem:[%s18031_s5] sm:$0xf] }
  0xe4   :  { %1204 = vmatprep.subr.bf16.mxu0 %v13692_v12  ;;  %1245 = vmatprep.subr.bf16.mxu1 %v13694_v13  ;;  %v16388_v11 = vsub.s32 0, %v202_v9  ;;  %v16390_v12 = vsub.s32 2, %v202_v9  ;;  %v16392_v13 = vsub.s32 1, %v202_v9 }
  0xe6   :  { %18257 = vst [vmem:[#allocation27_spill] sm:$0xff] %v16388_v11  ;;  %18258 = vst [vmem:[#allocation28_spill] sm:$0xff] %v16390_v12 }
  0xe7   :  { %1205 = vmatpush1.bf16.msra.mxu0 %v13696_v14  ;;  %1246 = vmatpush1.bf16.msra.mxu1 %v13697_v15  ;;  %18259 = vst [vmem:[#allocation29_spill] sm:$0xff] %v16392_v13  ;;  %v16394_v14 = vsub.s32 3, %v202_v9  ;;  %v204_v15 = vrot.slane %v199_v10, %v16388_v11 }
  0xe8   :  { %1206 = vmatprep.subr.bf16.mxu0 %v13698_v16  ;;  %1247 = vmatprep.subr.bf16.mxu1 %v13700_v17  ;;  %v212_v16 = vrot.slane %v199_v10, %v16390_v12  ;;  %v208_v17 = vrot.slane %v199_v10, %v16392_v13 }
  0xe9   :  { %18260 = vst [vmem:[#allocation30_spill] sm:$0xff] %v16394_v14 }
  0xeb   :  { %1207 = vmatpush1.bf16.msra.mxu0 %v13702_v18  ;;  %1248 = vmatpush1.bf16.msra.mxu1 %v13703_v19  ;;  %v216_v18 = vrot.slane %v199_v10, %v16394_v14  ;;  %v15670_v10 = vld [vmem:[#allocation11 + $0x40] ss:$16 sps:$4 sm:$0xff]  }
  0xec   :  { %1208 = vmatprep.subr.bf16.mxu0 %v13704_v20  ;;  %1249 = vmatprep.subr.bf16.mxu1 %v13706_v21 }
  0xef   :  { %1209 = vmatpush1.bf16.msra.mxu0 %v13708_v22  ;;  %1250 = vmatpush1.bf16.msra.mxu1 %v13709_v23 }
  0xf0   :  { %1210 = vmatprep.subr.bf16.mxu0 %v13710_v24  ;;  %1251 = vmatprep.subr.bf16.mxu1 %v13712_v25 }
  0xf3   :  { %1211 = vmatpush1.bf16.msra.mxu0 %v13714_v26  ;;  %1252 = vmatpush1.bf16.msra.mxu1 %v13715_v27 }
  0xf4   :  { %1212 = vmatprep.subr.bf16.mxu0 %v13716_v28  ;;  %1253 = vmatprep.subr.bf16.mxu1 %v13718_v29 }
  0xf7   :  { %1213 = vmatpush1.bf16.msra.mxu0 %v13720_v30  ;;  %1254 = vmatpush1.bf16.msra.mxu1 %v13721_v31  ;;  %v16163_v31 = vmov 1966171168  }
  0xf8   :  { %1214 = vmatprep.subr.bf16.mxu0 %v13722_v32  ;;  %1255 = vmatprep.subr.bf16.mxu1 %v13724_v33  ;;  %v749_v32 = vunpack.c.l.s4 %v16163_v31  ;;  %v16442_v31 = vld [vmem:[#allocation11 + $0xc8] ss:$16 sps:$4 sm:$0xff]  }
  0xfa   :  { %v750_v33 = vunpack.c.0.s8 %v749_v32  ;;  %v16445_v32 = vld [vmem:[#allocation11 + $0xe4] ss:$16 sps:$4 sm:$0xff]  }
  0xfb   :  { %1215 = vmatpush1.bf16.msra.mxu0 %v13726_v34  ;;  %1256 = vmatpush1.bf16.msra.mxu1 %v13727_v35 }
  0xfc   :  { %1216 = vmatprep.subr.bf16.mxu0 %v13728_v36  ;;  %1257 = vmatprep.subr.bf16.mxu1 %v13730_v37  ;;  %v16400_v36 = vsub.s32 %v750_v33, %v202_v9  ;;  %v15669_v9 = vld [vmem:[#allocation11 + $0x4c] ss:$16 sps:$4 sm:$0xff]  }
  0xfd   :  { %v16448_v33 = vld [vmem:[#allocation11 + $0xec] ss:$16 sps:$4 sm:$0xff]  }
  0xff   :  { %1217 = vmatpush1.bf16.msra.mxu0 %v13732_v38  ;;  %1258 = vmatpush1.bf16.msra.mxu1 %v13733_v39 }
 0x100   :  { %1218 = vmatprep.subr.bf16.mxu0 %v13734_v40  ;;  %1259 = vmatprep.subr.bf16.mxu1 %v13736_v41 }
 0x103   :  { %1219 = vmatpush1.bf16.msra.mxu0 %v13738_v42  ;;  %1260 = vmatpush1.bf16.msra.mxu1 %v13739_v43 }
 0x104   :  { %1220 = vmatprep.subr.bf16.mxu0 %v13740_v44  ;;  %1261 = vmatprep.subr.bf16.mxu1 %v13742_v45 }
 0x107   :  { %1221 = vmatpush1.bf16.msra.mxu0 %v13744_v46  ;;  %1262 = vmatpush1.bf16.msra.mxu1 %v13745_v47 }
 0x108   :  { %1222 = vmatprep.subr.bf16.mxu0 %v13746_v48  ;;  %1263 = vmatprep.subr.bf16.mxu1 %v13748_v49 }
 0x10b   :  { %1223 = vmatpush1.bf16.msra.mxu0 %v13750_v50  ;;  %1264 = vmatpush1.bf16.msra.mxu1 %v13751_v51 }
 0x10c   :  { %1224 = vmatprep.subr.bf16.mxu0 %v13752_v52  ;;  %1265 = vmatprep.subr.bf16.mxu1 %v13754_v53 }
 0x10f   :  { %1225 = vmatpush1.bf16.msra.mxu0 %v13756_v54  ;;  %1266 = vmatpush1.bf16.msra.mxu1 %v13757_v55 }
 0x110   :  { %1226 = vmatprep.subr.bf16.mxu0 %v13758_v56  ;;  %1267 = vmatprep.subr.bf16.mxu1 %v13760_v57 }
 0x113   :  { %1227 = vmatpush1.bf16.msra.mxu0 %v13762_v58  ;;  %1268 = vmatpush1.bf16.msra.mxu1 %v13763_v59 }
 0x114   :  { %1228 = vmatprep.subr.bf16.mxu0 %v13764_v60  ;;  %1269 = vmatprep.subr.bf16.mxu1 %v13766_v61 }
 0x117   :  { %1229 = vmatpush1.bf16.msra.mxu0 %v13768_v62  ;;  %1270 = vmatpush1.bf16.msra.mxu1 %v13769_v63 }
 0x118   :  { %1230 = vmatprep.subr.bf16.mxu0 %v13770_v0  ;;  %1271 = vmatprep.subr.bf16.mxu1 %v13772_v1  ;;  %v15662_v1 = vld [vmem:[#allocation11] ss:$16 sps:$4 sm:$0xff]  }
 0x11b   :  { %1231 = vmatpush1.bf16.msra.mxu0 %v13774_v4  ;;  %1272 = vmatpush1.bf16.msra.mxu1 %v13775_v5  ;;  %v15664_v4 = vld [vmem:[#allocation11 + $0x24] ss:$16 sps:$4 sm:$0xff]   ;;  %v15665_v5 = vld [vmem:[#allocation11 + $0x2c] ss:$16 sps:$4 sm:$0xff]  }
 0x11c   :  { %1302 = vmatprep.subr.bf16.mxu0 %v15660_v6  ;;  %1343 = vmatprep.subr.bf16.mxu1 %v15661_v7  ;;  %v15666_v6 = vld [vmem:[#allocation11 + $0x20] ss:$16 sps:$4 sm:$0xff]   ;;  %v15667_v7 = vld [vmem:[#allocation11 + $0x28] ss:$16 sps:$4 sm:$0xff]  }
 0x191   :  { %v415_v19 = vpop.f32.mrb[0].mxu0  ;;  %v456_v20 = vpop.f32.mrb[0].mxu1 }
 0x192   :  { %v416_v21 = vadd.f32 %v415_v19, %v204_v15  ;;  %v457_v22 = vadd.f32 %v456_v20, %v212_v16  ;;  %v417_v23 = vpop.f32.mrb[1].mxu0  ;;  %v458_v24 = vpop.f32.mrb[1].mxu1  ;;  %v15671_v15 = vld [vmem:[#allocation11 + $0x48] ss:$16 sps:$4 sm:$0xff]   ;;  %v15672_v16 = vld [vmem:[#allocation11 + $0x64] ss:$16 sps:$4 sm:$0xff]  }
 0x193   :  { %v418_v25 = vadd.f32 %v417_v23, %v208_v17  ;;  %v459_v26 = vadd.f32 %v458_v24, %v216_v18  ;;  %v419_v27 = vpop.f32.mrb[2].mxu0  ;;  %v460_v28 = vpop.f32.mrb[2].mxu1  ;;  %v15673_v17 = vld [vmem:[#allocation11 + $0x6c] ss:$16 sps:$4 sm:$0xff]   ;;  %v15674_v18 = vld [vmem:[#allocation11 + $0x60] ss:$16 sps:$4 sm:$0xff]  }
 0x194   :  { %463 = vst [vmem:[#allocation2] sm:$0xff] %v416_v21  ;;  %465 = vst [vmem:[#allocation2 + $0x10] sm:$0xff] %v457_v22  ;;  %v420_v29 = vpop.f32.mrb[3].mxu0  ;;  %v461_v30 = vpop.f32.mrb[3].mxu1  ;;  %v15675_v19 = vld [vmem:[#allocation11 + $0x68] ss:$16 sps:$4 sm:$0xff]  }
 0x195   :  { %464 = vst [vmem:[#allocation2 + $0x8] sm:$0xff] %v418_v25  ;;  %466 = vst [vmem:[#allocation2 + $0x18] sm:$0xff] %v459_v26  ;;  %v15676_v20 = vld [vmem:[#allocation11 + $0x84] ss:$16 sps:$4 sm:$0xff]   ;;  %v15677_v21 = vld [vmem:[#allocation11 + $0x8c] ss:$16 sps:$4 sm:$0xff]  }
 0x196   :  { %v16415_v22 = vld [vmem:[#allocation11 + $0x80] ss:$16 sps:$4 sm:$0xff]   ;;  %v16418_v23 = vld [vmem:[#allocation11 + $0x88] ss:$16 sps:$4 sm:$0xff]   ;;  %v16421_v24 = vld [vmem:[#allocation11 + $0xa4] ss:$16 sps:$4 sm:$0xff]  }
 0x197   :  { %v16424_v25 = vld [vmem:[#allocation11 + $0xac] ss:$16 sps:$4 sm:$0xff]   ;;  %v16427_v26 = vld [vmem:[#allocation11 + $0xa0] ss:$16 sps:$4 sm:$0xff]   ;;  %v16430_v27 = vld [vmem:[#allocation11 + $0xa8] ss:$16 sps:$4 sm:$0xff]  }
 0x198   :  { %v16433_v28 = vld [vmem:[#allocation11 + $0xc4] ss:$16 sps:$4 sm:$0xff]   ;;  %v16436_v29 = vld [vmem:[#allocation11 + $0xcc] ss:$16 sps:$4 sm:$0xff]   ;;  %v16439_v30 = vld [vmem:[#allocation11 + $0xc0] ss:$16 sps:$4 sm:$0xff]  }
 0x19c   :  { %v467_v48 = vld [vmem:[#allocation2] ss:$8 sm:$0xf] }
 0x1b1   :  { %v694_v34 = vpop.f32.mrb[4].mxu0  ;;  %v735_v35 = vpop.f32.mrb[4].mxu1 }
 0x1b2   :  { %v696_v37 = vpop.f32.mrb[5].mxu0  ;;  %v737_v38 = vpop.f32.mrb[5].mxu1 }
 0x1b3   :  { %v746_v39 = vcombine.low %v694_v34, %v696_v37  ;;  %v747_v40 = vcombine.low %v735_v35, %v737_v38  ;;  %v698_v41 = vpop.f32.mrb[6].mxu0  ;;  %v739_v42 = vpop.f32.mrb[6].mxu1  ;;  %v16451_v34 = vld [vmem:[#allocation11 + $0xe0] ss:$16 sps:$4 sm:$0xff]   ;;  %v16454_v35 = vld [vmem:[#allocation11 + $0xe8] ss:$16 sps:$4 sm:$0xff]  }
 0x1b4   :  { %v699_v43 = vpop.f32.mrb[7].mxu0  ;;  %v740_v44 = vpop.f32.mrb[7].mxu1  ;;  %v16457_v37 = vld [vmem:[#allocation13 + $0x4] ss:$16 sps:$4 sm:$0xff]   ;;  %v16460_v38 = vld [vmem:[#allocation13 + $0xc] ss:$16 sps:$4 sm:$0xff]  }
 0x1b5   :  { %v754_v45 = vrot.slane %v746_v39, %v16400_v36  ;;  %v761_v46 = vrot.slane %v747_v40, %v16400_v36  ;;  %v16465_v39 = vld [vmem:[#allocation13] ss:$16 sps:$4 sm:$0xff]   ;;  %v16468_v40 = vld [vmem:[#allocation13 + $0x8] ss:$16 sps:$4 sm:$0xff]   ;;  %v16471_v41 = vld [vmem:[#allocation13 + $0x24] ss:$16 sps:$4 sm:$0xff]  }
 0x1b6   :  { %v16474_v42 = vld [vmem:[#allocation13 + $0x2c] ss:$16 sps:$4 sm:$0xff]   ;;  %v16477_v43 = vld [vmem:[#allocation13 + $0x20] ss:$16 sps:$4 sm:$0xff]   ;;  %v16480_v44 = vld [vmem:[#allocation13 + $0x28] ss:$16 sps:$4 sm:$0xff]  }
 0x1b7   :  { %v762_v47 = vcombine.low %v754_v45, %v761_v46  ;;  %v16483_v45 = vld [vmem:[#allocation13 + $0x44] ss:$16 sps:$4 sm:$0xff]   ;;  %v16486_v46 = vld [vmem:[#allocation13 + $0x4c] ss:$16 sps:$4 sm:$0xff]  }
 0x1b9   :  { %v769_v49 = vrot.slane %v762_v47, %v16400_v36  ;;  %v16489_v47 = vld [vmem:[#allocation13 + $0x40] ss:$16 sps:$4 sm:$0xff]  }
 0x1bb   :  { %v771_v50 = vadd.f32 %v769_v49, %v467_v48  ;;  %v16492_v48 = vld [vmem:[#allocation13 + $0x48] ss:$16 sps:$4 sm:$0xff]   ;;  %v16495_v49 = vld [vmem:[#allocation13 + $0x64] ss:$16 sps:$4 sm:$0xff]  }
 0x1bd   :  { %v12111_v51 = vmul.f32 -1.442695, %v771_v50  ;;  %v779_v54 = vrot.slane %v771_v50, 3  ;;  %v782_v57 = vrot.slane %v771_v50, 2  ;;  %v16498_v50 = vld [vmem:[#allocation13 + $0x6c] ss:$16 sps:$4 sm:$0xff]  }
 0x1bf   :  { %15340 = vpow2.f32 %v12111_v51  ;;  %v16501_v51 = vld [vmem:[#allocation13 + $0x60] ss:$16 sps:$4 sm:$0xff]  }
 0x1c9   :  { %v15341_v52 = vpop.eup %15340 }
 0x1ca   :  { %v775_v53 = vadd.f32 1.0, %v15341_v52  ;;  %v16504_v52 = vld [vmem:[#allocation13 + $0x68] ss:$16 sps:$4 sm:$0xff]  }
 0x1cc   :  { %15342 = vrcp.f32 %v775_v53  ;;  %v16507_v53 = vld [vmem:[#allocation13 + $0x84] ss:$16 sps:$4 sm:$0xff]  }
 0x1d6   :  { %v15343_v55 = vpop.eup %15342 }
 0x1d7   :  { %v781_v56 = vmul.f32 %v15343_v55, %v779_v54  ;;  %v788_v61 = vrot.slane %v15343_v55, 1  ;;  %v16510_v54 = vld [vmem:[#allocation13 + $0x8c] ss:$16 sps:$4 sm:$0xff]   ;;  %v16513_v55 = vld [vmem:[#allocation13 + $0x80] ss:$16 sps:$4 sm:$0xff]  }
 0x1d9   :  { %v784_v58 = vadd.f32 %v782_v57, %v781_v56  ;;  %v16516_v56 = vld [vmem:[#allocation13 + $0x88] ss:$16 sps:$4 sm:$0xff]   ;;  %v16519_v57 = vld [vmem:[#allocation13 + $0xa4] ss:$16 sps:$4 sm:$0xff]  }
 0x1db   :  { %15344 = vtanh.f32 %v784_v58  ;;  %v16522_v58 = vld [vmem:[#allocation13 + $0xac] ss:$16 sps:$4 sm:$0xff]  }
 0x1e5   :  { %v15345_v59 = vpop.eup %15344 }
 0x1e6   :  { %v786_v60 = vsub.f32 0.0, %v15345_v59 }
 0x1e8   :  { %v790_v62 = vmul.f32 %v788_v61, %v786_v60  ;;  %v16528_v60 = vld [vmem:[#allocation13 + $0xa8] ss:$16 sps:$4 sm:$0xff]   ;;  %v16531_v61 = vld [vmem:[#allocation13 + $0xc4] ss:$16 sps:$4 sm:$0xff]  }
 0x1ea   :  { %v16405_v63 = vadd.f32 %v15345_v59, %v790_v62  ;;  %v16525_v59 = vld [vmem:[#allocation13 + $0xa0] ss:$16 sps:$4 sm:$0xff]   ;;  %v16534_v62 = vld [vmem:[#allocation13 + $0xcc] ss:$16 sps:$4 sm:$0xff]  }
 0x1ec   :  { %v16409_v0 = vpack.c.bf16 %v16405_v63, %v16405_v63 }
 0x1ee   :  { %1233 = vmatmul.mubr.bf16.vlgmr.msra.gmra.mrb[8].mxu0 %v16409_v0  ;;  %1274 = vmatmul.mubr.bf16.vlgmr.msra.gmra.mrb[8].mxu1 %v16409_v0 }
 0x1ef   :  { %1303 = vmatpush1.bf16.msra.mxu0 %v15662_v1  ;;  %1344 = vmatpush1.bf16.msra.mxu1 %v15663_v3  ;;  %v16540_v1 = vld [vmem:[#allocation13 + $0xc8] ss:$16 sps:$4 sm:$0xff]   ;;  %v16543_v3 = vld [vmem:[#allocation13 + $0xe4] ss:$16 sps:$4 sm:$0xff]  }
 0x1f0   :  { %1304 = vmatprep.subr.bf16.mxu0 %v15664_v4  ;;  %1345 = vmatprep.subr.bf16.mxu1 %v15665_v5  ;;  %18261 = vst [vmem:[#allocation31_spill] sm:$0xff] %v16540_v1  ;;  %18262 = vst [vmem:[#allocation32_spill] sm:$0xff] %v16543_v3  ;;  %v16546_v4 = vld [vmem:[#allocation13 + $0xec] ss:$16 sps:$4 sm:$0xff]   ;;  %v16549_v5 = vld [vmem:[#allocation13 + $0xe0] ss:$16 sps:$4 sm:$0xff]  }
 0x1f1   :  { %1334 = vmatprep.mubr.bf16.mxu0 %v18041_v2  ;;  %1375 = vmatprep.mubr.bf16.mxu1 %v18041_v2  ;;  %18263 = vst [vmem:[#allocation33_spill] sm:$0xff] %v16546_v4  ;;  %18264 = vst [vmem:[#allocation34_spill] sm:$0xff] %v16549_v5  ;;  %v16588_v2 = vld [vmem:[#allocation13 + $0x148] ss:$16 sps:$4 sm:$0xff]  }
 0x1f2   :  { %18277 = vst [vmem:[#allocation47_spill] sm:$0xff] %v16588_v2 }
 0x1f3   :  { %1305 = vmatpush1.bf16.msra.mxu0 %v15666_v6  ;;  %1346 = vmatpush1.bf16.msra.mxu1 %v15667_v7  ;;  %v16552_v6 = vld [vmem:[#allocation13 + $0xe8] ss:$16 sps:$4 sm:$0xff]   ;;  %v16555_v7 = vld [vmem:[#allocation13 + $0x104] ss:$16 sps:$4 sm:$0xff]  }
 0x1f4   :  { %1306 = vmatprep.subr.bf16.mxu0 %v15668_v8  ;;  %1347 = vmatprep.subr.bf16.mxu1 %v15669_v9  ;;  %18265 = vst [vmem:[#allocation35_spill] sm:$0xff] %v16552_v6  ;;  %18266 = vst [vmem:[#allocation36_spill] sm:$0xff] %v16555_v7  ;;  %v16558_v8 = vld [vmem:[#allocation13 + $0x10c] ss:$16 sps:$4 sm:$0xff]   ;;  %v16561_v9 = vld [vmem:[#allocation13 + $0x100] ss:$16 sps:$4 sm:$0xff]  }
 0x1f5   :  { %18267 = vst [vmem:[#allocation37_spill] sm:$0xff] %v16558_v8  ;;  %18268 = vst [vmem:[#allocation38_spill] sm:$0xff] %v16561_v9 }
 0x1f7   :  { %1307 = vmatpush1.bf16.msra.mxu0 %v15670_v10  ;;  %1348 = vmatpush1.bf16.msra.mxu1 %v15671_v15  ;;  %v16564_v10 = vld [vmem:[#allocation13 + $0x108] ss:$16 sps:$4 sm:$0xff]   ;;  %v16567_v15 = vld [vmem:[#allocation13 + $0x124] ss:$16 sps:$4 sm:$0xff]  }
 0x1f8   :  { %1308 = vmatprep.subr.bf16.mxu0 %v15672_v16  ;;  %1349 = vmatprep.subr.bf16.mxu1 %v15673_v17  ;;  %18269 = vst [vmem:[#allocation39_spill] sm:$0xff] %v16564_v10  ;;  %18270 = vst [vmem:[#allocation40_spill] sm:$0xff] %v16567_v15  ;;  %v16570_v16 = vld [vmem:[#allocation13 + $0x12c] ss:$16 sps:$4 sm:$0xff]   ;;  %v16573_v17 = vld [vmem:[#allocation13 + $0x120] ss:$16 sps:$4 sm:$0xff]  }
 0x1f9   :  { %18271 = vst [vmem:[#allocation41_spill] sm:$0xff] %v16570_v16  ;;  %18272 = vst [vmem:[#allocation42_spill] sm:$0xff] %v16573_v17 }
 0x1fb   :  { %1309 = vmatpush1.bf16.msra.mxu0 %v15674_v18  ;;  %1350 = vmatpush1.bf16.msra.mxu1 %v15675_v19  ;;  %v16576_v18 = vld [vmem:[#allocation13 + $0x128] ss:$16 sps:$4 sm:$0xff]   ;;  %v16579_v19 = vld [vmem:[#allocation13 + $0x144] ss:$16 sps:$4 sm:$0xff]  }
 0x1fc   :  { %1310 = vmatprep.subr.bf16.mxu0 %v15676_v20  ;;  %1351 = vmatprep.subr.bf16.mxu1 %v15677_v21  ;;  %18273 = vst [vmem:[#allocation43_spill] sm:$0xff] %v16576_v18  ;;  %18274 = vst [vmem:[#allocation44_spill] sm:$0xff] %v16579_v19  ;;  %v16582_v20 = vld [vmem:[#allocation13 + $0x14c] ss:$16 sps:$4 sm:$0xff]   ;;  %v16585_v21 = vld [vmem:[#allocation13 + $0x140] ss:$16 sps:$4 sm:$0xff]  }
 0x1fd   :  { %18275 = vst [vmem:[#allocation45_spill] sm:$0xff] %v16582_v20  ;;  %18276 = vst [vmem:[#allocation46_spill] sm:$0xff] %v16585_v21 }
 0x1ff   :  { %1311 = vmatpush1.bf16.msra.mxu0 %v16415_v22  ;;  %1352 = vmatpush1.bf16.msra.mxu1 %v16418_v23 }
 0x200   :  { %1312 = vmatprep.subr.bf16.mxu0 %v16421_v24  ;;  %1353 = vmatprep.subr.bf16.mxu1 %v16424_v25 }
 0x203   :  { %1313 = vmatpush1.bf16.msra.mxu0 %v16427_v26  ;;  %1354 = vmatpush1.bf16.msra.mxu1 %v16430_v27 }
 0x204   :  { %1314 = vmatprep.subr.bf16.mxu0 %v16433_v28  ;;  %1355 = vmatprep.subr.bf16.mxu1 %v16436_v29 }
 0x207   :  { %1315 = vmatpush1.bf16.msra.mxu0 %v16439_v30  ;;  %1356 = vmatpush1.bf16.msra.mxu1 %v16442_v31 }
 0x208   :  { %1316 = vmatprep.subr.bf16.mxu0 %v16445_v32  ;;  %1357 = vmatprep.subr.bf16.mxu1 %v16448_v33 }
 0x20b   :  { %1317 = vmatpush1.bf16.msra.mxu0 %v16451_v34  ;;  %1358 = vmatpush1.bf16.msra.mxu1 %v16454_v35 }
 0x20c   :  { %1436 = vmatprep.subr.bf16.mxu0 %v16457_v37  ;;  %1477 = vmatprep.subr.bf16.mxu1 %v16460_v38 }
 0x20e   :  { %1335 = vmatmul.mubr.bf16.vlgmr.msra.gmra.mrb[12].mxu0 %v16409_v0  ;;  %1376 = vmatmul.mubr.bf16.vlgmr.msra.gmra.mrb[12].mxu1 %v16409_v0  ;;  %v16537_v0 = vld [vmem:[#allocation13 + $0xc0] ss:$16 sps:$4 sm:$0xff]  }
 0x20f   :  { %1437 = vmatpush1.bf16.msra.mxu0 %v16465_v39  ;;  %1478 = vmatpush1.bf16.msra.mxu1 %v16468_v40 }
 0x210   :  { %1438 = vmatprep.subr.bf16.mxu0 %v16471_v41  ;;  %1479 = vmatprep.subr.bf16.mxu1 %v16474_v42 }
 0x213   :  { %1439 = vmatpush1.bf16.msra.mxu0 %v16477_v43  ;;  %1480 = vmatpush1.bf16.msra.mxu1 %v16480_v44 }
 0x214   :  { %1440 = vmatprep.subr.bf16.mxu0 %v16483_v45  ;;  %1481 = vmatprep.subr.bf16.mxu1 %v16486_v46 }
 0x217   :  { %1441 = vmatpush1.bf16.msra.mxu0 %v16489_v47  ;;  %1482 = vmatpush1.bf16.msra.mxu1 %v16492_v48 }
 0x218   :  { %1442 = vmatprep.subr.bf16.mxu0 %v16495_v49  ;;  %1483 = vmatprep.subr.bf16.mxu1 %v16498_v50 }
 0x21b   :  { %1443 = vmatpush1.bf16.msra.mxu0 %v16501_v51  ;;  %1484 = vmatpush1.bf16.msra.mxu1 %v16504_v52 }
 0x21c   :  { %1444 = vmatprep.subr.bf16.mxu0 %v16507_v53  ;;  %1485 = vmatprep.subr.bf16.mxu1 %v16510_v54 }
 0x21f   :  { %1445 = vmatpush1.bf16.msra.mxu0 %v16513_v55  ;;  %1486 = vmatpush1.bf16.msra.mxu1 %v16516_v56 }
 0x220   :  { %1446 = vmatprep.subr.bf16.mxu0 %v16519_v57  ;;  %1487 = vmatprep.subr.bf16.mxu1 %v16522_v58 }
 0x223   :  { %1447 = vmatpush1.bf16.msra.mxu0 %v16525_v59  ;;  %1488 = vmatpush1.bf16.msra.mxu1 %v16528_v60 }
 0x224   :  { %1448 = vmatprep.subr.bf16.mxu0 %v16531_v61  ;;  %1489 = vmatprep.subr.bf16.mxu1 %v16534_v62 }
 0x227   :  { %1449 = vmatpush1.bf16.msra.mxu0 %v16537_v0  ;;  %1490 = vmatpush1.bf16.msra.mxu1 %v16540_v1 }
 0x228   :  { %1450 = vmatprep.subr.bf16.mxu0 %v16543_v3  ;;  %1491 = vmatprep.subr.bf16.mxu1 %v16546_v4 }
 0x22b   :  { %1451 = vmatpush1.bf16.msra.mxu0 %v16549_v5  ;;  %1492 = vmatpush1.bf16.msra.mxu1 %v16552_v6 }
 0x22c   :  { %1452 = vmatprep.subr.bf16.mxu0 %v16555_v7  ;;  %1493 = vmatprep.subr.bf16.mxu1 %v16558_v8 }
 0x22f   :  { %1453 = vmatpush1.bf16.msra.mxu0 %v16561_v9  ;;  %1494 = vmatpush1.bf16.msra.mxu1 %v16564_v10 }
 0x230   :  { %1454 = vmatprep.subr.bf16.mxu0 %v16567_v15  ;;  %1495 = vmatprep.subr.bf16.mxu1 %v16570_v16 }
 0x233   :  { %1455 = vmatpush1.bf16.msra.mxu0 %v16573_v17  ;;  %1496 = vmatpush1.bf16.msra.mxu1 %v16576_v18  ;;  %v16591_v17 = vld [vmem:[#allocation13 + $0x164] ss:$16 sps:$4 sm:$0xff]   ;;  %v16594_v18 = vld [vmem:[#allocation13 + $0x16c] ss:$16 sps:$4 sm:$0xff]  }
 0x234   :  { %1456 = vmatprep.subr.bf16.mxu0 %v16579_v19  ;;  %1497 = vmatprep.subr.bf16.mxu1 %v16582_v20  ;;  %18278 = vst [vmem:[#allocation48_spill] sm:$0xff] %v16591_v17  ;;  %18279 = vst [vmem:[#allocation49_spill] sm:$0xff] %v16594_v18  ;;  %v16597_v19 = vld [vmem:[#allocation13 + $0x160] ss:$16 sps:$4 sm:$0xff]   ;;  %v16600_v20 = vld [vmem:[#allocation13 + $0x168] ss:$16 sps:$4 sm:$0xff]  }
 0x235   :  { %18280 = vst [vmem:[#allocation50_spill] sm:$0xff] %v16597_v19  ;;  %18281 = vst [vmem:[#allocation51_spill] sm:$0xff] %v16600_v20 }
 0x237   :  { %1457 = vmatpush1.bf16.msra.mxu0 %v16585_v21  ;;  %1498 = vmatpush1.bf16.msra.mxu1 %v16588_v2  ;;  %v16603_v21 = vld [vmem:[#allocation13 + $0x184] ss:$16 sps:$4 sm:$0xff]   ;;  %v16606_v2 = vld [vmem:[#allocation13 + $0x18c] ss:$16 sps:$4 sm:$0xff]  }
 0x238   :  { %1458 = vmatprep.subr.bf16.mxu0 %v16591_v17  ;;  %1499 = vmatprep.subr.bf16.mxu1 %v16594_v18  ;;  %18282 = vst [vmem:[#allocation52_spill] sm:$0xff] %v16603_v21  ;;  %18283 = vst [vmem:[#allocation53_spill] sm:$0xff] %v16606_v2  ;;  %v16609_v17 = vld [vmem:[#allocation13 + $0x180] ss:$16 sps:$4 sm:$0xff]   ;;  %v16612_v18 = vld [vmem:[#allocation13 + $0x188] ss:$16 sps:$4 sm:$0xff]  }
 0x239   :  { %18284 = vst [vmem:[#allocation54_spill] sm:$0xff] %v16609_v17  ;;  %18285 = vst [vmem:[#allocation55_spill] sm:$0xff] %v16612_v18 }
 0x23b   :  { %1459 = vmatpush1.bf16.msra.mxu0 %v16597_v19  ;;  %1500 = vmatpush1.bf16.msra.mxu1 %v16600_v20  ;;  %v16615_v19 = vld [vmem:[#allocation13 + $0x1a4] ss:$16 sps:$4 sm:$0xff]   ;;  %v16618_v20 = vld [vmem:[#allocation13 + $0x1ac] ss:$16 sps:$4 sm:$0xff]  }
 0x23c   :  { %1460 = vmatprep.subr.bf16.mxu0 %v16603_v21  ;;  %1501 = vmatprep.subr.bf16.mxu1 %v16606_v2  ;;  %18286 = vst [vmem:[#allocation56_spill] sm:$0xff] %v16615_v19  ;;  %18287 = vst [vmem:[#allocation57_spill] sm:$0xff] %v16618_v20  ;;  %v16621_v21 = vld [vmem:[#allocation13 + $0x1a0] ss:$16 sps:$4 sm:$0xff]   ;;  %v16624_v2 = vld [vmem:[#allocation13 + $0x1a8] ss:$16 sps:$4 sm:$0xff]  }
 0x23d   :  { %18288 = vst [vmem:[#allocation58_spill] sm:$0xff] %v16621_v21  ;;  %18289 = vst [vmem:[#allocation59_spill] sm:$0xff] %v16624_v2 }
 0x23f   :  { %1461 = vmatpush1.bf16.msra.mxu0 %v16609_v17  ;;  %1502 = vmatpush1.bf16.msra.mxu1 %v16612_v18  ;;  %v16627_v17 = vld [vmem:[#allocation13 + $0x1c4] ss:$16 sps:$4 sm:$0xff]   ;;  %v16630_v18 = vld [vmem:[#allocation13 + $0x1cc] ss:$16 sps:$4 sm:$0xff]  }
 0x240   :  { %1462 = vmatprep.subr.bf16.mxu0 %v16615_v19  ;;  %1503 = vmatprep.subr.bf16.mxu1 %v16618_v20  ;;  %18290 = vst [vmem:[#allocation60_spill] sm:$0xff] %v16627_v17  ;;  %18291 = vst [vmem:[#allocation61_spill] sm:$0xff] %v16630_v18  ;;  %v16633_v19 = vld [vmem:[#allocation13 + $0x1c0] ss:$16 sps:$4 sm:$0xff]   ;;  %v16636_v20 = vld [vmem:[#allocation13 + $0x1c8] ss:$16 sps:$4 sm:$0xff]  }
 0x241   :  { %18292 = vst [vmem:[#allocation62_spill] sm:$0xff] %v16633_v19  ;;  %18293 = vst [vmem:[#allocation63_spill] sm:$0xff] %v16636_v20 }
 0x243   :  { %1463 = vmatpush1.bf16.msra.mxu0 %v16621_v21  ;;  %1504 = vmatpush1.bf16.msra.mxu1 %v16624_v2  ;;  %v16639_v21 = vld [vmem:[#allocation13 + $0x1e4] ss:$16 sps:$4 sm:$0xff]   ;;  %v16642_v2 = vld [vmem:[#allocation13 + $0x1ec] ss:$16 sps:$4 sm:$0xff]  }
 0x244   :  { %1464 = vmatprep.subr.bf16.mxu0 %v16627_v17  ;;  %1505 = vmatprep.subr.bf16.mxu1 %v16630_v18  ;;  %18294 = vst [vmem:[#allocation64_spill] sm:$0xff] %v16639_v21  ;;  %18295 = vst [vmem:[#allocation65_spill] sm:$0xff] %v16642_v2  ;;  %v16645_v17 = vld [vmem:[#allocation13 + $0x1e0] ss:$16 sps:$4 sm:$0xff]   ;;  %v16648_v18 = vld [vmem:[#allocation13 + $0x1e8] ss:$16 sps:$4 sm:$0xff]  }
 0x245   :  { %18296 = vst [vmem:[#allocation66_spill] sm:$0xff] %v16645_v17  ;;  %18297 = vst [vmem:[#allocation67_spill] sm:$0xff] %v16648_v18 }
 0x247   :  { %1465 = vmatpush1.bf16.msra.mxu0 %v16633_v19  ;;  %1506 = vmatpush1.bf16.msra.mxu1 %v16636_v20  ;;  %v16651_v19 = vld [vmem:[#allocation11 + $0x4] ss:$16 sps:$4 sm:$0xff]   ;;  %v16654_v20 = vld [vmem:[#allocation11 + $0xc] ss:$16 sps:$4 sm:$0xff]  }
 0x248   :  { %1466 = vmatprep.subr.bf16.mxu0 %v16639_v21  ;;  %1507 = vmatprep.subr.bf16.mxu1 %v16642_v2  ;;  %18298 = vst [vmem:[#allocation68_spill] sm:$0xff] %v16651_v19  ;;  %18299 = vst [vmem:[#allocation69_spill] sm:$0xff] %v16654_v20  ;;  %v858_v2 = vld [vmem:[%s18033_s7] sm:$0xf]  ;;  %s13191_s7 = sld [smem:[#allocation3 + $0x6]] }
 0x249   :  { %v16661_v21 = vrot.slane %v858_v2, %v16388_v11 }
 0x24b   :  { %1467 = vmatpush1.bf16.msra.mxu0 %v16645_v17  ;;  %1508 = vmatpush1.bf16.msra.mxu1 %v16648_v18  ;;  %18300 = vst [vmem:[#allocation70_spill] sm:$0xff] %v16661_v21 }
 0x24c   :  { %1538 = vmatprep.subr.bf16.mxu0 %v16651_v19  ;;  %1579 = vmatprep.subr.bf16.mxu1 %v16654_v20  ;;  %v16665_v20 = vrot.slane %v858_v2, %v16392_v13 }
 0x24e   :  { %18301 = vst [vmem:[#allocation71_spill] sm:$0xff] %v16665_v20  ;;  %p10893_p3 = scmp.gt.s32.totalorder %s13191_s7, 0 }
 0x250   :  { %s10895_s18 = scalar_select %p10893_p3, 1, 0 }
 0x2c1   :  { %v1234_v17 = vpop.f32.mrb[8].mxu0  ;;  %v1275_v16 = vpop.f32.mrb[8].mxu1 }
 0x2c2   :  { %v1235_v15 = vadd.f32 %v1234_v17, %v16661_v21  ;;  %v1236_v18 = vpop.f32.mrb[9].mxu0  ;;  %v1277_v10 = vpop.f32.mrb[9].mxu1  ;;  %v16669_v17 = vrot.slane %v858_v2, %v16394_v14 }
 0x2c3   :  { %v1238_v9 = vpop.f32.mrb[10].mxu0  ;;  %v1279_v8 = vpop.f32.mrb[10].mxu1  ;;  %v1237_v5 = vadd.f32 %v1236_v18, %v16665_v20 }
 0x2c4   :  { %v12176_v19 = vmul.f32 -1.442695, %v1235_v15  ;;  %v1239_v7 = vpop.f32.mrb[11].mxu0  ;;  %v1280_v6 = vpop.f32.mrb[11].mxu1  ;;  %18302 = vst [vmem:[#allocation72_spill] sm:$0xff] %v16669_v17  ;;  %v16672_v9 = vrot.slane %v858_v2, %v16390_v12 }
 0x2c5   :  { %v12177_v4 = vmul.f32 -1.442695, %v1237_v5  ;;  %v1278_v6 = vadd.f32 %v1277_v10, %v16669_v17 }
 0x2c6   :  { %15346 = vpow2.f32 %v12176_v19  ;;  %18303 = vst [vmem:[#allocation73_spill] sm:$0xff] %v16672_v9  ;;  %v1276_v15 = vadd.f32 %v1275_v16, %v16672_v9 }
 0x2c7   :  { %15348 = vpow2.f32 %v12177_v4 }
 0x2d0   :  { %v15347_v11 = vpop.eup %15346 }
 0x2d1   :  { %v1288_v3 = vadd.f32 1.0, %v15347_v11  ;;  %v15349_v8 = vpop.eup %15348 }
 0x2d2   :  { %v1289_v13 = vadd.f32 1.0, %v15349_v8 }
 0x2d3   :  { %15350 = vrcp.f32 %v1288_v3 }
 0x2dd   :  { %v15351_v7 = vpop.eup %15350 }
 0x2de   :  { %v1294_v19 = vmul.f32 %v15351_v7, %v1278_v6  ;;  %v1301_v6 = vld [vmem:[#allocation2 + $0x1] ss:$8 sm:$0xf] }
 0x2e0   :  { %v1295_v18 = vadd.f32 %v1294_v19, %v1276_v15 }
 0x2e1   :  { %v1336_v5 = vpop.f32.mrb[12].mxu0  ;;  %v1377_v20 = vpop.f32.mrb[12].mxu1 }
 0x2e2   :  { %15352 = vtanh.f32 %v1295_v18  ;;  %v1338_v11 = vpop.f32.mrb[13].mxu0  ;;  %v1379_v3 = vpop.f32.mrb[13].mxu1 }
 0x2e3   :  { %v1388_v4 = vcombine.low %v1336_v5, %v1338_v11  ;;  %v1389_v14 = vcombine.low %v1377_v20, %v1379_v3  ;;  %v1340_v21 = vpop.f32.mrb[14].mxu0  ;;  %v1381_v1 = vpop.f32.mrb[14].mxu1  ;;  %15354 = vrcp.f32 %v1289_v13 }
 0x2e4   :  { %v1341_v2 = vpop.f32.mrb[15].mxu0  ;;  %v1382_v12 = vpop.f32.mrb[15].mxu1 }
 0x2e5   :  { %v1396_v10 = vrot.slane %v1388_v4, %v16400_v36  ;;  %v1403_v17 = vrot.slane %v1389_v14, %v16400_v36 }
 0x2e7   :  { %v1404_v16 = vcombine.low %v1396_v10, %v1403_v17 }
 0x2e9   :  { %v1411_v8 = vrot.slane %v1404_v16, %v16400_v36 }
 0x2eb   :  { %v1413_v7 = vadd.f32 %v1411_v8, %v1301_v6  ;;  %v16688_v6 = vld [vmem:[#allocation11] ss:$16 sps:$4 sm:$0xff]  }
 0x2ec   :  { %v15353_v15 = vpop.eup %15352 }
 0x2ed   :  { %v12178_v19 = vmul.f32 -1.442695, %v1413_v7  ;;  %v1297_v18 = vsub.f32 0.0, %v15353_v15  ;;  %v15355_v9 = vpop.eup %15354  ;;  %v1421_v1 = vrot.slane %v1413_v7, 3  ;;  %v1424_v11 = vrot.slane %v1413_v7, 2 }
 0x2ee   :  { %v16694_v7 = vld [vmem:[#allocation11 + $0x24] ss:$16 sps:$4 sm:$0xff]  }
 0x2ef   :  { %15356 = vpow2.f32 %v12178_v19  ;;  %v1298_v20 = vmul.f32 %v15355_v9, %v1297_v18  ;;  %v18304_v19 = vmov 0   ;;  %v16702_v18 = vld [vmem:[#allocation11 + $0x20] ss:$16 sps:$4 sm:$0xff]  }
 0x2f1   :  { %v16679_v21 = vadd.f32 %v15353_v15, %v1298_v20  ;;  %v16691_v15 = vld [vmem:[#allocation11 + $0x8] ss:$16 sps:$4 sm:$0xff]  }
 0x2f2   :  { %v16705_v20 = vld [vmem:[#allocation11 + $0x28] ss:$16 sps:$4 sm:$0xff]  }
 0x2f3   :  { %v1435_v12 = vpack.c.bf16 %v16679_v21, %v16679_v21 }
 0x2f5   :  { %1468 = vmatprep.mubr.bf16.mxu0 %v1435_v12  ;;  %1509 = vmatprep.mubr.bf16.mxu1 %v1435_v12  ;;  %v16708_v12 = vld [vmem:[#allocation11 + $0x44] ss:$16 sps:$4 sm:$0xff]  }
 0x2f9   :  { %v15357_v13 = vpop.eup %15356 }
 0x2fa   :  { %v1417_v14 = vadd.f32 1.0, %v15357_v13  ;;  %v16711_v13 = vld [vmem:[#allocation11 + $0x4c] ss:$16 sps:$4 sm:$0xff]  }
 0x2fc   :  { %15358 = vrcp.f32 %v1417_v14  ;;  %v16714_v14 = vld [vmem:[#allocation11 + $0x40] ss:$16 sps:$4 sm:$0xff]  }
 0x306   :  { %v15359_v17 = vpop.eup %15358 }
 0x307   :  { %v1423_v5 = vmul.f32 %v15359_v17, %v1421_v1  ;;  %v1430_v9 = vrot.slane %v15359_v17, 1  ;;  %v16717_v1 = vld [vmem:[#allocation11 + $0x48] ss:$16 sps:$4 sm:$0xff]   ;;  %v16720_v17 = vld [vmem:[#allocation11 + $0x64] ss:$16 sps:$4 sm:$0xff]  }
 0x309   :  { %v1426_v3 = vadd.f32 %v1424_v11, %v1423_v5  ;;  %v16723_v5 = vld [vmem:[#allocation11 + $0x6c] ss:$16 sps:$4 sm:$0xff]   ;;  %v16726_v11 = vld [vmem:[#allocation11 + $0x60] ss:$16 sps:$4 sm:$0xff]  }
 0x30b   :  { %15360 = vtanh.f32 %v1426_v3  ;;  %v16729_v3 = vld [vmem:[#allocation11 + $0x68] ss:$16 sps:$4 sm:$0xff]  }
 0x315   :  { %v15361_v4 = vpop.eup %15360 }
 0x316   :  { %v1428_v2 = vsub.f32 %v16405_v63, %v15361_v4  ;;  %v16697_v63 = vld [vmem:[#allocation11 + $0x2c] ss:$16 sps:$4 sm:$0xff]  }
 0x318   :  { %v1432_v10 = vmul.f32 %v1430_v9, %v1428_v2  ;;  %v16735_v2 = vld [vmem:[#allocation11 + $0x8c] ss:$16 sps:$4 sm:$0xff]   ;;  %v18344_v9 = vld [vmem:[#allocation70_spill] sm:$0xff] }
 0x31a   :  { %v16684_v16 = vadd.f32 %v15361_v4, %v1432_v10  ;;  %v16732_v4 = vld [vmem:[#allocation11 + $0x84] ss:$16 sps:$4 sm:$0xff]  }
 0x31c   :  { %v1434_v8 = vpack.c.bf16 %v16684_v16, %v16684_v16 }
 0x31e   :  { %1469 = vmatmul.mubr.bf16.vlgmr.msra.gmra.mrb[16].mxu0 %v1434_v8  ;;  %1510 = vmatmul.mubr.bf16.vlgmr.msra.gmra.mrb[16].mxu1 %v1434_v8 }
 0x31f   :  { %1539 = vmatpush1.bf16.msra.mxu0 %v16688_v6  ;;  %1580 = vmatpush1.bf16.msra.mxu1 %v16691_v15 }
 0x320   :  { %1540 = vmatprep.subr.bf16.mxu0 %v16694_v7  ;;  %1581 = vmatprep.subr.bf16.mxu1 %v16697_v63 }
 0x321   :  { %1570 = vmatprep.mubr.bf16.mxu0 %v18304_v19  ;;  %1611 = vmatprep.mubr.bf16.mxu1 %v18304_v19 }
 0x323   :  { %1541 = vmatpush1.bf16.msra.mxu0 %v16702_v18  ;;  %1582 = vmatpush1.bf16.msra.mxu1 %v16705_v20 }
 0x324   :  { %1542 = vmatprep.subr.bf16.mxu0 %v16708_v12  ;;  %1583 = vmatprep.subr.bf16.mxu1 %v16711_v13 }
 0x327   :  { %1543 = vmatpush1.bf16.msra.mxu0 %v16714_v14  ;;  %1584 = vmatpush1.bf16.msra.mxu1 %v16717_v1 }
 0x328   :  { %1544 = vmatprep.subr.bf16.mxu0 %v16720_v17  ;;  %1585 = vmatprep.subr.bf16.mxu1 %v16723_v5 }
 0x32b   :  { %1545 = vmatpush1.bf16.msra.mxu0 %v16726_v11  ;;  %1586 = vmatpush1.bf16.msra.mxu1 %v16729_v3 }
 0x32c   :  { %1546 = vmatprep.subr.bf16.mxu0 %v16732_v4  ;;  %1587 = vmatprep.subr.bf16.mxu1 %v16735_v2 }
 0x32f   :  { %1547 = vmatpush1.bf16.msra.mxu0 %v16415_v22  ;;  %1588 = vmatpush1.bf16.msra.mxu1 %v16418_v23  ;;  %v18305_v22 = vld [vmem:[#allocation31_spill] sm:$0xff]  ;;  %v18306_v23 = vld [vmem:[#allocation32_spill] sm:$0xff] }
 0x330   :  { %1548 = vmatprep.subr.bf16.mxu0 %v16421_v24  ;;  %1589 = vmatprep.subr.bf16.mxu1 %v16424_v25  ;;  %v18307_v24 = vld [vmem:[#allocation33_spill] sm:$0xff]  ;;  %v18308_v25 = vld [vmem:[#allocation34_spill] sm:$0xff] }
 0x333   :  { %1549 = vmatpush1.bf16.msra.mxu0 %v16427_v26  ;;  %1590 = vmatpush1.bf16.msra.mxu1 %v16430_v27  ;;  %v18309_v26 = vld [vmem:[#allocation35_spill] sm:$0xff]  ;;  %v18310_v27 = vld [vmem:[#allocation36_spill] sm:$0xff] }
 0x334   :  { %1550 = vmatprep.subr.bf16.mxu0 %v16433_v28  ;;  %1591 = vmatprep.subr.bf16.mxu1 %v16436_v29  ;;  %v18311_v28 = vld [vmem:[#allocation37_spill] sm:$0xff]  ;;  %v18312_v29 = vld [vmem:[#allocation38_spill] sm:$0xff] }
 0x337   :  { %1551 = vmatpush1.bf16.msra.mxu0 %v16439_v30  ;;  %1592 = vmatpush1.bf16.msra.mxu1 %v16442_v31  ;;  %v18313_v30 = vld [vmem:[#allocation39_spill] sm:$0xff]  ;;  %v18314_v31 = vld [vmem:[#allocation40_spill] sm:$0xff] }
 0x338   :  { %1552 = vmatprep.subr.bf16.mxu0 %v16445_v32  ;;  %1593 = vmatprep.subr.bf16.mxu1 %v16448_v33  ;;  %v18315_v32 = vld [vmem:[#allocation41_spill] sm:$0xff]  ;;  %v18316_v33 = vld [vmem:[#allocation42_spill] sm:$0xff] }
 0x33b   :  { %1553 = vmatpush1.bf16.msra.mxu0 %v16451_v34  ;;  %1594 = vmatpush1.bf16.msra.mxu1 %v16454_v35  ;;  %v18317_v34 = vld [vmem:[#allocation43_spill] sm:$0xff]  ;;  %v18318_v35 = vld [vmem:[#allocation44_spill] sm:$0xff] }
 0x33c   :  { %1672 = vmatprep.subr.bf16.mxu0 %v16457_v37  ;;  %1713 = vmatprep.subr.bf16.mxu1 %v16460_v38  ;;  %v18319_v37 = vld [vmem:[#allocation45_spill] sm:$0xff]  ;;  %v18320_v38 = vld [vmem:[#allocation46_spill] sm:$0xff] }
 0x33e   :  { %1571 = vmatmul.mubr.bf16.vlgmr.msra.gmra.mrb[20].mxu0 %v1434_v8  ;;  %1612 = vmatmul.mubr.bf16.vlgmr.msra.gmra.mrb[20].mxu1 %v1434_v8 }
 0x33f   :  { %1673 = vmatpush1.bf16.msra.mxu0 %v16465_v39  ;;  %1714 = vmatpush1.bf16.msra.mxu1 %v16468_v40  ;;  %v18321_v39 = vld [vmem:[#allocation47_spill] sm:$0xff]  ;;  %v18322_v40 = vld [vmem:[#allocation48_spill] sm:$0xff] }
 0x340   :  { %1674 = vmatprep.subr.bf16.mxu0 %v16471_v41  ;;  %1715 = vmatprep.subr.bf16.mxu1 %v16474_v42  ;;  %v18323_v41 = vld [vmem:[#allocation49_spill] sm:$0xff]  ;;  %v18324_v42 = vld [vmem:[#allocation50_spill] sm:$0xff] }
 0x343   :  { %1675 = vmatpush1.bf16.msra.mxu0 %v16477_v43  ;;  %1716 = vmatpush1.bf16.msra.mxu1 %v16480_v44  ;;  %v18325_v43 = vld [vmem:[#allocation51_spill] sm:$0xff]  ;;  %v18326_v44 = vld [vmem:[#allocation52_spill] sm:$0xff] }
 0x344   :  { %1676 = vmatprep.subr.bf16.mxu0 %v16483_v45  ;;  %1717 = vmatprep.subr.bf16.mxu1 %v16486_v46  ;;  %v18327_v45 = vld [vmem:[#allocation53_spill] sm:$0xff]  ;;  %v18328_v46 = vld [vmem:[#allocation54_spill] sm:$0xff] }
 0x347   :  { %1677 = vmatpush1.bf16.msra.mxu0 %v16489_v47  ;;  %1718 = vmatpush1.bf16.msra.mxu1 %v16492_v48  ;;  %v18329_v47 = vld [vmem:[#allocation55_spill] sm:$0xff]  ;;  %v18330_v48 = vld [vmem:[#allocation56_spill] sm:$0xff] }
 0x348   :  { %1678 = vmatprep.subr.bf16.mxu0 %v16495_v49  ;;  %1719 = vmatprep.subr.bf16.mxu1 %v16498_v50  ;;  %v18331_v49 = vld [vmem:[#allocation57_spill] sm:$0xff]  ;;  %v18332_v50 = vld [vmem:[#allocation58_spill] sm:$0xff] }
 0x34b   :  { %1679 = vmatpush1.bf16.msra.mxu0 %v16501_v51  ;;  %1720 = vmatpush1.bf16.msra.mxu1 %v16504_v52  ;;  %v18333_v51 = vld [vmem:[#allocation59_spill] sm:$0xff]  ;;  %v18334_v52 = vld [vmem:[#allocation60_spill] sm:$0xff] }
 0x34c   :  { %1680 = vmatprep.subr.bf16.mxu0 %v16507_v53  ;;  %1721 = vmatprep.subr.bf16.mxu1 %v16510_v54  ;;  %v18335_v53 = vld [vmem:[#allocation61_spill] sm:$0xff]  ;;  %v18336_v54 = vld [vmem:[#allocation62_spill] sm:$0xff] }
 0x34f   :  { %1681 = vmatpush1.bf16.msra.mxu0 %v16513_v55  ;;  %1722 = vmatpush1.bf16.msra.mxu1 %v16516_v56  ;;  %v18337_v55 = vld [vmem:[#allocation63_spill] sm:$0xff]  ;;  %v18338_v56 = vld [vmem:[#allocation64_spill] sm:$0xff] }
 0x350   :  { %1682 = vmatprep.subr.bf16.mxu0 %v16519_v57  ;;  %1723 = vmatprep.subr.bf16.mxu1 %v16522_v58  ;;  %v18339_v57 = vld [vmem:[#allocation65_spill] sm:$0xff]  ;;  %v18340_v58 = vld [vmem:[#allocation66_spill] sm:$0xff] }
 0x353   :  { %1683 = vmatpush1.bf16.msra.mxu0 %v16525_v59  ;;  %1724 = vmatpush1.bf16.msra.mxu1 %v16528_v60  ;;  %v18341_v59 = vld [vmem:[#allocation67_spill] sm:$0xff]  ;;  %v18342_v60 = vld [vmem:[#allocation68_spill] sm:$0xff] }
 0x354   :  { %1684 = vmatprep.subr.bf16.mxu0 %v16531_v61  ;;  %1725 = vmatprep.subr.bf16.mxu1 %v16534_v62  ;;  %v18343_v61 = vld [vmem:[#allocation69_spill] sm:$0xff] }
 0x357   :  { %1685 = vmatpush1.bf16.msra.mxu0 %v16537_v0  ;;  %1726 = vmatpush1.bf16.msra.mxu1 %v18305_v22 }
 0x358   :  { %1686 = vmatprep.subr.bf16.mxu0 %v18306_v23  ;;  %1727 = vmatprep.subr.bf16.mxu1 %v18307_v24 }
 0x35b   :  { %1687 = vmatpush1.bf16.msra.mxu0 %v18308_v25  ;;  %1728 = vmatpush1.bf16.msra.mxu1 %v18309_v26 }
 0x35c   :  { %1688 = vmatprep.subr.bf16.mxu0 %v18310_v27  ;;  %1729 = vmatprep.subr.bf16.mxu1 %v18311_v28  ;;  %v18345_v28 = vld [vmem:[#allocation71_spill] sm:$0xff] }
 0x35f   :  { %1689 = vmatpush1.bf16.msra.mxu0 %v18312_v29  ;;  %1730 = vmatpush1.bf16.msra.mxu1 %v18313_v30 }
 0x360   :  { %1690 = vmatprep.subr.bf16.mxu0 %v18314_v31  ;;  %1731 = vmatprep.subr.bf16.mxu1 %v18315_v32 }
 0x363   :  { %1691 = vmatpush1.bf16.msra.mxu0 %v18316_v33  ;;  %1732 = vmatpush1.bf16.msra.mxu1 %v18317_v34  ;;  %v18346_v34 = vld [vmem:[#allocation72_spill] sm:$0xff] }
 0x364   :  { %1692 = vmatprep.subr.bf16.mxu0 %v18318_v35  ;;  %1733 = vmatprep.subr.bf16.mxu1 %v18319_v37 }
 0x367   :  { %1693 = vmatpush1.bf16.msra.mxu0 %v18320_v38  ;;  %1734 = vmatpush1.bf16.msra.mxu1 %v18321_v39 }
 0x368   :  { %1694 = vmatprep.subr.bf16.mxu0 %v18322_v40  ;;  %1735 = vmatprep.subr.bf16.mxu1 %v18323_v41 }
 0x36b   :  { %1695 = vmatpush1.bf16.msra.mxu0 %v18324_v42  ;;  %1736 = vmatpush1.bf16.msra.mxu1 %v18325_v43 }
 0x36c   :  { %1696 = vmatprep.subr.bf16.mxu0 %v18326_v44  ;;  %1737 = vmatprep.subr.bf16.mxu1 %v18327_v45 }
 0x36f   :  { %1697 = vmatpush1.bf16.msra.mxu0 %v18328_v46  ;;  %1738 = vmatpush1.bf16.msra.mxu1 %v18329_v47 }
 0x370   :  { %1698 = vmatprep.subr.bf16.mxu0 %v18330_v48  ;;  %1739 = vmatprep.subr.bf16.mxu1 %v18331_v49 }
 0x373   :  { %1699 = vmatpush1.bf16.msra.mxu0 %v18332_v50  ;;  %1740 = vmatpush1.bf16.msra.mxu1 %v18333_v51 }
 0x374   :  { %1700 = vmatprep.subr.bf16.mxu0 %v18334_v52  ;;  %1741 = vmatprep.subr.bf16.mxu1 %v18335_v53 }
 0x377   :  { %1701 = vmatpush1.bf16.msra.mxu0 %v18336_v54  ;;  %1742 = vmatpush1.bf16.msra.mxu1 %v18337_v55 }
 0x378   :  { %1702 = vmatprep.subr.bf16.mxu0 %v18338_v56  ;;  %1743 = vmatprep.subr.bf16.mxu1 %v18339_v57 }
 0x37b   :  { %1703 = vmatpush1.bf16.msra.mxu0 %v18340_v58  ;;  %1744 = vmatpush1.bf16.msra.mxu1 %v18341_v59 }
 0x37c   :  { %1774 = vmatprep.subr.bf16.mxu0 %v18342_v60  ;;  %1815 = vmatprep.subr.bf16.mxu1 %v18343_v61 }
 0x3f1   :  { %v1470_v62 = vpop.f32.mrb[16].mxu0  ;;  %v1511_v0 = vpop.f32.mrb[16].mxu1 }
 0x3f2   :  { %v1471_v10 = vadd.f32 %v1470_v62, %v18344_v9  ;;  %v1472_v8 = vpop.f32.mrb[17].mxu0  ;;  %v1513_v22 = vpop.f32.mrb[17].mxu1  ;;  %v18347_v62 = vld [vmem:[#allocation73_spill] sm:$0xff] }
 0x3f3   :  { %v1474_v23 = vpop.f32.mrb[18].mxu0  ;;  %v1515_v24 = vpop.f32.mrb[18].mxu1  ;;  %v1473_v29 = vadd.f32 %v1472_v8, %v18345_v28  ;;  %v1514_v35 = vadd.f32 %v1513_v22, %v18346_v34  ;;  %v1512_v9 = vadd.f32 %v1511_v0, %v18347_v62 }
 0x3f4   :  { %v12179_v25 = vmul.f32 -1.442695, %v1471_v10  ;;  %v1475_v26 = vpop.f32.mrb[19].mxu0  ;;  %v1516_v27 = vpop.f32.mrb[19].mxu1 }
 0x3f5   :  { %v12180_v30 = vmul.f32 -1.442695, %v1473_v29 }
 0x3f6   :  { %15362 = vpow2.f32 %v12179_v25 }
 0x3f7   :  { %15364 = vpow2.f32 %v12180_v30 }
 0x400   :  { %v15363_v31 = vpop.eup %15362 }
 0x401   :  { %v1524_v32 = vadd.f32 1.0, %v15363_v31  ;;  %v15365_v33 = vpop.eup %15364 }
 0x402   :  { %v1525_v23 = vadd.f32 1.0, %v15365_v33 }
 0x403   :  { %15366 = vrcp.f32 %v1524_v32 }
 0x40d   :  { %v15367_v37 = vpop.eup %15366 }
 0x40e   :  { %v1530_v61 = vmul.f32 %v15367_v37, %v1514_v35 }
 0x410   :  { %v1531_v24 = vadd.f32 %v1530_v61, %v1512_v9  ;;  %v1537_v61 = vld [vmem:[#allocation2 + $0x2] ss:$8 sm:$0xf] }
 0x411   :  { %v1572_v10 = vpop.f32.mrb[20].mxu0  ;;  %v1613_v26 = vpop.f32.mrb[20].mxu1 }
 0x412   :  { %15368 = vtanh.f32 %v1531_v24  ;;  %v1574_v25 = vpop.f32.mrb[21].mxu0  ;;  %v1615_v27 = vpop.f32.mrb[21].mxu1 }
 0x413   :  { %v1624_v8 = vcombine.low %v1572_v10, %v1574_v25  ;;  %v1625_v29 = vcombine.low %v1613_v26, %v1615_v27  ;;  %v1576_v28 = vpop.f32.mrb[22].mxu0  ;;  %v1617_v31 = vpop.f32.mrb[22].mxu1  ;;  %15370 = vrcp.f32 %v1525_v23 }
 0x414   :  { %v1577_v30 = vpop.f32.mrb[23].mxu0  ;;  %v1618_v32 = vpop.f32.mrb[23].mxu1 }
 0x415   :  { %v1632_v22 = vrot.slane %v1624_v8, %v16400_v36  ;;  %v1639_v34 = vrot.slane %v1625_v29, %v16400_v36 }
 0x417   :  { %v1640_v0 = vcombine.low %v1632_v22, %v1639_v34 }
 0x419   :  { %v1647_v33 = vrot.slane %v1640_v0, %v16400_v36 }
 0x41b   :  { %v1649_v9 = vadd.f32 %v1647_v33, %v1537_v61 }
 0x41c   :  { %v15369_v35 = vpop.eup %15368 }
 0x41d   :  { %v12181_v37 = vmul.f32 -1.442695, %v1649_v9  ;;  %v1533_v24 = vsub.f32 %v16679_v21, %v15369_v35  ;;  %v15371_v10 = vpop.eup %15370  ;;  %v1657_v27 = vrot.slane %v1649_v9, 3  ;;  %v1660_v31 = vrot.slane %v1649_v9, 2  ;;  %v16856_v9 = vld [vmem:[#allocation11 + $0x88] ss:$16 sps:$4 sm:$0xff]  }
 0x41f   :  { %15372 = vpow2.f32 %v12181_v37  ;;  %v1534_v28 = vmul.f32 %v15371_v10, %v1533_v24  ;;  %v16862_v37 = vld [vmem:[#allocation11 + $0xac] ss:$16 sps:$4 sm:$0xff]   ;;  %v16865_v24 = vld [vmem:[#allocation11 + $0xa0] ss:$16 sps:$4 sm:$0xff]   ;;  %v16868_v10 = vld [vmem:[#allocation11 + $0xa8] ss:$16 sps:$4 sm:$0xff]  }
 0x421   :  { %v16826_v26 = vadd.f32 %v15369_v35, %v1534_v28  ;;  %v16859_v35 = vld [vmem:[#allocation11 + $0xa4] ss:$16 sps:$4 sm:$0xff]  }
 0x422   :  { %v16871_v28 = vld [vmem:[#allocation11 + $0xc4] ss:$16 sps:$4 sm:$0xff]  }
 0x423   :  { %v1671_v23 = vpack.c.bf16 %v16826_v26, %v16826_v26 }
 0x425   :  { %1704 = vmatprep.mubr.bf16.mxu0 %v1671_v23  ;;  %1745 = vmatprep.mubr.bf16.mxu1 %v1671_v23  ;;  %v16874_v23 = vld [vmem:[#allocation11 + $0xcc] ss:$16 sps:$4 sm:$0xff]  }
 0x429   :  { %v15373_v25 = vpop.eup %15372 }
 0x42a   :  { %v1653_v34 = vadd.f32 1.0, %v15373_v25  ;;  %v16877_v25 = vld [vmem:[#allocation11 + $0xc0] ss:$16 sps:$4 sm:$0xff]  }
 0x42c   :  { %15374 = vrcp.f32 %v1653_v34  ;;  %v16880_v34 = vld [vmem:[#allocation11 + $0xc8] ss:$16 sps:$4 sm:$0xff]  }
 0x436   :  { %v15375_v8 = vpop.eup %15374 }
 0x437   :  { %v1659_v29 = vmul.f32 %v15375_v8, %v1657_v27  ;;  %v1666_v22 = vrot.slane %v15375_v8, 1  ;;  %v16883_v27 = vld [vmem:[#allocation11 + $0xe4] ss:$16 sps:$4 sm:$0xff]   ;;  %v16886_v8 = vld [vmem:[#allocation11 + $0xec] ss:$16 sps:$4 sm:$0xff]  }
 0x439   :  { %v1662_v30 = vadd.f32 %v1660_v31, %v1659_v29  ;;  %v16889_v29 = vld [vmem:[#allocation11 + $0xe0] ss:$16 sps:$4 sm:$0xff]   ;;  %v16892_v31 = vld [vmem:[#allocation11 + $0xe8] ss:$16 sps:$4 sm:$0xff]  }
 0x43a   :  { %18348 = vst [vmem:[#allocation31_spill] sm:$0xff] %v16892_v31 }
 0x43b   :  { %15376 = vtanh.f32 %v1662_v30  ;;  %v16895_v30 = vld [vmem:[#allocation13 + $0x4] ss:$16 sps:$4 sm:$0xff]  }
 0x43c   :  { %18349 = vst [vmem:[#allocation32_spill] sm:$0xff] %v16895_v30 }
 0x445   :  { %v15377_v21 = vpop.eup %15376 }
 0x446   :  { %v1664_v32 = vsub.f32 %v16684_v16, %v15377_v21  ;;  %v16853_v16 = vld [vmem:[#allocation11 + $0x80] ss:$16 sps:$4 sm:$0xff]  }
 0x448   :  { %v1668_v0 = vmul.f32 %v1666_v22, %v1664_v32  ;;  %v16901_v32 = vld [vmem:[#allocation13] ss:$16 sps:$4 sm:$0xff]   ;;  %v16904_v22 = vld [vmem:[#allocation13 + $0x8] ss:$16 sps:$4 sm:$0xff]  }
 0x449   :  { %18350 = vst [vmem:[#allocation33_spill] sm:$0xff] %v16901_v32  ;;  %18351 = vst [vmem:[#allocation34_spill] sm:$0xff] %v16904_v22 }
 0x44a   :  { %v16831_v33 = vadd.f32 %v15377_v21, %v1668_v0  ;;  %v16898_v21 = vld [vmem:[#allocation13 + $0xc] ss:$16 sps:$4 sm:$0xff]   ;;  %v16907_v0 = vld [vmem:[#allocation13 + $0x24] ss:$16 sps:$4 sm:$0xff]  }
 0x44b   :  { %18352 = vst [vmem:[#allocation35_spill] sm:$0xff] %v16907_v0 }
 0x44c   :  { %v1670_v61 = vpack.c.bf16 %v16831_v33, %v16831_v33 }
 0x44e   :  { %1705 = vmatmul.mubr.bf16.vlgmr.msra.gmra.mrb[24].mxu0 %v1670_v61  ;;  %1746 = vmatmul.mubr.bf16.vlgmr.msra.gmra.mrb[24].mxu1 %v1670_v61 }
 0x44f   :  { %1775 = vmatpush1.bf16.msra.mxu0 %v16688_v6  ;;  %1816 = vmatpush1.bf16.msra.mxu1 %v16691_v15 }
 0x450   :  { %1776 = vmatprep.subr.bf16.mxu0 %v16694_v7  ;;  %1817 = vmatprep.subr.bf16.mxu1 %v16697_v63 }
 0x451   :  { %1806 = vmatprep.mubr.bf16.mxu0 %v18304_v19  ;;  %1847 = vmatprep.mubr.bf16.mxu1 %v18304_v19 }
 0x453   :  { %1777 = vmatpush1.bf16.msra.mxu0 %v16702_v18  ;;  %1818 = vmatpush1.bf16.msra.mxu1 %v16705_v20 }
 0x454   :  { %1778 = vmatprep.subr.bf16.mxu0 %v16708_v12  ;;  %1819 = vmatprep.subr.bf16.mxu1 %v16711_v13 }
 0x457   :  { %1779 = vmatpush1.bf16.msra.mxu0 %v16714_v14  ;;  %1820 = vmatpush1.bf16.msra.mxu1 %v16717_v1 }
 0x458   :  { %1780 = vmatprep.subr.bf16.mxu0 %v16720_v17  ;;  %1821 = vmatprep.subr.bf16.mxu1 %v16723_v5 }
 0x45b   :  { %1781 = vmatpush1.bf16.msra.mxu0 %v16726_v11  ;;  %1822 = vmatpush1.bf16.msra.mxu1 %v16729_v3 }
 0x45c   :  { %1782 = vmatprep.subr.bf16.mxu0 %v16732_v4  ;;  %1823 = vmatprep.subr.bf16.mxu1 %v16735_v2 }
 0x45f   :  { %1783 = vmatpush1.bf16.msra.mxu0 %v16853_v16  ;;  %1824 = vmatpush1.bf16.msra.mxu1 %v16856_v9 }
 0x460   :  { %1784 = vmatprep.subr.bf16.mxu0 %v16859_v35  ;;  %1825 = vmatprep.subr.bf16.mxu1 %v16862_v37 }
 0x463   :  { %1785 = vmatpush1.bf16.msra.mxu0 %v16865_v24  ;;  %1826 = vmatpush1.bf16.msra.mxu1 %v16868_v10 }
 0x464   :  { %1786 = vmatprep.subr.bf16.mxu0 %v16871_v28  ;;  %1827 = vmatprep.subr.bf16.mxu1 %v16874_v23 }
 0x467   :  { %1787 = vmatpush1.bf16.msra.mxu0 %v16877_v25  ;;  %1828 = vmatpush1.bf16.msra.mxu1 %v16880_v34 }
 0x468   :  { %1788 = vmatprep.subr.bf16.mxu0 %v16883_v27  ;;  %1829 = vmatprep.subr.bf16.mxu1 %v16886_v8 }
 0x46b   :  { %1789 = vmatpush1.bf16.msra.mxu0 %v16889_v29  ;;  %1830 = vmatpush1.bf16.msra.mxu1 %v16892_v31  ;;  %v16910_v31 = vld [vmem:[#allocation13 + $0x2c] ss:$16 sps:$4 sm:$0xff]  }
 0x46c   :  { %1908 = vmatprep.subr.bf16.mxu0 %v16895_v30  ;;  %1949 = vmatprep.subr.bf16.mxu1 %v16898_v21  ;;  %18353 = vst [vmem:[#allocation36_spill] sm:$0xff] %v16910_v31  ;;  %v16913_v30 = vld [vmem:[#allocation13 + $0x20] ss:$16 sps:$4 sm:$0xff]  }
 0x46d   :  { %18354 = vst [vmem:[#allocation37_spill] sm:$0xff] %v16913_v30 }
 0x46e   :  { %1807 = vmatmul.mubr.bf16.vlgmr.msra.gmra.mrb[28].mxu0 %v1670_v61  ;;  %1848 = vmatmul.mubr.bf16.vlgmr.msra.gmra.mrb[28].mxu1 %v1670_v61  ;;  %v16916_v61 = vld [vmem:[#allocation13 + $0x28] ss:$16 sps:$4 sm:$0xff]  }
 0x46f   :  { %1909 = vmatpush1.bf16.msra.mxu0 %v16901_v32  ;;  %1950 = vmatpush1.bf16.msra.mxu1 %v16904_v22  ;;  %18355 = vst [vmem:[#allocation38_spill] sm:$0xff] %v16916_v61  ;;  %v16919_v32 = vld [vmem:[#allocation13 + $0x44] ss:$16 sps:$4 sm:$0xff]   ;;  %v16922_v22 = vld [vmem:[#allocation13 + $0x4c] ss:$16 sps:$4 sm:$0xff]  }
 0x470   :  { %1910 = vmatprep.subr.bf16.mxu0 %v16907_v0  ;;  %1951 = vmatprep.subr.bf16.mxu1 %v16910_v31  ;;  %18356 = vst [vmem:[#allocation39_spill] sm:$0xff] %v16919_v32  ;;  %18357 = vst [vmem:[#allocation40_spill] sm:$0xff] %v16922_v22  ;;  %v16925_v0 = vld [vmem:[#allocation13 + $0x40] ss:$16 sps:$4 sm:$0xff]   ;;  %v16928_v31 = vld [vmem:[#allocation13 + $0x48] ss:$16 sps:$4 sm:$0xff]  }
 0x471   :  { %18358 = vst [vmem:[#allocation41_spill] sm:$0xff] %v16925_v0  ;;  %18359 = vst [vmem:[#allocation42_spill] sm:$0xff] %v16928_v31 }
 0x473   :  { %1911 = vmatpush1.bf16.msra.mxu0 %v16913_v30  ;;  %1952 = vmatpush1.bf16.msra.mxu1 %v16916_v61  ;;  %v16931_v30 = vld [vmem:[#allocation13 + $0x64] ss:$16 sps:$4 sm:$0xff]   ;;  %v16934_v61 = vld [vmem:[#allocation13 + $0x6c] ss:$16 sps:$4 sm:$0xff]  }
 0x474   :  { %1912 = vmatprep.subr.bf16.mxu0 %v16919_v32  ;;  %1953 = vmatprep.subr.bf16.mxu1 %v16922_v22  ;;  %18360 = vst [vmem:[#allocation43_spill] sm:$0xff] %v16931_v30  ;;  %18361 = vst [vmem:[#allocation44_spill] sm:$0xff] %v16934_v61  ;;  %v16937_v32 = vld [vmem:[#allocation13 + $0x60] ss:$16 sps:$4 sm:$0xff]   ;;  %v16940_v22 = vld [vmem:[#allocation13 + $0x68] ss:$16 sps:$4 sm:$0xff]  }
 0x475   :  { %18362 = vst [vmem:[#allocation45_spill] sm:$0xff] %v16937_v32  ;;  %18363 = vst [vmem:[#allocation46_spill] sm:$0xff] %v16940_v22 }
 0x477   :  { %1913 = vmatpush1.bf16.msra.mxu0 %v16925_v0  ;;  %1954 = vmatpush1.bf16.msra.mxu1 %v16928_v31  ;;  %v16943_v0 = vld [vmem:[#allocation13 + $0x84] ss:$16 sps:$4 sm:$0xff]   ;;  %v16946_v31 = vld [vmem:[#allocation13 + $0x8c] ss:$16 sps:$4 sm:$0xff]  }
 0x478   :  { %1914 = vmatprep.subr.bf16.mxu0 %v16931_v30  ;;  %1955 = vmatprep.subr.bf16.mxu1 %v16934_v61  ;;  %18364 = vst [vmem:[#allocation47_spill] sm:$0xff] %v16943_v0  ;;  %18365 = vst [vmem:[#allocation48_spill] sm:$0xff] %v16946_v31  ;;  %v16949_v30 = vld [vmem:[#allocation13 + $0x80] ss:$16 sps:$4 sm:$0xff]   ;;  %v16952_v61 = vld [vmem:[#allocation13 + $0x88] ss:$16 sps:$4 sm:$0xff]  }
 0x479   :  { %18366 = vst [vmem:[#allocation49_spill] sm:$0xff] %v16949_v30  ;;  %18367 = vst [vmem:[#allocation50_spill] sm:$0xff] %v16952_v61 }
 0x47b   :  { %1915 = vmatpush1.bf16.msra.mxu0 %v16937_v32  ;;  %1956 = vmatpush1.bf16.msra.mxu1 %v16940_v22  ;;  %v16955_v32 = vld [vmem:[#allocation13 + $0xa4] ss:$16 sps:$4 sm:$0xff]   ;;  %v16958_v22 = vld [vmem:[#allocation13 + $0xac] ss:$16 sps:$4 sm:$0xff]  }
 0x47c   :  { %1916 = vmatprep.subr.bf16.mxu0 %v16943_v0  ;;  %1957 = vmatprep.subr.bf16.mxu1 %v16946_v31  ;;  %18368 = vst [vmem:[#allocation51_spill] sm:$0xff] %v16955_v32  ;;  %18369 = vst [vmem:[#allocation52_spill] sm:$0xff] %v16958_v22  ;;  %v16961_v0 = vld [vmem:[#allocation13 + $0xa0] ss:$16 sps:$4 sm:$0xff]   ;;  %v16964_v31 = vld [vmem:[#allocation13 + $0xa8] ss:$16 sps:$4 sm:$0xff]  }
 0x47d   :  { %18370 = vst [vmem:[#allocation53_spill] sm:$0xff] %v16961_v0  ;;  %18371 = vst [vmem:[#allocation54_spill] sm:$0xff] %v16964_v31 }
 0x47f   :  { %1917 = vmatpush1.bf16.msra.mxu0 %v16949_v30  ;;  %1958 = vmatpush1.bf16.msra.mxu1 %v16952_v61  ;;  %v16967_v30 = vld [vmem:[#allocation13 + $0xc4] ss:$16 sps:$4 sm:$0xff]   ;;  %v16970_v61 = vld [vmem:[#allocation13 + $0xcc] ss:$16 sps:$4 sm:$0xff]  }
 0x480   :  { %1918 = vmatprep.subr.bf16.mxu0 %v16955_v32  ;;  %1959 = vmatprep.subr.bf16.mxu1 %v16958_v22  ;;  %18372 = vst [vmem:[#allocation55_spill] sm:$0xff] %v16967_v30  ;;  %18373 = vst [vmem:[#allocation56_spill] sm:$0xff] %v16970_v61  ;;  %v16973_v32 = vld [vmem:[#allocation13 + $0xc0] ss:$16 sps:$4 sm:$0xff]   ;;  %v16976_v22 = vld [vmem:[#allocation13 + $0xc8] ss:$16 sps:$4 sm:$0xff]  }
 0x481   :  { %18374 = vst [vmem:[#allocation57_spill] sm:$0xff] %v16973_v32  ;;  %18375 = vst [vmem:[#allocation58_spill] sm:$0xff] %v16976_v22 }
 0x483   :  { %1919 = vmatpush1.bf16.msra.mxu0 %v16961_v0  ;;  %1960 = vmatpush1.bf16.msra.mxu1 %v16964_v31  ;;  %v16979_v0 = vld [vmem:[#allocation13 + $0xe4] ss:$16 sps:$4 sm:$0xff]   ;;  %v16982_v31 = vld [vmem:[#allocation13 + $0xec] ss:$16 sps:$4 sm:$0xff]  }
 0x484   :  { %1920 = vmatprep.subr.bf16.mxu0 %v16967_v30  ;;  %1961 = vmatprep.subr.bf16.mxu1 %v16970_v61  ;;  %18376 = vst [vmem:[#allocation59_spill] sm:$0xff] %v16979_v0  ;;  %18377 = vst [vmem:[#allocation60_spill] sm:$0xff] %v16982_v31  ;;  %v16985_v30 = vld [vmem:[#allocation13 + $0xe0] ss:$16 sps:$4 sm:$0xff]   ;;  %v16988_v61 = vld [vmem:[#allocation13 + $0xe8] ss:$16 sps:$4 sm:$0xff]  }
 0x485   :  { %18378 = vst [vmem:[#allocation61_spill] sm:$0xff] %v16985_v30  ;;  %18379 = vst [vmem:[#allocation62_spill] sm:$0xff] %v16988_v61 }
 0x487   :  { %1921 = vmatpush1.bf16.msra.mxu0 %v16973_v32  ;;  %1962 = vmatpush1.bf16.msra.mxu1 %v16976_v22  ;;  %v16991_v32 = vld [vmem:[#allocation13 + $0x104] ss:$16 sps:$4 sm:$0xff]   ;;  %v16994_v22 = vld [vmem:[#allocation13 + $0x10c] ss:$16 sps:$4 sm:$0xff]  }
 0x488   :  { %1922 = vmatprep.subr.bf16.mxu0 %v16979_v0  ;;  %1963 = vmatprep.subr.bf16.mxu1 %v16982_v31  ;;  %18380 = vst [vmem:[#allocation63_spill] sm:$0xff] %v16991_v32  ;;  %18381 = vst [vmem:[#allocation64_spill] sm:$0xff] %v16994_v22  ;;  %v16997_v0 = vld [vmem:[#allocation13 + $0x100] ss:$16 sps:$4 sm:$0xff]   ;;  %v17000_v31 = vld [vmem:[#allocation13 + $0x108] ss:$16 sps:$4 sm:$0xff]  }
 0x489   :  { %18382 = vst [vmem:[#allocation65_spill] sm:$0xff] %v16997_v0  ;;  %18383 = vst [vmem:[#allocation66_spill] sm:$0xff] %v17000_v31 }
 0x48b   :  { %1923 = vmatpush1.bf16.msra.mxu0 %v16985_v30  ;;  %1964 = vmatpush1.bf16.msra.mxu1 %v16988_v61  ;;  %v17003_v30 = vld [vmem:[#allocation13 + $0x124] ss:$16 sps:$4 sm:$0xff]   ;;  %v17006_v61 = vld [vmem:[#allocation13 + $0x12c] ss:$16 sps:$4 sm:$0xff]  }
 0x48c   :  { %1924 = vmatprep.subr.bf16.mxu0 %v16991_v32  ;;  %1965 = vmatprep.subr.bf16.mxu1 %v16994_v22  ;;  %18384 = vst [vmem:[#allocation67_spill] sm:$0xff] %v17003_v30  ;;  %18385 = vst [vmem:[#allocation68_spill] sm:$0xff] %v17006_v61  ;;  %v17009_v32 = vld [vmem:[#allocation13 + $0x120] ss:$16 sps:$4 sm:$0xff]   ;;  %v17012_v22 = vld [vmem:[#allocation13 + $0x128] ss:$16 sps:$4 sm:$0xff]  }
 0x48d   :  { %18386 = vst [vmem:[#allocation73_spill] sm:$0xff] %v17009_v32  ;;  %18387 = vst [vmem:[#allocation74_spill] sm:$0xff] %v17012_v22 }
 0x48f   :  { %1925 = vmatpush1.bf16.msra.mxu0 %v16997_v0  ;;  %1966 = vmatpush1.bf16.msra.mxu1 %v17000_v31  ;;  %v17015_v0 = vld [vmem:[#allocation13 + $0x144] ss:$16 sps:$4 sm:$0xff]   ;;  %v17018_v31 = vld [vmem:[#allocation13 + $0x14c] ss:$16 sps:$4 sm:$0xff]  }
 0x490   :  { %1926 = vmatprep.subr.bf16.mxu0 %v17003_v30  ;;  %1967 = vmatprep.subr.bf16.mxu1 %v17006_v61  ;;  %18388 = vst [vmem:[#allocation75_spill] sm:$0xff] %v17015_v0  ;;  %18389 = vst [vmem:[#allocation76_spill] sm:$0xff] %v17018_v31 }
 0x493   :  { %1927 = vmatpush1.bf16.msra.mxu0 %v17009_v32  ;;  %1968 = vmatpush1.bf16.msra.mxu1 %v17012_v22 }
 0x494   :  { %1928 = vmatprep.subr.bf16.mxu0 %v17015_v0  ;;  %1969 = vmatprep.subr.bf16.mxu1 %v17018_v31 }
 0x497   :  { %1929 = vmatpush1.bf16.msra.mxu0 %v18320_v38  ;;  %1970 = vmatpush1.bf16.msra.mxu1 %v18321_v39  ;;  %v18390_v38 = vld [vmem:[#allocation69_spill] sm:$0xff] }
 0x498   :  { %1930 = vmatprep.subr.bf16.mxu0 %v18322_v40  ;;  %1971 = vmatprep.subr.bf16.mxu1 %v18323_v41  ;;  %v18391_v41 = vld [vmem:[#allocation70_spill] sm:$0xff] }
 0x49b   :  { %1931 = vmatpush1.bf16.msra.mxu0 %v18324_v42  ;;  %1972 = vmatpush1.bf16.msra.mxu1 %v18325_v43 }
 0x49c   :  { %1932 = vmatprep.subr.bf16.mxu0 %v18326_v44  ;;  %1973 = vmatprep.subr.bf16.mxu1 %v18327_v45 }
 0x49f   :  { %1933 = vmatpush1.bf16.msra.mxu0 %v18328_v46  ;;  %1974 = vmatpush1.bf16.msra.mxu1 %v18329_v47 }
 0x4a0   :  { %1934 = vmatprep.subr.bf16.mxu0 %v18330_v48  ;;  %1975 = vmatprep.subr.bf16.mxu1 %v18331_v49 }
 0x4a3   :  { %1935 = vmatpush1.bf16.msra.mxu0 %v18332_v50  ;;  %1976 = vmatpush1.bf16.msra.mxu1 %v18333_v51  ;;  %v18392_v50 = vld [vmem:[#allocation71_spill] sm:$0xff] }
 0x4a4   :  { %1936 = vmatprep.subr.bf16.mxu0 %v18334_v52  ;;  %1977 = vmatprep.subr.bf16.mxu1 %v18335_v53 }
 0x4a7   :  { %1937 = vmatpush1.bf16.msra.mxu0 %v18336_v54  ;;  %1978 = vmatpush1.bf16.msra.mxu1 %v18337_v55 }
 0x4a8   :  { %1938 = vmatprep.subr.bf16.mxu0 %v18338_v56  ;;  %1979 = vmatprep.subr.bf16.mxu1 %v18339_v57  ;;  %v18393_v56 = vld [vmem:[#allocation72_spill] sm:$0xff] }
 0x4ab   :  { %1939 = vmatpush1.bf16.msra.mxu0 %v18340_v58  ;;  %1980 = vmatpush1.bf16.msra.mxu1 %v18341_v59 }
 0x4ac   :  { %2010 = vmatprep.subr.bf16.mxu0 %v18342_v60  ;;  %2051 = vmatprep.subr.bf16.mxu1 %v18390_v38 }
 0x521   :  { %v1706_v39 = vpop.f32.mrb[24].mxu0  ;;  %v1747_v40 = vpop.f32.mrb[24].mxu1 }
 0x522   :  { %v1707_v42 = vadd.f32 %v1706_v39, %v18391_v41  ;;  %v1708_v43 = vpop.f32.mrb[25].mxu0  ;;  %v1749_v44 = vpop.f32.mrb[25].mxu1  ;;  %v1748_v59 = vadd.f32 %v1747_v40, %v18347_v62 }
 0x523   :  { %v1710_v45 = vpop.f32.mrb[26].mxu0  ;;  %v1751_v46 = vpop.f32.mrb[26].mxu1  ;;  %v1709_v51 = vadd.f32 %v1708_v43, %v18392_v50  ;;  %v1750_v57 = vadd.f32 %v1749_v44, %v18393_v56 }
 0x524   :  { %v12182_v47 = vmul.f32 -1.442695, %v1707_v42  ;;  %v1711_v48 = vpop.f32.mrb[27].mxu0  ;;  %v1752_v49 = vpop.f32.mrb[27].mxu1 }
 0x525   :  { %v12183_v52 = vmul.f32 -1.442695, %v1709_v51 }
 0x526   :  { %15378 = vpow2.f32 %v12182_v47 }
 0x527   :  { %15380 = vpow2.f32 %v12183_v52 }
 0x530   :  { %v15379_v53 = vpop.eup %15378 }
 0x531   :  { %v1760_v54 = vadd.f32 1.0, %v15379_v53  ;;  %v15381_v55 = vpop.eup %15380 }
 0x532   :  { %v1761_v38 = vadd.f32 1.0, %v15381_v55 }
 0x533   :  { %15382 = vrcp.f32 %v1760_v54 }
 0x53d   :  { %v15383_v58 = vpop.eup %15382 }
 0x53e   :  { %v1766_v60 = vmul.f32 %v15383_v58, %v1750_v57  ;;  %v1773_v57 = vld [vmem:[#allocation2 + $0x3] ss:$8 sm:$0xf] }
 0x540   :  { %v1767_v39 = vadd.f32 %v1766_v60, %v1748_v59 }
 0x541   :  { %v1808_v42 = vpop.f32.mrb[28].mxu0  ;;  %v1849_v45 = vpop.f32.mrb[28].mxu1 }
 0x542   :  { %15384 = vtanh.f32 %v1767_v39  ;;  %v1810_v46 = vpop.f32.mrb[29].mxu0  ;;  %v1851_v47 = vpop.f32.mrb[29].mxu1 }
 0x543   :  { %v1860_v43 = vcombine.low %v1808_v42, %v1810_v46  ;;  %v1861_v48 = vcombine.low %v1849_v45, %v1851_v47  ;;  %v1812_v49 = vpop.f32.mrb[30].mxu0  ;;  %v1853_v51 = vpop.f32.mrb[30].mxu1  ;;  %15386 = vrcp.f32 %v1761_v38 }
 0x544   :  { %v1813_v52 = vpop.f32.mrb[31].mxu0  ;;  %v1854_v53 = vpop.f32.mrb[31].mxu1 }
 0x545   :  { %v1868_v44 = vrot.slane %v1860_v43, %v16400_v36  ;;  %v1875_v54 = vrot.slane %v1861_v48, %v16400_v36 }
 0x547   :  { %v1876_v40 = vcombine.low %v1868_v44, %v1875_v54 }
 0x549   :  { %v1883_v55 = vrot.slane %v1876_v40, %v16400_v36 }
 0x54b   :  { %v1885_v58 = vadd.f32 %v1883_v55, %v1773_v57 }
 0x54c   :  { %v15385_v59 = vpop.eup %15384 }
 0x54d   :  { %v12184_v60 = vmul.f32 -1.442695, %v1885_v58  ;;  %v1769_v39 = vsub.f32 %v16826_v26, %v15385_v59  ;;  %v15387_v42 = vpop.eup %15386  ;;  %v1893_v48 = vrot.slane %v1885_v58, 3  ;;  %v1896_v52 = vrot.slane %v1885_v58, 2  ;;  %v18395_v58 = vld [vmem:[#allocation32_spill] sm:$0xff] }
 0x54f   :  { %15388 = vpow2.f32 %v12184_v60  ;;  %v1770_v45 = vmul.f32 %v15387_v42, %v1769_v39  ;;  %v18397_v60 = vld [vmem:[#allocation34_spill] sm:$0xff]  ;;  %v18398_v39 = vld [vmem:[#allocation35_spill] sm:$0xff]  ;;  %v18399_v42 = vld [vmem:[#allocation36_spill] sm:$0xff] }
 0x551   :  { %v17053_v46 = vadd.f32 %v15385_v59, %v1770_v45  ;;  %v18396_v59 = vld [vmem:[#allocation33_spill] sm:$0xff] }
 0x552   :  { %v18400_v45 = vld [vmem:[#allocation37_spill] sm:$0xff] }
 0x553   :  { %v1907_v38 = vpack.c.bf16 %v17053_v46, %v17053_v46 }
 0x555   :  { %1940 = vmatprep.mubr.bf16.mxu0 %v1907_v38  ;;  %1981 = vmatprep.mubr.bf16.mxu1 %v1907_v38  ;;  %v18401_v38 = vld [vmem:[#allocation38_spill] sm:$0xff] }
 0x559   :  { %v15389_v47 = vpop.eup %15388 }
 0x55a   :  { %v1889_v43 = vadd.f32 1.0, %v15389_v47  ;;  %v18402_v47 = vld [vmem:[#allocation39_spill] sm:$0xff] }
 0x55c   :  { %15390 = vrcp.f32 %v1889_v43  ;;  %v18403_v43 = vld [vmem:[#allocation40_spill] sm:$0xff] }
 0x566   :  { %v15391_v49 = vpop.eup %15390 }
 0x567   :  { %v1895_v51 = vmul.f32 %v15391_v49, %v1893_v48  ;;  %v1902_v54 = vrot.slane %v15391_v49, 1  ;;  %v18404_v48 = vld [vmem:[#allocation41_spill] sm:$0xff]  ;;  %v18405_v49 = vld [vmem:[#allocation42_spill] sm:$0xff] }
 0x569   :  { %v1898_v53 = vadd.f32 %v1896_v52, %v1895_v51  ;;  %v18406_v51 = vld [vmem:[#allocation43_spill] sm:$0xff]  ;;  %v18407_v52 = vld [vmem:[#allocation44_spill] sm:$0xff] }
 0x56b   :  { %15392 = vtanh.f32 %v1898_v53  ;;  %v18408_v53 = vld [vmem:[#allocation45_spill] sm:$0xff] }
 0x575   :  { %v15393_v26 = vpop.eup %15392 }
 0x576   :  { %v1900_v44 = vsub.f32 %v16831_v33, %v15393_v26  ;;  %v18394_v33 = vld [vmem:[#allocation31_spill] sm:$0xff] }
 0x578   :  { %v1904_v40 = vmul.f32 %v1902_v54, %v1900_v44  ;;  %v18410_v44 = vld [vmem:[#allocation47_spill] sm:$0xff]  ;;  %v18411_v54 = vld [vmem:[#allocation48_spill] sm:$0xff] }
 0x57a   :  { %v17058_v55 = vadd.f32 %v15393_v26, %v1904_v40  ;;  %v18409_v26 = vld [vmem:[#allocation46_spill] sm:$0xff]  ;;  %v18412_v40 = vld [vmem:[#allocation49_spill] sm:$0xff] }
 0x57c   :  { %v1906_v57 = vpack.c.bf16 %v17058_v55, %v17058_v55 }
 0x57e   :  { %1941 = vmatmul.mubr.bf16.vlgmr.msra.gmra.mrb[32].mxu0 %v1906_v57  ;;  %1982 = vmatmul.mubr.bf16.vlgmr.msra.gmra.mrb[32].mxu1 %v1906_v57 }
 0x57f   :  { %2011 = vmatpush1.bf16.msra.mxu0 %v16688_v6  ;;  %2052 = vmatpush1.bf16.msra.mxu1 %v16691_v15 }
 0x580   :  { %2012 = vmatprep.subr.bf16.mxu0 %v16694_v7  ;;  %2053 = vmatprep.subr.bf16.mxu1 %v16697_v63 }
 0x581   :  { %2042 = vmatprep.mubr.bf16.mxu0 %v18304_v19  ;;  %2083 = vmatprep.mubr.bf16.mxu1 %v18304_v19 }
 0x583   :  { %2013 = vmatpush1.bf16.msra.mxu0 %v16702_v18  ;;  %2054 = vmatpush1.bf16.msra.mxu1 %v16705_v20 }
 0x584   :  { %2014 = vmatprep.subr.bf16.mxu0 %v16708_v12  ;;  %2055 = vmatprep.subr.bf16.mxu1 %v16711_v13 }
 0x587   :  { %2015 = vmatpush1.bf16.msra.mxu0 %v16714_v14  ;;  %2056 = vmatpush1.bf16.msra.mxu1 %v16717_v1 }
 0x588   :  { %2016 = vmatprep.subr.bf16.mxu0 %v16720_v17  ;;  %2057 = vmatprep.subr.bf16.mxu1 %v16723_v5 }
 0x58b   :  { %2017 = vmatpush1.bf16.msra.mxu0 %v16726_v11  ;;  %2058 = vmatpush1.bf16.msra.mxu1 %v16729_v3 }
 0x58c   :  { %2018 = vmatprep.subr.bf16.mxu0 %v16732_v4  ;;  %2059 = vmatprep.subr.bf16.mxu1 %v16735_v2 }
 0x58f   :  { %2019 = vmatpush1.bf16.msra.mxu0 %v16853_v16  ;;  %2060 = vmatpush1.bf16.msra.mxu1 %v16856_v9 }
 0x590   :  { %2020 = vmatprep.subr.bf16.mxu0 %v16859_v35  ;;  %2061 = vmatprep.subr.bf16.mxu1 %v16862_v37 }
 0x593   :  { %2021 = vmatpush1.bf16.msra.mxu0 %v16865_v24  ;;  %2062 = vmatpush1.bf16.msra.mxu1 %v16868_v10 }
 0x594   :  { %2022 = vmatprep.subr.bf16.mxu0 %v16871_v28  ;;  %2063 = vmatprep.subr.bf16.mxu1 %v16874_v23 }
 0x597   :  { %2023 = vmatpush1.bf16.msra.mxu0 %v16877_v25  ;;  %2064 = vmatpush1.bf16.msra.mxu1 %v16880_v34 }
 0x598   :  { %2024 = vmatprep.subr.bf16.mxu0 %v16883_v27  ;;  %2065 = vmatprep.subr.bf16.mxu1 %v16886_v8 }
 0x59b   :  { %2025 = vmatpush1.bf16.msra.mxu0 %v16889_v29  ;;  %2066 = vmatpush1.bf16.msra.mxu1 %v18394_v33 }
 0x59c   :  { %2144 = vmatprep.subr.bf16.mxu0 %v18395_v58  ;;  %2185 = vmatprep.subr.bf16.mxu1 %v16898_v21 }
 0x59e   :  { %2043 = vmatmul.mubr.bf16.vlgmr.msra.gmra.mrb[36].mxu0 %v1906_v57  ;;  %2084 = vmatmul.mubr.bf16.vlgmr.msra.gmra.mrb[36].mxu1 %v1906_v57  ;;  %v18413_v57 = vld [vmem:[#allocation50_spill] sm:$0xff] }
 0x59f   :  { %2145 = vmatpush1.bf16.msra.mxu0 %v18396_v59  ;;  %2186 = vmatpush1.bf16.msra.mxu1 %v18397_v60 }
 0x5a0   :  { %2146 = vmatprep.subr.bf16.mxu0 %v18398_v39  ;;  %2187 = vmatprep.subr.bf16.mxu1 %v18399_v42 }
 0x5a3   :  { %2147 = vmatpush1.bf16.msra.mxu0 %v18400_v45  ;;  %2188 = vmatpush1.bf16.msra.mxu1 %v18401_v38 }
 0x5a4   :  { %2148 = vmatprep.subr.bf16.mxu0 %v18402_v47  ;;  %2189 = vmatprep.subr.bf16.mxu1 %v18403_v43  ;;  %v18414_v43 = vld [vmem:[#allocation51_spill] sm:$0xff] }
 0x5a7   :  { %2149 = vmatpush1.bf16.msra.mxu0 %v18404_v48  ;;  %2190 = vmatpush1.bf16.msra.mxu1 %v18405_v49  ;;  %v18415_v48 = vld [vmem:[#allocation52_spill] sm:$0xff]  ;;  %v18416_v49 = vld [vmem:[#allocation53_spill] sm:$0xff] }
 0x5a8   :  { %2150 = vmatprep.subr.bf16.mxu0 %v18406_v51  ;;  %2191 = vmatprep.subr.bf16.mxu1 %v18407_v52  ;;  %v18417_v51 = vld [vmem:[#allocation54_spill] sm:$0xff]  ;;  %v18418_v52 = vld [vmem:[#allocation55_spill] sm:$0xff] }
 0x5ab   :  { %2151 = vmatpush1.bf16.msra.mxu0 %v18408_v53  ;;  %2192 = vmatpush1.bf16.msra.mxu1 %v18409_v26  ;;  %v18419_v53 = vld [vmem:[#allocation56_spill] sm:$0xff]  ;;  %v18420_v26 = vld [vmem:[#allocation57_spill] sm:$0xff] }
 0x5ac   :  { %2152 = vmatprep.subr.bf16.mxu0 %v18410_v44  ;;  %2193 = vmatprep.subr.bf16.mxu1 %v18411_v54  ;;  %v18421_v44 = vld [vmem:[#allocation58_spill] sm:$0xff]  ;;  %v18422_v54 = vld [vmem:[#allocation59_spill] sm:$0xff] }
 0x5af   :  { %2153 = vmatpush1.bf16.msra.mxu0 %v18412_v40  ;;  %2194 = vmatpush1.bf16.msra.mxu1 %v18413_v57  ;;  %v18423_v40 = vld [vmem:[#allocation60_spill] sm:$0xff]  ;;  %v18424_v57 = vld [vmem:[#allocation61_spill] sm:$0xff] }
 0x5b0   :  { %2154 = vmatprep.subr.bf16.mxu0 %v18414_v43  ;;  %2195 = vmatprep.subr.bf16.mxu1 %v18415_v48  ;;  %v18425_v43 = vld [vmem:[#allocation62_spill] sm:$0xff]  ;;  %v18426_v48 = vld [vmem:[#allocation63_spill] sm:$0xff] }
 0x5b3   :  { %2155 = vmatpush1.bf16.msra.mxu0 %v18416_v49  ;;  %2196 = vmatpush1.bf16.msra.mxu1 %v18417_v51  ;;  %v18427_v49 = vld [vmem:[#allocation64_spill] sm:$0xff]  ;;  %v18428_v51 = vld [vmem:[#allocation65_spill] sm:$0xff] }
 0x5b4   :  { %2156 = vmatprep.subr.bf16.mxu0 %v18418_v52  ;;  %2197 = vmatprep.subr.bf16.mxu1 %v18419_v53  ;;  %v18429_v52 = vld [vmem:[#allocation66_spill] sm:$0xff] }
 0x5b7   :  { %2157 = vmatpush1.bf16.msra.mxu0 %v18420_v26  ;;  %2198 = vmatpush1.bf16.msra.mxu1 %v18421_v44 }
 0x5b8   :  { %2158 = vmatprep.subr.bf16.mxu0 %v18422_v54  ;;  %2199 = vmatprep.subr.bf16.mxu1 %v18423_v40 }
 0x5bb   :  { %2159 = vmatpush1.bf16.msra.mxu0 %v18424_v57  ;;  %2200 = vmatpush1.bf16.msra.mxu1 %v18425_v43  ;;  %v17136_v43 = vld [vmem:[#allocation13 + $0x140] ss:$16 sps:$4 sm:$0xff]  }
 0x5bc   :  { %2160 = vmatprep.subr.bf16.mxu0 %v18426_v48  ;;  %2201 = vmatprep.subr.bf16.mxu1 %v18427_v49  ;;  %18430 = vst [vmem:[#allocation69_spill] sm:$0xff] %v17136_v43  ;;  %v17139_v49 = vld [vmem:[#allocation13 + $0x148] ss:$16 sps:$4 sm:$0xff]  }
 0x5bd   :  { %18431 = vst [vmem:[#allocation31_spill] sm:$0xff] %v17139_v49 }
 0x5bf   :  { %2161 = vmatpush1.bf16.msra.mxu0 %v18428_v51  ;;  %2202 = vmatpush1.bf16.msra.mxu1 %v18429_v52  ;;  %v17142_v52 = vld [vmem:[#allocation13 + $0x164] ss:$16 sps:$4 sm:$0xff]  }
 0x5c0   :  { %2162 = vmatprep.subr.bf16.mxu0 %v17003_v30  ;;  %2203 = vmatprep.subr.bf16.mxu1 %v17006_v61  ;;  %18432 = vst [vmem:[#allocation32_spill] sm:$0xff] %v17142_v52  ;;  %v17145_v61 = vld [vmem:[#allocation13 + $0x16c] ss:$16 sps:$4 sm:$0xff]  }
 0x5c1   :  { %18433 = vst [vmem:[#allocation33_spill] sm:$0xff] %v17145_v61 }
 0x5c3   :  { %2163 = vmatpush1.bf16.msra.mxu0 %v17009_v32  ;;  %2204 = vmatpush1.bf16.msra.mxu1 %v17012_v22  ;;  %v17148_v22 = vld [vmem:[#allocation13 + $0x160] ss:$16 sps:$4 sm:$0xff]  }
 0x5c4   :  { %2164 = vmatprep.subr.bf16.mxu0 %v17015_v0  ;;  %2205 = vmatprep.subr.bf16.mxu1 %v17018_v31  ;;  %18434 = vst [vmem:[#allocation34_spill] sm:$0xff] %v17148_v22  ;;  %v17151_v31 = vld [vmem:[#allocation13 + $0x168] ss:$16 sps:$4 sm:$0xff]  }
 0x5c5   :  { %18435 = vst [vmem:[#allocation35_spill] sm:$0xff] %v17151_v31 }
 0x5c7   :  { %2165 = vmatpush1.bf16.msra.mxu0 %v17136_v43  ;;  %2206 = vmatpush1.bf16.msra.mxu1 %v17139_v49  ;;  %v17154_v43 = vld [vmem:[#allocation13 + $0x184] ss:$16 sps:$4 sm:$0xff]   ;;  %v17157_v49 = vld [vmem:[#allocation13 + $0x18c] ss:$16 sps:$4 sm:$0xff]  }
 0x5c8   :  { %2166 = vmatprep.subr.bf16.mxu0 %v17142_v52  ;;  %2207 = vmatprep.subr.bf16.mxu1 %v17145_v61  ;;  %18436 = vst [vmem:[#allocation36_spill] sm:$0xff] %v17154_v43  ;;  %18437 = vst [vmem:[#allocation37_spill] sm:$0xff] %v17157_v49  ;;  %v17160_v52 = vld [vmem:[#allocation13 + $0x180] ss:$16 sps:$4 sm:$0xff]   ;;  %v17163_v61 = vld [vmem:[#allocation13 + $0x188] ss:$16 sps:$4 sm:$0xff]  }
 0x5c9   :  { %18438 = vst [vmem:[#allocation38_spill] sm:$0xff] %v17160_v52  ;;  %18439 = vst [vmem:[#allocation39_spill] sm:$0xff] %v17163_v61 }
 0x5cb   :  { %2167 = vmatpush1.bf16.msra.mxu0 %v17148_v22  ;;  %2208 = vmatpush1.bf16.msra.mxu1 %v17151_v31  ;;  %v17166_v22 = vld [vmem:[#allocation13 + $0x1a4] ss:$16 sps:$4 sm:$0xff]   ;;  %v17169_v31 = vld [vmem:[#allocation13 + $0x1ac] ss:$16 sps:$4 sm:$0xff]  }
 0x5cc   :  { %2168 = vmatprep.subr.bf16.mxu0 %v17154_v43  ;;  %2209 = vmatprep.subr.bf16.mxu1 %v17157_v49  ;;  %18440 = vst [vmem:[#allocation77_spill] sm:$0xff] %v17166_v22  ;;  %18441 = vst [vmem:[#allocation78_spill] sm:$0xff] %v17169_v31  ;;  %v17172_v43 = vld [vmem:[#allocation13 + $0x1a0] ss:$16 sps:$4 sm:$0xff]   ;;  %v17175_v49 = vld [vmem:[#allocation13 + $0x1a8] ss:$16 sps:$4 sm:$0xff]  }
 0x5cd   :  { %18442 = vst [vmem:[#allocation79_spill] sm:$0xff] %v17172_v43  ;;  %18443 = vst [vmem:[#allocation80_spill] sm:$0xff] %v17175_v49 }
 0x5cf   :  { %2169 = vmatpush1.bf16.msra.mxu0 %v17160_v52  ;;  %2210 = vmatpush1.bf16.msra.mxu1 %v17163_v61  ;;  %v17178_v52 = vld [vmem:[#allocation13 + $0x1c4] ss:$16 sps:$4 sm:$0xff]   ;;  %v17181_v61 = vld [vmem:[#allocation13 + $0x1cc] ss:$16 sps:$4 sm:$0xff]  }
 0x5d0   :  { %2170 = vmatprep.subr.bf16.mxu0 %v17166_v22  ;;  %2211 = vmatprep.subr.bf16.mxu1 %v17169_v31  ;;  %18444 = vst [vmem:[#allocation81_spill] sm:$0xff] %v17178_v52  ;;  %18445 = vst [vmem:[#allocation82_spill] sm:$0xff] %v17181_v61  ;;  %v17184_v22 = vld [vmem:[#allocation13 + $0x1c0] ss:$16 sps:$4 sm:$0xff]   ;;  %v17187_v31 = vld [vmem:[#allocation13 + $0x1c8] ss:$16 sps:$4 sm:$0xff]  }
 0x5d1   :  { %18446 = vst [vmem:[#allocation83_spill] sm:$0xff] %v17184_v22  ;;  %18447 = vst [vmem:[#allocation84_spill] sm:$0xff] %v17187_v31 }
 0x5d3   :  { %2171 = vmatpush1.bf16.msra.mxu0 %v17172_v43  ;;  %2212 = vmatpush1.bf16.msra.mxu1 %v17175_v49  ;;  %v17190_v43 = vld [vmem:[#allocation13 + $0x1e4] ss:$16 sps:$4 sm:$0xff]   ;;  %v17193_v49 = vld [vmem:[#allocation13 + $0x1ec] ss:$16 sps:$4 sm:$0xff]  }
 0x5d4   :  { %2172 = vmatprep.subr.bf16.mxu0 %v17178_v52  ;;  %2213 = vmatprep.subr.bf16.mxu1 %v17181_v61  ;;  %18448 = vst [vmem:[#allocation85_spill] sm:$0xff] %v17190_v43  ;;  %18449 = vst [vmem:[#allocation86_spill] sm:$0xff] %v17193_v49  ;;  %v17196_v52 = vld [vmem:[#allocation13 + $0x1e0] ss:$16 sps:$4 sm:$0xff]   ;;  %v17199_v61 = vld [vmem:[#allocation13 + $0x1e8] ss:$16 sps:$4 sm:$0xff]  }
 0x5d5   :  { %18450 = vst [vmem:[#allocation87_spill] sm:$0xff] %v17196_v52  ;;  %18451 = vst [vmem:[#allocation88_spill] sm:$0xff] %v17199_v61 }
 0x5d7   :  { %2173 = vmatpush1.bf16.msra.mxu0 %v17184_v22  ;;  %2214 = vmatpush1.bf16.msra.mxu1 %v17187_v31  ;;  %v17202_v22 = vld [vmem:[#allocation11 + $0x4] ss:$16 sps:$4 sm:$0xff]   ;;  %v17205_v31 = vld [vmem:[#allocation11 + $0xc] ss:$16 sps:$4 sm:$0xff]  }
 0x5d8   :  { %2174 = vmatprep.subr.bf16.mxu0 %v17190_v43  ;;  %2215 = vmatprep.subr.bf16.mxu1 %v17193_v49  ;;  %18452 = vst [vmem:[#allocation89_spill] sm:$0xff] %v17202_v22  ;;  %18453 = vst [vmem:[#allocation90_spill] sm:$0xff] %v17205_v31 }
 0x5db   :  { %2175 = vmatpush1.bf16.msra.mxu0 %v17196_v52  ;;  %2216 = vmatpush1.bf16.msra.mxu1 %v17199_v61 }
 0x5dc   :  { %2246 = vmatprep.subr.bf16.mxu0 %v17202_v22  ;;  %2287 = vmatprep.subr.bf16.mxu1 %v17205_v31 }
 0x651   :  { %v1942_v43 = vpop.f32.mrb[32].mxu0  ;;  %v1983_v0 = vpop.f32.mrb[32].mxu1 }
 0x652   :  { %v1943_v49 = vadd.f32 %v1942_v43, %v18391_v41  ;;  %v1944_v32 = vpop.f32.mrb[33].mxu0  ;;  %v1985_v30 = vpop.f32.mrb[33].mxu1  ;;  %v1984_v43 = vadd.f32 %v1983_v0, %v18347_v62 }
 0x653   :  { %v1946_v51 = vpop.f32.mrb[34].mxu0  ;;  %v1987_v52 = vpop.f32.mrb[34].mxu1  ;;  %v1945_v61 = vadd.f32 %v1944_v32, %v18392_v50  ;;  %v1986_v26 = vadd.f32 %v1985_v30, %v18393_v56 }
 0x654   :  { %v12185_v48 = vmul.f32 -1.442695, %v1943_v49  ;;  %v1947_v57 = vpop.f32.mrb[35].mxu0  ;;  %v1988_v40 = vpop.f32.mrb[35].mxu1 }
 0x655   :  { %v12186_v54 = vmul.f32 -1.442695, %v1945_v61 }
 0x656   :  { %15394 = vpow2.f32 %v12185_v48 }
 0x657   :  { %15396 = vpow2.f32 %v12186_v54 }
 0x660   :  { %v15395_v22 = vpop.eup %15394 }
 0x661   :  { %v1996_v44 = vadd.f32 1.0, %v15395_v22  ;;  %v15397_v31 = vpop.eup %15396 }
 0x662   :  { %v1997_v51 = vadd.f32 1.0, %v15397_v31 }
 0x663   :  { %15398 = vrcp.f32 %v1996_v44 }
 0x66d   :  { %v15399_v53 = vpop.eup %15398 }
 0x66e   :  { %v2002_v41 = vmul.f32 %v15399_v53, %v1986_v26 }
 0x670   :  { %v2003_v52 = vadd.f32 %v2002_v41, %v1984_v43  ;;  %v2009_v41 = vld [vmem:[#allocation2 + $0x4] ss:$8 sm:$0xf] }
 0x671   :  { %v2044_v49 = vpop.f32.mrb[36].mxu0  ;;  %v2085_v57 = vpop.f32.mrb[36].mxu1 }
 0x672   :  { %15400 = vtanh.f32 %v2003_v52  ;;  %v2046_v48 = vpop.f32.mrb[37].mxu0  ;;  %v2087_v40 = vpop.f32.mrb[37].mxu1 }
 0x673   :  { %v2096_v32 = vcombine.low %v2044_v49, %v2046_v48  ;;  %v2097_v61 = vcombine.low %v2085_v57, %v2087_v40  ;;  %v2048_v50 = vpop.f32.mrb[38].mxu0  ;;  %v2089_v22 = vpop.f32.mrb[38].mxu1  ;;  %15402 = vrcp.f32 %v1997_v51 }
 0x674   :  { %v2049_v44 = vpop.f32.mrb[39].mxu0  ;;  %v2090_v54 = vpop.f32.mrb[39].mxu1 }
 0x675   :  { %v2104_v30 = vrot.slane %v2096_v32, %v16400_v36  ;;  %v2111_v56 = vrot.slane %v2097_v61, %v16400_v36 }
 0x677   :  { %v2112_v0 = vcombine.low %v2104_v30, %v2111_v56 }
 0x679   :  { %v2119_v31 = vrot.slane %v2112_v0, %v16400_v36 }
 0x67b   :  { %v2121_v53 = vadd.f32 %v2119_v31, %v2009_v41 }
 0x67c   :  { %v15401_v26 = vpop.eup %15400 }
 0x67d   :  { %v12187_v43 = vmul.f32 -1.442695, %v2121_v53  ;;  %v2005_v52 = vsub.f32 %v17053_v46, %v15401_v26  ;;  %v15403_v49 = vpop.eup %15402  ;;  %v2129_v40 = vrot.slane %v2121_v53, 3  ;;  %v2132_v22 = vrot.slane %v2121_v53, 2  ;;  %v18471_v53 = vld [vmem:[#allocation57_spill] sm:$0xff] }
 0x67f   :  { %15404 = vpow2.f32 %v12187_v43  ;;  %v2006_v50 = vmul.f32 %v15403_v49, %v2005_v52  ;;  %v18473_v43 = vld [vmem:[#allocation59_spill] sm:$0xff]  ;;  %v18474_v52 = vld [vmem:[#allocation60_spill] sm:$0xff]  ;;  %v18475_v49 = vld [vmem:[#allocation61_spill] sm:$0xff] }
 0x681   :  { %v17216_v57 = vadd.f32 %v15401_v26, %v2006_v50  ;;  %v18472_v26 = vld [vmem:[#allocation58_spill] sm:$0xff] }
 0x682   :  { %v18476_v50 = vld [vmem:[#allocation62_spill] sm:$0xff] }
 0x683   :  { %v2143_v51 = vpack.c.bf16 %v17216_v57, %v17216_v57 }
 0x685   :  { %2176 = vmatprep.mubr.bf16.mxu0 %v2143_v51  ;;  %2217 = vmatprep.mubr.bf16.mxu1 %v2143_v51  ;;  %v18477_v51 = vld [vmem:[#allocation63_spill] sm:$0xff] }
 0x689   :  { %v15405_v48 = vpop.eup %15404 }
 0x68a   :  { %v2125_v56 = vadd.f32 1.0, %v15405_v48  ;;  %v18478_v48 = vld [vmem:[#allocation64_spill] sm:$0xff] }
 0x68c   :  { %15406 = vrcp.f32 %v2125_v56  ;;  %v18479_v56 = vld [vmem:[#allocation65_spill] sm:$0xff] }
 0x696   :  { %v15407_v32 = vpop.eup %15406 }
 0x697   :  { %v2131_v61 = vmul.f32 %v15407_v32, %v2129_v40  ;;  %v2138_v30 = vrot.slane %v15407_v32, 1  ;;  %v18480_v40 = vld [vmem:[#allocation66_spill] sm:$0xff]  ;;  %v18481_v32 = vld [vmem:[#allocation67_spill] sm:$0xff] }
 0x699   :  { %v2134_v44 = vadd.f32 %v2132_v22, %v2131_v61  ;;  %v18482_v61 = vld [vmem:[#allocation68_spill] sm:$0xff]  ;;  %v18483_v22 = vld [vmem:[#allocation73_spill] sm:$0xff] }
 0x69b   :  { %15408 = vtanh.f32 %v2134_v44  ;;  %v18484_v44 = vld [vmem:[#allocation74_spill] sm:$0xff] }
 0x6a5   :  { %v15409_v46 = vpop.eup %15408 }
 0x6a6   :  { %v2136_v54 = vsub.f32 %v17058_v55, %v15409_v46  ;;  %v18470_v55 = vld [vmem:[#allocation56_spill] sm:$0xff] }
 0x6a8   :  { %v2140_v0 = vmul.f32 %v2138_v30, %v2136_v54  ;;  %v18486_v54 = vld [vmem:[#allocation76_spill] sm:$0xff]  ;;  %v18487_v30 = vld [vmem:[#allocation69_spill] sm:$0xff] }
 0x6aa   :  { %v17221_v31 = vadd.f32 %v15409_v46, %v2140_v0  ;;  %v18485_v46 = vld [vmem:[#allocation75_spill] sm:$0xff] }
 0x6ab   :  { %v18488_v0 = vld [vmem:[#allocation31_spill] sm:$0xff] }
 0x6ac   :  { %v2142_v41 = vpack.c.bf16 %v17221_v31, %v17221_v31 }
 0x6ae   :  { %2177 = vmatmul.mubr.bf16.vlgmr.msra.gmra.mrb[40].mxu0 %v2142_v41  ;;  %2218 = vmatmul.mubr.bf16.vlgmr.msra.gmra.mrb[40].mxu1 %v2142_v41 }
 0x6af   :  { %2247 = vmatpush1.bf16.msra.mxu0 %v16688_v6  ;;  %2288 = vmatpush1.bf16.msra.mxu1 %v16691_v15  ;;  %v18454_v6 = vld [vmem:[#allocation40_spill] sm:$0xff]  ;;  %v18455_v15 = vld [vmem:[#allocation41_spill] sm:$0xff] }
 0x6b0   :  { %2248 = vmatprep.subr.bf16.mxu0 %v16694_v7  ;;  %2289 = vmatprep.subr.bf16.mxu1 %v16697_v63  ;;  %v18456_v7 = vld [vmem:[#allocation42_spill] sm:$0xff]  ;;  %v18457_v63 = vld [vmem:[#allocation43_spill] sm:$0xff] }
 0x6b1   :  { %2278 = vmatprep.mubr.bf16.mxu0 %v18304_v19  ;;  %2319 = vmatprep.mubr.bf16.mxu1 %v18304_v19 }
 0x6b3   :  { %2249 = vmatpush1.bf16.msra.mxu0 %v16702_v18  ;;  %2290 = vmatpush1.bf16.msra.mxu1 %v16705_v20  ;;  %v18458_v18 = vld [vmem:[#allocation44_spill] sm:$0xff]  ;;  %v18459_v20 = vld [vmem:[#allocation45_spill] sm:$0xff] }
 0x6b4   :  { %2250 = vmatprep.subr.bf16.mxu0 %v16708_v12  ;;  %2291 = vmatprep.subr.bf16.mxu1 %v16711_v13  ;;  %v18460_v12 = vld [vmem:[#allocation46_spill] sm:$0xff]  ;;  %v18461_v13 = vld [vmem:[#allocation47_spill] sm:$0xff] }
 0x6b7   :  { %2251 = vmatpush1.bf16.msra.mxu0 %v16714_v14  ;;  %2292 = vmatpush1.bf16.msra.mxu1 %v16717_v1  ;;  %v18462_v14 = vld [vmem:[#allocation48_spill] sm:$0xff]  ;;  %v18463_v1 = vld [vmem:[#allocation49_spill] sm:$0xff] }
 0x6b8   :  { %2252 = vmatprep.subr.bf16.mxu0 %v16720_v17  ;;  %2293 = vmatprep.subr.bf16.mxu1 %v16723_v5  ;;  %v18464_v17 = vld [vmem:[#allocation50_spill] sm:$0xff]  ;;  %v18465_v5 = vld [vmem:[#allocation51_spill] sm:$0xff] }
 0x6bb   :  { %2253 = vmatpush1.bf16.msra.mxu0 %v16726_v11  ;;  %2294 = vmatpush1.bf16.msra.mxu1 %v16729_v3  ;;  %v18466_v11 = vld [vmem:[#allocation52_spill] sm:$0xff]  ;;  %v18467_v3 = vld [vmem:[#allocation53_spill] sm:$0xff] }
 0x6bc   :  { %2254 = vmatprep.subr.bf16.mxu0 %v16732_v4  ;;  %2295 = vmatprep.subr.bf16.mxu1 %v16735_v2  ;;  %v18468_v4 = vld [vmem:[#allocation54_spill] sm:$0xff]  ;;  %v18469_v2 = vld [vmem:[#allocation55_spill] sm:$0xff] }
 0x6bf   :  { %2255 = vmatpush1.bf16.msra.mxu0 %v16853_v16  ;;  %2296 = vmatpush1.bf16.msra.mxu1 %v16856_v9 }
 0x6c0   :  { %2256 = vmatprep.subr.bf16.mxu0 %v16859_v35  ;;  %2297 = vmatprep.subr.bf16.mxu1 %v16862_v37 }
 0x6c3   :  { %2257 = vmatpush1.bf16.msra.mxu0 %v16865_v24  ;;  %2298 = vmatpush1.bf16.msra.mxu1 %v16868_v10 }
 0x6c4   :  { %2258 = vmatprep.subr.bf16.mxu0 %v16871_v28  ;;  %2299 = vmatprep.subr.bf16.mxu1 %v16874_v23 }
 0x6c7   :  { %2259 = vmatpush1.bf16.msra.mxu0 %v16877_v25  ;;  %2300 = vmatpush1.bf16.msra.mxu1 %v16880_v34 }
 0x6c8   :  { %2260 = vmatprep.subr.bf16.mxu0 %v16883_v27  ;;  %2301 = vmatprep.subr.bf16.mxu1 %v16886_v8 }
 0x6cb   :  { %2261 = vmatpush1.bf16.msra.mxu0 %v16889_v29  ;;  %2302 = vmatpush1.bf16.msra.mxu1 %v18394_v33 }
 0x6cc   :  { %2380 = vmatprep.subr.bf16.mxu0 %v18395_v58  ;;  %2421 = vmatprep.subr.bf16.mxu1 %v16898_v21 }
 0x6ce   :  { %2279 = vmatmul.mubr.bf16.vlgmr.msra.gmra.mrb[44].mxu0 %v2142_v41  ;;  %2320 = vmatmul.mubr.bf16.vlgmr.msra.gmra.mrb[44].mxu1 %v2142_v41  ;;  %v18489_v41 = vld [vmem:[#allocation32_spill] sm:$0xff] }
 0x6cf   :  { %2381 = vmatpush1.bf16.msra.mxu0 %v18396_v59  ;;  %2422 = vmatpush1.bf16.msra.mxu1 %v18397_v60 }
 0x6d0   :  { %2382 = vmatprep.subr.bf16.mxu0 %v18398_v39  ;;  %2423 = vmatprep.subr.bf16.mxu1 %v18399_v42 }
 0x6d3   :  { %2383 = vmatpush1.bf16.msra.mxu0 %v18400_v45  ;;  %2424 = vmatpush1.bf16.msra.mxu1 %v18401_v38 }
 0x6d4   :  { %2384 = vmatprep.subr.bf16.mxu0 %v18402_v47  ;;  %2425 = vmatprep.subr.bf16.mxu1 %v18454_v6 }
 0x6d7   :  { %2385 = vmatpush1.bf16.msra.mxu0 %v18455_v15  ;;  %2426 = vmatpush1.bf16.msra.mxu1 %v18456_v7 }
 0x6d8   :  { %2386 = vmatprep.subr.bf16.mxu0 %v18457_v63  ;;  %2427 = vmatprep.subr.bf16.mxu1 %v18458_v18 }
 0x6db   :  { %2387 = vmatpush1.bf16.msra.mxu0 %v18459_v20  ;;  %2428 = vmatpush1.bf16.msra.mxu1 %v18460_v12 }
 0x6dc   :  { %2388 = vmatprep.subr.bf16.mxu0 %v18461_v13  ;;  %2429 = vmatprep.subr.bf16.mxu1 %v18462_v14 }
 0x6df   :  { %2389 = vmatpush1.bf16.msra.mxu0 %v18463_v1  ;;  %2430 = vmatpush1.bf16.msra.mxu1 %v18464_v17 }
 0x6e0   :  { %2390 = vmatprep.subr.bf16.mxu0 %v18465_v5  ;;  %2431 = vmatprep.subr.bf16.mxu1 %v18466_v11 }
 0x6e3   :  { %2391 = vmatpush1.bf16.msra.mxu0 %v18467_v3  ;;  %2432 = vmatpush1.bf16.msra.mxu1 %v18468_v4 }
 0x6e4   :  { %2392 = vmatprep.subr.bf16.mxu0 %v18469_v2  ;;  %2433 = vmatprep.subr.bf16.mxu1 %v18470_v55 }
 0x6e7   :  { %2393 = vmatpush1.bf16.msra.mxu0 %v18471_v53  ;;  %2434 = vmatpush1.bf16.msra.mxu1 %v18472_v26 }
 0x6e8   :  { %2394 = vmatprep.subr.bf16.mxu0 %v18473_v43  ;;  %2435 = vmatprep.subr.bf16.mxu1 %v18474_v52 }
 0x6eb   :  { %2395 = vmatpush1.bf16.msra.mxu0 %v18475_v49  ;;  %2436 = vmatpush1.bf16.msra.mxu1 %v18476_v50 }
 0x6ec   :  { %2396 = vmatprep.subr.bf16.mxu0 %v18477_v51  ;;  %2437 = vmatprep.subr.bf16.mxu1 %v18478_v48  ;;  %v18511_v48 = vld [vmem:[#allocation70_spill] sm:$0xff] }
 0x6ef   :  { %2397 = vmatpush1.bf16.msra.mxu0 %v18479_v56  ;;  %2438 = vmatpush1.bf16.msra.mxu1 %v18480_v40  ;;  %v18490_v56 = vld [vmem:[#allocation33_spill] sm:$0xff]  ;;  %v18491_v40 = vld [vmem:[#allocation34_spill] sm:$0xff] }
 0x6f0   :  { %2398 = vmatprep.subr.bf16.mxu0 %v18481_v32  ;;  %2439 = vmatprep.subr.bf16.mxu1 %v18482_v61  ;;  %v18492_v32 = vld [vmem:[#allocation35_spill] sm:$0xff]  ;;  %v18493_v61 = vld [vmem:[#allocation36_spill] sm:$0xff] }
 0x6f3   :  { %2399 = vmatpush1.bf16.msra.mxu0 %v18483_v22  ;;  %2440 = vmatpush1.bf16.msra.mxu1 %v18484_v44  ;;  %v18494_v22 = vld [vmem:[#allocation37_spill] sm:$0xff]  ;;  %v18495_v44 = vld [vmem:[#allocation38_spill] sm:$0xff] }
 0x6f4   :  { %2400 = vmatprep.subr.bf16.mxu0 %v18485_v46  ;;  %2441 = vmatprep.subr.bf16.mxu1 %v18486_v54  ;;  %v18496_v46 = vld [vmem:[#allocation39_spill] sm:$0xff]  ;;  %v18497_v54 = vld [vmem:[#allocation77_spill] sm:$0xff] }
 0x6f7   :  { %2401 = vmatpush1.bf16.msra.mxu0 %v18487_v30  ;;  %2442 = vmatpush1.bf16.msra.mxu1 %v18488_v0  ;;  %v18498_v30 = vld [vmem:[#allocation78_spill] sm:$0xff]  ;;  %v18499_v0 = vld [vmem:[#allocation79_spill] sm:$0xff] }
 0x6f8   :  { %2402 = vmatprep.subr.bf16.mxu0 %v18489_v41  ;;  %2443 = vmatprep.subr.bf16.mxu1 %v18490_v56  ;;  %v18500_v41 = vld [vmem:[#allocation80_spill] sm:$0xff]  ;;  %v18501_v56 = vld [vmem:[#allocation81_spill] sm:$0xff] }
 0x6fb   :  { %2403 = vmatpush1.bf16.msra.mxu0 %v18491_v40  ;;  %2444 = vmatpush1.bf16.msra.mxu1 %v18492_v32  ;;  %v18502_v40 = vld [vmem:[#allocation82_spill] sm:$0xff]  ;;  %v18503_v32 = vld [vmem:[#allocation83_spill] sm:$0xff] }
 0x6fc   :  { %2404 = vmatprep.subr.bf16.mxu0 %v18493_v61  ;;  %2445 = vmatprep.subr.bf16.mxu1 %v18494_v22  ;;  %v18504_v61 = vld [vmem:[#allocation84_spill] sm:$0xff]  ;;  %v18505_v22 = vld [vmem:[#allocation85_spill] sm:$0xff] }
 0x6ff   :  { %2405 = vmatpush1.bf16.msra.mxu0 %v18495_v44  ;;  %2446 = vmatpush1.bf16.msra.mxu1 %v18496_v46  ;;  %v18506_v44 = vld [vmem:[#allocation86_spill] sm:$0xff]  ;;  %v18507_v46 = vld [vmem:[#allocation87_spill] sm:$0xff] }
 0x700   :  { %2406 = vmatprep.subr.bf16.mxu0 %v18497_v54  ;;  %2447 = vmatprep.subr.bf16.mxu1 %v18498_v30  ;;  %v18508_v54 = vld [vmem:[#allocation88_spill] sm:$0xff]  ;;  %v18509_v30 = vld [vmem:[#allocation89_spill] sm:$0xff] }
 0x703   :  { %2407 = vmatpush1.bf16.msra.mxu0 %v18499_v0  ;;  %2448 = vmatpush1.bf16.msra.mxu1 %v18500_v41  ;;  %v18510_v0 = vld [vmem:[#allocation90_spill] sm:$0xff] }
 0x704   :  { %2408 = vmatprep.subr.bf16.mxu0 %v18501_v56  ;;  %2449 = vmatprep.subr.bf16.mxu1 %v18502_v40 }
 0x707   :  { %2409 = vmatpush1.bf16.msra.mxu0 %v18503_v32  ;;  %2450 = vmatpush1.bf16.msra.mxu1 %v18504_v61 }
 0x708   :  { %2410 = vmatprep.subr.bf16.mxu0 %v18505_v22  ;;  %2451 = vmatprep.subr.bf16.mxu1 %v18506_v44  ;;  %v18512_v44 = vld [vmem:[#allocation71_spill] sm:$0xff] }
 0x70b   :  { %2411 = vmatpush1.bf16.msra.mxu0 %v18507_v46  ;;  %2452 = vmatpush1.bf16.msra.mxu1 %v18508_v54 }
 0x70c   :  { %2482 = vmatprep.subr.bf16.mxu0 %v18509_v30  ;;  %2523 = vmatprep.subr.bf16.mxu1 %v18510_v0  ;;  %v18513_v30 = vld [vmem:[#allocation72_spill] sm:$0xff] }
 0x781   :  { %v2178_v41 = vpop.f32.mrb[40].mxu0  ;;  %v2219_v56 = vpop.f32.mrb[40].mxu1 }
 0x782   :  { %v2179_v40 = vadd.f32 %v2178_v41, %v18511_v48  ;;  %v2180_v51 = vpop.f32.mrb[41].mxu0  ;;  %v2221_v32 = vpop.f32.mrb[41].mxu1  ;;  %v2220_v41 = vadd.f32 %v2219_v56, %v18347_v62 }
 0x783   :  { %v2182_v50 = vpop.f32.mrb[42].mxu0  ;;  %v2223_v61 = vpop.f32.mrb[42].mxu1  ;;  %v2181_v46 = vadd.f32 %v2180_v51, %v18512_v44  ;;  %v2222_v53 = vadd.f32 %v2221_v32, %v18513_v30 }
 0x784   :  { %v12188_v49 = vmul.f32 -1.442695, %v2179_v40  ;;  %v2183_v22 = vpop.f32.mrb[43].mxu0  ;;  %v2224_v52 = vpop.f32.mrb[43].mxu1 }
 0x785   :  { %v12189_v43 = vmul.f32 -1.442695, %v2181_v46 }
 0x786   :  { %15410 = vpow2.f32 %v12188_v49 }
 0x787   :  { %15412 = vpow2.f32 %v12189_v43 }
 0x790   :  { %v15411_v54 = vpop.eup %15410 }
 0x791   :  { %v2232_v26 = vadd.f32 1.0, %v15411_v54  ;;  %v15413_v0 = vpop.eup %15412 }
 0x792   :  { %v2233_v50 = vadd.f32 1.0, %v15413_v0 }
 0x793   :  { %15414 = vrcp.f32 %v2232_v26 }
 0x79d   :  { %v15415_v55 = vpop.eup %15414 }
 0x79e   :  { %v2238_v48 = vmul.f32 %v15415_v55, %v2222_v53  ;;  %v2245_v53 = vld [vmem:[#allocation2 + $0x5] ss:$8 sm:$0xf] }
 0x7a0   :  { %v2239_v61 = vadd.f32 %v2238_v48, %v2220_v41 }
 0x7a1   :  { %v2280_v40 = vpop.f32.mrb[44].mxu0  ;;  %v2321_v22 = vpop.f32.mrb[44].mxu1 }
 0x7a2   :  { %15416 = vtanh.f32 %v2239_v61  ;;  %v2282_v52 = vpop.f32.mrb[45].mxu0  ;;  %v2323_v49 = vpop.f32.mrb[45].mxu1 }
 0x7a3   :  { %v2332_v51 = vcombine.low %v2280_v40, %v2282_v52  ;;  %v2333_v46 = vcombine.low %v2321_v22, %v2323_v49  ;;  %v2284_v44 = vpop.f32.mrb[46].mxu0  ;;  %v2325_v54 = vpop.f32.mrb[46].mxu1  ;;  %15418 = vrcp.f32 %v2233_v50 }
 0x7a4   :  { %v2285_v26 = vpop.f32.mrb[47].mxu0  ;;  %v2326_v43 = vpop.f32.mrb[47].mxu1 }
 0x7a5   :  { %v2340_v32 = vrot.slane %v2332_v51, %v16400_v36  ;;  %v2347_v30 = vrot.slane %v2333_v46, %v16400_v36 }
 0x7a7   :  { %v2348_v56 = vcombine.low %v2340_v32, %v2347_v30 }
 0x7a9   :  { %v2355_v55 = vrot.slane %v2348_v56, %v16400_v36 }
 0x7ab   :  { %v2357_v48 = vadd.f32 %v2355_v55, %v2245_v53 }
 0x7ac   :  { %v15417_v0 = vpop.eup %15416 }
 0x7ad   :  { %v12190_v41 = vmul.f32 -1.442695, %v2357_v48  ;;  %v2241_v61 = vsub.f32 %v17216_v57, %v15417_v0  ;;  %v15419_v40 = vpop.eup %15418  ;;  %v2365_v49 = vrot.slane %v2357_v48, 3  ;;  %v2368_v54 = vrot.slane %v2357_v48, 2  ;;  %v17346_v48 = vld [vmem:[#allocation11 + $0x24] ss:$16 sps:$4 sm:$0xff]  }
 0x7af   :  { %15420 = vpow2.f32 %v12190_v41  ;;  %v2242_v44 = vmul.f32 %v15419_v40, %v2241_v61  ;;  %v17343_v41 = vld [vmem:[#allocation11 + $0x8] ss:$16 sps:$4 sm:$0xff]   ;;  %v17354_v61 = vld [vmem:[#allocation11 + $0x20] ss:$16 sps:$4 sm:$0xff]  }
 0x7b0   :  { %v17357_v40 = vld [vmem:[#allocation11 + $0x28] ss:$16 sps:$4 sm:$0xff]  }
 0x7b1   :  { %v17331_v22 = vadd.f32 %v15417_v0, %v2242_v44  ;;  %v17340_v0 = vld [vmem:[#allocation11] ss:$16 sps:$4 sm:$0xff]   ;;  %v17360_v44 = vld [vmem:[#allocation11 + $0x44] ss:$16 sps:$4 sm:$0xff]  }
 0x7b3   :  { %v2379_v50 = vpack.c.bf16 %v17331_v22, %v17331_v22 }
 0x7b5   :  { %2412 = vmatprep.mubr.bf16.mxu0 %v2379_v50  ;;  %2453 = vmatprep.mubr.bf16.mxu1 %v2379_v50  ;;  %v17363_v50 = vld [vmem:[#allocation11 + $0x4c] ss:$16 sps:$4 sm:$0xff]  }
 0x7b9   :  { %v15421_v52 = vpop.eup %15420 }
 0x7ba   :  { %v2361_v30 = vadd.f32 1.0, %v15421_v52  ;;  %v17366_v52 = vld [vmem:[#allocation11 + $0x40] ss:$16 sps:$4 sm:$0xff]  }
 0x7bc   :  { %15422 = vrcp.f32 %v2361_v30  ;;  %v17369_v30 = vld [vmem:[#allocation11 + $0x48] ss:$16 sps:$4 sm:$0xff]  }
 0x7c6   :  { %v15423_v51 = vpop.eup %15422 }
 0x7c7   :  { %v2367_v46 = vmul.f32 %v15423_v51, %v2365_v49  ;;  %v2374_v32 = vrot.slane %v15423_v51, 1  ;;  %v17372_v49 = vld [vmem:[#allocation11 + $0x64] ss:$16 sps:$4 sm:$0xff]   ;;  %v17375_v51 = vld [vmem:[#allocation11 + $0x6c] ss:$16 sps:$4 sm:$0xff]  }
 0x7c9   :  { %v2370_v26 = vadd.f32 %v2368_v54, %v2367_v46  ;;  %v17378_v46 = vld [vmem:[#allocation11 + $0x60] ss:$16 sps:$4 sm:$0xff]   ;;  %v17381_v54 = vld [vmem:[#allocation11 + $0x68] ss:$16 sps:$4 sm:$0xff]  }
 0x7cb   :  { %15424 = vtanh.f32 %v2370_v26  ;;  %v17384_v26 = vld [vmem:[#allocation11 + $0x84] ss:$16 sps:$4 sm:$0xff]  }
 0x7d5   :  { %v15425_v57 = vpop.eup %15424 }
 0x7d6   :  { %v2372_v43 = vsub.f32 %v17221_v31, %v15425_v57  ;;  %v17349_v31 = vld [vmem:[#allocation11 + $0x2c] ss:$16 sps:$4 sm:$0xff]  }
 0x7d8   :  { %v2376_v56 = vmul.f32 %v2374_v32, %v2372_v43  ;;  %v18553_v43 = vld [vmem:[#allocation89_spill] sm:$0xff]  ;;  %v18554_v32 = vld [vmem:[#allocation90_spill] sm:$0xff] }
 0x7da   :  { %v17336_v55 = vadd.f32 %v15425_v57, %v2376_v56  ;;  %v17387_v57 = vld [vmem:[#allocation11 + $0x8c] ss:$16 sps:$4 sm:$0xff]  }
 0x7dc   :  { %v2378_v53 = vpack.c.bf16 %v17336_v55, %v17336_v55 }
 0x7de   :  { %2413 = vmatmul.mubr.bf16.vlgmr.msra.gmra.mrb[48].mxu0 %v2378_v53  ;;  %2454 = vmatmul.mubr.bf16.vlgmr.msra.gmra.mrb[48].mxu1 %v2378_v53 }
 0x7df   :  { %2483 = vmatpush1.bf16.msra.mxu0 %v17340_v0  ;;  %2524 = vmatpush1.bf16.msra.mxu1 %v17343_v41 }
 0x7e0   :  { %2484 = vmatprep.subr.bf16.mxu0 %v17346_v48  ;;  %2525 = vmatprep.subr.bf16.mxu1 %v17349_v31 }
 0x7e1   :  { %2514 = vmatprep.mubr.bf16.mxu0 %v18304_v19  ;;  %2555 = vmatprep.mubr.bf16.mxu1 %v18304_v19 }
 0x7e3   :  { %2485 = vmatpush1.bf16.msra.mxu0 %v17354_v61  ;;  %2526 = vmatpush1.bf16.msra.mxu1 %v17357_v40 }
 0x7e4   :  { %2486 = vmatprep.subr.bf16.mxu0 %v17360_v44  ;;  %2527 = vmatprep.subr.bf16.mxu1 %v17363_v50 }
 0x7e7   :  { %2487 = vmatpush1.bf16.msra.mxu0 %v17366_v52  ;;  %2528 = vmatpush1.bf16.msra.mxu1 %v17369_v30 }
 0x7e8   :  { %2488 = vmatprep.subr.bf16.mxu0 %v17372_v49  ;;  %2529 = vmatprep.subr.bf16.mxu1 %v17375_v51 }
 0x7eb   :  { %2489 = vmatpush1.bf16.msra.mxu0 %v17378_v46  ;;  %2530 = vmatpush1.bf16.msra.mxu1 %v17381_v54 }
 0x7ec   :  { %2490 = vmatprep.subr.bf16.mxu0 %v17384_v26  ;;  %2531 = vmatprep.subr.bf16.mxu1 %v17387_v57 }
 0x7ef   :  { %2491 = vmatpush1.bf16.msra.mxu0 %v16853_v16  ;;  %2532 = vmatpush1.bf16.msra.mxu1 %v16856_v9  ;;  %v18514_v16 = vld [vmem:[#allocation56_spill] sm:$0xff]  ;;  %v18515_v9 = vld [vmem:[#allocation57_spill] sm:$0xff] }
 0x7f0   :  { %2492 = vmatprep.subr.bf16.mxu0 %v16859_v35  ;;  %2533 = vmatprep.subr.bf16.mxu1 %v16862_v37  ;;  %v18516_v35 = vld [vmem:[#allocation58_spill] sm:$0xff]  ;;  %v18517_v37 = vld [vmem:[#allocation59_spill] sm:$0xff] }
 0x7f3   :  { %2493 = vmatpush1.bf16.msra.mxu0 %v16865_v24  ;;  %2534 = vmatpush1.bf16.msra.mxu1 %v16868_v10  ;;  %v18518_v24 = vld [vmem:[#allocation60_spill] sm:$0xff]  ;;  %v18519_v10 = vld [vmem:[#allocation61_spill] sm:$0xff] }
 0x7f4   :  { %2494 = vmatprep.subr.bf16.mxu0 %v16871_v28  ;;  %2535 = vmatprep.subr.bf16.mxu1 %v16874_v23  ;;  %v18520_v28 = vld [vmem:[#allocation62_spill] sm:$0xff]  ;;  %v18521_v23 = vld [vmem:[#allocation63_spill] sm:$0xff] }
 0x7f7   :  { %2495 = vmatpush1.bf16.msra.mxu0 %v16877_v25  ;;  %2536 = vmatpush1.bf16.msra.mxu1 %v16880_v34  ;;  %v18522_v25 = vld [vmem:[#allocation64_spill] sm:$0xff]  ;;  %v18523_v34 = vld [vmem:[#allocation65_spill] sm:$0xff] }
 0x7f8   :  { %2496 = vmatprep.subr.bf16.mxu0 %v16883_v27  ;;  %2537 = vmatprep.subr.bf16.mxu1 %v16886_v8  ;;  %v18524_v27 = vld [vmem:[#allocation66_spill] sm:$0xff]  ;;  %v18525_v8 = vld [vmem:[#allocation67_spill] sm:$0xff] }
 0x7fb   :  { %2497 = vmatpush1.bf16.msra.mxu0 %v16889_v29  ;;  %2538 = vmatpush1.bf16.msra.mxu1 %v18394_v33  ;;  %v18526_v29 = vld [vmem:[#allocation68_spill] sm:$0xff]  ;;  %v18528_v33 = vld [vmem:[#allocation74_spill] sm:$0xff] }
 0x7fc   :  { %2616 = vmatprep.subr.bf16.mxu0 %v18395_v58  ;;  %2657 = vmatprep.subr.bf16.mxu1 %v16898_v21  ;;  %v18527_v21 = vld [vmem:[#allocation73_spill] sm:$0xff]  ;;  %v18529_v58 = vld [vmem:[#allocation75_spill] sm:$0xff] }
 0x7fe   :  { %2515 = vmatmul.mubr.bf16.vlgmr.msra.gmra.mrb[52].mxu0 %v2378_v53  ;;  %2556 = vmatmul.mubr.bf16.vlgmr.msra.gmra.mrb[52].mxu1 %v2378_v53 }
 0x7ff   :  { %2617 = vmatpush1.bf16.msra.mxu0 %v18396_v59  ;;  %2658 = vmatpush1.bf16.msra.mxu1 %v18397_v60  ;;  %v18530_v59 = vld [vmem:[#allocation76_spill] sm:$0xff]  ;;  %v18531_v60 = vld [vmem:[#allocation69_spill] sm:$0xff] }
 0x800   :  { %2618 = vmatprep.subr.bf16.mxu0 %v18398_v39  ;;  %2659 = vmatprep.subr.bf16.mxu1 %v18399_v42  ;;  %v18532_v39 = vld [vmem:[#allocation31_spill] sm:$0xff]  ;;  %v18533_v42 = vld [vmem:[#allocation32_spill] sm:$0xff] }
 0x803   :  { %2619 = vmatpush1.bf16.msra.mxu0 %v18400_v45  ;;  %2660 = vmatpush1.bf16.msra.mxu1 %v18401_v38  ;;  %v18534_v45 = vld [vmem:[#allocation33_spill] sm:$0xff]  ;;  %v18535_v38 = vld [vmem:[#allocation34_spill] sm:$0xff] }
 0x804   :  { %2620 = vmatprep.subr.bf16.mxu0 %v18402_v47  ;;  %2661 = vmatprep.subr.bf16.mxu1 %v18454_v6  ;;  %v18536_v47 = vld [vmem:[#allocation35_spill] sm:$0xff]  ;;  %v18537_v6 = vld [vmem:[#allocation36_spill] sm:$0xff] }
 0x807   :  { %2621 = vmatpush1.bf16.msra.mxu0 %v18455_v15  ;;  %2662 = vmatpush1.bf16.msra.mxu1 %v18456_v7  ;;  %v18538_v15 = vld [vmem:[#allocation37_spill] sm:$0xff]  ;;  %v18539_v7 = vld [vmem:[#allocation38_spill] sm:$0xff] }
 0x808   :  { %2622 = vmatprep.subr.bf16.mxu0 %v18457_v63  ;;  %2663 = vmatprep.subr.bf16.mxu1 %v18458_v18  ;;  %v18540_v63 = vld [vmem:[#allocation39_spill] sm:$0xff]  ;;  %v18541_v18 = vld [vmem:[#allocation77_spill] sm:$0xff] }
 0x80b   :  { %2623 = vmatpush1.bf16.msra.mxu0 %v18459_v20  ;;  %2664 = vmatpush1.bf16.msra.mxu1 %v18460_v12  ;;  %v18542_v20 = vld [vmem:[#allocation78_spill] sm:$0xff]  ;;  %v18543_v12 = vld [vmem:[#allocation79_spill] sm:$0xff] }
 0x80c   :  { %2624 = vmatprep.subr.bf16.mxu0 %v18461_v13  ;;  %2665 = vmatprep.subr.bf16.mxu1 %v18462_v14  ;;  %v18544_v13 = vld [vmem:[#allocation80_spill] sm:$0xff]  ;;  %v18545_v14 = vld [vmem:[#allocation81_spill] sm:$0xff] }
 0x80f   :  { %2625 = vmatpush1.bf16.msra.mxu0 %v18463_v1  ;;  %2666 = vmatpush1.bf16.msra.mxu1 %v18464_v17  ;;  %v18546_v1 = vld [vmem:[#allocation82_spill] sm:$0xff]  ;;  %v18547_v17 = vld [vmem:[#allocation83_spill] sm:$0xff] }
 0x810   :  { %2626 = vmatprep.subr.bf16.mxu0 %v18465_v5  ;;  %2667 = vmatprep.subr.bf16.mxu1 %v18466_v11  ;;  %v18548_v5 = vld [vmem:[#allocation84_spill] sm:$0xff]  ;;  %v18549_v11 = vld [vmem:[#allocation85_spill] sm:$0xff] }
 0x813   :  { %2627 = vmatpush1.bf16.msra.mxu0 %v18467_v3  ;;  %2668 = vmatpush1.bf16.msra.mxu1 %v18468_v4  ;;  %v18550_v3 = vld [vmem:[#allocation86_spill] sm:$0xff]  ;;  %v18551_v4 = vld [vmem:[#allocation87_spill] sm:$0xff] }
 0x814   :  { %2628 = vmatprep.subr.bf16.mxu0 %v18469_v2  ;;  %2669 = vmatprep.subr.bf16.mxu1 %v18514_v16  ;;  %v18552_v2 = vld [vmem:[#allocation88_spill] sm:$0xff]  ;;  %v18555_v16 = vld [vmem:[#allocation70_spill] sm:$0xff] }
 0x817   :  { %2629 = vmatpush1.bf16.msra.mxu0 %v18515_v9  ;;  %2670 = vmatpush1.bf16.msra.mxu1 %v18516_v35 }
 0x818   :  { %2630 = vmatprep.subr.bf16.mxu0 %v18517_v37  ;;  %2671 = vmatprep.subr.bf16.mxu1 %v18518_v24 }
 0x81b   :  { %2631 = vmatpush1.bf16.msra.mxu0 %v18519_v10  ;;  %2672 = vmatpush1.bf16.msra.mxu1 %v18520_v28 }
 0x81c   :  { %2632 = vmatprep.subr.bf16.mxu0 %v18521_v23  ;;  %2673 = vmatprep.subr.bf16.mxu1 %v18522_v25 }
 0x81f   :  { %2633 = vmatpush1.bf16.msra.mxu0 %v18523_v34  ;;  %2674 = vmatpush1.bf16.msra.mxu1 %v18524_v27  ;;  %v18556_v34 = vld [vmem:[#allocation71_spill] sm:$0xff] }
 0x820   :  { %2634 = vmatprep.subr.bf16.mxu0 %v18525_v8  ;;  %2675 = vmatprep.subr.bf16.mxu1 %v18526_v29 }
 0x823   :  { %2635 = vmatpush1.bf16.msra.mxu0 %v18527_v21  ;;  %2676 = vmatpush1.bf16.msra.mxu1 %v18528_v33 }
 0x824   :  { %2636 = vmatprep.subr.bf16.mxu0 %v18529_v58  ;;  %2677 = vmatprep.subr.bf16.mxu1 %v18530_v59  ;;  %v18557_v58 = vld [vmem:[#allocation72_spill] sm:$0xff] }
 0x827   :  { %2637 = vmatpush1.bf16.msra.mxu0 %v18531_v60  ;;  %2678 = vmatpush1.bf16.msra.mxu1 %v18532_v39 }
 0x828   :  { %2638 = vmatprep.subr.bf16.mxu0 %v18533_v42  ;;  %2679 = vmatprep.subr.bf16.mxu1 %v18534_v45 }
 0x82b   :  { %2639 = vmatpush1.bf16.msra.mxu0 %v18535_v38  ;;  %2680 = vmatpush1.bf16.msra.mxu1 %v18536_v47 }
 0x82c   :  { %2640 = vmatprep.subr.bf16.mxu0 %v18537_v6  ;;  %2681 = vmatprep.subr.bf16.mxu1 %v18538_v15 }
 0x82f   :  { %2641 = vmatpush1.bf16.msra.mxu0 %v18539_v7  ;;  %2682 = vmatpush1.bf16.msra.mxu1 %v18540_v63 }
 0x830   :  { %2642 = vmatprep.subr.bf16.mxu0 %v18541_v18  ;;  %2683 = vmatprep.subr.bf16.mxu1 %v18542_v20 }
 0x833   :  { %2643 = vmatpush1.bf16.msra.mxu0 %v18543_v12  ;;  %2684 = vmatpush1.bf16.msra.mxu1 %v18544_v13 }
 0x834   :  { %2644 = vmatprep.subr.bf16.mxu0 %v18545_v14  ;;  %2685 = vmatprep.subr.bf16.mxu1 %v18546_v1 }
 0x837   :  { %2645 = vmatpush1.bf16.msra.mxu0 %v18547_v17  ;;  %2686 = vmatpush1.bf16.msra.mxu1 %v18548_v5 }
 0x838   :  { %2646 = vmatprep.subr.bf16.mxu0 %v18549_v11  ;;  %2687 = vmatprep.subr.bf16.mxu1 %v18550_v3 }
 0x83b   :  { %2647 = vmatpush1.bf16.msra.mxu0 %v18551_v4  ;;  %2688 = vmatpush1.bf16.msra.mxu1 %v18552_v2 }
 0x83c   :  { %2718 = vmatprep.subr.bf16.mxu0 %v18553_v43  ;;  %2759 = vmatprep.subr.bf16.mxu1 %v18554_v32 }
 0x8b1   :  { %v2414_v56 = vpop.f32.mrb[48].mxu0  ;;  %v2455_v53 = vpop.f32.mrb[48].mxu1 }
 0x8b2   :  { %v2415_v9 = vadd.f32 %v2414_v56, %v18555_v16  ;;  %v2416_v35 = vpop.f32.mrb[49].mxu0  ;;  %v2457_v37 = vpop.f32.mrb[49].mxu1  ;;  %v2456_v32 = vadd.f32 %v2455_v53, %v18347_v62 }
 0x8b3   :  { %v2418_v24 = vpop.f32.mrb[50].mxu0  ;;  %v2459_v10 = vpop.f32.mrb[50].mxu1  ;;  %v2417_v27 = vadd.f32 %v2416_v35, %v18556_v34  ;;  %v2458_v59 = vadd.f32 %v2457_v37, %v18557_v58 }
 0x8b4   :  { %v12191_v28 = vmul.f32 -1.442695, %v2415_v9  ;;  %v2419_v23 = vpop.f32.mrb[51].mxu0  ;;  %v2460_v25 = vpop.f32.mrb[51].mxu1 }
 0x8b5   :  { %v12192_v8 = vmul.f32 -1.442695, %v2417_v27 }
 0x8b6   :  { %15426 = vpow2.f32 %v12191_v28 }
 0x8b7   :  { %15428 = vpow2.f32 %v12192_v8 }
 0x8c0   :  { %v15427_v29 = vpop.eup %15426 }
 0x8c1   :  { %v2468_v21 = vadd.f32 1.0, %v15427_v29  ;;  %v15429_v33 = vpop.eup %15428 }
 0x8c2   :  { %v2469_v24 = vadd.f32 1.0, %v15429_v33 }
 0x8c3   :  { %15430 = vrcp.f32 %v2468_v21 }
 0x8cd   :  { %v15431_v43 = vpop.eup %15430 }
 0x8ce   :  { %v2474_v56 = vmul.f32 %v15431_v43, %v2458_v59  ;;  %v2481_v59 = vld [vmem:[#allocation2 + $0x6] ss:$8 sm:$0xf] }
 0x8d0   :  { %v2475_v10 = vadd.f32 %v2474_v56, %v2456_v32 }
 0x8d1   :  { %v2516_v9 = vpop.f32.mrb[52].mxu0  ;;  %v2557_v23 = vpop.f32.mrb[52].mxu1 }
 0x8d2   :  { %15432 = vtanh.f32 %v2475_v10  ;;  %v2518_v28 = vpop.f32.mrb[53].mxu0  ;;  %v2559_v25 = vpop.f32.mrb[53].mxu1 }
 0x8d3   :  { %v2568_v35 = vcombine.low %v2516_v9, %v2518_v28  ;;  %v2569_v27 = vcombine.low %v2557_v23, %v2559_v25  ;;  %v2520_v34 = vpop.f32.mrb[54].mxu0  ;;  %v2561_v29 = vpop.f32.mrb[54].mxu1  ;;  %15434 = vrcp.f32 %v2469_v24 }
 0x8d4   :  { %v2521_v8 = vpop.f32.mrb[55].mxu0  ;;  %v2562_v21 = vpop.f32.mrb[55].mxu1 }
 0x8d5   :  { %v2576_v37 = vrot.slane %v2568_v35, %v16400_v36  ;;  %v2583_v58 = vrot.slane %v2569_v27, %v16400_v36 }
 0x8d7   :  { %v2584_v53 = vcombine.low %v2576_v37, %v2583_v58 }
 0x8d9   :  { %v2591_v33 = vrot.slane %v2584_v53, %v16400_v36 }
 0x8db   :  { %v2593_v43 = vadd.f32 %v2591_v33, %v2481_v59 }
 0x8dc   :  { %v15433_v32 = vpop.eup %15432 }
 0x8dd   :  { %v12193_v56 = vmul.f32 -1.442695, %v2593_v43  ;;  %v2477_v10 = vsub.f32 %v17331_v22, %v15433_v32  ;;  %v15435_v9 = vpop.eup %15434  ;;  %v2601_v25 = vrot.slane %v2593_v43, 3  ;;  %v2604_v29 = vrot.slane %v2593_v43, 2  ;;  %v15888_v43 = vld [vmem:[#allocation13 + $0x24] ss:$16 sps:$4 sm:$0xff]  }
 0x8df   :  { %15436 = vpow2.f32 %v12193_v56  ;;  %v2478_v34 = vmul.f32 %v15435_v9, %v2477_v10  ;;  %v15890_v56 = vld [vmem:[#allocation13 + $0x20] ss:$16 sps:$4 sm:$0xff]   ;;  %v15891_v10 = vld [vmem:[#allocation13 + $0x28] ss:$16 sps:$4 sm:$0xff]   ;;  %v15892_v9 = vld [vmem:[#allocation13 + $0x44] ss:$16 sps:$4 sm:$0xff]  }
 0x8e1   :  { %v17478_v23 = vadd.f32 %v15433_v32, %v2478_v34  ;;  %v15889_v32 = vld [vmem:[#allocation13 + $0x2c] ss:$16 sps:$4 sm:$0xff]  }
 0x8e2   :  { %v15893_v34 = vld [vmem:[#allocation13 + $0x4c] ss:$16 sps:$4 sm:$0xff]  }
 0x8e3   :  { %v2615_v24 = vpack.c.bf16 %v17478_v23, %v17478_v23 }
 0x8e5   :  { %2648 = vmatprep.mubr.bf16.mxu0 %v2615_v24  ;;  %2689 = vmatprep.mubr.bf16.mxu1 %v2615_v24  ;;  %v15894_v24 = vld [vmem:[#allocation13 + $0x40] ss:$16 sps:$4 sm:$0xff]  }
 0x8e9   :  { %v15437_v28 = vpop.eup %15436 }
 0x8ea   :  { %v2597_v58 = vadd.f32 1.0, %v15437_v28  ;;  %v15895_v28 = vld [vmem:[#allocation13 + $0x48] ss:$16 sps:$4 sm:$0xff]  }
 0x8ec   :  { %15438 = vrcp.f32 %v2597_v58  ;;  %v15896_v58 = vld [vmem:[#allocation13 + $0x64] ss:$16 sps:$4 sm:$0xff]  }
 0x8f6   :  { %v15439_v35 = vpop.eup %15438 }
 0x8f7   :  { %v2603_v27 = vmul.f32 %v15439_v35, %v2601_v25  ;;  %v2610_v37 = vrot.slane %v15439_v35, 1  ;;  %v15897_v25 = vld [vmem:[#allocation13 + $0x6c] ss:$16 sps:$4 sm:$0xff]   ;;  %v15898_v35 = vld [vmem:[#allocation13 + $0x60] ss:$16 sps:$4 sm:$0xff]  }
 0x8f9   :  { %v2606_v8 = vadd.f32 %v2604_v29, %v2603_v27  ;;  %v15899_v27 = vld [vmem:[#allocation13 + $0x68] ss:$16 sps:$4 sm:$0xff]   ;;  %v15900_v29 = vld [vmem:[#allocation13 + $0x84] ss:$16 sps:$4 sm:$0xff]  }
 0x8fb   :  { %15440 = vtanh.f32 %v2606_v8  ;;  %v15901_v8 = vld [vmem:[#allocation13 + $0x8c] ss:$16 sps:$4 sm:$0xff]  }
 0x905   :  { %v15441_v22 = vpop.eup %15440 }
 0x906   :  { %v2608_v21 = vsub.f32 %v17336_v55, %v15441_v22  ;;  %v15871_v55 = vld [vmem:[#allocation11 + $0x88] ss:$16 sps:$4 sm:$0xff]  }
 0x908   :  { %v2612_v53 = vmul.f32 %v2610_v37, %v2608_v21  ;;  %v15903_v21 = vld [vmem:[#allocation13 + $0x88] ss:$16 sps:$4 sm:$0xff]   ;;  %v15904_v37 = vld [vmem:[#allocation13 + $0xa4] ss:$16 sps:$4 sm:$0xff]  }
 0x90a   :  { %v17483_v33 = vadd.f32 %v15441_v22, %v2612_v53  ;;  %v15902_v22 = vld [vmem:[#allocation13 + $0x80] ss:$16 sps:$4 sm:$0xff]   ;;  %v15905_v53 = vld [vmem:[#allocation13 + $0xac] ss:$16 sps:$4 sm:$0xff]  }
 0x90c   :  { %v2614_v59 = vpack.c.bf16 %v17483_v33, %v17483_v33 }
 0x90e   :  { %2649 = vmatmul.mubr.bf16.vlgmr.msra.gmra.mrb[56].mxu0 %v2614_v59  ;;  %2690 = vmatmul.mubr.bf16.vlgmr.msra.gmra.mrb[56].mxu1 %v2614_v59 }
 0x90f   :  { %2719 = vmatpush1.bf16.msra.mxu0 %v17340_v0  ;;  %2760 = vmatpush1.bf16.msra.mxu1 %v17343_v41  ;;  %v15872_v0 = vld [vmem:[#allocation11 + $0xa4] ss:$16 sps:$4 sm:$0xff]   ;;  %v15873_v41 = vld [vmem:[#allocation11 + $0xac] ss:$16 sps:$4 sm:$0xff]  }
 0x910   :  { %2720 = vmatprep.subr.bf16.mxu0 %v17346_v48  ;;  %2761 = vmatprep.subr.bf16.mxu1 %v17349_v31  ;;  %v15874_v48 = vld [vmem:[#allocation11 + $0xa0] ss:$16 sps:$4 sm:$0xff]   ;;  %v15875_v31 = vld [vmem:[#allocation11 + $0xa8] ss:$16 sps:$4 sm:$0xff]  }
 0x911   :  { %2750 = vmatprep.mubr.bf16.mxu0 %v18304_v19  ;;  %2791 = vmatprep.mubr.bf16.mxu1 %v18304_v19  ;;  %v15870_v19 = vld [vmem:[#allocation11 + $0x80] ss:$16 sps:$4 sm:$0xff]  }
 0x913   :  { %2721 = vmatpush1.bf16.msra.mxu0 %v17354_v61  ;;  %2762 = vmatpush1.bf16.msra.mxu1 %v17357_v40  ;;  %v15876_v61 = vld [vmem:[#allocation11 + $0xc4] ss:$16 sps:$4 sm:$0xff]   ;;  %v15877_v40 = vld [vmem:[#allocation11 + $0xcc] ss:$16 sps:$4 sm:$0xff]  }
 0x914   :  { %2722 = vmatprep.subr.bf16.mxu0 %v17360_v44  ;;  %2763 = vmatprep.subr.bf16.mxu1 %v17363_v50  ;;  %v15878_v44 = vld [vmem:[#allocation11 + $0xc0] ss:$16 sps:$4 sm:$0xff]   ;;  %v15879_v50 = vld [vmem:[#allocation11 + $0xc8] ss:$16 sps:$4 sm:$0xff]  }
 0x917   :  { %2723 = vmatpush1.bf16.msra.mxu0 %v17366_v52  ;;  %2764 = vmatpush1.bf16.msra.mxu1 %v17369_v30  ;;  %v15880_v52 = vld [vmem:[#allocation11 + $0xe4] ss:$16 sps:$4 sm:$0xff]   ;;  %v15881_v30 = vld [vmem:[#allocation11 + $0xec] ss:$16 sps:$4 sm:$0xff]  }
 0x918   :  { %2724 = vmatprep.subr.bf16.mxu0 %v17372_v49  ;;  %2765 = vmatprep.subr.bf16.mxu1 %v17375_v51  ;;  %v15882_v49 = vld [vmem:[#allocation11 + $0xe0] ss:$16 sps:$4 sm:$0xff]   ;;  %v15883_v51 = vld [vmem:[#allocation11 + $0xe8] ss:$16 sps:$4 sm:$0xff]  }
 0x91b   :  { %2725 = vmatpush1.bf16.msra.mxu0 %v17378_v46  ;;  %2766 = vmatpush1.bf16.msra.mxu1 %v17381_v54  ;;  %v15884_v46 = vld [vmem:[#allocation13 + $0x4] ss:$16 sps:$4 sm:$0xff]   ;;  %v15885_v54 = vld [vmem:[#allocation13 + $0xc] ss:$16 sps:$4 sm:$0xff]  }
 0x91c   :  { %2726 = vmatprep.subr.bf16.mxu0 %v17384_v26  ;;  %2767 = vmatprep.subr.bf16.mxu1 %v17387_v57  ;;  %v15886_v26 = vld [vmem:[#allocation13] ss:$16 sps:$4 sm:$0xff]   ;;  %v15887_v57 = vld [vmem:[#allocation13 + $0x8] ss:$16 sps:$4 sm:$0xff]  }
 0x91f   :  { %2727 = vmatpush1.bf16.msra.mxu0 %v15870_v19  ;;  %2768 = vmatpush1.bf16.msra.mxu1 %v15871_v55  ;;  %v15907_v19 = vld [vmem:[#allocation13 + $0xa8] ss:$16 sps:$4 sm:$0xff]   ;;  %v15908_v55 = vld [vmem:[#allocation13 + $0xc4] ss:$16 sps:$4 sm:$0xff]  }
 0x920   :  { %2728 = vmatprep.subr.bf16.mxu0 %v15872_v0  ;;  %2769 = vmatprep.subr.bf16.mxu1 %v15873_v41  ;;  %v15909_v0 = vld [vmem:[#allocation13 + $0xcc] ss:$16 sps:$4 sm:$0xff]   ;;  %v15910_v41 = vld [vmem:[#allocation13 + $0xc0] ss:$16 sps:$4 sm:$0xff]  }
 0x923   :  { %2729 = vmatpush1.bf16.msra.mxu0 %v15874_v48  ;;  %2770 = vmatpush1.bf16.msra.mxu1 %v15875_v31  ;;  %v15911_v48 = vld [vmem:[#allocation13 + $0xc8] ss:$16 sps:$4 sm:$0xff]   ;;  %v15912_v31 = vld [vmem:[#allocation13 + $0xe4] ss:$16 sps:$4 sm:$0xff]  }
 0x924   :  { %2730 = vmatprep.subr.bf16.mxu0 %v15876_v61  ;;  %2771 = vmatprep.subr.bf16.mxu1 %v15877_v40  ;;  %v15913_v61 = vld [vmem:[#allocation13 + $0xec] ss:$16 sps:$4 sm:$0xff]   ;;  %v15914_v40 = vld [vmem:[#allocation13 + $0xe0] ss:$16 sps:$4 sm:$0xff]  }
 0x927   :  { %2731 = vmatpush1.bf16.msra.mxu0 %v15878_v44  ;;  %2772 = vmatpush1.bf16.msra.mxu1 %v15879_v50  ;;  %v15915_v44 = vld [vmem:[#allocation13 + $0xe8] ss:$16 sps:$4 sm:$0xff]   ;;  %v15916_v50 = vld [vmem:[#allocation13 + $0x104] ss:$16 sps:$4 sm:$0xff]  }
 0x928   :  { %2732 = vmatprep.subr.bf16.mxu0 %v15880_v52  ;;  %2773 = vmatprep.subr.bf16.mxu1 %v15881_v30  ;;  %v15917_v52 = vld [vmem:[#allocation13 + $0x10c] ss:$16 sps:$4 sm:$0xff]   ;;  %v15918_v30 = vld [vmem:[#allocation13 + $0x100] ss:$16 sps:$4 sm:$0xff]  }
 0x92b   :  { %2733 = vmatpush1.bf16.msra.mxu0 %v15882_v49  ;;  %2774 = vmatpush1.bf16.msra.mxu1 %v15883_v51  ;;  %v15919_v49 = vld [vmem:[#allocation13 + $0x108] ss:$16 sps:$4 sm:$0xff]   ;;  %v15920_v51 = vld [vmem:[#allocation13 + $0x124] ss:$16 sps:$4 sm:$0xff]  }
 0x92c   :  { %2852 = vmatprep.subr.bf16.mxu0 %v15884_v46  ;;  %2893 = vmatprep.subr.bf16.mxu1 %v15885_v54  ;;  %v15921_v46 = vld [vmem:[#allocation13 + $0x12c] ss:$16 sps:$4 sm:$0xff]   ;;  %v15922_v54 = vld [vmem:[#allocation13 + $0x120] ss:$16 sps:$4 sm:$0xff]  }
 0x92e   :  { %2751 = vmatmul.mubr.bf16.vlgmr.msra.gmra.mrb[60].mxu0 %v2614_v59  ;;  %2792 = vmatmul.mubr.bf16.vlgmr.msra.gmra.mrb[60].mxu1 %v2614_v59  ;;  %v15906_v59 = vld [vmem:[#allocation13 + $0xa0] ss:$16 sps:$4 sm:$0xff]  }
 0x92f   :  { %2853 = vmatpush1.bf16.msra.mxu0 %v15886_v26  ;;  %2894 = vmatpush1.bf16.msra.mxu1 %v15887_v57  ;;  %v15923_v26 = vld [vmem:[#allocation13 + $0x128] ss:$16 sps:$4 sm:$0xff]   ;;  %v15924_v57 = vld [vmem:[#allocation13 + $0x144] ss:$16 sps:$4 sm:$0xff]  }
 0x930   :  { %2854 = vmatprep.subr.bf16.mxu0 %v15888_v43  ;;  %2895 = vmatprep.subr.bf16.mxu1 %v15889_v32  ;;  %v15925_v43 = vld [vmem:[#allocation13 + $0x14c] ss:$16 sps:$4 sm:$0xff]  }
 0x933   :  { %2855 = vmatpush1.bf16.msra.mxu0 %v15890_v56  ;;  %2896 = vmatpush1.bf16.msra.mxu1 %v15891_v10 }
 0x934   :  { %2856 = vmatprep.subr.bf16.mxu0 %v15892_v9  ;;  %2897 = vmatprep.subr.bf16.mxu1 %v15893_v34 }
 0x937   :  { %2857 = vmatpush1.bf16.msra.mxu0 %v15894_v24  ;;  %2898 = vmatpush1.bf16.msra.mxu1 %v15895_v28 }
 0x938   :  { %2858 = vmatprep.subr.bf16.mxu0 %v15896_v58  ;;  %2899 = vmatprep.subr.bf16.mxu1 %v15897_v25 }
 0x93b   :  { %2859 = vmatpush1.bf16.msra.mxu0 %v15898_v35  ;;  %2900 = vmatpush1.bf16.msra.mxu1 %v15899_v27 }
 0x93c   :  { %2860 = vmatprep.subr.bf16.mxu0 %v15900_v29  ;;  %2901 = vmatprep.subr.bf16.mxu1 %v15901_v8 }
 0x93f   :  { %2861 = vmatpush1.bf16.msra.mxu0 %v15902_v22  ;;  %2902 = vmatpush1.bf16.msra.mxu1 %v15903_v21 }
 0x940   :  { %2862 = vmatprep.subr.bf16.mxu0 %v15904_v37  ;;  %2903 = vmatprep.subr.bf16.mxu1 %v15905_v53 }
 0x943   :  { %2863 = vmatpush1.bf16.msra.mxu0 %v15906_v59  ;;  %2904 = vmatpush1.bf16.msra.mxu1 %v15907_v19  ;;  %v2717_v59 = vld [vmem:[#allocation2 + $0x7] ss:$8 sm:$0xf] }
 0x944   :  { %2864 = vmatprep.subr.bf16.mxu0 %v15908_v55  ;;  %2905 = vmatprep.subr.bf16.mxu1 %v15909_v0 }
 0x947   :  { %2865 = vmatpush1.bf16.msra.mxu0 %v15910_v41  ;;  %2906 = vmatpush1.bf16.msra.mxu1 %v15911_v48 }
 0x948   :  { %2866 = vmatprep.subr.bf16.mxu0 %v15912_v31  ;;  %2907 = vmatprep.subr.bf16.mxu1 %v15913_v61 }
 0x94b   :  { %2867 = vmatpush1.bf16.msra.mxu0 %v15914_v40  ;;  %2908 = vmatpush1.bf16.msra.mxu1 %v15915_v44 }
 0x94c   :  { %2868 = vmatprep.subr.bf16.mxu0 %v15916_v50  ;;  %2909 = vmatprep.subr.bf16.mxu1 %v15917_v52 }
 0x94f   :  { %2869 = vmatpush1.bf16.msra.mxu0 %v15918_v30  ;;  %2910 = vmatpush1.bf16.msra.mxu1 %v15919_v49 }
 0x950   :  { %2870 = vmatprep.subr.bf16.mxu0 %v15920_v51  ;;  %2911 = vmatprep.subr.bf16.mxu1 %v15921_v46 }
 0x953   :  { %2871 = vmatpush1.bf16.msra.mxu0 %v15922_v54  ;;  %2912 = vmatpush1.bf16.msra.mxu1 %v15923_v26 }
 0x954   :  { %2872 = vmatprep.subr.bf16.mxu0 %v15924_v57  ;;  %2913 = vmatprep.subr.bf16.mxu1 %v15925_v43  ;;  %v13776_v43 = vld [vmem:[#allocation14] ss:$16 sps:$4 sm:$0xff]  }
 0x957   :  { %2873 = vmatpush1.bf16.msra.mxu0 %v18531_v60  ;;  %2914 = vmatpush1.bf16.msra.mxu1 %v18532_v39  ;;  %v13778_v60 = vld [vmem:[#allocation14 + $0x4] ss:$16 sps:$4 sm:$0xff]   ;;  %v17527_v39 = vld [vmem:[#allocation14 + $0xc] ss:$16 sps:$4 sm:$0xff]  }
 0x958   :  { %2874 = vmatprep.subr.bf16.mxu0 %v18533_v42  ;;  %2915 = vmatprep.subr.bf16.mxu1 %v18534_v45 }
 0x95b   :  { %2875 = vmatpush1.bf16.msra.mxu0 %v18535_v38  ;;  %2916 = vmatpush1.bf16.msra.mxu1 %v18536_v47 }
 0x95c   :  { %2876 = vmatprep.subr.bf16.mxu0 %v18537_v6  ;;  %2917 = vmatprep.subr.bf16.mxu1 %v18538_v15 }
 0x95f   :  { %2877 = vmatpush1.bf16.msra.mxu0 %v18539_v7  ;;  %2918 = vmatpush1.bf16.msra.mxu1 %v18540_v63 }
 0x960   :  { %2878 = vmatprep.subr.bf16.mxu0 %v18541_v18  ;;  %2919 = vmatprep.subr.bf16.mxu1 %v18542_v20 }
 0x963   :  { %2879 = vmatpush1.bf16.msra.mxu0 %v18543_v12  ;;  %2920 = vmatpush1.bf16.msra.mxu1 %v18544_v13  ;;  %v18558_v12 = vld [vmem:[#allocation71_spill] sm:$0xff] }
 0x964   :  { %2880 = vmatprep.subr.bf16.mxu0 %v18545_v14  ;;  %2921 = vmatprep.subr.bf16.mxu1 %v18546_v1 }
 0x967   :  { %2881 = vmatpush1.bf16.msra.mxu0 %v18547_v17  ;;  %2922 = vmatpush1.bf16.msra.mxu1 %v18548_v5 }
 0x968   :  { %2882 = vmatprep.subr.bf16.mxu0 %v18549_v11  ;;  %2923 = vmatprep.subr.bf16.mxu1 %v18550_v3  ;;  %v18559_v11 = vld [vmem:[#allocation72_spill] sm:$0xff] }
 0x96b   :  { %2883 = vmatpush1.bf16.msra.mxu0 %v18551_v4  ;;  %2924 = vmatpush1.bf16.msra.mxu1 %v18552_v2 }
 0x96c   :  { %3361 = vmatprep.subr.bf16.mxu0 %v13778_v60  ;;  %3402 = vmatprep.subr.bf16.mxu1 %v17527_v39 }
 0x9e1   :  { %v2650_v42 = vpop.f32.mrb[56].mxu0  ;;  %v2691_v45 = vpop.f32.mrb[56].mxu1 }
 0x9e2   :  { %v2651_v38 = vadd.f32 %v2650_v42, %v18555_v16  ;;  %v2652_v47 = vpop.f32.mrb[57].mxu0  ;;  %v2693_v6 = vpop.f32.mrb[57].mxu1  ;;  %v2692_v2 = vadd.f32 %v2691_v45, %v18347_v62  ;;  %v13781_v42 = vld [vmem:[#allocation14 + $0x24] ss:$16 sps:$4 sm:$0xff]   ;;  %v17547_v45 = vld [vmem:[#allocation14 + $0x8] ss:$16 sps:$4 sm:$0xff]  }
 0x9e3   :  { %v2654_v15 = vpop.f32.mrb[58].mxu0  ;;  %v2695_v7 = vpop.f32.mrb[58].mxu1  ;;  %v2653_v13 = vadd.f32 %v2652_v47, %v18558_v12  ;;  %v2694_v3 = vadd.f32 %v2693_v6, %v18559_v11  ;;  %v13779_v47 = vld [vmem:[#allocation14 + $0x20] ss:$16 sps:$4 sm:$0xff]   ;;  %v17552_v6 = vld [vmem:[#allocation14 + $0x28] ss:$16 sps:$4 sm:$0xff]  }
 0x9e4   :  { %v12194_v63 = vmul.f32 -1.442695, %v2651_v38  ;;  %v2655_v18 = vpop.f32.mrb[59].mxu0  ;;  %v2696_v20 = vpop.f32.mrb[59].mxu1  ;;  %v17549_v38 = vld [vmem:[#allocation14 + $0x2c] ss:$16 sps:$4 sm:$0xff]  }
 0x9e5   :  { %v12195_v14 = vmul.f32 -1.442695, %v2653_v13  ;;  %v17555_v15 = vld [vmem:[#allocation14 + $0x4c] ss:$16 sps:$4 sm:$0xff]   ;;  %v13782_v7 = vld [vmem:[#allocation14 + $0x40] ss:$16 sps:$4 sm:$0xff]  }
 0x9e6   :  { %15442 = vpow2.f32 %v12194_v63  ;;  %v13787_v63 = vld [vmem:[#allocation14 + $0x64] ss:$16 sps:$4 sm:$0xff]   ;;  %v17558_v18 = vld [vmem:[#allocation14 + $0x48] ss:$16 sps:$4 sm:$0xff]   ;;  %v17561_v20 = vld [vmem:[#allocation14 + $0x6c] ss:$16 sps:$4 sm:$0xff]  }
 0x9e7   :  { %15444 = vpow2.f32 %v12195_v14  ;;  %v13785_v13 = vld [vmem:[#allocation14 + $0x60] ss:$16 sps:$4 sm:$0xff]   ;;  %v13790_v14 = vld [vmem:[#allocation14 + $0x84] ss:$16 sps:$4 sm:$0xff]  }
 0x9f0   :  { %v15443_v1 = vpop.eup %15442 }
 0x9f1   :  { %v2704_v17 = vadd.f32 1.0, %v15443_v1  ;;  %v15445_v5 = vpop.eup %15444  ;;  %v17564_v1 = vld [vmem:[#allocation14 + $0x68] ss:$16 sps:$4 sm:$0xff]  }
 0x9f2   :  { %v2705_v56 = vadd.f32 1.0, %v15445_v5  ;;  %v13788_v5 = vld [vmem:[#allocation14 + $0x80] ss:$16 sps:$4 sm:$0xff]  }
 0x9f3   :  { %15446 = vrcp.f32 %v2704_v17  ;;  %v17567_v17 = vld [vmem:[#allocation14 + $0x8c] ss:$16 sps:$4 sm:$0xff]  }
 0x9fd   :  { %v15447_v4 = vpop.eup %15446 }
 0x9fe   :  { %v2710_v32 = vmul.f32 %v15447_v4, %v2694_v3  ;;  %v13793_v3 = vld [vmem:[#allocation14 + $0xa4] ss:$16 sps:$4 sm:$0xff]   ;;  %v17570_v4 = vld [vmem:[#allocation14 + $0x88] ss:$16 sps:$4 sm:$0xff]  }
 0xa00   :  { %v2711_v10 = vadd.f32 %v2710_v32, %v2692_v2  ;;  %v17573_v2 = vld [vmem:[#allocation14 + $0xac] ss:$16 sps:$4 sm:$0xff]   ;;  %v13791_v32 = vld [vmem:[#allocation14 + $0xa0] ss:$16 sps:$4 sm:$0xff]  }
 0xa01   :  { %v2752_v9 = vpop.f32.mrb[60].mxu0  ;;  %v2793_v34 = vpop.f32.mrb[60].mxu1 }
 0xa02   :  { %15448 = vtanh.f32 %v2711_v10  ;;  %v2754_v24 = vpop.f32.mrb[61].mxu0  ;;  %v2795_v28 = vpop.f32.mrb[61].mxu1  ;;  %v17576_v10 = vld [vmem:[#allocation14 + $0xa8] ss:$16 sps:$4 sm:$0xff]  }
 0xa03   :  { %v2804_v58 = vcombine.low %v2752_v9, %v2754_v24  ;;  %v2805_v25 = vcombine.low %v2793_v34, %v2795_v28  ;;  %v2756_v35 = vpop.f32.mrb[62].mxu0  ;;  %v2797_v27 = vpop.f32.mrb[62].mxu1  ;;  %15450 = vrcp.f32 %v2705_v56  ;;  %v13799_v56 = vld [vmem:[#allocation14 + $0xc4] ss:$16 sps:$4 sm:$0xff]   ;;  %v17579_v9 = vld [vmem:[#allocation14 + $0xcc] ss:$16 sps:$4 sm:$0xff]  }
 0xa04   :  { %v2757_v29 = vpop.f32.mrb[63].mxu0  ;;  %v2798_v8 = vpop.f32.mrb[63].mxu1  ;;  %v13797_v34 = vld [vmem:[#allocation14 + $0xc0] ss:$16 sps:$4 sm:$0xff]   ;;  %v13805_v24 = vld [vmem:[#allocation14 + $0xe4] ss:$16 sps:$4 sm:$0xff]  }
 0xa05   :  { %v2812_v22 = vrot.slane %v2804_v58, %v16400_v36  ;;  %v2819_v21 = vrot.slane %v2805_v25, %v16400_v36  ;;  %v17582_v28 = vld [vmem:[#allocation14 + $0xc8] ss:$16 sps:$4 sm:$0xff]   ;;  %v17585_v58 = vld [vmem:[#allocation14 + $0xec] ss:$16 sps:$4 sm:$0xff]   ;;  %v13803_v25 = vld [vmem:[#allocation14 + $0xe0] ss:$16 sps:$4 sm:$0xff]  }
 0xa06   :  { %v13811_v35 = vld [vmem:[#allocation14 + $0x104] ss:$16 sps:$4 sm:$0xff]   ;;  %v17588_v27 = vld [vmem:[#allocation14 + $0xe8] ss:$16 sps:$4 sm:$0xff]   ;;  %v17591_v29 = vld [vmem:[#allocation14 + $0x10c] ss:$16 sps:$4 sm:$0xff]  }
 0xa07   :  { %v2820_v37 = vcombine.low %v2812_v22, %v2819_v21  ;;  %v13809_v8 = vld [vmem:[#allocation14 + $0x100] ss:$16 sps:$4 sm:$0xff]   ;;  %v13817_v22 = vld [vmem:[#allocation14 + $0x124] ss:$16 sps:$4 sm:$0xff]   ;;  %v17594_v21 = vld [vmem:[#allocation14 + $0x108] ss:$16 sps:$4 sm:$0xff]  }
 0xa09   :  { %v2827_v53 = vrot.slane %v2820_v37, %v16400_v36  ;;  %v17597_v37 = vld [vmem:[#allocation14 + $0x12c] ss:$16 sps:$4 sm:$0xff]  }
 0xa0b   :  { %v2829_v19 = vadd.f32 %v2827_v53, %v2717_v59  ;;  %v13815_v53 = vld [vmem:[#allocation14 + $0x120] ss:$16 sps:$4 sm:$0xff]   ;;  %v13823_v59 = vld [vmem:[#allocation14 + $0x144] ss:$16 sps:$4 sm:$0xff]  }
 0xa0c   :  { %v15449_v55 = vpop.eup %15448 }
 0xa0d   :  { %v12196_v0 = vmul.f32 -1.442695, %v2829_v19  ;;  %v2713_v41 = vsub.f32 %v17478_v23, %v15449_v55  ;;  %v15451_v48 = vpop.eup %15450  ;;  %v2837_v36 = vrot.slane %v2829_v19, 3  ;;  %v2840_v49 = vrot.slane %v2829_v19, 2  ;;  %v17600_v19 = vld [vmem:[#allocation14 + $0x128] ss:$16 sps:$4 sm:$0xff]  }
 0xa0f   :  { %15452 = vpow2.f32 %v12196_v0  ;;  %v2714_v31 = vmul.f32 %v15451_v48, %v2713_v41  ;;  %v13821_v0 = vld [vmem:[#allocation14 + $0x140] ss:$16 sps:$4 sm:$0xff]   ;;  %v13829_v41 = vld [vmem:[#allocation14 + $0x164] ss:$16 sps:$4 sm:$0xff]   ;;  %v17606_v48 = vld [vmem:[#allocation14 + $0x148] ss:$16 sps:$4 sm:$0xff]  }
 0xa11   :  { %v17538_v61 = vadd.f32 %v15449_v55, %v2714_v31  ;;  %v17603_v55 = vld [vmem:[#allocation14 + $0x14c] ss:$16 sps:$4 sm:$0xff]  }
 0xa12   :  { %v17609_v31 = vld [vmem:[#allocation14 + $0x16c] ss:$16 sps:$4 sm:$0xff]  }
 0xa13   :  { %v2851_v40 = vpack.c.bf16 %v17538_v61, %v17538_v61 }
 0xa15   :  { %2884 = vmatprep.mubr.bf16.mxu0 %v2851_v40  ;;  %2925 = vmatprep.mubr.bf16.mxu1 %v2851_v40  ;;  %v13827_v40 = vld [vmem:[#allocation14 + $0x160] ss:$16 sps:$4 sm:$0xff]  }
 0xa19   :  { %v15453_v44 = vpop.eup %15452 }
 0xa1a   :  { %v2833_v50 = vadd.f32 1.0, %v15453_v44  ;;  %v13835_v44 = vld [vmem:[#allocation14 + $0x184] ss:$16 sps:$4 sm:$0xff]  }
 0xa1c   :  { %15454 = vrcp.f32 %v2833_v50  ;;  %v17612_v50 = vld [vmem:[#allocation14 + $0x168] ss:$16 sps:$4 sm:$0xff]  }
 0xa26   :  { %v15455_v52 = vpop.eup %15454 }
 0xa27   :  { %v2839_v30 = vmul.f32 %v15455_v52, %v2837_v36  ;;  %v2846_v54 = vrot.slane %v15455_v52, 1  ;;  %v13862_v36 = vld [vmem:[#allocation14 + $0x18c] ss:$16 sps:$4 sm:$0xff]   ;;  %v13833_v52 = vld [vmem:[#allocation14 + $0x180] ss:$16 sps:$4 sm:$0xff]  }
 0xa29   :  { %v2842_v51 = vadd.f32 %v2840_v49, %v2839_v30  ;;  %v13841_v30 = vld [vmem:[#allocation14 + $0x1a4] ss:$16 sps:$4 sm:$0xff]   ;;  %v13860_v49 = vld [vmem:[#allocation14 + $0x188] ss:$16 sps:$4 sm:$0xff]  }
 0xa2b   :  { %15456 = vtanh.f32 %v2842_v51  ;;  %v13865_v51 = vld [vmem:[#allocation14 + $0x1ac] ss:$16 sps:$4 sm:$0xff]  }
 0xa35   :  { %v15457_v23 = vpop.eup %15456 }
 0xa36   :  { %v2844_v46 = vsub.f32 %v17483_v33, %v15457_v23  ;;  %v13784_v33 = vld [vmem:[#allocation14 + $0x44] ss:$16 sps:$4 sm:$0xff]  }
 0xa38   :  { %v2848_v26 = vmul.f32 %v2846_v54, %v2844_v46  ;;  %v13847_v46 = vld [vmem:[#allocation14 + $0x1c4] ss:$16 sps:$4 sm:$0xff]   ;;  %v13863_v54 = vld [vmem:[#allocation14 + $0x1a8] ss:$16 sps:$4 sm:$0xff]  }
 0xa3a   :  { %v17543_v57 = vadd.f32 %v15457_v23, %v2848_v26  ;;  %v13839_v23 = vld [vmem:[#allocation14 + $0x1a0] ss:$16 sps:$4 sm:$0xff]   ;;  %v13868_v26 = vld [vmem:[#allocation14 + $0x1cc] ss:$16 sps:$4 sm:$0xff]  }
 0xa3c   :  { %v2850_v60 = vpack.c.bf16 %v17543_v57, %v17543_v57 }
 0xa3e   :  { %2885 = vmatmul.mubr.bf16.vlgmr.msra.gmra.mrb[64].mxu0 %v2850_v60  ;;  %2926 = vmatmul.mubr.bf16.vlgmr.msra.gmra.mrb[64].mxu1 %v2850_v60 }
 0xa3f   :  { %3362 = vmatpush1.bf16.msra.mxu0 %v13776_v43  ;;  %3393 = vmatprep.mubr.bf16.mxu0 %v2850_v60  ;;  %v13845_v43 = vld [vmem:[#allocation14 + $0x1c0] ss:$16 sps:$4 sm:$0xff]  }
 0xa40   :  { %3434 = vmatprep.mubr.bf16.mxu1 %v2850_v60  ;;  %3363 = vmatprep.subr.bf16.mxu0 %v13781_v42  ;;  %v2952_v60 = vld [vmem:[#allocation8] sm:$0x1]  ;;  %v13853_v42 = vld [vmem:[#allocation14 + $0x1e4] ss:$16 sps:$4 sm:$0xff]  }
 0xa41   :  { %3403 = vmatpush1.bf16.msra.mxu1 %v17547_v45 }
 0xa42   :  { %3404 = vmatprep.subr.bf16.mxu1 %v17549_v38 }
 0xa43   :  { %3364 = vmatpush1.bf16.msra.mxu0 %v13779_v47  ;;  %v13866_v47 = vld [vmem:[#allocation14 + $0x1c8] ss:$16 sps:$4 sm:$0xff]  }
 0xa44   :  { %3365 = vmatprep.subr.bf16.mxu0 %v13784_v33  ;;  %v2953_v33 = vmax.f32 %v2952_v60, 0.0  ;;  %v13908_v60 = vld [vmem:[#allocation16 + $0xc0] ss:$16 sps:$4 sm:$0xff]  }
 0xa45   :  { %3405 = vmatpush1.bf16.msra.mxu1 %v17552_v6 }
 0xa46   :  { %3406 = vmatprep.subr.bf16.mxu1 %v17555_v15 }
 0xa47   :  { %3366 = vmatpush1.bf16.msra.mxu0 %v13782_v7  ;;  %v13871_v7 = vld [vmem:[#allocation14 + $0x1ec] ss:$16 sps:$4 sm:$0xff]  }
 0xa48   :  { %3367 = vmatprep.subr.bf16.mxu0 %v13787_v63  ;;  %v13851_v63 = vld [vmem:[#allocation14 + $0x1e0] ss:$16 sps:$4 sm:$0xff]  }
 0xa49   :  { %3407 = vmatpush1.bf16.msra.mxu1 %v17558_v18 }
 0xa4a   :  { %3408 = vmatprep.subr.bf16.mxu1 %v17561_v20 }
 0xa4b   :  { %3368 = vmatpush1.bf16.msra.mxu0 %v13785_v13  ;;  %v13869_v13 = vld [vmem:[#allocation14 + $0x1e8] ss:$16 sps:$4 sm:$0xff]  }
 0xa4c   :  { %3369 = vmatprep.subr.bf16.mxu0 %v13790_v14  ;;  %v2954_v14 = vpack.c.bf16 %v2953_v33, %v2953_v33  ;;  %v13919_v33 = vld [vmem:[#allocation16 + $0xec] ss:$16 sps:$4 sm:$0xff]  }
 0xa4d   :  { %3409 = vmatpush1.bf16.msra.mxu1 %v17564_v1 }
 0xa4e   :  { %3410 = vmatprep.subr.bf16.mxu1 %v17567_v17 }
 0xa4f   :  { %3370 = vmatpush1.bf16.msra.mxu0 %v13788_v5  ;;  %v13872_v5 = vld [vmem:[#allocation16] ss:$16 sps:$4 sm:$0xff]  }
 0xa50   :  { %3371 = vmatprep.subr.bf16.mxu0 %v13793_v3  ;;  %v13874_v3 = vld [vmem:[#allocation16 + $0x4] ss:$16 sps:$4 sm:$0xff]  }
 0xa51   :  { %3411 = vmatpush1.bf16.msra.mxu1 %v17570_v4 }
 0xa52   :  { %3412 = vmatprep.subr.bf16.mxu1 %v17573_v2 }
 0xa53   :  { %3372 = vmatpush1.bf16.msra.mxu0 %v13791_v32  ;;  %v13875_v32 = vld [vmem:[#allocation16 + $0x8] ss:$16 sps:$4 sm:$0xff]  }
 0xa54   :  { %3373 = vmatprep.subr.bf16.mxu0 %v13799_v56  ;;  %v13877_v56 = vld [vmem:[#allocation16 + $0xc] ss:$16 sps:$4 sm:$0xff]  }
 0xa55   :  { %3413 = vmatpush1.bf16.msra.mxu1 %v17576_v10 }
 0xa56   :  { %3414 = vmatprep.subr.bf16.mxu1 %v17579_v9 }
 0xa57   :  { %3374 = vmatpush1.bf16.msra.mxu0 %v13797_v34  ;;  %v13878_v34 = vld [vmem:[#allocation16 + $0x20] ss:$16 sps:$4 sm:$0xff]  }
 0xa58   :  { %3375 = vmatprep.subr.bf16.mxu0 %v13805_v24  ;;  %v13880_v24 = vld [vmem:[#allocation16 + $0x24] ss:$16 sps:$4 sm:$0xff]  }
 0xa59   :  { %3415 = vmatpush1.bf16.msra.mxu1 %v17582_v28 }
 0xa5a   :  { %3416 = vmatprep.subr.bf16.mxu1 %v17585_v58 }
 0xa5b   :  { %3376 = vmatpush1.bf16.msra.mxu0 %v13803_v25  ;;  %v13881_v25 = vld [vmem:[#allocation16 + $0x28] ss:$16 sps:$4 sm:$0xff]  }
 0xa5c   :  { %3377 = vmatprep.subr.bf16.mxu0 %v13811_v35  ;;  %v13883_v35 = vld [vmem:[#allocation16 + $0x2c] ss:$16 sps:$4 sm:$0xff]  }
 0xa5d   :  { %3417 = vmatpush1.bf16.msra.mxu1 %v17588_v27 }
 0xa5e   :  { %3418 = vmatprep.subr.bf16.mxu1 %v17591_v29 }
 0xa5f   :  { %3378 = vmatpush1.bf16.msra.mxu0 %v13809_v8  ;;  %v13886_v8 = vld [vmem:[#allocation16 + $0x44] ss:$16 sps:$4 sm:$0xff]  }
 0xa60   :  { %3379 = vmatprep.subr.bf16.mxu0 %v13817_v22  ;;  %v13889_v22 = vld [vmem:[#allocation16 + $0x4c] ss:$16 sps:$4 sm:$0xff]  }
 0xa61   :  { %3419 = vmatpush1.bf16.msra.mxu1 %v17594_v21 }
 0xa62   :  { %3420 = vmatprep.subr.bf16.mxu1 %v17597_v37 }
 0xa63   :  { %3380 = vmatpush1.bf16.msra.mxu0 %v13815_v53  ;;  %v13884_v53 = vld [vmem:[#allocation16 + $0x40] ss:$16 sps:$4 sm:$0xff]  }
 0xa64   :  { %3381 = vmatprep.subr.bf16.mxu0 %v13823_v59  ;;  %v13887_v59 = vld [vmem:[#allocation16 + $0x48] ss:$16 sps:$4 sm:$0xff]  }
 0xa65   :  { %3421 = vmatpush1.bf16.msra.mxu1 %v17600_v19 }
 0xa66   :  { %3422 = vmatprep.subr.bf16.mxu1 %v17603_v55 }
 0xa67   :  { %3382 = vmatpush1.bf16.msra.mxu0 %v13821_v0  ;;  %v13892_v0 = vld [vmem:[#allocation16 + $0x64] ss:$16 sps:$4 sm:$0xff]  }
 0xa68   :  { %3383 = vmatprep.subr.bf16.mxu0 %v13829_v41  ;;  %v13895_v41 = vld [vmem:[#allocation16 + $0x6c] ss:$16 sps:$4 sm:$0xff]  }
 0xa69   :  { %3423 = vmatpush1.bf16.msra.mxu1 %v17606_v48 }
 0xa6a   :  { %3424 = vmatprep.subr.bf16.mxu1 %v17609_v31 }
 0xa6b   :  { %3384 = vmatpush1.bf16.msra.mxu0 %v13827_v40  ;;  %v13890_v40 = vld [vmem:[#allocation16 + $0x60] ss:$16 sps:$4 sm:$0xff]  }
 0xa6c   :  { %3385 = vmatprep.subr.bf16.mxu0 %v13835_v44  ;;  %v13893_v44 = vld [vmem:[#allocation16 + $0x68] ss:$16 sps:$4 sm:$0xff]  }
 0xa6d   :  { %3425 = vmatpush1.bf16.msra.mxu1 %v17612_v50 }
 0xa6e   :  { %3426 = vmatprep.subr.bf16.mxu1 %v13862_v36  ;;  %v13898_v36 = vld [vmem:[#allocation16 + $0x84] ss:$16 sps:$4 sm:$0xff]  }
 0xa6f   :  { %3386 = vmatpush1.bf16.msra.mxu0 %v13833_v52  ;;  %v13901_v52 = vld [vmem:[#allocation16 + $0x8c] ss:$16 sps:$4 sm:$0xff]  }
 0xa70   :  { %3387 = vmatprep.subr.bf16.mxu0 %v13841_v30  ;;  %v13896_v30 = vld [vmem:[#allocation16 + $0x80] ss:$16 sps:$4 sm:$0xff]  }
 0xa71   :  { %3427 = vmatpush1.bf16.msra.mxu1 %v13860_v49  ;;  %v13899_v49 = vld [vmem:[#allocation16 + $0x88] ss:$16 sps:$4 sm:$0xff]  }
 0xa72   :  { %3428 = vmatprep.subr.bf16.mxu1 %v13865_v51  ;;  %v13904_v51 = vld [vmem:[#allocation16 + $0xa4] ss:$16 sps:$4 sm:$0xff]  }
 0xa73   :  { %3388 = vmatpush1.bf16.msra.mxu0 %v13839_v23  ;;  %v13907_v23 = vld [vmem:[#allocation16 + $0xac] ss:$16 sps:$4 sm:$0xff]  }
 0xa74   :  { %3389 = vmatprep.subr.bf16.mxu0 %v13847_v46  ;;  %v13902_v46 = vld [vmem:[#allocation16 + $0xa0] ss:$16 sps:$4 sm:$0xff]  }
 0xa75   :  { %3429 = vmatpush1.bf16.msra.mxu1 %v13863_v54  ;;  %v13905_v54 = vld [vmem:[#allocation16 + $0xa8] ss:$16 sps:$4 sm:$0xff]  }
 0xa76   :  { %3430 = vmatprep.subr.bf16.mxu1 %v13868_v26  ;;  %v13910_v26 = vld [vmem:[#allocation16 + $0xc4] ss:$16 sps:$4 sm:$0xff]  }
 0xa77   :  { %3390 = vmatpush1.bf16.msra.mxu0 %v13845_v43  ;;  %v13913_v43 = vld [vmem:[#allocation16 + $0xcc] ss:$16 sps:$4 sm:$0xff]  }
 0xa78   :  { %3391 = vmatprep.subr.bf16.mxu0 %v13853_v42  ;;  %v13911_v42 = vld [vmem:[#allocation16 + $0xc8] ss:$16 sps:$4 sm:$0xff]  }
 0xa79   :  { %3431 = vmatpush1.bf16.msra.mxu1 %v13866_v47  ;;  %v13916_v47 = vld [vmem:[#allocation16 + $0xe4] ss:$16 sps:$4 sm:$0xff]  }
 0xa7a   :  { %3432 = vmatprep.subr.bf16.mxu1 %v13871_v7  ;;  %v13914_v7 = vld [vmem:[#allocation16 + $0xe0] ss:$16 sps:$4 sm:$0xff]  }
 0xa7b   :  { %3392 = vmatpush1.bf16.msra.mxu0 %v13851_v63  ;;  %v13917_v63 = vld [vmem:[#allocation16 + $0xe8] ss:$16 sps:$4 sm:$0xff]  }
 0xa7c   :  { %3869 = vmatprep.subr.bf16.mxu0 %v13874_v3  ;;  %v13923_v3 = vld [vmem:[#allocation16 + $0x108] ss:$16 sps:$4 sm:$0xff]  }
 0xa7d   :  { %3433 = vmatpush1.bf16.msra.mxu1 %v13869_v13  ;;  %v13922_v13 = vld [vmem:[#allocation16 + $0x104] ss:$16 sps:$4 sm:$0xff]  }
 0xa7e   :  { %3394 = vmatmul.mubr.bf16.vlgmr.msra.gmra.mrb[68].mxu0 %v2954_v14  ;;  %3910 = vmatprep.subr.bf16.mxu1 %v13877_v56  ;;  %v13931_v56 = vld [vmem:[#allocation16 + $0x12c] ss:$16 sps:$4 sm:$0xff]  }
 0xa7f   :  { %3870 = vmatpush1.bf16.msra.mxu0 %v13872_v5  ;;  %v13920_v5 = vld [vmem:[#allocation16 + $0x100] ss:$16 sps:$4 sm:$0xff]  }
 0xa80   :  { %3435 = vmatmul.mubr.bf16.vlgmr.msra.gmra.mrb[68].mxu1 %v2954_v14  ;;  %3871 = vmatprep.subr.bf16.mxu0 %v13880_v24  ;;  %v13925_v14 = vld [vmem:[#allocation16 + $0x10c] ss:$16 sps:$4 sm:$0xff]   ;;  %v13929_v24 = vld [vmem:[#allocation16 + $0x128] ss:$16 sps:$4 sm:$0xff]  }
 0xa81   :  { %3911 = vmatpush1.bf16.msra.mxu1 %v13875_v32  ;;  %v13928_v32 = vld [vmem:[#allocation16 + $0x124] ss:$16 sps:$4 sm:$0xff]  }
 0xa82   :  { %3912 = vmatprep.subr.bf16.mxu1 %v13883_v35  ;;  %v13937_v35 = vld [vmem:[#allocation16 + $0x14c] ss:$16 sps:$4 sm:$0xff]  }
 0xa83   :  { %3872 = vmatpush1.bf16.msra.mxu0 %v13878_v34  ;;  %v13926_v34 = vld [vmem:[#allocation16 + $0x120] ss:$16 sps:$4 sm:$0xff]  }
 0xa84   :  { %3873 = vmatprep.subr.bf16.mxu0 %v13886_v8  ;;  %v13932_v8 = vld [vmem:[#allocation16 + $0x140] ss:$16 sps:$4 sm:$0xff]  }
 0xa85   :  { %3913 = vmatpush1.bf16.msra.mxu1 %v13881_v25  ;;  %v13934_v25 = vld [vmem:[#allocation16 + $0x144] ss:$16 sps:$4 sm:$0xff]  }
 0xa86   :  { %3914 = vmatprep.subr.bf16.mxu1 %v13889_v22  ;;  %v13935_v22 = vld [vmem:[#allocation16 + $0x148] ss:$16 sps:$4 sm:$0xff]  }
 0xa87   :  { %3874 = vmatpush1.bf16.msra.mxu0 %v13884_v53  ;;  %v13940_v53 = vld [vmem:[#allocation16 + $0x164] ss:$16 sps:$4 sm:$0xff]  }
 0xa88   :  { %3875 = vmatprep.subr.bf16.mxu0 %v13892_v0  ;;  %v13938_v0 = vld [vmem:[#allocation16 + $0x160] ss:$16 sps:$4 sm:$0xff]  }
 0xa89   :  { %3915 = vmatpush1.bf16.msra.mxu1 %v13887_v59  ;;  %v13943_v59 = vld [vmem:[#allocation16 + $0x16c] ss:$16 sps:$4 sm:$0xff]  }
 0xa8a   :  { %3916 = vmatprep.subr.bf16.mxu1 %v13895_v41  ;;  %v13941_v41 = vld [vmem:[#allocation16 + $0x168] ss:$16 sps:$4 sm:$0xff]  }
 0xa8b   :  { %3876 = vmatpush1.bf16.msra.mxu0 %v13890_v40  ;;  %v13944_v40 = vld [vmem:[#allocation16 + $0x180] ss:$16 sps:$4 sm:$0xff]  }
 0xa8c   :  { %3877 = vmatprep.subr.bf16.mxu0 %v13898_v36  ;;  %v13947_v36 = vld [vmem:[#allocation16 + $0x188] ss:$16 sps:$4 sm:$0xff]  }
 0xa8d   :  { %3917 = vmatpush1.bf16.msra.mxu1 %v13893_v44  ;;  %v13946_v44 = vld [vmem:[#allocation16 + $0x184] ss:$16 sps:$4 sm:$0xff]  }
 0xa8e   :  { %3918 = vmatprep.subr.bf16.mxu1 %v13901_v52  ;;  %v13949_v52 = vld [vmem:[#allocation16 + $0x18c] ss:$16 sps:$4 sm:$0xff]  }
 0xa8f   :  { %3878 = vmatpush1.bf16.msra.mxu0 %v13896_v30  ;;  %v13952_v30 = vld [vmem:[#allocation16 + $0x1a4] ss:$16 sps:$4 sm:$0xff]  }
 0xa90   :  { %3879 = vmatprep.subr.bf16.mxu0 %v13904_v51  ;;  %v13950_v51 = vld [vmem:[#allocation16 + $0x1a0] ss:$16 sps:$4 sm:$0xff]  }
 0xa91   :  { %3919 = vmatpush1.bf16.msra.mxu1 %v13899_v49  ;;  %v13955_v49 = vld [vmem:[#allocation16 + $0x1ac] ss:$16 sps:$4 sm:$0xff]  }
 0xa92   :  { %3920 = vmatprep.subr.bf16.mxu1 %v13907_v23  ;;  %v13953_v23 = vld [vmem:[#allocation16 + $0x1a8] ss:$16 sps:$4 sm:$0xff]  }
 0xa93   :  { %3880 = vmatpush1.bf16.msra.mxu0 %v13902_v46  ;;  %v13958_v46 = vld [vmem:[#allocation16 + $0x1c4] ss:$16 sps:$4 sm:$0xff]  }
 0xa94   :  { %3881 = vmatprep.subr.bf16.mxu0 %v13910_v26  ;;  %v13956_v26 = vld [vmem:[#allocation16 + $0x1c0] ss:$16 sps:$4 sm:$0xff]  }
 0xa95   :  { %3921 = vmatpush1.bf16.msra.mxu1 %v13905_v54  ;;  %v13961_v54 = vld [vmem:[#allocation16 + $0x1cc] ss:$16 sps:$4 sm:$0xff]  }
 0xa96   :  { %3922 = vmatprep.subr.bf16.mxu1 %v13913_v43  ;;  %v13959_v43 = vld [vmem:[#allocation16 + $0x1c8] ss:$16 sps:$4 sm:$0xff]  }
 0xa97   :  { %3882 = vmatpush1.bf16.msra.mxu0 %v13908_v60  ;;  %v13964_v60 = vld [vmem:[#allocation16 + $0x1e4] ss:$16 sps:$4 sm:$0xff]  }
 0xa98   :  { %3883 = vmatprep.subr.bf16.mxu0 %v13916_v47  ;;  %v13962_v47 = vld [vmem:[#allocation16 + $0x1e0] ss:$16 sps:$4 sm:$0xff]  }
 0xa99   :  { %3923 = vmatpush1.bf16.msra.mxu1 %v13911_v42  ;;  %v13967_v42 = vld [vmem:[#allocation16 + $0x1ec] ss:$16 sps:$4 sm:$0xff]  }
 0xa9a   :  { %3924 = vmatprep.subr.bf16.mxu1 %v13919_v33  ;;  %v13965_v33 = vld [vmem:[#allocation16 + $0x1e8] ss:$16 sps:$4 sm:$0xff]  }
 0xa9b   :  { %3884 = vmatpush1.bf16.msra.mxu0 %v13914_v7 }
 0xa9c   :  { %3885 = vmatprep.subr.bf16.mxu0 %v13922_v13 }
 0xa9d   :  { %3925 = vmatpush1.bf16.msra.mxu1 %v13917_v63 }
 0xa9e   :  { %3926 = vmatprep.subr.bf16.mxu1 %v13925_v14 }
 0xa9f   :  { %3886 = vmatpush1.bf16.msra.mxu0 %v13920_v5 }
 0xaa0   :  { %3887 = vmatprep.subr.bf16.mxu0 %v13928_v32 }
 0xaa1   :  { %3927 = vmatpush1.bf16.msra.mxu1 %v13923_v3 }
 0xaa2   :  { %3928 = vmatprep.subr.bf16.mxu1 %v13931_v56 }
 0xaa3   :  { %3888 = vmatpush1.bf16.msra.mxu0 %v13926_v34 }
 0xaa4   :  { %3889 = vmatprep.subr.bf16.mxu0 %v13934_v25 }
 0xaa5   :  { %3929 = vmatpush1.bf16.msra.mxu1 %v13929_v24 }
 0xaa6   :  { %3930 = vmatprep.subr.bf16.mxu1 %v13937_v35 }
 0xaa7   :  { %3890 = vmatpush1.bf16.msra.mxu0 %v13932_v8 }
 0xaa8   :  { %3891 = vmatprep.subr.bf16.mxu0 %v13940_v53 }
 0xaa9   :  { %3931 = vmatpush1.bf16.msra.mxu1 %v13935_v22 }
 0xaaa   :  { %3932 = vmatprep.subr.bf16.mxu1 %v13943_v59 }
 0xaab   :  { %3892 = vmatpush1.bf16.msra.mxu0 %v13938_v0 }
 0xaac   :  { %3893 = vmatprep.subr.bf16.mxu0 %v13946_v44 }
 0xaad   :  { %3933 = vmatpush1.bf16.msra.mxu1 %v13941_v41 }
 0xaae   :  { %3934 = vmatprep.subr.bf16.mxu1 %v13949_v52 }
 0xaaf   :  { %3894 = vmatpush1.bf16.msra.mxu0 %v13944_v40 }
 0xab0   :  { %3895 = vmatprep.subr.bf16.mxu0 %v13952_v30 }
 0xab1   :  { %3935 = vmatpush1.bf16.msra.mxu1 %v13947_v36 }
 0xab2   :  { %3936 = vmatprep.subr.bf16.mxu1 %v13955_v49 }
 0xab3   :  { %3896 = vmatpush1.bf16.msra.mxu0 %v13950_v51 }
 0xab4   :  { %3897 = vmatprep.subr.bf16.mxu0 %v13958_v46 }
 0xab5   :  { %3937 = vmatpush1.bf16.msra.mxu1 %v13953_v23 }
 0xab6   :  { %3938 = vmatprep.subr.bf16.mxu1 %v13961_v54 }
 0xab7   :  { %3898 = vmatpush1.bf16.msra.mxu0 %v13956_v26 }
 0xab8   :  { %3899 = vmatprep.subr.bf16.mxu0 %v13964_v60 }
 0xab9   :  { %3939 = vmatpush1.bf16.msra.mxu1 %v13959_v43 }
 0xaba   :  { %3940 = vmatprep.subr.bf16.mxu1 %v13967_v42 }
 0xabb   :  { %3900 = vmatpush1.bf16.msra.mxu0 %v13962_v47 }
 0xabd   :  { %3941 = vmatpush1.bf16.msra.mxu1 %v13965_v33 }
 0xb11   :  { %v2886_v7 = vpop.f32.mrb[64].mxu0  ;;  %v2927_v63 = vpop.f32.mrb[64].mxu1 }
 0xb12   :  { %v2887_v13 = vadd.f32 %v2886_v7, %v18555_v16  ;;  %v2888_v14 = vpop.f32.mrb[65].mxu0  ;;  %v2929_v5 = vpop.f32.mrb[65].mxu1  ;;  %v2928_v16 = vadd.f32 %v2927_v63, %v18347_v62  ;;  %v3019_v62 = vld [vmem:[%s18035_s9] sm:$0xf]  ;;  %v18561_v7 = vld [vmem:[#allocation29_spill] sm:$0xff] }
 0xb13   :  { %v2890_v3 = vpop.f32.mrb[66].mxu0  ;;  %v2931_v32 = vpop.f32.mrb[66].mxu1  ;;  %v2889_v25 = vadd.f32 %v2888_v14, %v18558_v12  ;;  %v2930_v59 = vadd.f32 %v2929_v5, %v18559_v11  ;;  %v18560_v11 = vld [vmem:[#allocation27_spill] sm:$0xff]  ;;  %v3348_v63 = vrot.slane %v3019_v62, %v18561_v7 }
 0xb14   :  { %v12197_v56 = vmul.f32 -1.442695, %v2887_v13  ;;  %v2891_v34 = vpop.f32.mrb[67].mxu0  ;;  %v2932_v24 = vpop.f32.mrb[67].mxu1  ;;  %v3344_v23 = vrot.slane %v3019_v62, %v18560_v11 }
 0xb15   :  { %v12198_v35 = vmul.f32 -1.442695, %v2889_v25  ;;  %v18563_v24 = vld [vmem:[#allocation28_spill] sm:$0xff] }
 0xb16   :  { %15458 = vpow2.f32 %v12197_v56  ;;  %v18562_v56 = vld [vmem:[#allocation30_spill] sm:$0xff]  ;;  %v3352_v25 = vrot.slane %v3019_v62, %v18563_v24 }
 0xb17   :  { %15460 = vpow2.f32 %v12198_v35  ;;  %v3356_v34 = vrot.slane %v3019_v62, %v18562_v56  ;;  %v13970_v62 = vld [vmem:[#allocation17 + $0x10] sm:$0xff]  }
 0xb20   :  { %v15459_v8 = vpop.eup %15458 }
 0xb21   :  { %v2940_v22 = vadd.f32 1.0, %v15459_v8  ;;  %v15461_v53 = vpop.eup %15460 }
 0xb22   :  { %v2941_v40 = vadd.f32 1.0, %v15461_v53 }
 0xb23   :  { %15462 = vrcp.f32 %v2940_v22 }
 0xb2d   :  { %v15463_v0 = vpop.eup %15462 }
 0xb2e   :  { %v2946_v41 = vmul.f32 %v15463_v0, %v2930_v59 }
 0xb30   :  { %v2947_v44 = vadd.f32 %v2946_v41, %v2928_v16 }
 0xb32   :  { %15464 = vtanh.f32 %v2947_v44 }
 0xb33   :  { %15466 = vrcp.f32 %v2941_v40 }
 0xb3c   :  { %v15465_v36 = vpop.eup %15464 }
 0xb3d   :  { %v2949_v52 = vsub.f32 %v17538_v61, %v15465_v36  ;;  %v15467_v12 = vpop.eup %15466 }
 0xb3f   :  { %v2950_v30 = vmul.f32 %v15467_v12, %v2949_v52 }
 0xb41   :  { %v17621_v49 = vadd.f32 %v15465_v36, %v2950_v30  ;;  %v13968_v30 = vld [vmem:[#allocation17] sm:$0xff]  }
 0xb43   :  { %v3462_v51 = vpack.c.bf16 %v17621_v49, %v17621_v49 }
 0xb45   :  { %3901 = vmatprep.mubr.bf16.mxu0 %v3462_v51  ;;  %3942 = vmatprep.mubr.bf16.mxu1 %v3462_v51  ;;  %v16164_v51 = vmov 0.0  }
 0xb46   :  { %13405 = vmatprep.subr.bf16.mxu0 %v16164_v51 }
 0xb51   :  { %v3395_v46 = vpop.f32.mrb[68].mxu0 }
 0xb52   :  { %v3396_v54 = vadd.f32 %v3395_v46, %v3344_v23  ;;  %v3397_v26 = vpop.f32.mrb[69].mxu0  ;;  %v13971_v23 = vld [vmem:[#allocation17 + $0x18] sm:$0xff]   ;;  %v13972_v46 = vld [vmem:[#allocation17 + $0x20] sm:$0xff]  }
 0xb53   :  { %v3399_v43 = vpop.f32.mrb[70].mxu0  ;;  %v3436_v61 = vpop.f32.mrb[68].mxu1  ;;  %v3398_v14 = vadd.f32 %v3397_v26, %v3348_v63  ;;  %v13974_v26 = vld [vmem:[#allocation17 + $0x30] sm:$0xff]  }
 0xb54   :  { %v12263_v60 = vmul.f32 -1.442695, %v3396_v54  ;;  %v3400_v42 = vpop.f32.mrb[71].mxu0  ;;  %v3438_v47 = vpop.f32.mrb[69].mxu1  ;;  %v3437_v53 = vadd.f32 %v3436_v61, %v3352_v25  ;;  %v13973_v54 = vld [vmem:[#allocation17 + $0x28] sm:$0xff]   ;;  %v13975_v43 = vld [vmem:[#allocation17 + $0x38] sm:$0xff]  }
 0xb55   :  { %v3440_v33 = vpop.f32.mrb[70].mxu1  ;;  %v12264_v5 = vmul.f32 -1.442695, %v3398_v14  ;;  %v3439_v35 = vadd.f32 %v3438_v47, %v3356_v34  ;;  %v13976_v61 = vld [vmem:[#allocation14] ss:$16 sps:$4 sm:$0xff]  }
 0xb56   :  { %15468 = vpow2.f32 %v12263_v60  ;;  %v3441_v13 = vpop.f32.mrb[71].mxu1  ;;  %v13978_v60 = vld [vmem:[#allocation14 + $0x4] ss:$16 sps:$4 sm:$0xff]   ;;  %v13979_v47 = vld [vmem:[#allocation14 + $0x20] ss:$16 sps:$4 sm:$0xff]  }
 0xb57   :  { %15470 = vpow2.f32 %v12264_v5  ;;  %v13981_v42 = vld [vmem:[#allocation14 + $0x24] ss:$16 sps:$4 sm:$0xff]   ;;  %4497 = vmatprep.subr.bf16.mxu1 %v13978_v60  ;;  %v13982_v63 = vld [vmem:[#allocation14 + $0x40] ss:$16 sps:$4 sm:$0xff]  }
 0xb58   :  { %v13984_v33 = vld [vmem:[#allocation14 + $0x44] ss:$16 sps:$4 sm:$0xff]   ;;  %v13985_v14 = vld [vmem:[#allocation14 + $0x60] ss:$16 sps:$4 sm:$0xff]  }
 0xb59   :  { %v13987_v13 = vld [vmem:[#allocation14 + $0x64] ss:$16 sps:$4 sm:$0xff]   ;;  %v13994_v25 = vld [vmem:[#allocation14 + $0xc0] ss:$16 sps:$4 sm:$0xff]  }
 0xb5a   :  { %v13990_v5 = vld [vmem:[#allocation14 + $0x84] ss:$16 sps:$4 sm:$0xff]  }
 0xb5b   :  { %v13996_v34 = vld [vmem:[#allocation14 + $0xc4] ss:$16 sps:$4 sm:$0xff]  }
 0xb60   :  { %v15469_v3 = vpop.eup %15468 }
 0xb61   :  { %v3449_v32 = vadd.f32 1.0, %v15469_v3  ;;  %v15471_v8 = vpop.eup %15470  ;;  %v13988_v3 = vld [vmem:[#allocation14 + $0x80] ss:$16 sps:$4 sm:$0xff]  }
 0xb62   :  { %v3450_v0 = vadd.f32 1.0, %v15471_v8  ;;  %v13997_v8 = vld [vmem:[#allocation14 + $0xe0] ss:$16 sps:$4 sm:$0xff]  }
 0xb63   :  { %15472 = vrcp.f32 %v3449_v32  ;;  %v13991_v32 = vld [vmem:[#allocation14 + $0xa0] ss:$16 sps:$4 sm:$0xff]  }
 0xb6d   :  { %v15473_v22 = vpop.eup %15472 }
 0xb6e   :  { %v3455_v59 = vmul.f32 %v15473_v22, %v3439_v35  ;;  %v13999_v35 = vld [vmem:[#allocation14 + $0xe4] ss:$16 sps:$4 sm:$0xff]   ;;  %v3527_v22 = vld [vmem:[%s18037_s11] sm:$0xf] }
 0xb6f   :  { %v3860_v60 = vrot.slane %v3527_v22, %v18563_v24 }
 0xb70   :  { %v3456_v16 = vadd.f32 %v3455_v59, %v3437_v53  ;;  %v3852_v53 = vrot.slane %v3527_v22, %v18560_v11 }
 0xb72   :  { %15474 = vtanh.f32 %v3456_v16 }
 0xb73   :  { %15476 = vrcp.f32 %v3450_v0 }
 0xb7c   :  { %v15475_v41 = vpop.eup %15474 }
 0xb7d   :  { %v3458_v40 = vsub.f32 %v17543_v57, %v15475_v41  ;;  %v15477_v44 = vpop.eup %15476  ;;  %v13969_v57 = vld [vmem:[#allocation17 + $0x8] sm:$0xff]  }
 0xb7f   :  { %v3459_v36 = vmul.f32 %v15477_v44, %v3458_v40 }
 0xb81   :  { %v17633_v52 = vadd.f32 %v15475_v41, %v3459_v36 }
 0xb83   :  { %v17637_v12 = vpack.c.bf16 %v17633_v52, %v17633_v52 }
 0xb85   :  { %3902 = vmatmul.mubr.bf16.vlgmr.msra.gmra.mrb[72].mxu0 %v17637_v12  ;;  %3943 = vmatmul.mubr.bf16.vlgmr.msra.gmra.mrb[72].mxu1 %v17637_v12 }
 0xb86   :  { %4529 = vmatprep.mubr.bf16.mxu1 %v17637_v12  ;;  %13406 = vmatpush3.bf16.msra.mxu0 %v13968_v30 }
 0xb87   :  { %13407 = vmatprep.subr.bf16.mxu0 %v16164_v51  ;;  %13421 = vmatprep.mubr.msk.bf16.mxu0 %vm16165_vm0, %v16164_v51 }
 0xb88   :  { %4498 = vmatpush1.bf16.msra.mxu1 %v13976_v61  ;;  %v3864_v61 = vrot.slane %v3527_v22, %v18562_v56 }
 0xb89   :  { %4499 = vmatprep.subr.bf16.mxu1 %v13981_v42 }
 0xb8a   :  { %13408 = vmatpush3.bf16.msra.mxu0 %v13969_v57 }
 0xb8b   :  { %13409 = vmatprep.subr.bf16.mxu0 %v16164_v51 }
 0xb8c   :  { %4500 = vmatpush1.bf16.msra.mxu1 %v13979_v47 }
 0xb8d   :  { %4501 = vmatprep.subr.bf16.mxu1 %v13984_v33 }
 0xb8e   :  { %13410 = vmatpush3.bf16.msra.mxu0 %v13970_v62 }
 0xb8f   :  { %13411 = vmatprep.subr.bf16.mxu0 %v16164_v51 }
 0xb90   :  { %4502 = vmatpush1.bf16.msra.mxu1 %v13982_v63 }
 0xb91   :  { %4503 = vmatprep.subr.bf16.mxu1 %v13987_v13 }
 0xb92   :  { %13412 = vmatpush3.bf16.msra.mxu0 %v13971_v23  ;;  %v3856_v23 = vrot.slane %v3527_v22, %v18561_v7  ;;  %v3986_v22 = vld [vmem:[%s18039_s13] sm:$0x1] }
 0xb93   :  { %13413 = vmatprep.subr.bf16.mxu0 %v16164_v51 }
 0xb94   :  { %4504 = vmatpush1.bf16.msra.mxu1 %v13985_v14 }
 0xb95   :  { %4505 = vmatprep.subr.bf16.mxu1 %v13990_v5 }
 0xb96   :  { %13414 = vmatpush3.bf16.msra.mxu0 %v13972_v46 }
 0xb97   :  { %13415 = vmatprep.subr.bf16.mxu0 %v16164_v51 }
 0xb98   :  { %4506 = vmatpush1.bf16.msra.mxu1 %v13988_v3 }
 0xb9a   :  { %13416 = vmatpush3.bf16.msra.mxu0 %v13973_v54 }
 0xb9b   :  { %13417 = vmatprep.subr.bf16.mxu0 %v16164_v51 }
 0xb9e   :  { %13418 = vmatpush3.bf16.msra.mxu0 %v13974_v26 }
 0xb9f   :  { %13419 = vmatprep.subr.bf16.mxu0 %v16164_v51 }
 0xba2   :  { %13420 = vmatpush3.bf16.msra.mxu0 %v13975_v43 }
 0xba3   :  { %4538 = vmatprep.subr.bf16.mxu0 %v17527_v39  ;;  %v13993_v39 = vld [vmem:[#allocation14 + $0xa4] ss:$16 sps:$4 sm:$0xff]  }
 0xba4   :  { %4507 = vmatprep.subr.bf16.mxu1 %v13993_v39 }
 0xba5   :  { %4508 = vmatpush1.bf16.msra.mxu1 %v13991_v32 }
 0xba6   :  { %4509 = vmatprep.subr.bf16.mxu1 %v13996_v34 }
 0xba9   :  { %4510 = vmatpush1.bf16.msra.mxu1 %v13994_v25 }
 0xbaa   :  { %4511 = vmatprep.subr.bf16.mxu1 %v13999_v35 }
 0xbad   :  { %4512 = vmatpush1.bf16.msra.mxu1 %v13997_v8  ;;  %v14041_v8 = vld [vmem:[#allocation16 + $0xc] ss:$16 sps:$4 sm:$0xff]  }
 0xc58   :  { %v3903_v59 = vpop.f32.mrb[72].mxu0  ;;  %v3944_v0 = vpop.f32.mrb[72].mxu1 }
 0xc59   :  { %v3904_v16 = vadd.f32 %v3903_v59, %v3852_v53  ;;  %v3905_v41 = vpop.f32.mrb[73].mxu0  ;;  %v3946_v40 = vpop.f32.mrb[73].mxu1  ;;  %v3945_v63 = vadd.f32 %v3944_v0, %v3860_v60  ;;  %v14047_v60 = vld [vmem:[#allocation16 + $0x2c] ss:$16 sps:$4 sm:$0xff]  }
 0xc5a   :  { %v3907_v44 = vpop.f32.mrb[74].mxu0  ;;  %v3948_v36 = vpop.f32.mrb[74].mxu1  ;;  %v3906_v46 = vadd.f32 %v3905_v41, %v3856_v23  ;;  %v3947_v47 = vadd.f32 %v3946_v40, %v3864_v61  ;;  %v14044_v61 = vld [vmem:[#allocation16 + $0x24] ss:$16 sps:$4 sm:$0xff]  }
 0xc5b   :  { %v12329_v30 = vmul.f32 -1.442695, %v3904_v16  ;;  %v3908_v57 = vpop.f32.mrb[75].mxu0  ;;  %v3949_v62 = vpop.f32.mrb[75].mxu1 }
 0xc5c   :  { %v12330_v54 = vmul.f32 -1.442695, %v3906_v46  ;;  %v4084_v57 = vld [vmem:[#allocation8] sm:$0x1] }
 0xc5d   :  { %15478 = vpow2.f32 %v12329_v30  ;;  %v4086_v30 = vstv %s4085_s6  ;;  %s12033_s6 = sshll.u32 %s16166_s20, 4  ;;  %s12034_s6 = int_to_ptr.vmem [resolvable:$true] %s12033_s6 }
 0xc5e   :  { %15480 = vpow2.f32 %v12330_v54  ;;  %vm4087_vm1 = vcmp.eq.s32.totalorder %v4086_v30, 1  ;;  %v14119_v30 = vld [vmem:[#allocation16 + $0x1ac] ss:$16 sps:$4 sm:$0xff]   ;;  %s16112_s19 = scalar_lea.vmem %s12034_s6, 128  ;;  %p16117_p5 = scmp.lt.s32.totalorder %s12034_s6, %s12034_s6 }
 0xc5f   :  { %p16113_p4 = scmp.ne.s32.totalorder %s12034_s6, %s16112_s19  ;;  %p16118_p6 = scmp.lt.s32.totalorder %s16112_s19, %s16112_s19 }
 0xc61   :  { %p16119_p7 = por %p16118_p6, %p16117_p5 }
 0xc63   :  { %p16120_p8 = pnand %p16119_p7, %p16113_p4 }
 0xc67   :  { %v15479_v26 = vpop.eup %15478 }
 0xc68   :  { %v3957_v43 = vadd.f32 1.0, %v15479_v26  ;;  %v15481_v42 = vpop.eup %15480  ;;  %v14036_v26 = vld [vmem:[#allocation16] ss:$16 sps:$4 sm:$0xff]  }
 0xc69   :  { %v3958_v14 = vadd.f32 1.0, %v15481_v42  ;;  %v14042_v42 = vld [vmem:[#allocation16 + $0x20] ss:$16 sps:$4 sm:$0xff]  }
 0xc6a   :  { %15482 = vrcp.f32 %v3957_v43  ;;  %v14039_v43 = vld [vmem:[#allocation16 + $0x8] ss:$16 sps:$4 sm:$0xff]  }
 0xc74   :  { %v15483_v33 = vpop.eup %15482 }
 0xc75   :  { %v3963_v13 = vmul.f32 %v15483_v33, %v3947_v47  ;;  %v14045_v47 = vld [vmem:[#allocation16 + $0x28] ss:$16 sps:$4 sm:$0xff]   ;;  %v14050_v33 = vld [vmem:[#allocation16 + $0x44] ss:$16 sps:$4 sm:$0xff]  }
 0xc77   :  { %v3964_v5 = vadd.f32 %v3963_v13, %v3945_v63  ;;  %v14053_v63 = vld [vmem:[#allocation16 + $0x4c] ss:$16 sps:$4 sm:$0xff]   ;;  %v14048_v13 = vld [vmem:[#allocation16 + $0x40] ss:$16 sps:$4 sm:$0xff]  }
 0xc79   :  { %15484 = vtanh.f32 %v3964_v5  ;;  %v14056_v5 = vld [vmem:[#allocation16 + $0x64] ss:$16 sps:$4 sm:$0xff]  }
 0xc7a   :  { %15486 = vrcp.f32 %v3958_v14  ;;  %v14051_v14 = vld [vmem:[#allocation16 + $0x48] ss:$16 sps:$4 sm:$0xff]  }
 0xc83   :  { %v15485_v3 = vpop.eup %15484 }
 0xc84   :  { %v3966_v39 = vsub.f32 %v17621_v49, %v15485_v3  ;;  %v15487_v32 = vpop.eup %15486  ;;  %v14033_v49 = vld [vmem:[#allocation14 + $0x1e8] ss:$16 sps:$4 sm:$0xff]  }
 0xc86   :  { %v3967_v34 = vmul.f32 %v15487_v32, %v3966_v39  ;;  %v14054_v39 = vld [vmem:[#allocation16 + $0x60] ss:$16 sps:$4 sm:$0xff]   ;;  %v14057_v32 = vld [vmem:[#allocation16 + $0x68] ss:$16 sps:$4 sm:$0xff]  }
 0xc88   :  { %v17661_v25 = vadd.f32 %v15485_v3, %v3967_v34  ;;  %v14059_v3 = vld [vmem:[#allocation16 + $0x6c] ss:$16 sps:$4 sm:$0xff]   ;;  %v14062_v34 = vld [vmem:[#allocation16 + $0x84] ss:$16 sps:$4 sm:$0xff]  }
 0xc8a   :  { %v17665_v35 = vpack.c.bf16 %v17661_v25, %v17661_v25 }
 0xc8c   :  { %13422 = vmatmul.mubr.bf16.vlgmr.msra.gmra.mrb[76].mxu0 %v17665_v35 }
 0xc8d   :  { %4570 = vmatprep.mubr.bf16.mxu0 %v17637_v12  ;;  %4539 = vmatpush1.bf16.msra.mxu0 %v17547_v45  ;;  %v14002_v45 = vld [vmem:[#allocation14 + $0x104] ss:$16 sps:$4 sm:$0xff]  }
 0xc8e   :  { %4540 = vmatprep.subr.bf16.mxu0 %v17549_v38  ;;  %v14000_v38 = vld [vmem:[#allocation14 + $0x100] ss:$16 sps:$4 sm:$0xff]   ;;  %4513 = vmatprep.subr.bf16.mxu1 %v14002_v45  ;;  %v14038_v12 = vld [vmem:[#allocation16 + $0x4] ss:$16 sps:$4 sm:$0xff]  }
 0xc8f   :  { %4514 = vmatpush1.bf16.msra.mxu1 %v14000_v38  ;;  %v14060_v45 = vld [vmem:[#allocation16 + $0x80] ss:$16 sps:$4 sm:$0xff]   ;;  %v14063_v38 = vld [vmem:[#allocation16 + $0x88] ss:$16 sps:$4 sm:$0xff]  }
 0xc91   :  { %4541 = vmatpush1.bf16.msra.mxu0 %v17552_v6  ;;  %v14005_v6 = vld [vmem:[#allocation14 + $0x124] ss:$16 sps:$4 sm:$0xff]  }
 0xc92   :  { %4542 = vmatprep.subr.bf16.mxu0 %v17555_v15  ;;  %v14003_v15 = vld [vmem:[#allocation14 + $0x120] ss:$16 sps:$4 sm:$0xff]   ;;  %4515 = vmatprep.subr.bf16.mxu1 %v14005_v6  ;;  %v14068_v6 = vld [vmem:[#allocation16 + $0xa4] ss:$16 sps:$4 sm:$0xff]  }
 0xc93   :  { %4516 = vmatpush1.bf16.msra.mxu1 %v14003_v15  ;;  %v14071_v15 = vld [vmem:[#allocation16 + $0xac] ss:$16 sps:$4 sm:$0xff]  }
 0xc95   :  { %4543 = vmatpush1.bf16.msra.mxu0 %v17558_v18  ;;  %v14008_v18 = vld [vmem:[#allocation14 + $0x144] ss:$16 sps:$4 sm:$0xff]  }
 0xc96   :  { %4544 = vmatprep.subr.bf16.mxu0 %v17561_v20  ;;  %v14006_v20 = vld [vmem:[#allocation14 + $0x140] ss:$16 sps:$4 sm:$0xff]   ;;  %4517 = vmatprep.subr.bf16.mxu1 %v14008_v18 }
 0xc97   :  { %4518 = vmatpush1.bf16.msra.mxu1 %v14006_v20  ;;  %v14066_v18 = vld [vmem:[#allocation16 + $0xa0] ss:$16 sps:$4 sm:$0xff]   ;;  %v14069_v20 = vld [vmem:[#allocation16 + $0xa8] ss:$16 sps:$4 sm:$0xff]  }
 0xc99   :  { %4545 = vmatpush1.bf16.msra.mxu0 %v17564_v1  ;;  %v14011_v1 = vld [vmem:[#allocation14 + $0x164] ss:$16 sps:$4 sm:$0xff]  }
 0xc9a   :  { %4546 = vmatprep.subr.bf16.mxu0 %v17567_v17  ;;  %v14009_v17 = vld [vmem:[#allocation14 + $0x160] ss:$16 sps:$4 sm:$0xff]   ;;  %4519 = vmatprep.subr.bf16.mxu1 %v14011_v1  ;;  %v14074_v1 = vld [vmem:[#allocation16 + $0xc4] ss:$16 sps:$4 sm:$0xff]  }
 0xc9b   :  { %4520 = vmatpush1.bf16.msra.mxu1 %v14009_v17  ;;  %v14077_v17 = vld [vmem:[#allocation16 + $0xcc] ss:$16 sps:$4 sm:$0xff]  }
 0xc9d   :  { %4547 = vmatpush1.bf16.msra.mxu0 %v17570_v4  ;;  %v14014_v4 = vld [vmem:[#allocation14 + $0x184] ss:$16 sps:$4 sm:$0xff]  }
 0xc9e   :  { %4548 = vmatprep.subr.bf16.mxu0 %v17573_v2  ;;  %v14017_v2 = vld [vmem:[#allocation14 + $0x18c] ss:$16 sps:$4 sm:$0xff]   ;;  %4521 = vmatprep.subr.bf16.mxu1 %v14014_v4  ;;  %v14072_v4 = vld [vmem:[#allocation16 + $0xc0] ss:$16 sps:$4 sm:$0xff]  }
 0xca1   :  { %4549 = vmatpush1.bf16.msra.mxu0 %v17576_v10  ;;  %v14012_v10 = vld [vmem:[#allocation14 + $0x180] ss:$16 sps:$4 sm:$0xff]  }
 0xca2   :  { %4550 = vmatprep.subr.bf16.mxu0 %v17579_v9  ;;  %v14015_v9 = vld [vmem:[#allocation14 + $0x188] ss:$16 sps:$4 sm:$0xff]   ;;  %4522 = vmatpush1.bf16.msra.mxu1 %v14012_v10  ;;  %v14080_v10 = vld [vmem:[#allocation16 + $0xe4] ss:$16 sps:$4 sm:$0xff]  }
 0xca5   :  { %4551 = vmatpush1.bf16.msra.mxu0 %v17582_v28  ;;  %v14020_v28 = vld [vmem:[#allocation14 + $0x1a4] ss:$16 sps:$4 sm:$0xff]  }
 0xca6   :  { %4552 = vmatprep.subr.bf16.mxu0 %v17585_v58  ;;  %v14023_v58 = vld [vmem:[#allocation14 + $0x1ac] ss:$16 sps:$4 sm:$0xff]   ;;  %4523 = vmatprep.subr.bf16.mxu1 %v14020_v28  ;;  %v14078_v28 = vld [vmem:[#allocation16 + $0xe0] ss:$16 sps:$4 sm:$0xff]  }
 0xca9   :  { %4553 = vmatpush1.bf16.msra.mxu0 %v17588_v27  ;;  %v14018_v27 = vld [vmem:[#allocation14 + $0x1a0] ss:$16 sps:$4 sm:$0xff]  }
 0xcaa   :  { %4554 = vmatprep.subr.bf16.mxu0 %v17591_v29  ;;  %v14021_v29 = vld [vmem:[#allocation14 + $0x1a8] ss:$16 sps:$4 sm:$0xff]   ;;  %4524 = vmatpush1.bf16.msra.mxu1 %v14018_v27  ;;  %v14086_v27 = vld [vmem:[#allocation16 + $0x104] ss:$16 sps:$4 sm:$0xff]  }
 0xcad   :  { %4555 = vmatpush1.bf16.msra.mxu0 %v17594_v21  ;;  %v14026_v21 = vld [vmem:[#allocation14 + $0x1c4] ss:$16 sps:$4 sm:$0xff]  }
 0xcae   :  { %4556 = vmatprep.subr.bf16.mxu0 %v17597_v37  ;;  %v14029_v37 = vld [vmem:[#allocation14 + $0x1cc] ss:$16 sps:$4 sm:$0xff]   ;;  %4525 = vmatprep.subr.bf16.mxu1 %v14026_v21  ;;  %v14084_v21 = vld [vmem:[#allocation16 + $0x100] ss:$16 sps:$4 sm:$0xff]  }
 0xcb1   :  { %4557 = vmatpush1.bf16.msra.mxu0 %v17600_v19  ;;  %v14024_v19 = vld [vmem:[#allocation14 + $0x1c0] ss:$16 sps:$4 sm:$0xff]  }
 0xcb2   :  { %4558 = vmatprep.subr.bf16.mxu0 %v17603_v55  ;;  %v14027_v55 = vld [vmem:[#allocation14 + $0x1c8] ss:$16 sps:$4 sm:$0xff]   ;;  %4526 = vmatpush1.bf16.msra.mxu1 %v14024_v19  ;;  %v14092_v19 = vld [vmem:[#allocation16 + $0x124] ss:$16 sps:$4 sm:$0xff]  }
 0xcb5   :  { %4559 = vmatpush1.bf16.msra.mxu0 %v17606_v48  ;;  %v14032_v48 = vld [vmem:[#allocation14 + $0x1e4] ss:$16 sps:$4 sm:$0xff]  }
 0xcb6   :  { %4560 = vmatprep.subr.bf16.mxu0 %v17609_v31  ;;  %v14035_v31 = vld [vmem:[#allocation14 + $0x1ec] ss:$16 sps:$4 sm:$0xff]   ;;  %4527 = vmatprep.subr.bf16.mxu1 %v14032_v48  ;;  %v14090_v48 = vld [vmem:[#allocation16 + $0x120] ss:$16 sps:$4 sm:$0xff]  }
 0xcb9   :  { %4561 = vmatpush1.bf16.msra.mxu0 %v17612_v50  ;;  %v14030_v50 = vld [vmem:[#allocation14 + $0x1e0] ss:$16 sps:$4 sm:$0xff]  }
 0xcba   :  { %4562 = vmatprep.subr.bf16.mxu0 %v14017_v2  ;;  %4528 = vmatpush1.bf16.msra.mxu1 %v14030_v50  ;;  %v14075_v2 = vld [vmem:[#allocation16 + $0xc8] ss:$16 sps:$4 sm:$0xff]   ;;  %v14098_v50 = vld [vmem:[#allocation16 + $0x144] ss:$16 sps:$4 sm:$0xff]  }
 0xcbb   :  { %5004 = vmatprep.subr.bf16.mxu1 %v14038_v12  ;;  %v14096_v12 = vld [vmem:[#allocation16 + $0x140] ss:$16 sps:$4 sm:$0xff]  }
 0xcbd   :  { %4563 = vmatpush1.bf16.msra.mxu0 %v14015_v9  ;;  %v14083_v9 = vld [vmem:[#allocation16 + $0xec] ss:$16 sps:$4 sm:$0xff]  }
 0xcbe   :  { %4564 = vmatprep.subr.bf16.mxu0 %v14023_v58  ;;  %v14081_v58 = vld [vmem:[#allocation16 + $0xe8] ss:$16 sps:$4 sm:$0xff]  }
 0xcc1   :  { %4565 = vmatpush1.bf16.msra.mxu0 %v14021_v29  ;;  %v14089_v29 = vld [vmem:[#allocation16 + $0x10c] ss:$16 sps:$4 sm:$0xff]  }
 0xcc2   :  { %4566 = vmatprep.subr.bf16.mxu0 %v14029_v37  ;;  %v14087_v37 = vld [vmem:[#allocation16 + $0x108] ss:$16 sps:$4 sm:$0xff]  }
 0xcc5   :  { %4567 = vmatpush1.bf16.msra.mxu0 %v14027_v55  ;;  %v14095_v55 = vld [vmem:[#allocation16 + $0x12c] ss:$16 sps:$4 sm:$0xff]  }
 0xcc6   :  { %4568 = vmatprep.subr.bf16.mxu0 %v14035_v31  ;;  %v14093_v31 = vld [vmem:[#allocation16 + $0x128] ss:$16 sps:$4 sm:$0xff]  }
 0xcc9   :  { %4569 = vmatpush1.bf16.msra.mxu0 %v14033_v49  ;;  %v14101_v49 = vld [vmem:[#allocation16 + $0x14c] ss:$16 sps:$4 sm:$0xff]  }
 0xcca   :  { %5045 = vmatprep.subr.bf16.mxu0 %v14041_v8  ;;  %v14099_v8 = vld [vmem:[#allocation16 + $0x148] ss:$16 sps:$4 sm:$0xff]  }
 0xd5f   :  { %v4069_v53 = vpop.f32.mrb[76].mxu0 }
 0xd60   :  { %v4070_v59 = vadd.f32 %v4069_v53, %v3986_v22  ;;  %v13423_v0 = vpop.f32.mrb[77].mxu0  ;;  %v14104_v22 = vld [vmem:[#allocation16 + $0x164] ss:$16 sps:$4 sm:$0xff]   ;;  %v14107_v53 = vld [vmem:[#allocation16 + $0x16c] ss:$16 sps:$4 sm:$0xff]  }
 0xd61   :  { %v4072_v16 = vpop.f32.mrb[78].mxu0  ;;  %v14105_v0 = vld [vmem:[#allocation16 + $0x168] ss:$16 sps:$4 sm:$0xff]  }
 0xd62   :  { %v12339_v41 = vmul.f32 -1.442695, %v4070_v59  ;;  %v13424_v40 = vpop.f32.mrb[79].mxu0  ;;  %v14102_v59 = vld [vmem:[#allocation16 + $0x160] ss:$16 sps:$4 sm:$0xff]  }
 0xd63   :  { %v14108_v16 = vld [vmem:[#allocation16 + $0x180] ss:$16 sps:$4 sm:$0xff]   ;;  %v14111_v40 = vld [vmem:[#allocation16 + $0x188] ss:$16 sps:$4 sm:$0xff]  }
 0xd64   :  { %15488 = vpow2.f32 %v12339_v41  ;;  %v14110_v41 = vld [vmem:[#allocation16 + $0x184] ss:$16 sps:$4 sm:$0xff]  }
 0xd6e   :  { %v15489_v44 = vpop.eup %15488 }
 0xd6f   :  { %v4078_v36 = vadd.f32 1.0, %v15489_v44  ;;  %v14113_v44 = vld [vmem:[#allocation16 + $0x18c] ss:$16 sps:$4 sm:$0xff]  }
 0xd71   :  { %15490 = vrcp.f32 %v4078_v36  ;;  %v14116_v36 = vld [vmem:[#allocation16 + $0x1a4] ss:$16 sps:$4 sm:$0xff]  }
 0xd7b   :  { %v15491_v62 = vpop.eup %15490 }
 0xd7c   :  { %4081 = vst [vmem:[#allocation19] sm:$0x1] %v15491_v62  ;;  %v4088_v23 = vsel %vm4087_vm1, %v4084_v57, %v15491_v62  ;;  %v14114_v57 = vld [vmem:[#allocation16 + $0x1a0] ss:$16 sps:$4 sm:$0xff]   ;;  %v14117_v62 = vld [vmem:[#allocation16 + $0x1a8] ss:$16 sps:$4 sm:$0xff]  }
 0xd7d   :  { %v4089_v46 = vmax.f32 %v4088_v23, 0.0  ;;  %v14122_v23 = vld [vmem:[#allocation16 + $0x1c4] ss:$16 sps:$4 sm:$0xff]  }
 0xd7f   :  { %v4090_v54 = vpack.c.bf16 %v4089_v46, %v4089_v46  ;;  %v14125_v46 = vld [vmem:[#allocation16 + $0x1cc] ss:$16 sps:$4 sm:$0xff]  }
 0xd81   :  { %4530 = vmatmul.mubr.bf16.vlgmr.msra.gmra.mrb[76].mxu1 %v4090_v54  ;;  %4571 = vmatmul.mubr.bf16.vlgmr.msra.gmra.mrb[80].mxu0 %v4090_v54  ;;  %v14120_v54 = vld [vmem:[#allocation16 + $0x1c0] ss:$16 sps:$4 sm:$0xff]  }
 0xd82   :  { %5036 = vmatprep.mubr.bf16.mxu1 %v17665_v35  ;;  %5077 = vmatprep.mubr.bf16.mxu0 %v17665_v35  ;;  %v14065_v35 = vld [vmem:[#allocation16 + $0x8c] ss:$16 sps:$4 sm:$0xff]  }
 0xd83   :  { %5005 = vmatpush1.bf16.msra.mxu1 %v14036_v26  ;;  %5046 = vmatpush1.bf16.msra.mxu0 %v14039_v43  ;;  %v14123_v26 = vld [vmem:[#allocation16 + $0x1c8] ss:$16 sps:$4 sm:$0xff]   ;;  %v14128_v43 = vld [vmem:[#allocation16 + $0x1e4] ss:$16 sps:$4 sm:$0xff]  }
 0xd84   :  { %5006 = vmatprep.subr.bf16.mxu1 %v14044_v61  ;;  %5047 = vmatprep.subr.bf16.mxu0 %v14047_v60  ;;  %v14131_v61 = vld [vmem:[#allocation16 + $0x1ec] ss:$16 sps:$4 sm:$0xff]   ;;  %v14126_v60 = vld [vmem:[#allocation16 + $0x1e0] ss:$16 sps:$4 sm:$0xff]  }
 0xd87   :  { %5007 = vmatpush1.bf16.msra.mxu1 %v14042_v42  ;;  %5048 = vmatpush1.bf16.msra.mxu0 %v14045_v47  ;;  %v14129_v42 = vld [vmem:[#allocation16 + $0x1e8] ss:$16 sps:$4 sm:$0xff]   ;;  %v4155_v47 = vld [vmem:[%s18035_s9] sm:$0xf] }
 0xd88   :  { %5008 = vmatprep.subr.bf16.mxu1 %v14050_v33  ;;  %5049 = vmatprep.subr.bf16.mxu0 %v14053_v63  ;;  %v4480_v33 = vrot.slane %v4155_v47, %v18560_v11 }
 0xd8b   :  { %5009 = vmatpush1.bf16.msra.mxu1 %v14048_v13  ;;  %5050 = vmatpush1.bf16.msra.mxu0 %v14051_v14 }
 0xd8c   :  { %5010 = vmatprep.subr.bf16.mxu1 %v14056_v5  ;;  %5051 = vmatprep.subr.bf16.mxu0 %v14059_v3 }
 0xd8f   :  { %5011 = vmatpush1.bf16.msra.mxu1 %v14054_v39  ;;  %5052 = vmatpush1.bf16.msra.mxu0 %v14057_v32 }
 0xd90   :  { %5012 = vmatprep.subr.bf16.mxu1 %v14062_v34  ;;  %5053 = vmatprep.subr.bf16.mxu0 %v14065_v35 }
 0xd93   :  { %5013 = vmatpush1.bf16.msra.mxu1 %v14060_v45  ;;  %5054 = vmatpush1.bf16.msra.mxu0 %v14063_v38  ;;  %v4484_v38 = vrot.slane %v4155_v47, %v18561_v7 }
 0xd94   :  { %5014 = vmatprep.subr.bf16.mxu1 %v14068_v6  ;;  %5055 = vmatprep.subr.bf16.mxu0 %v14071_v15 }
 0xd97   :  { %5015 = vmatpush1.bf16.msra.mxu1 %v14066_v18  ;;  %5056 = vmatpush1.bf16.msra.mxu0 %v14069_v20 }
 0xd98   :  { %5016 = vmatprep.subr.bf16.mxu1 %v14074_v1  ;;  %5057 = vmatprep.subr.bf16.mxu0 %v14077_v17  ;;  %v4492_v1 = vrot.slane %v4155_v47, %v18562_v56  ;;  %v4488_v17 = vrot.slane %v4155_v47, %v18563_v24 }
 0xd9b   :  { %5017 = vmatpush1.bf16.msra.mxu1 %v14072_v4  ;;  %5058 = vmatpush1.bf16.msra.mxu0 %v14075_v2 }
 0xd9c   :  { %5018 = vmatprep.subr.bf16.mxu1 %v14080_v10  ;;  %5059 = vmatprep.subr.bf16.mxu0 %v14083_v9 }
 0xd9f   :  { %5019 = vmatpush1.bf16.msra.mxu1 %v14078_v28  ;;  %5060 = vmatpush1.bf16.msra.mxu0 %v14081_v58 }
 0xda0   :  { %5020 = vmatprep.subr.bf16.mxu1 %v14086_v27  ;;  %5061 = vmatprep.subr.bf16.mxu0 %v14089_v29 }
 0xda3   :  { %5021 = vmatpush1.bf16.msra.mxu1 %v14084_v21  ;;  %5062 = vmatpush1.bf16.msra.mxu0 %v14087_v37 }
 0xda4   :  { %5022 = vmatprep.subr.bf16.mxu1 %v14092_v19  ;;  %5063 = vmatprep.subr.bf16.mxu0 %v14095_v55 }
 0xda7   :  { %5023 = vmatpush1.bf16.msra.mxu1 %v14090_v48  ;;  %5064 = vmatpush1.bf16.msra.mxu0 %v14093_v31  ;;  %v14132_v31 = vld [vmem:[#allocation17] sm:$0xff]  }
 0xda8   :  { %5024 = vmatprep.subr.bf16.mxu1 %v14098_v50  ;;  %5065 = vmatprep.subr.bf16.mxu0 %v14101_v49  ;;  %v14134_v50 = vld [vmem:[#allocation17 + $0x10] sm:$0xff]   ;;  %v14135_v49 = vld [vmem:[#allocation17 + $0x18] sm:$0xff]  }
 0xdab   :  { %5025 = vmatpush1.bf16.msra.mxu1 %v14096_v12  ;;  %5066 = vmatpush1.bf16.msra.mxu0 %v14099_v8  ;;  %v14136_v12 = vld [vmem:[#allocation17 + $0x20] sm:$0xff]   ;;  %v14137_v8 = vld [vmem:[#allocation17 + $0x28] sm:$0xff]  }
 0xdac   :  { %5026 = vmatprep.subr.bf16.mxu1 %v14104_v22  ;;  %5067 = vmatprep.subr.bf16.mxu0 %v14107_v53  ;;  %v14138_v22 = vld [vmem:[#allocation17 + $0x30] sm:$0xff]   ;;  %v14139_v53 = vld [vmem:[#allocation17 + $0x38] sm:$0xff]  }
 0xdaf   :  { %5027 = vmatpush1.bf16.msra.mxu1 %v14102_v59  ;;  %5068 = vmatpush1.bf16.msra.mxu0 %v14105_v0  ;;  %v14140_v59 = vld [vmem:[#allocation14] ss:$16 sps:$4 sm:$0xff]   ;;  %v14142_v0 = vld [vmem:[#allocation14 + $0x4] ss:$16 sps:$4 sm:$0xff]  }
 0xdb0   :  { %5028 = vmatprep.subr.bf16.mxu1 %v14110_v41  ;;  %5069 = vmatprep.subr.bf16.mxu0 %v14113_v44  ;;  %v14148_v41 = vld [vmem:[#allocation14 + $0x24] ss:$16 sps:$4 sm:$0xff]  }
 0xdb1   :  { %v14154_v44 = vld [vmem:[#allocation14 + $0x44] ss:$16 sps:$4 sm:$0xff]  }
 0xdb3   :  { %5029 = vmatpush1.bf16.msra.mxu1 %v14108_v16  ;;  %5070 = vmatpush1.bf16.msra.mxu0 %v14111_v40  ;;  %v14145_v16 = vld [vmem:[#allocation14 + $0xc] ss:$16 sps:$4 sm:$0xff]   ;;  %v14146_v40 = vld [vmem:[#allocation14 + $0x20] ss:$16 sps:$4 sm:$0xff]  }
 0xdb4   :  { %5030 = vmatprep.subr.bf16.mxu1 %v14116_v36  ;;  %5071 = vmatprep.subr.bf16.mxu0 %v14119_v30  ;;  %v14152_v36 = vld [vmem:[#allocation14 + $0x40] ss:$16 sps:$4 sm:$0xff]   ;;  %v14160_v30 = vld [vmem:[#allocation14 + $0x64] ss:$16 sps:$4 sm:$0xff]  }
 0xdb7   :  { %5031 = vmatpush1.bf16.msra.mxu1 %v14114_v57  ;;  %5072 = vmatpush1.bf16.msra.mxu0 %v14117_v62  ;;  %v14158_v57 = vld [vmem:[#allocation14 + $0x60] ss:$16 sps:$4 sm:$0xff]   ;;  %v14166_v62 = vld [vmem:[#allocation14 + $0x84] ss:$16 sps:$4 sm:$0xff]  }
 0xdb8   :  { %5032 = vmatprep.subr.bf16.mxu1 %v14122_v23  ;;  %5073 = vmatprep.subr.bf16.mxu0 %v14125_v46  ;;  %v14164_v23 = vld [vmem:[#allocation14 + $0x80] ss:$16 sps:$4 sm:$0xff]   ;;  %v14172_v46 = vld [vmem:[#allocation14 + $0xa4] ss:$16 sps:$4 sm:$0xff]  }
 0xdbb   :  { %5033 = vmatpush1.bf16.msra.mxu1 %v14120_v54  ;;  %5074 = vmatpush1.bf16.msra.mxu0 %v14123_v26  ;;  %v14170_v54 = vld [vmem:[#allocation14 + $0xa0] ss:$16 sps:$4 sm:$0xff]   ;;  %v14178_v26 = vld [vmem:[#allocation14 + $0xc4] ss:$16 sps:$4 sm:$0xff]  }
 0xdbc   :  { %5034 = vmatprep.subr.bf16.mxu1 %v14128_v43  ;;  %5075 = vmatprep.subr.bf16.mxu0 %v14131_v61  ;;  %v14176_v43 = vld [vmem:[#allocation14 + $0xc0] ss:$16 sps:$4 sm:$0xff]   ;;  %v14184_v61 = vld [vmem:[#allocation14 + $0xe4] ss:$16 sps:$4 sm:$0xff]  }
 0xdbf   :  { %5035 = vmatpush1.bf16.msra.mxu1 %v14126_v60  ;;  %5076 = vmatpush1.bf16.msra.mxu0 %v14129_v42  ;;  %v14182_v60 = vld [vmem:[#allocation14 + $0xe0] ss:$16 sps:$4 sm:$0xff]  }
 0xdc0   :  { %13425 = vmatprep.subr.bf16.mxu1 %v16164_v51  ;;  %5632 = vmatprep.subr.bf16.mxu0 %v14142_v0  ;;  %v4662_v42 = vld [vmem:[%s18037_s11] sm:$0xf]  ;;  %v14175_v0 = vld [vmem:[#allocation14 + $0xac] ss:$16 sps:$4 sm:$0xff]  }
 0xdc1   :  { %v4987_v47 = vrot.slane %v4662_v42, %v18560_v11 }
 0xe54   :  { %v4531_v63 = vpop.f32.mrb[76].mxu1  ;;  %v4572_v13 = vpop.f32.mrb[80].mxu0 }
 0xe55   :  { %v4532_v14 = vadd.f32 %v4531_v63, %v4480_v33  ;;  %v4533_v5 = vpop.f32.mrb[77].mxu1  ;;  %v4574_v3 = vpop.f32.mrb[81].mxu0  ;;  %v4573_v9 = vadd.f32 %v4572_v13, %v4488_v17 }
 0xe56   :  { %v4535_v39 = vpop.f32.mrb[78].mxu1  ;;  %v4576_v32 = vpop.f32.mrb[82].mxu0  ;;  %v4534_v6 = vadd.f32 %v4533_v5, %v4484_v38  ;;  %v4575_v2 = vadd.f32 %v4574_v3, %v4492_v1  ;;  %v4995_v1 = vrot.slane %v4662_v42, %v18563_v24 }
 0xe57   :  { %v12404_v34 = vmul.f32 -1.442695, %v4532_v14  ;;  %v4536_v35 = vpop.f32.mrb[79].mxu1  ;;  %v4577_v45 = vpop.f32.mrb[83].mxu0 }
 0xe58   :  { %v12405_v15 = vmul.f32 -1.442695, %v4534_v6  ;;  %v4991_v45 = vrot.slane %v4662_v42, %v18561_v7 }
 0xe59   :  { %15492 = vpow2.f32 %v12404_v34 }
 0xe5a   :  { %15494 = vpow2.f32 %v12405_v15 }
 0xe63   :  { %v15493_v18 = vpop.eup %15492 }
 0xe64   :  { %v4585_v20 = vadd.f32 1.0, %v15493_v18  ;;  %v15495_v4 = vpop.eup %15494 }
 0xe65   :  { %v4586_v58 = vadd.f32 1.0, %v15495_v4 }
 0xe66   :  { %15496 = vrcp.f32 %v4585_v20  ;;  %v4999_v20 = vrot.slane %v4662_v42, %v18562_v56  ;;  %v14203_v42 = vld [vmem:[#allocation14 + $0x148] ss:$16 sps:$4 sm:$0xff]  }
 0xe70   :  { %v15497_v10 = vpop.eup %15496 }
 0xe71   :  { %v4591_v28 = vmul.f32 %v15497_v10, %v4575_v2 }
 0xe73   :  { %v4592_v27 = vadd.f32 %v4591_v28, %v4573_v9 }
 0xe75   :  { %15498 = vtanh.f32 %v4592_v27 }
 0xe76   :  { %15500 = vrcp.f32 %v4586_v58 }
 0xe7f   :  { %v15499_v29 = vpop.eup %15498 }
 0xe80   :  { %v4594_v21 = vsub.f32 %v17633_v52, %v15499_v29  ;;  %v15501_v37 = vpop.eup %15500  ;;  %v14133_v52 = vld [vmem:[#allocation17 + $0x8] sm:$0xff]  }
 0xe82   :  { %v4595_v19 = vmul.f32 %v15501_v37, %v4594_v21 }
 0xe84   :  { %v17706_v55 = vadd.f32 %v15499_v29, %v4595_v19 }
 0xe86   :  { %v17710_v48 = vpack.c.bf16 %v17706_v55, %v17706_v55 }
 0xe88   :  { %5037 = vmatmul.mubr.bf16.vlgmr.msra.gmra.mrb[80].mxu1 %v17710_v48  ;;  %5078 = vmatmul.mubr.bf16.vlgmr.msra.gmra.mrb[84].mxu0 %v17710_v48 }
 0xe89   :  { %5664 = vmatprep.mubr.bf16.mxu0 %v17710_v48  ;;  %13441 = vmatprep.mubr.msk.bf16.mxu1 %vm16165_vm0, %v16164_v51 }
 0xe8a   :  { %13426 = vmatpush3.bf16.msra.mxu1 %v14132_v31  ;;  %5633 = vmatpush1.bf16.msra.mxu0 %v14140_v59  ;;  %v14143_v31 = vld [vmem:[#allocation14 + $0x8] ss:$16 sps:$4 sm:$0xff]  }
 0xe8b   :  { %13427 = vmatprep.subr.bf16.mxu1 %v16164_v51  ;;  %5634 = vmatprep.subr.bf16.mxu0 %v14148_v41  ;;  %v14167_v59 = vld [vmem:[#allocation14 + $0x88] ss:$16 sps:$4 sm:$0xff]  }
 0xe8c   :  { %v14179_v41 = vld [vmem:[#allocation14 + $0xc8] ss:$16 sps:$4 sm:$0xff]  }
 0xe8e   :  { %13428 = vmatpush3.bf16.msra.mxu1 %v14133_v52  ;;  %5635 = vmatpush1.bf16.msra.mxu0 %v14146_v40  ;;  %v14187_v40 = vld [vmem:[#allocation14 + $0xec] ss:$16 sps:$4 sm:$0xff]  }
 0xe8f   :  { %13429 = vmatprep.subr.bf16.mxu1 %v16164_v51  ;;  %5636 = vmatprep.subr.bf16.mxu0 %v14154_v44  ;;  %v14185_v44 = vld [vmem:[#allocation14 + $0xe8] ss:$16 sps:$4 sm:$0xff]  }
 0xe92   :  { %13430 = vmatpush3.bf16.msra.mxu1 %v14134_v50  ;;  %5637 = vmatpush1.bf16.msra.mxu0 %v14152_v36  ;;  %v14151_v50 = vld [vmem:[#allocation14 + $0x2c] ss:$16 sps:$4 sm:$0xff]   ;;  %v14190_v36 = vld [vmem:[#allocation14 + $0x104] ss:$16 sps:$4 sm:$0xff]  }
 0xe93   :  { %13431 = vmatprep.subr.bf16.mxu1 %v16164_v51  ;;  %5638 = vmatprep.subr.bf16.mxu0 %v14160_v30  ;;  %v14193_v30 = vld [vmem:[#allocation14 + $0x10c] ss:$16 sps:$4 sm:$0xff]  }
 0xe96   :  { %13432 = vmatpush3.bf16.msra.mxu1 %v14135_v49  ;;  %5639 = vmatpush1.bf16.msra.mxu0 %v14158_v57  ;;  %v14149_v49 = vld [vmem:[#allocation14 + $0x28] ss:$16 sps:$4 sm:$0xff]   ;;  %v14188_v57 = vld [vmem:[#allocation14 + $0x100] ss:$16 sps:$4 sm:$0xff]  }
 0xe97   :  { %13433 = vmatprep.subr.bf16.mxu1 %v16164_v51  ;;  %5640 = vmatprep.subr.bf16.mxu0 %v14166_v62  ;;  %v14191_v62 = vld [vmem:[#allocation14 + $0x108] ss:$16 sps:$4 sm:$0xff]  }
 0xe9a   :  { %13434 = vmatpush3.bf16.msra.mxu1 %v14136_v12  ;;  %5641 = vmatpush1.bf16.msra.mxu0 %v14164_v23  ;;  %v14157_v12 = vld [vmem:[#allocation14 + $0x4c] ss:$16 sps:$4 sm:$0xff]   ;;  %v14196_v23 = vld [vmem:[#allocation14 + $0x124] ss:$16 sps:$4 sm:$0xff]  }
 0xe9b   :  { %13435 = vmatprep.subr.bf16.mxu1 %v16164_v51  ;;  %5642 = vmatprep.subr.bf16.mxu0 %v14172_v46  ;;  %v14199_v46 = vld [vmem:[#allocation14 + $0x12c] ss:$16 sps:$4 sm:$0xff]  }
 0xe9e   :  { %13436 = vmatpush3.bf16.msra.mxu1 %v14137_v8  ;;  %5643 = vmatpush1.bf16.msra.mxu0 %v14170_v54  ;;  %v14163_v8 = vld [vmem:[#allocation14 + $0x6c] ss:$16 sps:$4 sm:$0xff]   ;;  %v14194_v54 = vld [vmem:[#allocation14 + $0x120] ss:$16 sps:$4 sm:$0xff]  }
 0xe9f   :  { %13437 = vmatprep.subr.bf16.mxu1 %v16164_v51  ;;  %5644 = vmatprep.subr.bf16.mxu0 %v14178_v26  ;;  %v14197_v26 = vld [vmem:[#allocation14 + $0x128] ss:$16 sps:$4 sm:$0xff]  }
 0xea2   :  { %13438 = vmatpush3.bf16.msra.mxu1 %v14138_v22  ;;  %5645 = vmatpush1.bf16.msra.mxu0 %v14176_v43  ;;  %v14161_v22 = vld [vmem:[#allocation14 + $0x68] ss:$16 sps:$4 sm:$0xff]   ;;  %v14202_v43 = vld [vmem:[#allocation14 + $0x144] ss:$16 sps:$4 sm:$0xff]  }
 0xea3   :  { %13439 = vmatprep.subr.bf16.mxu1 %v16164_v51  ;;  %5646 = vmatprep.subr.bf16.mxu0 %v14184_v61  ;;  %v14205_v61 = vld [vmem:[#allocation14 + $0x14c] ss:$16 sps:$4 sm:$0xff]  }
 0xea6   :  { %13440 = vmatpush3.bf16.msra.mxu1 %v14139_v53  ;;  %5647 = vmatpush1.bf16.msra.mxu0 %v14182_v60  ;;  %v14169_v53 = vld [vmem:[#allocation14 + $0x8c] ss:$16 sps:$4 sm:$0xff]   ;;  %v14200_v60 = vld [vmem:[#allocation14 + $0x140] ss:$16 sps:$4 sm:$0xff]  }
 0xea7   :  { %5673 = vmatprep.subr.bf16.mxu1 %v14145_v16  ;;  %v14173_v16 = vld [vmem:[#allocation14 + $0xa8] ss:$16 sps:$4 sm:$0xff]   ;;  %5648 = vmatprep.subr.bf16.mxu0 %v14190_v36  ;;  %v14253_v36 = vld [vmem:[#allocation16 + $0x4c] ss:$16 sps:$4 sm:$0xff]  }
 0xeaa   :  { %5649 = vmatpush1.bf16.msra.mxu0 %v14188_v57  ;;  %v14251_v57 = vld [vmem:[#allocation16 + $0x48] ss:$16 sps:$4 sm:$0xff]  }
 0xeab   :  { %5650 = vmatprep.subr.bf16.mxu0 %v14196_v23  ;;  %v14259_v23 = vld [vmem:[#allocation16 + $0x6c] ss:$16 sps:$4 sm:$0xff]  }
 0xeae   :  { %5651 = vmatpush1.bf16.msra.mxu0 %v14194_v54  ;;  %v14262_v54 = vld [vmem:[#allocation16 + $0x84] ss:$16 sps:$4 sm:$0xff]  }
 0xeaf   :  { %5652 = vmatprep.subr.bf16.mxu0 %v14202_v43  ;;  %v14260_v43 = vld [vmem:[#allocation16 + $0x80] ss:$16 sps:$4 sm:$0xff]  }
 0xeb2   :  { %5653 = vmatpush1.bf16.msra.mxu0 %v14200_v60  ;;  %v14268_v60 = vld [vmem:[#allocation16 + $0xa4] ss:$16 sps:$4 sm:$0xff]  }
 0xf5b   :  { %v5038_v33 = vpop.f32.mrb[80].mxu1  ;;  %v5079_v63 = vpop.f32.mrb[84].mxu0 }
 0xf5c   :  { %v5039_v13 = vadd.f32 %v5038_v33, %v4987_v47  ;;  %v5040_v14 = vpop.f32.mrb[81].mxu1  ;;  %v5081_v5 = vpop.f32.mrb[85].mxu0  ;;  %v5080_v10 = vadd.f32 %v5079_v63, %v4995_v1  ;;  %v14208_v47 = vld [vmem:[#allocation14 + $0x164] ss:$16 sps:$4 sm:$0xff]   ;;  %v14211_v33 = vld [vmem:[#allocation14 + $0x16c] ss:$16 sps:$4 sm:$0xff]  }
 0xf5d   :  { %v5042_v3 = vpop.f32.mrb[82].mxu1  ;;  %v5083_v39 = vpop.f32.mrb[86].mxu0  ;;  %v5041_v38 = vadd.f32 %v5040_v14, %v4991_v45  ;;  %v5082_v4 = vadd.f32 %v5081_v5, %v4999_v20  ;;  %v14206_v63 = vld [vmem:[#allocation14 + $0x160] ss:$16 sps:$4 sm:$0xff]   ;;  %5654 = vmatprep.subr.bf16.mxu0 %v14208_v47  ;;  %v14214_v14 = vld [vmem:[#allocation14 + $0x184] ss:$16 sps:$4 sm:$0xff]  }
 0xf5e   :  { %v12470_v32 = vmul.f32 -1.442695, %v5039_v13  ;;  %v5043_v34 = vpop.f32.mrb[83].mxu1  ;;  %v5084_v35 = vpop.f32.mrb[87].mxu0  ;;  %v14209_v13 = vld [vmem:[#allocation14 + $0x168] ss:$16 sps:$4 sm:$0xff]   ;;  %5655 = vmatpush1.bf16.msra.mxu0 %v14206_v63 }
 0xf5f   :  { %v12471_v6 = vmul.f32 -1.442695, %v5041_v38  ;;  %v14217_v5 = vld [vmem:[#allocation14 + $0x18c] ss:$16 sps:$4 sm:$0xff]   ;;  %v14212_v3 = vld [vmem:[#allocation14 + $0x180] ss:$16 sps:$4 sm:$0xff]   ;;  %5656 = vmatprep.subr.bf16.mxu0 %v14214_v14 }
 0xf60   :  { %15502 = vpow2.f32 %v12470_v32  ;;  %v14215_v39 = vld [vmem:[#allocation14 + $0x188] ss:$16 sps:$4 sm:$0xff]   ;;  %v14220_v32 = vld [vmem:[#allocation14 + $0x1a4] ss:$16 sps:$4 sm:$0xff]   ;;  %v14223_v34 = vld [vmem:[#allocation14 + $0x1ac] ss:$16 sps:$4 sm:$0xff]  }
 0xf61   :  { %15504 = vpow2.f32 %v12471_v6  ;;  %v14218_v35 = vld [vmem:[#allocation14 + $0x1a0] ss:$16 sps:$4 sm:$0xff]   ;;  %v14221_v45 = vld [vmem:[#allocation14 + $0x1a8] ss:$16 sps:$4 sm:$0xff]   ;;  %v14226_v38 = vld [vmem:[#allocation14 + $0x1c4] ss:$16 sps:$4 sm:$0xff]  }
 0xf62   :  { %5657 = vmatpush1.bf16.msra.mxu0 %v14212_v3  ;;  %v14229_v6 = vld [vmem:[#allocation14 + $0x1cc] ss:$16 sps:$4 sm:$0xff]   ;;  %v14232_v20 = vld [vmem:[#allocation14 + $0x1e4] ss:$16 sps:$4 sm:$0xff]   ;;  %v14266_v47 = vld [vmem:[#allocation16 + $0xa0] ss:$16 sps:$4 sm:$0xff]  }
 0xf63   :  { %5658 = vmatprep.subr.bf16.mxu0 %v14220_v32  ;;  %v14235_v1 = vld [vmem:[#allocation14 + $0x1ec] ss:$16 sps:$4 sm:$0xff]   ;;  %v14274_v63 = vld [vmem:[#allocation16 + $0xc4] ss:$16 sps:$4 sm:$0xff]   ;;  %v14272_v14 = vld [vmem:[#allocation16 + $0xc0] ss:$16 sps:$4 sm:$0xff]  }
 0xf64   :  { %v14280_v3 = vld [vmem:[#allocation16 + $0xe4] ss:$16 sps:$4 sm:$0xff]   ;;  %v14278_v32 = vld [vmem:[#allocation16 + $0xe0] ss:$16 sps:$4 sm:$0xff]  }
 0xf66   :  { %5659 = vmatpush1.bf16.msra.mxu0 %v14218_v35  ;;  %v14286_v35 = vld [vmem:[#allocation16 + $0x104] ss:$16 sps:$4 sm:$0xff]  }
 0xf67   :  { %5660 = vmatprep.subr.bf16.mxu0 %v14226_v38  ;;  %v14284_v38 = vld [vmem:[#allocation16 + $0x100] ss:$16 sps:$4 sm:$0xff]  }
 0xf6a   :  { %v15503_v15 = vpop.eup %15502 }
 0xf6b   :  { %v5092_v18 = vadd.f32 1.0, %v15503_v15  ;;  %v15505_v17 = vpop.eup %15504  ;;  %v14224_v15 = vld [vmem:[#allocation14 + $0x1c0] ss:$16 sps:$4 sm:$0xff]  }
 0xf6c   :  { %v5093_v28 = vadd.f32 1.0, %v15505_v17  ;;  %5661 = vmatpush1.bf16.msra.mxu0 %v14224_v15  ;;  %v14230_v17 = vld [vmem:[#allocation14 + $0x1e0] ss:$16 sps:$4 sm:$0xff]   ;;  %v14292_v15 = vld [vmem:[#allocation16 + $0x124] ss:$16 sps:$4 sm:$0xff]  }
 0xf6d   :  { %15506 = vrcp.f32 %v5092_v18  ;;  %v14227_v18 = vld [vmem:[#allocation14 + $0x1c8] ss:$16 sps:$4 sm:$0xff]   ;;  %5662 = vmatprep.subr.bf16.mxu0 %v14232_v20  ;;  %v14290_v20 = vld [vmem:[#allocation16 + $0x120] ss:$16 sps:$4 sm:$0xff]  }
 0xf70   :  { %5663 = vmatpush1.bf16.msra.mxu0 %v14230_v17  ;;  %v14298_v17 = vld [vmem:[#allocation16 + $0x144] ss:$16 sps:$4 sm:$0xff]  }
 0xf77   :  { %v15507_v2 = vpop.eup %15506 }
 0xf78   :  { %v5098_v9 = vmul.f32 %v15507_v2, %v5082_v4  ;;  %v14233_v4 = vld [vmem:[#allocation14 + $0x1e8] ss:$16 sps:$4 sm:$0xff]   ;;  %v14238_v2 = vld [vmem:[#allocation16 + $0x4] ss:$16 sps:$4 sm:$0xff]  }
 0xf79   :  { %6139 = vmatprep.subr.bf16.mxu0 %v14238_v2  ;;  %v14296_v2 = vld [vmem:[#allocation16 + $0x140] ss:$16 sps:$4 sm:$0xff]  }
 0xf7a   :  { %v5099_v58 = vadd.f32 %v5098_v9, %v5080_v10  ;;  %v14241_v10 = vld [vmem:[#allocation16 + $0xc] ss:$16 sps:$4 sm:$0xff]   ;;  %v5121_v9 = vld [vmem:[%s18039_s13] sm:$0x1] }
 0xf7c   :  { %15508 = vtanh.f32 %v5099_v58 }
 0xf7d   :  { %15510 = vrcp.f32 %v5093_v28 }
 0xf86   :  { %v15509_v27 = vpop.eup %15508 }
 0xf87   :  { %v5101_v29 = vsub.f32 %v17661_v25, %v15509_v27  ;;  %v15511_v21 = vpop.eup %15510  ;;  %v14155_v25 = vld [vmem:[#allocation14 + $0x48] ss:$16 sps:$4 sm:$0xff]  }
 0xf89   :  { %v5102_v37 = vmul.f32 %v15511_v21, %v5101_v29 }
 0xf8b   :  { %v17732_v19 = vadd.f32 %v15509_v27, %v5102_v37 }
 0xf8d   :  { %v17736_v52 = vpack.c.bf16 %v17732_v19, %v17732_v19 }
 0xf8f   :  { %13442 = vmatmul.mubr.bf16.vlgmr.msra.gmra.mrb[84].mxu1 %v17736_v52 }
 0xf90   :  { %5705 = vmatprep.mubr.bf16.mxu1 %v17710_v48  ;;  %5674 = vmatpush1.bf16.msra.mxu1 %v14143_v31  ;;  %v14181_v48 = vld [vmem:[#allocation14 + $0xcc] ss:$16 sps:$4 sm:$0xff]  }
 0xf91   :  { %5675 = vmatprep.subr.bf16.mxu1 %v14151_v50 }
 0xf94   :  { %5676 = vmatpush1.bf16.msra.mxu1 %v14149_v49  ;;  %v5221_v49 = vstv %s5220_s29 }
 0xf95   :  { %5677 = vmatprep.subr.bf16.mxu1 %v14157_v12  ;;  %v5219_v12 = vld [vmem:[#allocation8 + $0x1] sm:$0x1]  ;;  %vm5222_vm2 = vcmp.eq.s32.totalorder %v5221_v49, 1  ;;  %v14319_v49 = vld [vmem:[#allocation16 + $0x1ac] ss:$16 sps:$4 sm:$0xff]  }
 0xf98   :  { %5678 = vmatpush1.bf16.msra.mxu1 %v14155_v25 }
 0xf99   :  { %5679 = vmatprep.subr.bf16.mxu1 %v14163_v8 }
 0xf9c   :  { %5680 = vmatpush1.bf16.msra.mxu1 %v14161_v22 }
 0xf9d   :  { %5681 = vmatprep.subr.bf16.mxu1 %v14169_v53 }
 0xfa0   :  { %5682 = vmatpush1.bf16.msra.mxu1 %v14167_v59  ;;  %v14236_v59 = vld [vmem:[#allocation16] ss:$16 sps:$4 sm:$0xff]  }
 0xfa1   :  { %5683 = vmatprep.subr.bf16.mxu1 %v14175_v0  ;;  %v14239_v0 = vld [vmem:[#allocation16 + $0x8] ss:$16 sps:$4 sm:$0xff]  }
 0xfa4   :  { %5684 = vmatpush1.bf16.msra.mxu1 %v14173_v16  ;;  %v14244_v16 = vld [vmem:[#allocation16 + $0x24] ss:$16 sps:$4 sm:$0xff]  }
 0xfa5   :  { %5685 = vmatprep.subr.bf16.mxu1 %v14181_v48  ;;  %v14247_v48 = vld [vmem:[#allocation16 + $0x2c] ss:$16 sps:$4 sm:$0xff]  }
 0xfa8   :  { %5686 = vmatpush1.bf16.msra.mxu1 %v14179_v41  ;;  %v14242_v41 = vld [vmem:[#allocation16 + $0x20] ss:$16 sps:$4 sm:$0xff]  }
 0xfa9   :  { %5687 = vmatprep.subr.bf16.mxu1 %v14187_v40  ;;  %v14245_v40 = vld [vmem:[#allocation16 + $0x28] ss:$16 sps:$4 sm:$0xff]  }
 0xfac   :  { %5688 = vmatpush1.bf16.msra.mxu1 %v14185_v44  ;;  %v14250_v44 = vld [vmem:[#allocation16 + $0x44] ss:$16 sps:$4 sm:$0xff]  }
 0xfad   :  { %5689 = vmatprep.subr.bf16.mxu1 %v14193_v30  ;;  %v14248_v30 = vld [vmem:[#allocation16 + $0x40] ss:$16 sps:$4 sm:$0xff]  }
 0xfb0   :  { %5690 = vmatpush1.bf16.msra.mxu1 %v14191_v62  ;;  %v14256_v62 = vld [vmem:[#allocation16 + $0x64] ss:$16 sps:$4 sm:$0xff]  }
 0xfb1   :  { %5691 = vmatprep.subr.bf16.mxu1 %v14199_v46  ;;  %v14254_v46 = vld [vmem:[#allocation16 + $0x60] ss:$16 sps:$4 sm:$0xff]  }
 0xfb4   :  { %5692 = vmatpush1.bf16.msra.mxu1 %v14197_v26  ;;  %v14265_v26 = vld [vmem:[#allocation16 + $0x8c] ss:$16 sps:$4 sm:$0xff]  }
 0xfb5   :  { %5693 = vmatprep.subr.bf16.mxu1 %v14205_v61  ;;  %v14263_v61 = vld [vmem:[#allocation16 + $0x88] ss:$16 sps:$4 sm:$0xff]  }
 0xfb8   :  { %5694 = vmatpush1.bf16.msra.mxu1 %v14203_v42  ;;  %v14271_v42 = vld [vmem:[#allocation16 + $0xac] ss:$16 sps:$4 sm:$0xff]  }
 0xfb9   :  { %5695 = vmatprep.subr.bf16.mxu1 %v14211_v33  ;;  %v14269_v33 = vld [vmem:[#allocation16 + $0xa8] ss:$16 sps:$4 sm:$0xff]  }
 0xfbc   :  { %5696 = vmatpush1.bf16.msra.mxu1 %v14209_v13  ;;  %v14277_v13 = vld [vmem:[#allocation16 + $0xcc] ss:$16 sps:$4 sm:$0xff]  }
 0xfbd   :  { %5697 = vmatprep.subr.bf16.mxu1 %v14217_v5  ;;  %v14275_v5 = vld [vmem:[#allocation16 + $0xc8] ss:$16 sps:$4 sm:$0xff]  }
 0xfc0   :  { %5698 = vmatpush1.bf16.msra.mxu1 %v14215_v39  ;;  %v14283_v39 = vld [vmem:[#allocation16 + $0xec] ss:$16 sps:$4 sm:$0xff]  }
 0xfc1   :  { %5699 = vmatprep.subr.bf16.mxu1 %v14223_v34  ;;  %v14281_v34 = vld [vmem:[#allocation16 + $0xe8] ss:$16 sps:$4 sm:$0xff]  }
 0xfc4   :  { %5700 = vmatpush1.bf16.msra.mxu1 %v14221_v45  ;;  %v14289_v45 = vld [vmem:[#allocation16 + $0x10c] ss:$16 sps:$4 sm:$0xff]  }
 0xfc5   :  { %5701 = vmatprep.subr.bf16.mxu1 %v14229_v6  ;;  %v14287_v6 = vld [vmem:[#allocation16 + $0x108] ss:$16 sps:$4 sm:$0xff]  }
 0xfc8   :  { %5702 = vmatpush1.bf16.msra.mxu1 %v14227_v18  ;;  %v14295_v18 = vld [vmem:[#allocation16 + $0x12c] ss:$16 sps:$4 sm:$0xff]  }
 0xfc9   :  { %5703 = vmatprep.subr.bf16.mxu1 %v14235_v1  ;;  %v14293_v1 = vld [vmem:[#allocation16 + $0x128] ss:$16 sps:$4 sm:$0xff]  }
 0xfcc   :  { %5704 = vmatpush1.bf16.msra.mxu1 %v14233_v4  ;;  %v14301_v4 = vld [vmem:[#allocation16 + $0x14c] ss:$16 sps:$4 sm:$0xff]  }
 0xfcd   :  { %6180 = vmatprep.subr.bf16.mxu1 %v14241_v10  ;;  %v14299_v10 = vld [vmem:[#allocation16 + $0x148] ss:$16 sps:$4 sm:$0xff]  }
0x1062   :  { %v5204_v28 = vpop.f32.mrb[84].mxu1 }
0x1063   :  { %v5205_v58 = vadd.f32 %v5204_v28, %v5121_v9  ;;  %v13443_v27 = vpop.f32.mrb[85].mxu1  ;;  %v14304_v9 = vld [vmem:[#allocation16 + $0x164] ss:$16 sps:$4 sm:$0xff]   ;;  %v14307_v28 = vld [vmem:[#allocation16 + $0x16c] ss:$16 sps:$4 sm:$0xff]  }
0x1064   :  { %v5207_v29 = vpop.f32.mrb[86].mxu1  ;;  %v14305_v27 = vld [vmem:[#allocation16 + $0x168] ss:$16 sps:$4 sm:$0xff]  }
0x1065   :  { %v12480_v21 = vmul.f32 -1.442695, %v5205_v58  ;;  %v13444_v37 = vpop.f32.mrb[87].mxu1  ;;  %v14302_v58 = vld [vmem:[#allocation16 + $0x160] ss:$16 sps:$4 sm:$0xff]  }
0x1066   :  { %v14308_v29 = vld [vmem:[#allocation16 + $0x180] ss:$16 sps:$4 sm:$0xff]   ;;  %v14311_v37 = vld [vmem:[#allocation16 + $0x188] ss:$16 sps:$4 sm:$0xff]  }
0x1067   :  { %15512 = vpow2.f32 %v12480_v21  ;;  %v14310_v21 = vld [vmem:[#allocation16 + $0x184] ss:$16 sps:$4 sm:$0xff]  }
0x1071   :  { %v15513_v31 = vpop.eup %15512 }
0x1072   :  { %v5213_v50 = vadd.f32 1.0, %v15513_v31  ;;  %v14313_v31 = vld [vmem:[#allocation16 + $0x18c] ss:$16 sps:$4 sm:$0xff]  }
0x1074   :  { %15514 = vrcp.f32 %v5213_v50  ;;  %v14316_v50 = vld [vmem:[#allocation16 + $0x1a4] ss:$16 sps:$4 sm:$0xff]  }
0x107e   :  { %v15515_v25 = vpop.eup %15514 }
0x107f   :  { %5216 = vst [vmem:[#allocation19 + $0x1] sm:$0x1] %v15515_v25  ;;  %v5223_v8 = vsel %vm5222_vm2, %v5219_v12, %v15515_v25  ;;  %v14314_v12 = vld [vmem:[#allocation16 + $0x1a0] ss:$16 sps:$4 sm:$0xff]   ;;  %v14317_v25 = vld [vmem:[#allocation16 + $0x1a8] ss:$16 sps:$4 sm:$0xff]  }
0x1080   :  { %v5224_v22 = vmax.f32 %v5223_v8, 0.0  ;;  %v14322_v8 = vld [vmem:[#allocation16 + $0x1c4] ss:$16 sps:$4 sm:$0xff]  }
0x1082   :  { %v5225_v53 = vpack.c.bf16 %v5224_v22, %v5224_v22  ;;  %v14325_v22 = vld [vmem:[#allocation16 + $0x1cc] ss:$16 sps:$4 sm:$0xff]  }
0x1084   :  { %5665 = vmatmul.mubr.bf16.vlgmr.msra.gmra.mrb[88].mxu0 %v5225_v53  ;;  %5706 = vmatmul.mubr.bf16.vlgmr.msra.gmra.mrb[88].mxu1 %v5225_v53  ;;  %v14320_v53 = vld [vmem:[#allocation16 + $0x1c0] ss:$16 sps:$4 sm:$0xff]  }
0x1085   :  { %6171 = vmatprep.mubr.bf16.mxu0 %v17736_v52  ;;  %6212 = vmatprep.mubr.bf16.mxu1 %v17736_v52  ;;  %v14257_v52 = vld [vmem:[#allocation16 + $0x68] ss:$16 sps:$4 sm:$0xff]  }
0x1086   :  { %6140 = vmatpush1.bf16.msra.mxu0 %v14236_v59  ;;  %6181 = vmatpush1.bf16.msra.mxu1 %v14239_v0  ;;  %v14323_v59 = vld [vmem:[#allocation16 + $0x1c8] ss:$16 sps:$4 sm:$0xff]   ;;  %v14328_v0 = vld [vmem:[#allocation16 + $0x1e4] ss:$16 sps:$4 sm:$0xff]  }
0x1087   :  { %6141 = vmatprep.subr.bf16.mxu0 %v14244_v16  ;;  %6182 = vmatprep.subr.bf16.mxu1 %v14247_v48  ;;  %v14331_v16 = vld [vmem:[#allocation16 + $0x1ec] ss:$16 sps:$4 sm:$0xff]   ;;  %v14326_v48 = vld [vmem:[#allocation16 + $0x1e0] ss:$16 sps:$4 sm:$0xff]  }
0x108a   :  { %6142 = vmatpush1.bf16.msra.mxu0 %v14242_v41  ;;  %6183 = vmatpush1.bf16.msra.mxu1 %v14245_v40  ;;  %v14329_v41 = vld [vmem:[#allocation16 + $0x1e8] ss:$16 sps:$4 sm:$0xff]   ;;  %v5290_v40 = vld [vmem:[%s18035_s9] sm:$0xf] }
0x108b   :  { %6143 = vmatprep.subr.bf16.mxu0 %v14250_v44  ;;  %6184 = vmatprep.subr.bf16.mxu1 %v14253_v36  ;;  %v5615_v44 = vrot.slane %v5290_v40, %v18560_v11 }
0x108e   :  { %6144 = vmatpush1.bf16.msra.mxu0 %v14248_v30  ;;  %6185 = vmatpush1.bf16.msra.mxu1 %v14251_v57 }
0x108f   :  { %6145 = vmatprep.subr.bf16.mxu0 %v14256_v62  ;;  %6186 = vmatprep.subr.bf16.mxu1 %v14259_v23 }
0x1092   :  { %6146 = vmatpush1.bf16.msra.mxu0 %v14254_v46  ;;  %6187 = vmatpush1.bf16.msra.mxu1 %v14257_v52 }
0x1093   :  { %6147 = vmatprep.subr.bf16.mxu0 %v14262_v54  ;;  %6188 = vmatprep.subr.bf16.mxu1 %v14265_v26 }
0x1096   :  { %6148 = vmatpush1.bf16.msra.mxu0 %v14260_v43  ;;  %6189 = vmatpush1.bf16.msra.mxu1 %v14263_v61  ;;  %v5619_v61 = vrot.slane %v5290_v40, %v18561_v7 }
0x1097   :  { %6149 = vmatprep.subr.bf16.mxu0 %v14268_v60  ;;  %6190 = vmatprep.subr.bf16.mxu1 %v14271_v42 }
0x109a   :  { %6150 = vmatpush1.bf16.msra.mxu0 %v14266_v47  ;;  %6191 = vmatpush1.bf16.msra.mxu1 %v14269_v33 }
0x109b   :  { %6151 = vmatprep.subr.bf16.mxu0 %v14274_v63  ;;  %6192 = vmatprep.subr.bf16.mxu1 %v14277_v13  ;;  %v5627_v63 = vrot.slane %v5290_v40, %v18562_v56  ;;  %v5623_v13 = vrot.slane %v5290_v40, %v18563_v24 }
0x109e   :  { %6152 = vmatpush1.bf16.msra.mxu0 %v14272_v14  ;;  %6193 = vmatpush1.bf16.msra.mxu1 %v14275_v5 }
0x109f   :  { %6153 = vmatprep.subr.bf16.mxu0 %v14280_v3  ;;  %6194 = vmatprep.subr.bf16.mxu1 %v14283_v39 }
0x10a2   :  { %6154 = vmatpush1.bf16.msra.mxu0 %v14278_v32  ;;  %6195 = vmatpush1.bf16.msra.mxu1 %v14281_v34 }
0x10a3   :  { %6155 = vmatprep.subr.bf16.mxu0 %v14286_v35  ;;  %6196 = vmatprep.subr.bf16.mxu1 %v14289_v45 }
0x10a6   :  { %6156 = vmatpush1.bf16.msra.mxu0 %v14284_v38  ;;  %6197 = vmatpush1.bf16.msra.mxu1 %v14287_v6 }
0x10a7   :  { %6157 = vmatprep.subr.bf16.mxu0 %v14292_v15  ;;  %6198 = vmatprep.subr.bf16.mxu1 %v14295_v18 }
0x10aa   :  { %6158 = vmatpush1.bf16.msra.mxu0 %v14290_v20  ;;  %6199 = vmatpush1.bf16.msra.mxu1 %v14293_v1  ;;  %v14332_v1 = vld [vmem:[#allocation17] sm:$0xff]  }
0x10ab   :  { %6159 = vmatprep.subr.bf16.mxu0 %v14298_v17  ;;  %6200 = vmatprep.subr.bf16.mxu1 %v14301_v4  ;;  %v14334_v17 = vld [vmem:[#allocation17 + $0x10] sm:$0xff]   ;;  %v14335_v4 = vld [vmem:[#allocation17 + $0x18] sm:$0xff]  }
0x10ae   :  { %6160 = vmatpush1.bf16.msra.mxu0 %v14296_v2  ;;  %6201 = vmatpush1.bf16.msra.mxu1 %v14299_v10  ;;  %v14336_v2 = vld [vmem:[#allocation17 + $0x20] sm:$0xff]   ;;  %v14337_v10 = vld [vmem:[#allocation17 + $0x28] sm:$0xff]  }
0x10af   :  { %6161 = vmatprep.subr.bf16.mxu0 %v14304_v9  ;;  %6202 = vmatprep.subr.bf16.mxu1 %v14307_v28  ;;  %v14338_v9 = vld [vmem:[#allocation17 + $0x30] sm:$0xff]   ;;  %v14339_v28 = vld [vmem:[#allocation17 + $0x38] sm:$0xff]  }
0x10b2   :  { %6162 = vmatpush1.bf16.msra.mxu0 %v14302_v58  ;;  %6203 = vmatpush1.bf16.msra.mxu1 %v14305_v27  ;;  %v14340_v58 = vld [vmem:[#allocation14] ss:$16 sps:$4 sm:$0xff]   ;;  %v14342_v27 = vld [vmem:[#allocation14 + $0x4] ss:$16 sps:$4 sm:$0xff]  }
0x10b3   :  { %6163 = vmatprep.subr.bf16.mxu0 %v14310_v21  ;;  %6204 = vmatprep.subr.bf16.mxu1 %v14313_v31  ;;  %v14348_v21 = vld [vmem:[#allocation14 + $0x24] ss:$16 sps:$4 sm:$0xff]  }
0x10b4   :  { %v14354_v31 = vld [vmem:[#allocation14 + $0x44] ss:$16 sps:$4 sm:$0xff]  }
0x10b6   :  { %6164 = vmatpush1.bf16.msra.mxu0 %v14308_v29  ;;  %6205 = vmatpush1.bf16.msra.mxu1 %v14311_v37  ;;  %v14345_v29 = vld [vmem:[#allocation14 + $0xc] ss:$16 sps:$4 sm:$0xff]   ;;  %v14346_v37 = vld [vmem:[#allocation14 + $0x20] ss:$16 sps:$4 sm:$0xff]  }
0x10b7   :  { %6165 = vmatprep.subr.bf16.mxu0 %v14316_v50  ;;  %6206 = vmatprep.subr.bf16.mxu1 %v14319_v49  ;;  %v14352_v50 = vld [vmem:[#allocation14 + $0x40] ss:$16 sps:$4 sm:$0xff]   ;;  %v14360_v49 = vld [vmem:[#allocation14 + $0x64] ss:$16 sps:$4 sm:$0xff]  }
0x10ba   :  { %6166 = vmatpush1.bf16.msra.mxu0 %v14314_v12  ;;  %6207 = vmatpush1.bf16.msra.mxu1 %v14317_v25  ;;  %v14358_v12 = vld [vmem:[#allocation14 + $0x60] ss:$16 sps:$4 sm:$0xff]   ;;  %v14366_v25 = vld [vmem:[#allocation14 + $0x84] ss:$16 sps:$4 sm:$0xff]  }
0x10bb   :  { %6167 = vmatprep.subr.bf16.mxu0 %v14322_v8  ;;  %6208 = vmatprep.subr.bf16.mxu1 %v14325_v22  ;;  %v14364_v8 = vld [vmem:[#allocation14 + $0x80] ss:$16 sps:$4 sm:$0xff]   ;;  %v14372_v22 = vld [vmem:[#allocation14 + $0xa4] ss:$16 sps:$4 sm:$0xff]  }
0x10be   :  { %6168 = vmatpush1.bf16.msra.mxu0 %v14320_v53  ;;  %6209 = vmatpush1.bf16.msra.mxu1 %v14323_v59  ;;  %v14370_v53 = vld [vmem:[#allocation14 + $0xa0] ss:$16 sps:$4 sm:$0xff]   ;;  %v14378_v59 = vld [vmem:[#allocation14 + $0xc4] ss:$16 sps:$4 sm:$0xff]  }
0x10bf   :  { %6169 = vmatprep.subr.bf16.mxu0 %v14328_v0  ;;  %6210 = vmatprep.subr.bf16.mxu1 %v14331_v16  ;;  %v14376_v0 = vld [vmem:[#allocation14 + $0xc0] ss:$16 sps:$4 sm:$0xff]   ;;  %v14384_v16 = vld [vmem:[#allocation14 + $0xe4] ss:$16 sps:$4 sm:$0xff]  }
0x10c2   :  { %6170 = vmatpush1.bf16.msra.mxu0 %v14326_v48  ;;  %6211 = vmatpush1.bf16.msra.mxu1 %v14329_v41  ;;  %v14382_v48 = vld [vmem:[#allocation14 + $0xe0] ss:$16 sps:$4 sm:$0xff]  }
0x10c3   :  { %13445 = vmatprep.subr.bf16.mxu0 %v16164_v51  ;;  %6767 = vmatprep.subr.bf16.mxu1 %v14342_v27  ;;  %v5797_v41 = vld [vmem:[%s18037_s11] sm:$0xf]  ;;  %v14375_v27 = vld [vmem:[#allocation14 + $0xac] ss:$16 sps:$4 sm:$0xff]  }
0x10c4   :  { %v6122_v40 = vrot.slane %v5797_v41, %v18560_v11 }
0x1157   :  { %v5666_v36 = vpop.f32.mrb[88].mxu0  ;;  %v5707_v30 = vpop.f32.mrb[88].mxu1 }
0x1158   :  { %v5667_v57 = vadd.f32 %v5666_v36, %v5615_v44  ;;  %v5668_v62 = vpop.f32.mrb[89].mxu0  ;;  %v5709_v23 = vpop.f32.mrb[89].mxu1  ;;  %v5708_v39 = vadd.f32 %v5707_v30, %v5623_v13 }
0x1159   :  { %v5670_v46 = vpop.f32.mrb[90].mxu0  ;;  %v5711_v52 = vpop.f32.mrb[90].mxu1  ;;  %v5669_v60 = vadd.f32 %v5668_v62, %v5619_v61  ;;  %v5710_v5 = vadd.f32 %v5709_v23, %v5627_v63  ;;  %v6130_v63 = vrot.slane %v5797_v41, %v18563_v24 }
0x115a   :  { %v12546_v54 = vmul.f32 -1.442695, %v5667_v57  ;;  %v5671_v26 = vpop.f32.mrb[91].mxu0  ;;  %v5712_v43 = vpop.f32.mrb[91].mxu1 }
0x115b   :  { %v12547_v42 = vmul.f32 -1.442695, %v5669_v60  ;;  %v6126_v43 = vrot.slane %v5797_v41, %v18561_v7 }
0x115c   :  { %15516 = vpow2.f32 %v12546_v54 }
0x115d   :  { %15518 = vpow2.f32 %v12547_v42 }
0x1166   :  { %v15517_v47 = vpop.eup %15516 }
0x1167   :  { %v5720_v33 = vadd.f32 1.0, %v15517_v47  ;;  %v15519_v14 = vpop.eup %15518 }
0x1168   :  { %v5721_v34 = vadd.f32 1.0, %v15519_v14 }
0x1169   :  { %15520 = vrcp.f32 %v5720_v33  ;;  %v6134_v33 = vrot.slane %v5797_v41, %v18562_v56  ;;  %v14403_v41 = vld [vmem:[#allocation14 + $0x148] ss:$16 sps:$4 sm:$0xff]  }
0x1173   :  { %v15521_v3 = vpop.eup %15520 }
0x1174   :  { %v5726_v32 = vmul.f32 %v15521_v3, %v5710_v5 }
0x1176   :  { %v5727_v35 = vadd.f32 %v5726_v32, %v5708_v39 }
0x1178   :  { %15522 = vtanh.f32 %v5727_v35 }
0x1179   :  { %15524 = vrcp.f32 %v5721_v34 }
0x1182   :  { %v15523_v45 = vpop.eup %15522 }
0x1183   :  { %v5729_v38 = vsub.f32 %v17706_v55, %v15523_v45  ;;  %v15525_v6 = vpop.eup %15524  ;;  %v14333_v55 = vld [vmem:[#allocation17 + $0x8] sm:$0xff]  }
0x1185   :  { %v5730_v15 = vmul.f32 %v15525_v6, %v5729_v38 }
0x1187   :  { %v17754_v18 = vadd.f32 %v15523_v45, %v5730_v15 }
0x1189   :  { %v17758_v20 = vpack.c.bf16 %v17754_v18, %v17754_v18 }
0x118b   :  { %6172 = vmatmul.mubr.bf16.vlgmr.msra.gmra.mrb[92].mxu0 %v17758_v20  ;;  %6213 = vmatmul.mubr.bf16.vlgmr.msra.gmra.mrb[92].mxu1 %v17758_v20 }
0x118c   :  { %6799 = vmatprep.mubr.bf16.mxu1 %v17758_v20  ;;  %13461 = vmatprep.mubr.msk.bf16.mxu0 %vm16165_vm0, %v16164_v51 }
0x118d   :  { %13446 = vmatpush3.bf16.msra.mxu0 %v14332_v1  ;;  %6768 = vmatpush1.bf16.msra.mxu1 %v14340_v58  ;;  %v14343_v1 = vld [vmem:[#allocation14 + $0x8] ss:$16 sps:$4 sm:$0xff]  }
0x118e   :  { %13447 = vmatprep.subr.bf16.mxu0 %v16164_v51  ;;  %6769 = vmatprep.subr.bf16.mxu1 %v14348_v21  ;;  %v14367_v58 = vld [vmem:[#allocation14 + $0x88] ss:$16 sps:$4 sm:$0xff]  }
0x118f   :  { %v14379_v21 = vld [vmem:[#allocation14 + $0xc8] ss:$16 sps:$4 sm:$0xff]  }
0x1191   :  { %13448 = vmatpush3.bf16.msra.mxu0 %v14333_v55  ;;  %6770 = vmatpush1.bf16.msra.mxu1 %v14346_v37  ;;  %v14387_v37 = vld [vmem:[#allocation14 + $0xec] ss:$16 sps:$4 sm:$0xff]  }
0x1192   :  { %13449 = vmatprep.subr.bf16.mxu0 %v16164_v51  ;;  %6771 = vmatprep.subr.bf16.mxu1 %v14354_v31  ;;  %v14385_v31 = vld [vmem:[#allocation14 + $0xe8] ss:$16 sps:$4 sm:$0xff]  }
0x1195   :  { %13450 = vmatpush3.bf16.msra.mxu0 %v14334_v17  ;;  %6772 = vmatpush1.bf16.msra.mxu1 %v14352_v50  ;;  %v14351_v17 = vld [vmem:[#allocation14 + $0x2c] ss:$16 sps:$4 sm:$0xff]   ;;  %v14390_v50 = vld [vmem:[#allocation14 + $0x104] ss:$16 sps:$4 sm:$0xff]  }
0x1196   :  { %13451 = vmatprep.subr.bf16.mxu0 %v16164_v51  ;;  %6773 = vmatprep.subr.bf16.mxu1 %v14360_v49  ;;  %v14393_v49 = vld [vmem:[#allocation14 + $0x10c] ss:$16 sps:$4 sm:$0xff]  }
0x1199   :  { %13452 = vmatpush3.bf16.msra.mxu0 %v14335_v4  ;;  %6774 = vmatpush1.bf16.msra.mxu1 %v14358_v12  ;;  %v14349_v4 = vld [vmem:[#allocation14 + $0x28] ss:$16 sps:$4 sm:$0xff]   ;;  %v14388_v12 = vld [vmem:[#allocation14 + $0x100] ss:$16 sps:$4 sm:$0xff]  }
0x119a   :  { %13453 = vmatprep.subr.bf16.mxu0 %v16164_v51  ;;  %6775 = vmatprep.subr.bf16.mxu1 %v14366_v25  ;;  %v14391_v25 = vld [vmem:[#allocation14 + $0x108] ss:$16 sps:$4 sm:$0xff]  }
0x119d   :  { %13454 = vmatpush3.bf16.msra.mxu0 %v14336_v2  ;;  %6776 = vmatpush1.bf16.msra.mxu1 %v14364_v8  ;;  %v14357_v2 = vld [vmem:[#allocation14 + $0x4c] ss:$16 sps:$4 sm:$0xff]   ;;  %v14396_v8 = vld [vmem:[#allocation14 + $0x124] ss:$16 sps:$4 sm:$0xff]  }
0x119e   :  { %13455 = vmatprep.subr.bf16.mxu0 %v16164_v51  ;;  %6777 = vmatprep.subr.bf16.mxu1 %v14372_v22  ;;  %v14399_v22 = vld [vmem:[#allocation14 + $0x12c] ss:$16 sps:$4 sm:$0xff]  }
0x11a1   :  { %13456 = vmatpush3.bf16.msra.mxu0 %v14337_v10  ;;  %6778 = vmatpush1.bf16.msra.mxu1 %v14370_v53  ;;  %v14363_v10 = vld [vmem:[#allocation14 + $0x6c] ss:$16 sps:$4 sm:$0xff]   ;;  %v14394_v53 = vld [vmem:[#allocation14 + $0x120] ss:$16 sps:$4 sm:$0xff]  }
0x11a2   :  { %13457 = vmatprep.subr.bf16.mxu0 %v16164_v51  ;;  %6779 = vmatprep.subr.bf16.mxu1 %v14378_v59  ;;  %v14397_v59 = vld [vmem:[#allocation14 + $0x128] ss:$16 sps:$4 sm:$0xff]  }
0x11a5   :  { %13458 = vmatpush3.bf16.msra.mxu0 %v14338_v9  ;;  %6780 = vmatpush1.bf16.msra.mxu1 %v14376_v0  ;;  %v14361_v9 = vld [vmem:[#allocation14 + $0x68] ss:$16 sps:$4 sm:$0xff]   ;;  %v14402_v0 = vld [vmem:[#allocation14 + $0x144] ss:$16 sps:$4 sm:$0xff]  }
0x11a6   :  { %13459 = vmatprep.subr.bf16.mxu0 %v16164_v51  ;;  %6781 = vmatprep.subr.bf16.mxu1 %v14384_v16  ;;  %v14405_v16 = vld [vmem:[#allocation14 + $0x14c] ss:$16 sps:$4 sm:$0xff]  }
0x11a9   :  { %13460 = vmatpush3.bf16.msra.mxu0 %v14339_v28  ;;  %6782 = vmatpush1.bf16.msra.mxu1 %v14382_v48  ;;  %v14369_v28 = vld [vmem:[#allocation14 + $0x8c] ss:$16 sps:$4 sm:$0xff]   ;;  %v14400_v48 = vld [vmem:[#allocation14 + $0x140] ss:$16 sps:$4 sm:$0xff]  }
0x11aa   :  { %6808 = vmatprep.subr.bf16.mxu0 %v14345_v29  ;;  %v14373_v29 = vld [vmem:[#allocation14 + $0xa8] ss:$16 sps:$4 sm:$0xff]   ;;  %6783 = vmatprep.subr.bf16.mxu1 %v14390_v50  ;;  %v14453_v50 = vld [vmem:[#allocation16 + $0x4c] ss:$16 sps:$4 sm:$0xff]  }
0x11ad   :  { %6784 = vmatpush1.bf16.msra.mxu1 %v14388_v12  ;;  %v14451_v12 = vld [vmem:[#allocation16 + $0x48] ss:$16 sps:$4 sm:$0xff]  }
0x11ae   :  { %6785 = vmatprep.subr.bf16.mxu1 %v14396_v8  ;;  %v14459_v8 = vld [vmem:[#allocation16 + $0x6c] ss:$16 sps:$4 sm:$0xff]  }
0x11b1   :  { %6786 = vmatpush1.bf16.msra.mxu1 %v14394_v53  ;;  %v14462_v53 = vld [vmem:[#allocation16 + $0x84] ss:$16 sps:$4 sm:$0xff]  }
0x11b2   :  { %6787 = vmatprep.subr.bf16.mxu1 %v14402_v0  ;;  %v14460_v0 = vld [vmem:[#allocation16 + $0x80] ss:$16 sps:$4 sm:$0xff]  }
0x11b5   :  { %6788 = vmatpush1.bf16.msra.mxu1 %v14400_v48  ;;  %v14468_v48 = vld [vmem:[#allocation16 + $0xa4] ss:$16 sps:$4 sm:$0xff]  }
0x125e   :  { %v6173_v44 = vpop.f32.mrb[92].mxu0  ;;  %v6214_v36 = vpop.f32.mrb[92].mxu1 }
0x125f   :  { %v6174_v30 = vadd.f32 %v6173_v44, %v6122_v40  ;;  %v6175_v57 = vpop.f32.mrb[93].mxu0  ;;  %v6216_v62 = vpop.f32.mrb[93].mxu1  ;;  %v6215_v3 = vadd.f32 %v6214_v36, %v6130_v63  ;;  %v14408_v40 = vld [vmem:[#allocation14 + $0x164] ss:$16 sps:$4 sm:$0xff]   ;;  %v14411_v44 = vld [vmem:[#allocation14 + $0x16c] ss:$16 sps:$4 sm:$0xff]  }
0x1260   :  { %v6177_v23 = vpop.f32.mrb[94].mxu0  ;;  %v6218_v46 = vpop.f32.mrb[94].mxu1  ;;  %v6176_v61 = vadd.f32 %v6175_v57, %v6126_v43  ;;  %v6217_v14 = vadd.f32 %v6216_v62, %v6134_v33  ;;  %v14406_v36 = vld [vmem:[#allocation14 + $0x160] ss:$16 sps:$4 sm:$0xff]   ;;  %6789 = vmatprep.subr.bf16.mxu1 %v14408_v40  ;;  %v14414_v57 = vld [vmem:[#allocation14 + $0x184] ss:$16 sps:$4 sm:$0xff]  }
0x1261   :  { %v12612_v52 = vmul.f32 -1.442695, %v6174_v30  ;;  %v6178_v54 = vpop.f32.mrb[95].mxu0  ;;  %v6219_v26 = vpop.f32.mrb[95].mxu1  ;;  %v14409_v30 = vld [vmem:[#allocation14 + $0x168] ss:$16 sps:$4 sm:$0xff]   ;;  %6790 = vmatpush1.bf16.msra.mxu1 %v14406_v36 }
0x1262   :  { %v12613_v60 = vmul.f32 -1.442695, %v6176_v61  ;;  %v14417_v62 = vld [vmem:[#allocation14 + $0x18c] ss:$16 sps:$4 sm:$0xff]   ;;  %v14412_v23 = vld [vmem:[#allocation14 + $0x180] ss:$16 sps:$4 sm:$0xff]   ;;  %6791 = vmatprep.subr.bf16.mxu1 %v14414_v57 }
0x1263   :  { %15526 = vpow2.f32 %v12612_v52  ;;  %v14415_v46 = vld [vmem:[#allocation14 + $0x188] ss:$16 sps:$4 sm:$0xff]   ;;  %v14420_v52 = vld [vmem:[#allocation14 + $0x1a4] ss:$16 sps:$4 sm:$0xff]   ;;  %v14423_v54 = vld [vmem:[#allocation14 + $0x1ac] ss:$16 sps:$4 sm:$0xff]  }
0x1264   :  { %15528 = vpow2.f32 %v12613_v60  ;;  %v14418_v26 = vld [vmem:[#allocation14 + $0x1a0] ss:$16 sps:$4 sm:$0xff]   ;;  %v14421_v43 = vld [vmem:[#allocation14 + $0x1a8] ss:$16 sps:$4 sm:$0xff]   ;;  %v14426_v61 = vld [vmem:[#allocation14 + $0x1c4] ss:$16 sps:$4 sm:$0xff]  }
0x1265   :  { %6792 = vmatpush1.bf16.msra.mxu1 %v14412_v23  ;;  %v14429_v60 = vld [vmem:[#allocation14 + $0x1cc] ss:$16 sps:$4 sm:$0xff]   ;;  %v14432_v33 = vld [vmem:[#allocation14 + $0x1e4] ss:$16 sps:$4 sm:$0xff]   ;;  %v14466_v40 = vld [vmem:[#allocation16 + $0xa0] ss:$16 sps:$4 sm:$0xff]  }
0x1266   :  { %6793 = vmatprep.subr.bf16.mxu1 %v14420_v52  ;;  %v14435_v63 = vld [vmem:[#allocation14 + $0x1ec] ss:$16 sps:$4 sm:$0xff]   ;;  %v14474_v36 = vld [vmem:[#allocation16 + $0xc4] ss:$16 sps:$4 sm:$0xff]   ;;  %v14472_v57 = vld [vmem:[#allocation16 + $0xc0] ss:$16 sps:$4 sm:$0xff]  }
0x1267   :  { %v14480_v23 = vld [vmem:[#allocation16 + $0xe4] ss:$16 sps:$4 sm:$0xff]   ;;  %v14478_v52 = vld [vmem:[#allocation16 + $0xe0] ss:$16 sps:$4 sm:$0xff]  }
0x1269   :  { %6794 = vmatpush1.bf16.msra.mxu1 %v14418_v26  ;;  %v14486_v26 = vld [vmem:[#allocation16 + $0x104] ss:$16 sps:$4 sm:$0xff]  }
0x126a   :  { %6795 = vmatprep.subr.bf16.mxu1 %v14426_v61  ;;  %v14484_v61 = vld [vmem:[#allocation16 + $0x100] ss:$16 sps:$4 sm:$0xff]  }
0x126d   :  { %v15527_v42 = vpop.eup %15526 }
0x126e   :  { %v6227_v47 = vadd.f32 1.0, %v15527_v42  ;;  %v15529_v13 = vpop.eup %15528  ;;  %v14424_v42 = vld [vmem:[#allocation14 + $0x1c0] ss:$16 sps:$4 sm:$0xff]  }
0x126f   :  { %v6228_v32 = vadd.f32 1.0, %v15529_v13  ;;  %6796 = vmatpush1.bf16.msra.mxu1 %v14424_v42  ;;  %v14430_v13 = vld [vmem:[#allocation14 + $0x1e0] ss:$16 sps:$4 sm:$0xff]   ;;  %v14492_v42 = vld [vmem:[#allocation16 + $0x124] ss:$16 sps:$4 sm:$0xff]  }
0x1270   :  { %15530 = vrcp.f32 %v6227_v47  ;;  %v14427_v47 = vld [vmem:[#allocation14 + $0x1c8] ss:$16 sps:$4 sm:$0xff]   ;;  %6797 = vmatprep.subr.bf16.mxu1 %v14432_v33  ;;  %v14490_v33 = vld [vmem:[#allocation16 + $0x120] ss:$16 sps:$4 sm:$0xff]  }
0x1273   :  { %6798 = vmatpush1.bf16.msra.mxu1 %v14430_v13  ;;  %v14498_v13 = vld [vmem:[#allocation16 + $0x144] ss:$16 sps:$4 sm:$0xff]  }
0x127a   :  { %v15531_v5 = vpop.eup %15530 }
0x127b   :  { %v6233_v39 = vmul.f32 %v15531_v5, %v6217_v14  ;;  %v14433_v14 = vld [vmem:[#allocation14 + $0x1e8] ss:$16 sps:$4 sm:$0xff]   ;;  %v14438_v5 = vld [vmem:[#allocation16 + $0x4] ss:$16 sps:$4 sm:$0xff]  }
0x127c   :  { %7274 = vmatprep.subr.bf16.mxu1 %v14438_v5  ;;  %v14496_v5 = vld [vmem:[#allocation16 + $0x140] ss:$16 sps:$4 sm:$0xff]  }
0x127d   :  { %v6234_v34 = vadd.f32 %v6233_v39, %v6215_v3  ;;  %v14441_v3 = vld [vmem:[#allocation16 + $0xc] ss:$16 sps:$4 sm:$0xff]   ;;  %v6256_v39 = vld [vmem:[%s18039_s13] sm:$0x1] }
0x127f   :  { %15532 = vtanh.f32 %v6234_v34 }
0x1280   :  { %15534 = vrcp.f32 %v6228_v32 }
0x1289   :  { %v15533_v35 = vpop.eup %15532 }
0x128a   :  { %v6236_v45 = vsub.f32 %v17732_v19, %v15533_v35  ;;  %v15535_v38 = vpop.eup %15534  ;;  %v14355_v19 = vld [vmem:[#allocation14 + $0x48] ss:$16 sps:$4 sm:$0xff]  }
0x128c   :  { %v6237_v6 = vmul.f32 %v15535_v38, %v6236_v45 }
0x128e   :  { %v17780_v15 = vadd.f32 %v15533_v35, %v6237_v6 }
0x1290   :  { %v17784_v55 = vpack.c.bf16 %v17780_v15, %v17780_v15 }
0x1292   :  { %13462 = vmatmul.mubr.bf16.vlgmr.msra.gmra.mrb[96].mxu0 %v17784_v55 }
0x1293   :  { %6840 = vmatprep.mubr.bf16.mxu0 %v17758_v20  ;;  %6809 = vmatpush1.bf16.msra.mxu0 %v14343_v1  ;;  %v14381_v20 = vld [vmem:[#allocation14 + $0xcc] ss:$16 sps:$4 sm:$0xff]  }
0x1294   :  { %6810 = vmatprep.subr.bf16.mxu0 %v14351_v17 }
0x1297   :  { %6811 = vmatpush1.bf16.msra.mxu0 %v14349_v4  ;;  %v6356_v4 = vstv %s6355_s12 }
0x1298   :  { %6812 = vmatprep.subr.bf16.mxu0 %v14357_v2  ;;  %v6354_v2 = vld [vmem:[#allocation8 + $0x2] sm:$0x1]  ;;  %vm6357_vm3 = vcmp.eq.s32.totalorder %v6356_v4, 1  ;;  %v14519_v4 = vld [vmem:[#allocation16 + $0x1ac] ss:$16 sps:$4 sm:$0xff]  }
0x129b   :  { %6813 = vmatpush1.bf16.msra.mxu0 %v14355_v19 }
0x129c   :  { %6814 = vmatprep.subr.bf16.mxu0 %v14363_v10 }
0x129f   :  { %6815 = vmatpush1.bf16.msra.mxu0 %v14361_v9 }
0x12a0   :  { %6816 = vmatprep.subr.bf16.mxu0 %v14369_v28 }
0x12a3   :  { %6817 = vmatpush1.bf16.msra.mxu0 %v14367_v58  ;;  %v14436_v58 = vld [vmem:[#allocation16] ss:$16 sps:$4 sm:$0xff]  }
0x12a4   :  { %6818 = vmatprep.subr.bf16.mxu0 %v14375_v27  ;;  %v14439_v27 = vld [vmem:[#allocation16 + $0x8] ss:$16 sps:$4 sm:$0xff]  }
0x12a7   :  { %6819 = vmatpush1.bf16.msra.mxu0 %v14373_v29  ;;  %v14444_v29 = vld [vmem:[#allocation16 + $0x24] ss:$16 sps:$4 sm:$0xff]  }
0x12a8   :  { %6820 = vmatprep.subr.bf16.mxu0 %v14381_v20  ;;  %v14447_v20 = vld [vmem:[#allocation16 + $0x2c] ss:$16 sps:$4 sm:$0xff]  }
0x12ab   :  { %6821 = vmatpush1.bf16.msra.mxu0 %v14379_v21  ;;  %v14442_v21 = vld [vmem:[#allocation16 + $0x20] ss:$16 sps:$4 sm:$0xff]  }
0x12ac   :  { %6822 = vmatprep.subr.bf16.mxu0 %v14387_v37  ;;  %v14445_v37 = vld [vmem:[#allocation16 + $0x28] ss:$16 sps:$4 sm:$0xff]  }
0x12af   :  { %6823 = vmatpush1.bf16.msra.mxu0 %v14385_v31  ;;  %v14450_v31 = vld [vmem:[#allocation16 + $0x44] ss:$16 sps:$4 sm:$0xff]  }
0x12b0   :  { %6824 = vmatprep.subr.bf16.mxu0 %v14393_v49  ;;  %v14448_v49 = vld [vmem:[#allocation16 + $0x40] ss:$16 sps:$4 sm:$0xff]  }
0x12b3   :  { %6825 = vmatpush1.bf16.msra.mxu0 %v14391_v25  ;;  %v14456_v25 = vld [vmem:[#allocation16 + $0x64] ss:$16 sps:$4 sm:$0xff]  }
0x12b4   :  { %6826 = vmatprep.subr.bf16.mxu0 %v14399_v22  ;;  %v14454_v22 = vld [vmem:[#allocation16 + $0x60] ss:$16 sps:$4 sm:$0xff]  }
0x12b7   :  { %6827 = vmatpush1.bf16.msra.mxu0 %v14397_v59  ;;  %v14465_v59 = vld [vmem:[#allocation16 + $0x8c] ss:$16 sps:$4 sm:$0xff]  }
0x12b8   :  { %6828 = vmatprep.subr.bf16.mxu0 %v14405_v16  ;;  %v14463_v16 = vld [vmem:[#allocation16 + $0x88] ss:$16 sps:$4 sm:$0xff]  }
0x12bb   :  { %6829 = vmatpush1.bf16.msra.mxu0 %v14403_v41  ;;  %v14471_v41 = vld [vmem:[#allocation16 + $0xac] ss:$16 sps:$4 sm:$0xff]  }
0x12bc   :  { %6830 = vmatprep.subr.bf16.mxu0 %v14411_v44  ;;  %v14469_v44 = vld [vmem:[#allocation16 + $0xa8] ss:$16 sps:$4 sm:$0xff]  }
0x12bf   :  { %6831 = vmatpush1.bf16.msra.mxu0 %v14409_v30  ;;  %v14477_v30 = vld [vmem:[#allocation16 + $0xcc] ss:$16 sps:$4 sm:$0xff]  }
0x12c0   :  { %6832 = vmatprep.subr.bf16.mxu0 %v14417_v62  ;;  %v14475_v62 = vld [vmem:[#allocation16 + $0xc8] ss:$16 sps:$4 sm:$0xff]  }
0x12c3   :  { %6833 = vmatpush1.bf16.msra.mxu0 %v14415_v46  ;;  %v14483_v46 = vld [vmem:[#allocation16 + $0xec] ss:$16 sps:$4 sm:$0xff]  }
0x12c4   :  { %6834 = vmatprep.subr.bf16.mxu0 %v14423_v54  ;;  %v14481_v54 = vld [vmem:[#allocation16 + $0xe8] ss:$16 sps:$4 sm:$0xff]  }
0x12c7   :  { %6835 = vmatpush1.bf16.msra.mxu0 %v14421_v43  ;;  %v14489_v43 = vld [vmem:[#allocation16 + $0x10c] ss:$16 sps:$4 sm:$0xff]  }
0x12c8   :  { %6836 = vmatprep.subr.bf16.mxu0 %v14429_v60  ;;  %v14487_v60 = vld [vmem:[#allocation16 + $0x108] ss:$16 sps:$4 sm:$0xff]  }
0x12cb   :  { %6837 = vmatpush1.bf16.msra.mxu0 %v14427_v47  ;;  %v14495_v47 = vld [vmem:[#allocation16 + $0x12c] ss:$16 sps:$4 sm:$0xff]  }
0x12cc   :  { %6838 = vmatprep.subr.bf16.mxu0 %v14435_v63  ;;  %v14493_v63 = vld [vmem:[#allocation16 + $0x128] ss:$16 sps:$4 sm:$0xff]  }
0x12cf   :  { %6839 = vmatpush1.bf16.msra.mxu0 %v14433_v14  ;;  %v14501_v14 = vld [vmem:[#allocation16 + $0x14c] ss:$16 sps:$4 sm:$0xff]  }
0x12d0   :  { %7315 = vmatprep.subr.bf16.mxu0 %v14441_v3  ;;  %v14499_v3 = vld [vmem:[#allocation16 + $0x148] ss:$16 sps:$4 sm:$0xff]  }
0x1365   :  { %v6339_v32 = vpop.f32.mrb[96].mxu0 }
0x1366   :  { %v6340_v34 = vadd.f32 %v6339_v32, %v6256_v39  ;;  %v13463_v35 = vpop.f32.mrb[97].mxu0  ;;  %v14504_v39 = vld [vmem:[#allocation16 + $0x164] ss:$16 sps:$4 sm:$0xff]   ;;  %v14507_v32 = vld [vmem:[#allocation16 + $0x16c] ss:$16 sps:$4 sm:$0xff]  }
0x1367   :  { %v6342_v45 = vpop.f32.mrb[98].mxu0  ;;  %v14505_v35 = vld [vmem:[#allocation16 + $0x168] ss:$16 sps:$4 sm:$0xff]  }
0x1368   :  { %v12622_v38 = vmul.f32 -1.442695, %v6340_v34  ;;  %v13464_v6 = vpop.f32.mrb[99].mxu0  ;;  %v14502_v34 = vld [vmem:[#allocation16 + $0x160] ss:$16 sps:$4 sm:$0xff]  }
0x1369   :  { %v14508_v45 = vld [vmem:[#allocation16 + $0x180] ss:$16 sps:$4 sm:$0xff]   ;;  %v14511_v6 = vld [vmem:[#allocation16 + $0x188] ss:$16 sps:$4 sm:$0xff]  }
0x136a   :  { %15536 = vpow2.f32 %v12622_v38  ;;  %v14510_v38 = vld [vmem:[#allocation16 + $0x184] ss:$16 sps:$4 sm:$0xff]  }
0x1374   :  { %v15537_v1 = vpop.eup %15536 }
0x1375   :  { %v6348_v17 = vadd.f32 1.0, %v15537_v1  ;;  %v14513_v1 = vld [vmem:[#allocation16 + $0x18c] ss:$16 sps:$4 sm:$0xff]  }
0x1377   :  { %15538 = vrcp.f32 %v6348_v17  ;;  %v14516_v17 = vld [vmem:[#allocation16 + $0x1a4] ss:$16 sps:$4 sm:$0xff]  }
0x1381   :  { %v15539_v19 = vpop.eup %15538 }
0x1382   :  { %6351 = vst [vmem:[#allocation19 + $0x2] sm:$0x1] %v15539_v19  ;;  %v6358_v10 = vsel %vm6357_vm3, %v6354_v2, %v15539_v19  ;;  %v14514_v2 = vld [vmem:[#allocation16 + $0x1a0] ss:$16 sps:$4 sm:$0xff]   ;;  %v14517_v19 = vld [vmem:[#allocation16 + $0x1a8] ss:$16 sps:$4 sm:$0xff]  }
0x1383   :  { %v6359_v9 = vmax.f32 %v6358_v10, 0.0  ;;  %v14522_v10 = vld [vmem:[#allocation16 + $0x1c4] ss:$16 sps:$4 sm:$0xff]  }
0x1385   :  { %v6360_v28 = vpack.c.bf16 %v6359_v9, %v6359_v9  ;;  %v14525_v9 = vld [vmem:[#allocation16 + $0x1cc] ss:$16 sps:$4 sm:$0xff]  }
0x1387   :  { %6800 = vmatmul.mubr.bf16.vlgmr.msra.gmra.mrb[96].mxu1 %v6360_v28  ;;  %6841 = vmatmul.mubr.bf16.vlgmr.msra.gmra.mrb[100].mxu0 %v6360_v28  ;;  %v14520_v28 = vld [vmem:[#allocation16 + $0x1c0] ss:$16 sps:$4 sm:$0xff]  }
0x1388   :  { %7306 = vmatprep.mubr.bf16.mxu1 %v17784_v55  ;;  %7347 = vmatprep.mubr.bf16.mxu0 %v17784_v55  ;;  %v14457_v55 = vld [vmem:[#allocation16 + $0x68] ss:$16 sps:$4 sm:$0xff]  }
0x1389   :  { %7275 = vmatpush1.bf16.msra.mxu1 %v14436_v58  ;;  %7316 = vmatpush1.bf16.msra.mxu0 %v14439_v27  ;;  %v14523_v58 = vld [vmem:[#allocation16 + $0x1c8] ss:$16 sps:$4 sm:$0xff]   ;;  %v14528_v27 = vld [vmem:[#allocation16 + $0x1e4] ss:$16 sps:$4 sm:$0xff]  }
0x138a   :  { %7276 = vmatprep.subr.bf16.mxu1 %v14444_v29  ;;  %7317 = vmatprep.subr.bf16.mxu0 %v14447_v20  ;;  %v14531_v29 = vld [vmem:[#allocation16 + $0x1ec] ss:$16 sps:$4 sm:$0xff]   ;;  %v14526_v20 = vld [vmem:[#allocation16 + $0x1e0] ss:$16 sps:$4 sm:$0xff]  }
0x138d   :  { %7277 = vmatpush1.bf16.msra.mxu1 %v14442_v21  ;;  %7318 = vmatpush1.bf16.msra.mxu0 %v14445_v37  ;;  %v14529_v21 = vld [vmem:[#allocation16 + $0x1e8] ss:$16 sps:$4 sm:$0xff]   ;;  %v6425_v37 = vld [vmem:[%s18035_s9] sm:$0xf] }
0x138e   :  { %7278 = vmatprep.subr.bf16.mxu1 %v14450_v31  ;;  %7319 = vmatprep.subr.bf16.mxu0 %v14453_v50  ;;  %v6750_v31 = vrot.slane %v6425_v37, %v18560_v11 }
0x1391   :  { %7279 = vmatpush1.bf16.msra.mxu1 %v14448_v49  ;;  %7320 = vmatpush1.bf16.msra.mxu0 %v14451_v12 }
0x1392   :  { %7280 = vmatprep.subr.bf16.mxu1 %v14456_v25  ;;  %7321 = vmatprep.subr.bf16.mxu0 %v14459_v8 }
0x1395   :  { %7281 = vmatpush1.bf16.msra.mxu1 %v14454_v22  ;;  %7322 = vmatpush1.bf16.msra.mxu0 %v14457_v55 }
0x1396   :  { %7282 = vmatprep.subr.bf16.mxu1 %v14462_v53  ;;  %7323 = vmatprep.subr.bf16.mxu0 %v14465_v59 }
0x1399   :  { %7283 = vmatpush1.bf16.msra.mxu1 %v14460_v0  ;;  %7324 = vmatpush1.bf16.msra.mxu0 %v14463_v16  ;;  %v6754_v16 = vrot.slane %v6425_v37, %v18561_v7 }
0x139a   :  { %7284 = vmatprep.subr.bf16.mxu1 %v14468_v48  ;;  %7325 = vmatprep.subr.bf16.mxu0 %v14471_v41 }
0x139d   :  { %7285 = vmatpush1.bf16.msra.mxu1 %v14466_v40  ;;  %7326 = vmatpush1.bf16.msra.mxu0 %v14469_v44 }
0x139e   :  { %7286 = vmatprep.subr.bf16.mxu1 %v14474_v36  ;;  %7327 = vmatprep.subr.bf16.mxu0 %v14477_v30  ;;  %v6762_v36 = vrot.slane %v6425_v37, %v18562_v56  ;;  %v6758_v30 = vrot.slane %v6425_v37, %v18563_v24 }
0x13a1   :  { %7287 = vmatpush1.bf16.msra.mxu1 %v14472_v57  ;;  %7328 = vmatpush1.bf16.msra.mxu0 %v14475_v62 }
0x13a2   :  { %7288 = vmatprep.subr.bf16.mxu1 %v14480_v23  ;;  %7329 = vmatprep.subr.bf16.mxu0 %v14483_v46 }
0x13a5   :  { %7289 = vmatpush1.bf16.msra.mxu1 %v14478_v52  ;;  %7330 = vmatpush1.bf16.msra.mxu0 %v14481_v54 }
0x13a6   :  { %7290 = vmatprep.subr.bf16.mxu1 %v14486_v26  ;;  %7331 = vmatprep.subr.bf16.mxu0 %v14489_v43 }
0x13a9   :  { %7291 = vmatpush1.bf16.msra.mxu1 %v14484_v61  ;;  %7332 = vmatpush1.bf16.msra.mxu0 %v14487_v60 }
0x13aa   :  { %7292 = vmatprep.subr.bf16.mxu1 %v14492_v42  ;;  %7333 = vmatprep.subr.bf16.mxu0 %v14495_v47 }
0x13ad   :  { %7293 = vmatpush1.bf16.msra.mxu1 %v14490_v33  ;;  %7334 = vmatpush1.bf16.msra.mxu0 %v14493_v63  ;;  %v14532_v63 = vld [vmem:[#allocation17] sm:$0xff]  }
0x13ae   :  { %7294 = vmatprep.subr.bf16.mxu1 %v14498_v13  ;;  %7335 = vmatprep.subr.bf16.mxu0 %v14501_v14  ;;  %v14534_v13 = vld [vmem:[#allocation17 + $0x10] sm:$0xff]   ;;  %v14535_v14 = vld [vmem:[#allocation17 + $0x18] sm:$0xff]  }
0x13b1   :  { %7295 = vmatpush1.bf16.msra.mxu1 %v14496_v5  ;;  %7336 = vmatpush1.bf16.msra.mxu0 %v14499_v3  ;;  %v14536_v5 = vld [vmem:[#allocation17 + $0x20] sm:$0xff]   ;;  %v14537_v3 = vld [vmem:[#allocation17 + $0x28] sm:$0xff]  }
0x13b2   :  { %7296 = vmatprep.subr.bf16.mxu1 %v14504_v39  ;;  %7337 = vmatprep.subr.bf16.mxu0 %v14507_v32  ;;  %v14538_v39 = vld [vmem:[#allocation17 + $0x30] sm:$0xff]   ;;  %v14539_v32 = vld [vmem:[#allocation17 + $0x38] sm:$0xff]  }
0x13b5   :  { %7297 = vmatpush1.bf16.msra.mxu1 %v14502_v34  ;;  %7338 = vmatpush1.bf16.msra.mxu0 %v14505_v35  ;;  %v14540_v34 = vld [vmem:[#allocation14] ss:$16 sps:$4 sm:$0xff]   ;;  %v14542_v35 = vld [vmem:[#allocation14 + $0x4] ss:$16 sps:$4 sm:$0xff]  }
0x13b6   :  { %7298 = vmatprep.subr.bf16.mxu1 %v14510_v38  ;;  %7339 = vmatprep.subr.bf16.mxu0 %v14513_v1  ;;  %v14548_v38 = vld [vmem:[#allocation14 + $0x24] ss:$16 sps:$4 sm:$0xff]  }
0x13b7   :  { %v14554_v1 = vld [vmem:[#allocation14 + $0x44] ss:$16 sps:$4 sm:$0xff]  }
0x13b9   :  { %7299 = vmatpush1.bf16.msra.mxu1 %v14508_v45  ;;  %7340 = vmatpush1.bf16.msra.mxu0 %v14511_v6  ;;  %v14545_v45 = vld [vmem:[#allocation14 + $0xc] ss:$16 sps:$4 sm:$0xff]   ;;  %v14546_v6 = vld [vmem:[#allocation14 + $0x20] ss:$16 sps:$4 sm:$0xff]  }
0x13ba   :  { %7300 = vmatprep.subr.bf16.mxu1 %v14516_v17  ;;  %7341 = vmatprep.subr.bf16.mxu0 %v14519_v4  ;;  %v14552_v17 = vld [vmem:[#allocation14 + $0x40] ss:$16 sps:$4 sm:$0xff]   ;;  %v14560_v4 = vld [vmem:[#allocation14 + $0x64] ss:$16 sps:$4 sm:$0xff]  }
0x13bd   :  { %7301 = vmatpush1.bf16.msra.mxu1 %v14514_v2  ;;  %7342 = vmatpush1.bf16.msra.mxu0 %v14517_v19  ;;  %v14558_v2 = vld [vmem:[#allocation14 + $0x60] ss:$16 sps:$4 sm:$0xff]   ;;  %v14566_v19 = vld [vmem:[#allocation14 + $0x84] ss:$16 sps:$4 sm:$0xff]  }
0x13be   :  { %7302 = vmatprep.subr.bf16.mxu1 %v14522_v10  ;;  %7343 = vmatprep.subr.bf16.mxu0 %v14525_v9  ;;  %v14564_v10 = vld [vmem:[#allocation14 + $0x80] ss:$16 sps:$4 sm:$0xff]   ;;  %v14572_v9 = vld [vmem:[#allocation14 + $0xa4] ss:$16 sps:$4 sm:$0xff]  }
0x13c1   :  { %7303 = vmatpush1.bf16.msra.mxu1 %v14520_v28  ;;  %7344 = vmatpush1.bf16.msra.mxu0 %v14523_v58  ;;  %v14570_v28 = vld [vmem:[#allocation14 + $0xa0] ss:$16 sps:$4 sm:$0xff]   ;;  %v14578_v58 = vld [vmem:[#allocation14 + $0xc4] ss:$16 sps:$4 sm:$0xff]  }
0x13c2   :  { %7304 = vmatprep.subr.bf16.mxu1 %v14528_v27  ;;  %7345 = vmatprep.subr.bf16.mxu0 %v14531_v29  ;;  %v14576_v27 = vld [vmem:[#allocation14 + $0xc0] ss:$16 sps:$4 sm:$0xff]   ;;  %v14584_v29 = vld [vmem:[#allocation14 + $0xe4] ss:$16 sps:$4 sm:$0xff]  }
0x13c5   :  { %7305 = vmatpush1.bf16.msra.mxu1 %v14526_v20  ;;  %7346 = vmatpush1.bf16.msra.mxu0 %v14529_v21  ;;  %v14582_v20 = vld [vmem:[#allocation14 + $0xe0] ss:$16 sps:$4 sm:$0xff]  }
0x13c6   :  { %13465 = vmatprep.subr.bf16.mxu1 %v16164_v51  ;;  %7902 = vmatprep.subr.bf16.mxu0 %v14542_v35  ;;  %v6932_v21 = vld [vmem:[%s18037_s11] sm:$0xf]  ;;  %v14575_v35 = vld [vmem:[#allocation14 + $0xac] ss:$16 sps:$4 sm:$0xff]  }
0x13c7   :  { %v7257_v37 = vrot.slane %v6932_v21, %v18560_v11 }
0x145a   :  { %v6801_v50 = vpop.f32.mrb[96].mxu1  ;;  %v6842_v49 = vpop.f32.mrb[100].mxu0 }
0x145b   :  { %v6802_v12 = vadd.f32 %v6801_v50, %v6750_v31  ;;  %v6803_v25 = vpop.f32.mrb[97].mxu1  ;;  %v6844_v8 = vpop.f32.mrb[101].mxu0  ;;  %v6843_v46 = vadd.f32 %v6842_v49, %v6758_v30 }
0x145c   :  { %v6805_v22 = vpop.f32.mrb[98].mxu1  ;;  %v6846_v55 = vpop.f32.mrb[102].mxu0  ;;  %v6804_v48 = vadd.f32 %v6803_v25, %v6754_v16  ;;  %v6845_v62 = vadd.f32 %v6844_v8, %v6762_v36  ;;  %v7265_v36 = vrot.slane %v6932_v21, %v18563_v24 }
0x145d   :  { %v12688_v53 = vmul.f32 -1.442695, %v6802_v12  ;;  %v6806_v59 = vpop.f32.mrb[99].mxu1  ;;  %v6847_v0 = vpop.f32.mrb[103].mxu0 }
0x145e   :  { %v12689_v41 = vmul.f32 -1.442695, %v6804_v48  ;;  %v7261_v0 = vrot.slane %v6932_v21, %v18561_v7 }
0x145f   :  { %15540 = vpow2.f32 %v12688_v53 }
0x1460   :  { %15542 = vpow2.f32 %v12689_v41 }
0x1469   :  { %v15541_v40 = vpop.eup %15540 }
0x146a   :  { %v6855_v44 = vadd.f32 1.0, %v15541_v40  ;;  %v15543_v57 = vpop.eup %15542 }
0x146b   :  { %v6856_v54 = vadd.f32 1.0, %v15543_v57 }
0x146c   :  { %15544 = vrcp.f32 %v6855_v44  ;;  %v7269_v44 = vrot.slane %v6932_v21, %v18562_v56  ;;  %v14603_v21 = vld [vmem:[#allocation14 + $0x148] ss:$16 sps:$4 sm:$0xff]  }
0x1476   :  { %v15545_v23 = vpop.eup %15544 }
0x1477   :  { %v6861_v52 = vmul.f32 %v15545_v23, %v6845_v62 }
0x1479   :  { %v6862_v26 = vadd.f32 %v6861_v52, %v6843_v46 }
0x147b   :  { %15546 = vtanh.f32 %v6862_v26 }
0x147c   :  { %15548 = vrcp.f32 %v6856_v54 }
0x1485   :  { %v15547_v43 = vpop.eup %15546 }
0x1486   :  { %v6864_v61 = vsub.f32 %v17754_v18, %v15547_v43  ;;  %v15549_v60 = vpop.eup %15548  ;;  %v14533_v18 = vld [vmem:[#allocation17 + $0x8] sm:$0xff]  }
0x1488   :  { %v6865_v42 = vmul.f32 %v15549_v60, %v6864_v61 }
0x148a   :  { %v17802_v47 = vadd.f32 %v15547_v43, %v6865_v42 }
0x148c   :  { %v17806_v33 = vpack.c.bf16 %v17802_v47, %v17802_v47 }
0x148e   :  { %7307 = vmatmul.mubr.bf16.vlgmr.msra.gmra.mrb[100].mxu1 %v17806_v33  ;;  %7348 = vmatmul.mubr.bf16.vlgmr.msra.gmra.mrb[104].mxu0 %v17806_v33 }
0x148f   :  { %7934 = vmatprep.mubr.bf16.mxu0 %v17806_v33  ;;  %13481 = vmatprep.mubr.msk.bf16.mxu1 %vm16165_vm0, %v16164_v51 }
0x1490   :  { %13466 = vmatpush3.bf16.msra.mxu1 %v14532_v63  ;;  %7903 = vmatpush1.bf16.msra.mxu0 %v14540_v34  ;;  %v14543_v63 = vld [vmem:[#allocation14 + $0x8] ss:$16 sps:$4 sm:$0xff]  }
0x1491   :  { %13467 = vmatprep.subr.bf16.mxu1 %v16164_v51  ;;  %7904 = vmatprep.subr.bf16.mxu0 %v14548_v38  ;;  %v14567_v34 = vld [vmem:[#allocation14 + $0x88] ss:$16 sps:$4 sm:$0xff]  }
0x1492   :  { %v14579_v38 = vld [vmem:[#allocation14 + $0xc8] ss:$16 sps:$4 sm:$0xff]  }
0x1494   :  { %13468 = vmatpush3.bf16.msra.mxu1 %v14533_v18  ;;  %7905 = vmatpush1.bf16.msra.mxu0 %v14546_v6  ;;  %v14587_v6 = vld [vmem:[#allocation14 + $0xec] ss:$16 sps:$4 sm:$0xff]  }
0x1495   :  { %13469 = vmatprep.subr.bf16.mxu1 %v16164_v51  ;;  %7906 = vmatprep.subr.bf16.mxu0 %v14554_v1  ;;  %v14585_v1 = vld [vmem:[#allocation14 + $0xe8] ss:$16 sps:$4 sm:$0xff]  }
0x1498   :  { %13470 = vmatpush3.bf16.msra.mxu1 %v14534_v13  ;;  %7907 = vmatpush1.bf16.msra.mxu0 %v14552_v17  ;;  %v14551_v13 = vld [vmem:[#allocation14 + $0x2c] ss:$16 sps:$4 sm:$0xff]   ;;  %v14590_v17 = vld [vmem:[#allocation14 + $0x104] ss:$16 sps:$4 sm:$0xff]  }
0x1499   :  { %13471 = vmatprep.subr.bf16.mxu1 %v16164_v51  ;;  %7908 = vmatprep.subr.bf16.mxu0 %v14560_v4  ;;  %v14593_v4 = vld [vmem:[#allocation14 + $0x10c] ss:$16 sps:$4 sm:$0xff]  }
0x149c   :  { %13472 = vmatpush3.bf16.msra.mxu1 %v14535_v14  ;;  %7909 = vmatpush1.bf16.msra.mxu0 %v14558_v2  ;;  %v14549_v14 = vld [vmem:[#allocation14 + $0x28] ss:$16 sps:$4 sm:$0xff]   ;;  %v14588_v2 = vld [vmem:[#allocation14 + $0x100] ss:$16 sps:$4 sm:$0xff]  }
0x149d   :  { %13473 = vmatprep.subr.bf16.mxu1 %v16164_v51  ;;  %7910 = vmatprep.subr.bf16.mxu0 %v14566_v19  ;;  %v14591_v19 = vld [vmem:[#allocation14 + $0x108] ss:$16 sps:$4 sm:$0xff]  }
0x14a0   :  { %13474 = vmatpush3.bf16.msra.mxu1 %v14536_v5  ;;  %7911 = vmatpush1.bf16.msra.mxu0 %v14564_v10  ;;  %v14557_v5 = vld [vmem:[#allocation14 + $0x4c] ss:$16 sps:$4 sm:$0xff]   ;;  %v14596_v10 = vld [vmem:[#allocation14 + $0x124] ss:$16 sps:$4 sm:$0xff]  }
0x14a1   :  { %13475 = vmatprep.subr.bf16.mxu1 %v16164_v51  ;;  %7912 = vmatprep.subr.bf16.mxu0 %v14572_v9  ;;  %v14599_v9 = vld [vmem:[#allocation14 + $0x12c] ss:$16 sps:$4 sm:$0xff]  }
0x14a4   :  { %13476 = vmatpush3.bf16.msra.mxu1 %v14537_v3  ;;  %7913 = vmatpush1.bf16.msra.mxu0 %v14570_v28  ;;  %v14563_v3 = vld [vmem:[#allocation14 + $0x6c] ss:$16 sps:$4 sm:$0xff]   ;;  %v14594_v28 = vld [vmem:[#allocation14 + $0x120] ss:$16 sps:$4 sm:$0xff]  }
0x14a5   :  { %13477 = vmatprep.subr.bf16.mxu1 %v16164_v51  ;;  %7914 = vmatprep.subr.bf16.mxu0 %v14578_v58  ;;  %v14597_v58 = vld [vmem:[#allocation14 + $0x128] ss:$16 sps:$4 sm:$0xff]  }
0x14a8   :  { %13478 = vmatpush3.bf16.msra.mxu1 %v14538_v39  ;;  %7915 = vmatpush1.bf16.msra.mxu0 %v14576_v27  ;;  %v14561_v39 = vld [vmem:[#allocation14 + $0x68] ss:$16 sps:$4 sm:$0xff]   ;;  %v14602_v27 = vld [vmem:[#allocation14 + $0x144] ss:$16 sps:$4 sm:$0xff]  }
0x14a9   :  { %13479 = vmatprep.subr.bf16.mxu1 %v16164_v51  ;;  %7916 = vmatprep.subr.bf16.mxu0 %v14584_v29  ;;  %v14605_v29 = vld [vmem:[#allocation14 + $0x14c] ss:$16 sps:$4 sm:$0xff]  }
0x14ac   :  { %13480 = vmatpush3.bf16.msra.mxu1 %v14539_v32  ;;  %7917 = vmatpush1.bf16.msra.mxu0 %v14582_v20  ;;  %v14569_v32 = vld [vmem:[#allocation14 + $0x8c] ss:$16 sps:$4 sm:$0xff]   ;;  %v14600_v20 = vld [vmem:[#allocation14 + $0x140] ss:$16 sps:$4 sm:$0xff]  }
0x14ad   :  { %7943 = vmatprep.subr.bf16.mxu1 %v14545_v45  ;;  %v14573_v45 = vld [vmem:[#allocation14 + $0xa8] ss:$16 sps:$4 sm:$0xff]   ;;  %7918 = vmatprep.subr.bf16.mxu0 %v14590_v17  ;;  %v14653_v17 = vld [vmem:[#allocation16 + $0x4c] ss:$16 sps:$4 sm:$0xff]  }
0x14b0   :  { %7919 = vmatpush1.bf16.msra.mxu0 %v14588_v2  ;;  %v14651_v2 = vld [vmem:[#allocation16 + $0x48] ss:$16 sps:$4 sm:$0xff]  }
0x14b1   :  { %7920 = vmatprep.subr.bf16.mxu0 %v14596_v10  ;;  %v14659_v10 = vld [vmem:[#allocation16 + $0x6c] ss:$16 sps:$4 sm:$0xff]  }
0x14b4   :  { %7921 = vmatpush1.bf16.msra.mxu0 %v14594_v28  ;;  %v14662_v28 = vld [vmem:[#allocation16 + $0x84] ss:$16 sps:$4 sm:$0xff]  }
0x14b5   :  { %7922 = vmatprep.subr.bf16.mxu0 %v14602_v27  ;;  %v14660_v27 = vld [vmem:[#allocation16 + $0x80] ss:$16 sps:$4 sm:$0xff]  }
0x14b8   :  { %7923 = vmatpush1.bf16.msra.mxu0 %v14600_v20  ;;  %v14668_v20 = vld [vmem:[#allocation16 + $0xa4] ss:$16 sps:$4 sm:$0xff]  }
0x1561   :  { %v7308_v31 = vpop.f32.mrb[100].mxu1  ;;  %v7349_v50 = vpop.f32.mrb[104].mxu0 }
0x1562   :  { %v7309_v49 = vadd.f32 %v7308_v31, %v7257_v37  ;;  %v7310_v12 = vpop.f32.mrb[101].mxu1  ;;  %v7351_v25 = vpop.f32.mrb[105].mxu0  ;;  %v7350_v23 = vadd.f32 %v7349_v50, %v7265_v36  ;;  %v14608_v37 = vld [vmem:[#allocation14 + $0x164] ss:$16 sps:$4 sm:$0xff]   ;;  %v14611_v31 = vld [vmem:[#allocation14 + $0x16c] ss:$16 sps:$4 sm:$0xff]  }
0x1563   :  { %v7312_v8 = vpop.f32.mrb[102].mxu1  ;;  %v7353_v22 = vpop.f32.mrb[106].mxu0  ;;  %v7311_v16 = vadd.f32 %v7310_v12, %v7261_v0  ;;  %v7352_v57 = vadd.f32 %v7351_v25, %v7269_v44  ;;  %v14606_v50 = vld [vmem:[#allocation14 + $0x160] ss:$16 sps:$4 sm:$0xff]   ;;  %7924 = vmatprep.subr.bf16.mxu0 %v14608_v37  ;;  %v14614_v12 = vld [vmem:[#allocation14 + $0x184] ss:$16 sps:$4 sm:$0xff]  }
0x1564   :  { %v12754_v55 = vmul.f32 -1.442695, %v7309_v49  ;;  %v7313_v53 = vpop.f32.mrb[103].mxu1  ;;  %v7354_v59 = vpop.f32.mrb[107].mxu0  ;;  %v14609_v49 = vld [vmem:[#allocation14 + $0x168] ss:$16 sps:$4 sm:$0xff]   ;;  %7925 = vmatpush1.bf16.msra.mxu0 %v14606_v50 }
0x1565   :  { %v12755_v48 = vmul.f32 -1.442695, %v7311_v16  ;;  %v14617_v25 = vld [vmem:[#allocation14 + $0x18c] ss:$16 sps:$4 sm:$0xff]   ;;  %v14612_v8 = vld [vmem:[#allocation14 + $0x180] ss:$16 sps:$4 sm:$0xff]   ;;  %7926 = vmatprep.subr.bf16.mxu0 %v14614_v12 }
0x1566   :  { %15550 = vpow2.f32 %v12754_v55  ;;  %v14615_v22 = vld [vmem:[#allocation14 + $0x188] ss:$16 sps:$4 sm:$0xff]   ;;  %v14620_v55 = vld [vmem:[#allocation14 + $0x1a4] ss:$16 sps:$4 sm:$0xff]   ;;  %v14623_v53 = vld [vmem:[#allocation14 + $0x1ac] ss:$16 sps:$4 sm:$0xff]  }
0x1567   :  { %15552 = vpow2.f32 %v12755_v48  ;;  %v14618_v59 = vld [vmem:[#allocation14 + $0x1a0] ss:$16 sps:$4 sm:$0xff]   ;;  %v14621_v0 = vld [vmem:[#allocation14 + $0x1a8] ss:$16 sps:$4 sm:$0xff]   ;;  %v14626_v16 = vld [vmem:[#allocation14 + $0x1c4] ss:$16 sps:$4 sm:$0xff]  }
0x1568   :  { %7927 = vmatpush1.bf16.msra.mxu0 %v14612_v8  ;;  %v14629_v48 = vld [vmem:[#allocation14 + $0x1cc] ss:$16 sps:$4 sm:$0xff]   ;;  %v14632_v44 = vld [vmem:[#allocation14 + $0x1e4] ss:$16 sps:$4 sm:$0xff]   ;;  %v14666_v37 = vld [vmem:[#allocation16 + $0xa0] ss:$16 sps:$4 sm:$0xff]  }
0x1569   :  { %7928 = vmatprep.subr.bf16.mxu0 %v14620_v55  ;;  %v14635_v36 = vld [vmem:[#allocation14 + $0x1ec] ss:$16 sps:$4 sm:$0xff]   ;;  %v14674_v50 = vld [vmem:[#allocation16 + $0xc4] ss:$16 sps:$4 sm:$0xff]   ;;  %v14672_v12 = vld [vmem:[#allocation16 + $0xc0] ss:$16 sps:$4 sm:$0xff]  }
0x156a   :  { %v14680_v8 = vld [vmem:[#allocation16 + $0xe4] ss:$16 sps:$4 sm:$0xff]   ;;  %v14678_v55 = vld [vmem:[#allocation16 + $0xe0] ss:$16 sps:$4 sm:$0xff]  }
0x156c   :  { %7929 = vmatpush1.bf16.msra.mxu0 %v14618_v59  ;;  %v14686_v59 = vld [vmem:[#allocation16 + $0x104] ss:$16 sps:$4 sm:$0xff]  }
0x156d   :  { %7930 = vmatprep.subr.bf16.mxu0 %v14626_v16  ;;  %v14684_v16 = vld [vmem:[#allocation16 + $0x100] ss:$16 sps:$4 sm:$0xff]  }
0x1570   :  { %v15551_v41 = vpop.eup %15550 }
0x1571   :  { %v7362_v40 = vadd.f32 1.0, %v15551_v41  ;;  %v15553_v30 = vpop.eup %15552  ;;  %v14624_v41 = vld [vmem:[#allocation14 + $0x1c0] ss:$16 sps:$4 sm:$0xff]  }
0x1572   :  { %v7363_v52 = vadd.f32 1.0, %v15553_v30  ;;  %7931 = vmatpush1.bf16.msra.mxu0 %v14624_v41  ;;  %v14630_v30 = vld [vmem:[#allocation14 + $0x1e0] ss:$16 sps:$4 sm:$0xff]   ;;  %v14692_v41 = vld [vmem:[#allocation16 + $0x124] ss:$16 sps:$4 sm:$0xff]  }
0x1573   :  { %15554 = vrcp.f32 %v7362_v40  ;;  %v14627_v40 = vld [vmem:[#allocation14 + $0x1c8] ss:$16 sps:$4 sm:$0xff]   ;;  %7932 = vmatprep.subr.bf16.mxu0 %v14632_v44  ;;  %v14690_v44 = vld [vmem:[#allocation16 + $0x120] ss:$16 sps:$4 sm:$0xff]  }
0x1576   :  { %7933 = vmatpush1.bf16.msra.mxu0 %v14630_v30  ;;  %v14698_v30 = vld [vmem:[#allocation16 + $0x144] ss:$16 sps:$4 sm:$0xff]  }
0x157d   :  { %v15555_v62 = vpop.eup %15554 }
0x157e   :  { %v7368_v46 = vmul.f32 %v15555_v62, %v7352_v57  ;;  %v14633_v57 = vld [vmem:[#allocation14 + $0x1e8] ss:$16 sps:$4 sm:$0xff]   ;;  %v14638_v62 = vld [vmem:[#allocation16 + $0x4] ss:$16 sps:$4 sm:$0xff]  }
0x157f   :  { %8409 = vmatprep.subr.bf16.mxu0 %v14638_v62  ;;  %v14696_v62 = vld [vmem:[#allocation16 + $0x140] ss:$16 sps:$4 sm:$0xff]  }
0x1580   :  { %v7369_v54 = vadd.f32 %v7368_v46, %v7350_v23  ;;  %v14641_v23 = vld [vmem:[#allocation16 + $0xc] ss:$16 sps:$4 sm:$0xff]   ;;  %v7391_v46 = vld [vmem:[%s18039_s13] sm:$0x1] }
0x1582   :  { %15556 = vtanh.f32 %v7369_v54 }
0x1583   :  { %15558 = vrcp.f32 %v7363_v52 }
0x158c   :  { %v15557_v26 = vpop.eup %15556 }
0x158d   :  { %v7371_v43 = vsub.f32 %v17780_v15, %v15557_v26  ;;  %v15559_v61 = vpop.eup %15558  ;;  %v14555_v15 = vld [vmem:[#allocation14 + $0x48] ss:$16 sps:$4 sm:$0xff]  }
0x158f   :  { %v7372_v60 = vmul.f32 %v15559_v61, %v7371_v43 }
0x1591   :  { %v17828_v42 = vadd.f32 %v15557_v26, %v7372_v60 }
0x1593   :  { %v17832_v18 = vpack.c.bf16 %v17828_v42, %v17828_v42 }
0x1595   :  { %13482 = vmatmul.mubr.bf16.vlgmr.msra.gmra.mrb[104].mxu1 %v17832_v18 }
0x1596   :  { %7975 = vmatprep.mubr.bf16.mxu1 %v17806_v33  ;;  %7944 = vmatpush1.bf16.msra.mxu1 %v14543_v63  ;;  %v14581_v33 = vld [vmem:[#allocation14 + $0xcc] ss:$16 sps:$4 sm:$0xff]  }
0x1597   :  { %7945 = vmatprep.subr.bf16.mxu1 %v14551_v13 }
0x159a   :  { %7946 = vmatpush1.bf16.msra.mxu1 %v14549_v14  ;;  %v7491_v14 = vstv %s7490_s28 }
0x159b   :  { %7947 = vmatprep.subr.bf16.mxu1 %v14557_v5  ;;  %v7489_v5 = vld [vmem:[#allocation8 + $0x3] sm:$0x1]  ;;  %vm7492_vm4 = vcmp.eq.s32.totalorder %v7491_v14, 1  ;;  %v14719_v14 = vld [vmem:[#allocation16 + $0x1ac] ss:$16 sps:$4 sm:$0xff]  }
0x159e   :  { %7948 = vmatpush1.bf16.msra.mxu1 %v14555_v15 }
0x159f   :  { %7949 = vmatprep.subr.bf16.mxu1 %v14563_v3 }
0x15a2   :  { %7950 = vmatpush1.bf16.msra.mxu1 %v14561_v39 }
0x15a3   :  { %7951 = vmatprep.subr.bf16.mxu1 %v14569_v32 }
0x15a6   :  { %7952 = vmatpush1.bf16.msra.mxu1 %v14567_v34  ;;  %v14636_v34 = vld [vmem:[#allocation16] ss:$16 sps:$4 sm:$0xff]  }
0x15a7   :  { %7953 = vmatprep.subr.bf16.mxu1 %v14575_v35  ;;  %v14639_v35 = vld [vmem:[#allocation16 + $0x8] ss:$16 sps:$4 sm:$0xff]  }
0x15aa   :  { %7954 = vmatpush1.bf16.msra.mxu1 %v14573_v45  ;;  %v14644_v45 = vld [vmem:[#allocation16 + $0x24] ss:$16 sps:$4 sm:$0xff]  }
0x15ab   :  { %7955 = vmatprep.subr.bf16.mxu1 %v14581_v33  ;;  %v14647_v33 = vld [vmem:[#allocation16 + $0x2c] ss:$16 sps:$4 sm:$0xff]  }
0x15ae   :  { %7956 = vmatpush1.bf16.msra.mxu1 %v14579_v38  ;;  %v14642_v38 = vld [vmem:[#allocation16 + $0x20] ss:$16 sps:$4 sm:$0xff]  }
0x15af   :  { %7957 = vmatprep.subr.bf16.mxu1 %v14587_v6  ;;  %v14645_v6 = vld [vmem:[#allocation16 + $0x28] ss:$16 sps:$4 sm:$0xff]  }
0x15b2   :  { %7958 = vmatpush1.bf16.msra.mxu1 %v14585_v1  ;;  %v14650_v1 = vld [vmem:[#allocation16 + $0x44] ss:$16 sps:$4 sm:$0xff]  }
0x15b3   :  { %7959 = vmatprep.subr.bf16.mxu1 %v14593_v4  ;;  %v14648_v4 = vld [vmem:[#allocation16 + $0x40] ss:$16 sps:$4 sm:$0xff]  }
0x15b6   :  { %7960 = vmatpush1.bf16.msra.mxu1 %v14591_v19  ;;  %v14656_v19 = vld [vmem:[#allocation16 + $0x64] ss:$16 sps:$4 sm:$0xff]  }
0x15b7   :  { %7961 = vmatprep.subr.bf16.mxu1 %v14599_v9  ;;  %v14654_v9 = vld [vmem:[#allocation16 + $0x60] ss:$16 sps:$4 sm:$0xff]  }
0x15ba   :  { %7962 = vmatpush1.bf16.msra.mxu1 %v14597_v58  ;;  %v14665_v58 = vld [vmem:[#allocation16 + $0x8c] ss:$16 sps:$4 sm:$0xff]  }
0x15bb   :  { %7963 = vmatprep.subr.bf16.mxu1 %v14605_v29  ;;  %v14663_v29 = vld [vmem:[#allocation16 + $0x88] ss:$16 sps:$4 sm:$0xff]  }
0x15be   :  { %7964 = vmatpush1.bf16.msra.mxu1 %v14603_v21  ;;  %v14671_v21 = vld [vmem:[#allocation16 + $0xac] ss:$16 sps:$4 sm:$0xff]  }
0x15bf   :  { %7965 = vmatprep.subr.bf16.mxu1 %v14611_v31  ;;  %v14669_v31 = vld [vmem:[#allocation16 + $0xa8] ss:$16 sps:$4 sm:$0xff]  }
0x15c2   :  { %7966 = vmatpush1.bf16.msra.mxu1 %v14609_v49  ;;  %v14677_v49 = vld [vmem:[#allocation16 + $0xcc] ss:$16 sps:$4 sm:$0xff]  }
0x15c3   :  { %7967 = vmatprep.subr.bf16.mxu1 %v14617_v25  ;;  %v14675_v25 = vld [vmem:[#allocation16 + $0xc8] ss:$16 sps:$4 sm:$0xff]  }
0x15c6   :  { %7968 = vmatpush1.bf16.msra.mxu1 %v14615_v22  ;;  %v14683_v22 = vld [vmem:[#allocation16 + $0xec] ss:$16 sps:$4 sm:$0xff]  }
0x15c7   :  { %7969 = vmatprep.subr.bf16.mxu1 %v14623_v53  ;;  %v14681_v53 = vld [vmem:[#allocation16 + $0xe8] ss:$16 sps:$4 sm:$0xff]  }
0x15ca   :  { %7970 = vmatpush1.bf16.msra.mxu1 %v14621_v0  ;;  %v14689_v0 = vld [vmem:[#allocation16 + $0x10c] ss:$16 sps:$4 sm:$0xff]  }
0x15cb   :  { %7971 = vmatprep.subr.bf16.mxu1 %v14629_v48  ;;  %v14687_v48 = vld [vmem:[#allocation16 + $0x108] ss:$16 sps:$4 sm:$0xff]  }
0x15ce   :  { %7972 = vmatpush1.bf16.msra.mxu1 %v14627_v40  ;;  %v14695_v40 = vld [vmem:[#allocation16 + $0x12c] ss:$16 sps:$4 sm:$0xff]  }
0x15cf   :  { %7973 = vmatprep.subr.bf16.mxu1 %v14635_v36  ;;  %v14693_v36 = vld [vmem:[#allocation16 + $0x128] ss:$16 sps:$4 sm:$0xff]  }
0x15d2   :  { %7974 = vmatpush1.bf16.msra.mxu1 %v14633_v57  ;;  %v14701_v57 = vld [vmem:[#allocation16 + $0x14c] ss:$16 sps:$4 sm:$0xff]  }
0x15d3   :  { %8450 = vmatprep.subr.bf16.mxu1 %v14641_v23  ;;  %v14699_v23 = vld [vmem:[#allocation16 + $0x148] ss:$16 sps:$4 sm:$0xff]  }
0x1668   :  { %v7474_v52 = vpop.f32.mrb[104].mxu1 }
0x1669   :  { %v7475_v54 = vadd.f32 %v7474_v52, %v7391_v46  ;;  %v13483_v26 = vpop.f32.mrb[105].mxu1  ;;  %v14704_v46 = vld [vmem:[#allocation16 + $0x164] ss:$16 sps:$4 sm:$0xff]   ;;  %v14707_v52 = vld [vmem:[#allocation16 + $0x16c] ss:$16 sps:$4 sm:$0xff]  }
0x166a   :  { %v7477_v43 = vpop.f32.mrb[106].mxu1  ;;  %v14705_v26 = vld [vmem:[#allocation16 + $0x168] ss:$16 sps:$4 sm:$0xff]  }
0x166b   :  { %v12764_v61 = vmul.f32 -1.442695, %v7475_v54  ;;  %v13484_v60 = vpop.f32.mrb[107].mxu1  ;;  %v14702_v54 = vld [vmem:[#allocation16 + $0x160] ss:$16 sps:$4 sm:$0xff]  }
0x166c   :  { %v14708_v43 = vld [vmem:[#allocation16 + $0x180] ss:$16 sps:$4 sm:$0xff]   ;;  %v14711_v60 = vld [vmem:[#allocation16 + $0x188] ss:$16 sps:$4 sm:$0xff]  }
0x166d   :  { %15560 = vpow2.f32 %v12764_v61  ;;  %v14710_v61 = vld [vmem:[#allocation16 + $0x184] ss:$16 sps:$4 sm:$0xff]  }
0x1677   :  { %v15561_v63 = vpop.eup %15560 }
0x1678   :  { %v7483_v13 = vadd.f32 1.0, %v15561_v63  ;;  %v14713_v63 = vld [vmem:[#allocation16 + $0x18c] ss:$16 sps:$4 sm:$0xff]  }
0x167a   :  { %15562 = vrcp.f32 %v7483_v13  ;;  %v14716_v13 = vld [vmem:[#allocation16 + $0x1a4] ss:$16 sps:$4 sm:$0xff]  }
0x1684   :  { %v15563_v15 = vpop.eup %15562 }
0x1685   :  { %7486 = vst [vmem:[#allocation19 + $0x3] sm:$0x1] %v15563_v15  ;;  %v7493_v3 = vsel %vm7492_vm4, %v7489_v5, %v15563_v15  ;;  %v14714_v5 = vld [vmem:[#allocation16 + $0x1a0] ss:$16 sps:$4 sm:$0xff]   ;;  %v14717_v15 = vld [vmem:[#allocation16 + $0x1a8] ss:$16 sps:$4 sm:$0xff]  }
0x1686   :  { %v7494_v39 = vmax.f32 %v7493_v3, 0.0  ;;  %v14722_v3 = vld [vmem:[#allocation16 + $0x1c4] ss:$16 sps:$4 sm:$0xff]  }
0x1688   :  { %v7495_v32 = vpack.c.bf16 %v7494_v39, %v7494_v39  ;;  %v14725_v39 = vld [vmem:[#allocation16 + $0x1cc] ss:$16 sps:$4 sm:$0xff]  }
0x168a   :  { %7935 = vmatmul.mubr.bf16.vlgmr.msra.gmra.mrb[108].mxu0 %v7495_v32  ;;  %7976 = vmatmul.mubr.bf16.vlgmr.msra.gmra.mrb[108].mxu1 %v7495_v32  ;;  %v14720_v32 = vld [vmem:[#allocation16 + $0x1c0] ss:$16 sps:$4 sm:$0xff]  }
0x168b   :  { %8441 = vmatprep.mubr.bf16.mxu0 %v17832_v18  ;;  %8482 = vmatprep.mubr.bf16.mxu1 %v17832_v18  ;;  %v14657_v18 = vld [vmem:[#allocation16 + $0x68] ss:$16 sps:$4 sm:$0xff]  }
0x168c   :  { %8410 = vmatpush1.bf16.msra.mxu0 %v14636_v34  ;;  %8451 = vmatpush1.bf16.msra.mxu1 %v14639_v35  ;;  %v14723_v34 = vld [vmem:[#allocation16 + $0x1c8] ss:$16 sps:$4 sm:$0xff]   ;;  %v14728_v35 = vld [vmem:[#allocation16 + $0x1e4] ss:$16 sps:$4 sm:$0xff]  }
0x168d   :  { %8411 = vmatprep.subr.bf16.mxu0 %v14644_v45  ;;  %8452 = vmatprep.subr.bf16.mxu1 %v14647_v33  ;;  %v14731_v45 = vld [vmem:[#allocation16 + $0x1ec] ss:$16 sps:$4 sm:$0xff]   ;;  %v14726_v33 = vld [vmem:[#allocation16 + $0x1e0] ss:$16 sps:$4 sm:$0xff]  }
0x1690   :  { %8412 = vmatpush1.bf16.msra.mxu0 %v14642_v38  ;;  %8453 = vmatpush1.bf16.msra.mxu1 %v14645_v6  ;;  %v14729_v38 = vld [vmem:[#allocation16 + $0x1e8] ss:$16 sps:$4 sm:$0xff]   ;;  %v7560_v6 = vld [vmem:[%s18035_s9] sm:$0xf] }
0x1691   :  { %8413 = vmatprep.subr.bf16.mxu0 %v14650_v1  ;;  %8454 = vmatprep.subr.bf16.mxu1 %v14653_v17  ;;  %v7885_v1 = vrot.slane %v7560_v6, %v18560_v11 }
0x1694   :  { %8414 = vmatpush1.bf16.msra.mxu0 %v14648_v4  ;;  %8455 = vmatpush1.bf16.msra.mxu1 %v14651_v2 }
0x1695   :  { %8415 = vmatprep.subr.bf16.mxu0 %v14656_v19  ;;  %8456 = vmatprep.subr.bf16.mxu1 %v14659_v10 }
0x1698   :  { %8416 = vmatpush1.bf16.msra.mxu0 %v14654_v9  ;;  %8457 = vmatpush1.bf16.msra.mxu1 %v14657_v18 }
0x1699   :  { %8417 = vmatprep.subr.bf16.mxu0 %v14662_v28  ;;  %8458 = vmatprep.subr.bf16.mxu1 %v14665_v58 }
0x169c   :  { %8418 = vmatpush1.bf16.msra.mxu0 %v14660_v27  ;;  %8459 = vmatpush1.bf16.msra.mxu1 %v14663_v29  ;;  %v7889_v29 = vrot.slane %v7560_v6, %v18561_v7 }
0x169d   :  { %8419 = vmatprep.subr.bf16.mxu0 %v14668_v20  ;;  %8460 = vmatprep.subr.bf16.mxu1 %v14671_v21 }
0x16a0   :  { %8420 = vmatpush1.bf16.msra.mxu0 %v14666_v37  ;;  %8461 = vmatpush1.bf16.msra.mxu1 %v14669_v31 }
0x16a1   :  { %8421 = vmatprep.subr.bf16.mxu0 %v14674_v50  ;;  %8462 = vmatprep.subr.bf16.mxu1 %v14677_v49  ;;  %v7897_v50 = vrot.slane %v7560_v6, %v18562_v56  ;;  %v7893_v49 = vrot.slane %v7560_v6, %v18563_v24 }
0x16a4   :  { %8422 = vmatpush1.bf16.msra.mxu0 %v14672_v12  ;;  %8463 = vmatpush1.bf16.msra.mxu1 %v14675_v25 }
0x16a5   :  { %8423 = vmatprep.subr.bf16.mxu0 %v14680_v8  ;;  %8464 = vmatprep.subr.bf16.mxu1 %v14683_v22 }
0x16a8   :  { %8424 = vmatpush1.bf16.msra.mxu0 %v14678_v55  ;;  %8465 = vmatpush1.bf16.msra.mxu1 %v14681_v53 }
0x16a9   :  { %8425 = vmatprep.subr.bf16.mxu0 %v14686_v59  ;;  %8466 = vmatprep.subr.bf16.mxu1 %v14689_v0 }
0x16ac   :  { %8426 = vmatpush1.bf16.msra.mxu0 %v14684_v16  ;;  %8467 = vmatpush1.bf16.msra.mxu1 %v14687_v48 }
0x16ad   :  { %8427 = vmatprep.subr.bf16.mxu0 %v14692_v41  ;;  %8468 = vmatprep.subr.bf16.mxu1 %v14695_v40 }
0x16b0   :  { %8428 = vmatpush1.bf16.msra.mxu0 %v14690_v44  ;;  %8469 = vmatpush1.bf16.msra.mxu1 %v14693_v36  ;;  %v14732_v36 = vld [vmem:[#allocation17] sm:$0xff]  }
0x16b1   :  { %8429 = vmatprep.subr.bf16.mxu0 %v14698_v30  ;;  %8470 = vmatprep.subr.bf16.mxu1 %v14701_v57  ;;  %v14734_v30 = vld [vmem:[#allocation17 + $0x10] sm:$0xff]   ;;  %v14735_v57 = vld [vmem:[#allocation17 + $0x18] sm:$0xff]  }
0x16b4   :  { %8430 = vmatpush1.bf16.msra.mxu0 %v14696_v62  ;;  %8471 = vmatpush1.bf16.msra.mxu1 %v14699_v23  ;;  %v14736_v62 = vld [vmem:[#allocation17 + $0x20] sm:$0xff]   ;;  %v14737_v23 = vld [vmem:[#allocation17 + $0x28] sm:$0xff]  }
0x16b5   :  { %8431 = vmatprep.subr.bf16.mxu0 %v14704_v46  ;;  %8472 = vmatprep.subr.bf16.mxu1 %v14707_v52  ;;  %v14738_v46 = vld [vmem:[#allocation17 + $0x30] sm:$0xff]   ;;  %v14739_v52 = vld [vmem:[#allocation17 + $0x38] sm:$0xff]  }
0x16b8   :  { %8432 = vmatpush1.bf16.msra.mxu0 %v14702_v54  ;;  %8473 = vmatpush1.bf16.msra.mxu1 %v14705_v26  ;;  %v14740_v54 = vld [vmem:[#allocation14] ss:$16 sps:$4 sm:$0xff]   ;;  %v14742_v26 = vld [vmem:[#allocation14 + $0x4] ss:$16 sps:$4 sm:$0xff]  }
0x16b9   :  { %8433 = vmatprep.subr.bf16.mxu0 %v14710_v61  ;;  %8474 = vmatprep.subr.bf16.mxu1 %v14713_v63  ;;  %v14748_v61 = vld [vmem:[#allocation14 + $0x24] ss:$16 sps:$4 sm:$0xff]  }
0x16ba   :  { %v14754_v63 = vld [vmem:[#allocation14 + $0x44] ss:$16 sps:$4 sm:$0xff]  }
0x16bc   :  { %8434 = vmatpush1.bf16.msra.mxu0 %v14708_v43  ;;  %8475 = vmatpush1.bf16.msra.mxu1 %v14711_v60  ;;  %v14745_v43 = vld [vmem:[#allocation14 + $0xc] ss:$16 sps:$4 sm:$0xff]   ;;  %v14746_v60 = vld [vmem:[#allocation14 + $0x20] ss:$16 sps:$4 sm:$0xff]  }
0x16bd   :  { %8435 = vmatprep.subr.bf16.mxu0 %v14716_v13  ;;  %8476 = vmatprep.subr.bf16.mxu1 %v14719_v14  ;;  %v14752_v13 = vld [vmem:[#allocation14 + $0x40] ss:$16 sps:$4 sm:$0xff]   ;;  %v14760_v14 = vld [vmem:[#allocation14 + $0x64] ss:$16 sps:$4 sm:$0xff]  }
0x16c0   :  { %8436 = vmatpush1.bf16.msra.mxu0 %v14714_v5  ;;  %8477 = vmatpush1.bf16.msra.mxu1 %v14717_v15  ;;  %v14758_v5 = vld [vmem:[#allocation14 + $0x60] ss:$16 sps:$4 sm:$0xff]   ;;  %v14766_v15 = vld [vmem:[#allocation14 + $0x84] ss:$16 sps:$4 sm:$0xff]  }
0x16c1   :  { %8437 = vmatprep.subr.bf16.mxu0 %v14722_v3  ;;  %8478 = vmatprep.subr.bf16.mxu1 %v14725_v39  ;;  %v14764_v3 = vld [vmem:[#allocation14 + $0x80] ss:$16 sps:$4 sm:$0xff]   ;;  %v14772_v39 = vld [vmem:[#allocation14 + $0xa4] ss:$16 sps:$4 sm:$0xff]  }
0x16c4   :  { %8438 = vmatpush1.bf16.msra.mxu0 %v14720_v32  ;;  %8479 = vmatpush1.bf16.msra.mxu1 %v14723_v34  ;;  %v14770_v32 = vld [vmem:[#allocation14 + $0xa0] ss:$16 sps:$4 sm:$0xff]   ;;  %v14778_v34 = vld [vmem:[#allocation14 + $0xc4] ss:$16 sps:$4 sm:$0xff]  }
0x16c5   :  { %8439 = vmatprep.subr.bf16.mxu0 %v14728_v35  ;;  %8480 = vmatprep.subr.bf16.mxu1 %v14731_v45  ;;  %v14776_v35 = vld [vmem:[#allocation14 + $0xc0] ss:$16 sps:$4 sm:$0xff]   ;;  %v14784_v45 = vld [vmem:[#allocation14 + $0xe4] ss:$16 sps:$4 sm:$0xff]  }
0x16c8   :  { %8440 = vmatpush1.bf16.msra.mxu0 %v14726_v33  ;;  %8481 = vmatpush1.bf16.msra.mxu1 %v14729_v38  ;;  %v14782_v33 = vld [vmem:[#allocation14 + $0xe0] ss:$16 sps:$4 sm:$0xff]  }
0x16c9   :  { %13485 = vmatprep.subr.bf16.mxu0 %v16164_v51  ;;  %9037 = vmatprep.subr.bf16.mxu1 %v14742_v26  ;;  %v8067_v38 = vld [vmem:[%s18037_s11] sm:$0xf]  ;;  %v14775_v26 = vld [vmem:[#allocation14 + $0xac] ss:$16 sps:$4 sm:$0xff]  }
0x16ca   :  { %v8392_v6 = vrot.slane %v8067_v38, %v18560_v11 }
0x175d   :  { %v7936_v17 = vpop.f32.mrb[108].mxu0  ;;  %v7977_v4 = vpop.f32.mrb[108].mxu1 }
0x175e   :  { %v7937_v2 = vadd.f32 %v7936_v17, %v7885_v1  ;;  %v7938_v19 = vpop.f32.mrb[109].mxu0  ;;  %v7979_v10 = vpop.f32.mrb[109].mxu1  ;;  %v7978_v22 = vadd.f32 %v7977_v4, %v7893_v49 }
0x175f   :  { %v7940_v9 = vpop.f32.mrb[110].mxu0  ;;  %v7981_v18 = vpop.f32.mrb[110].mxu1  ;;  %v7939_v20 = vadd.f32 %v7938_v19, %v7889_v29  ;;  %v7980_v25 = vadd.f32 %v7979_v10, %v7897_v50  ;;  %v8400_v50 = vrot.slane %v8067_v38, %v18563_v24 }
0x1760   :  { %v12830_v28 = vmul.f32 -1.442695, %v7937_v2  ;;  %v7941_v58 = vpop.f32.mrb[111].mxu0  ;;  %v7982_v27 = vpop.f32.mrb[111].mxu1 }
0x1761   :  { %v12831_v21 = vmul.f32 -1.442695, %v7939_v20  ;;  %v8396_v27 = vrot.slane %v8067_v38, %v18561_v7 }
0x1762   :  { %15564 = vpow2.f32 %v12830_v28 }
0x1763   :  { %15566 = vpow2.f32 %v12831_v21 }
0x176c   :  { %v15565_v37 = vpop.eup %15564 }
0x176d   :  { %v7990_v31 = vadd.f32 1.0, %v15565_v37  ;;  %v15567_v12 = vpop.eup %15566 }
0x176e   :  { %v7991_v53 = vadd.f32 1.0, %v15567_v12 }
0x176f   :  { %15568 = vrcp.f32 %v7990_v31  ;;  %v8404_v31 = vrot.slane %v8067_v38, %v18562_v56  ;;  %v14803_v38 = vld [vmem:[#allocation14 + $0x148] ss:$16 sps:$4 sm:$0xff]  }
0x1779   :  { %v15569_v8 = vpop.eup %15568 }
0x177a   :  { %v7996_v55 = vmul.f32 %v15569_v8, %v7980_v25 }
0x177c   :  { %v7997_v59 = vadd.f32 %v7996_v55, %v7978_v22 }
0x177e   :  { %15570 = vtanh.f32 %v7997_v59 }
0x177f   :  { %15572 = vrcp.f32 %v7991_v53 }
0x1788   :  { %v15571_v0 = vpop.eup %15570 }
0x1789   :  { %v7999_v16 = vsub.f32 %v17802_v47, %v15571_v0  ;;  %v15573_v48 = vpop.eup %15572  ;;  %v14733_v47 = vld [vmem:[#allocation17 + $0x8] sm:$0xff]  }
0x178b   :  { %v8000_v41 = vmul.f32 %v15573_v48, %v7999_v16 }
0x178d   :  { %v17850_v40 = vadd.f32 %v15571_v0, %v8000_v41 }
0x178f   :  { %v17854_v44 = vpack.c.bf16 %v17850_v40, %v17850_v40 }
0x1791   :  { %8442 = vmatmul.mubr.bf16.vlgmr.msra.gmra.mrb[112].mxu0 %v17854_v44  ;;  %8483 = vmatmul.mubr.bf16.vlgmr.msra.gmra.mrb[112].mxu1 %v17854_v44 }
0x1792   :  { %9069 = vmatprep.mubr.bf16.mxu1 %v17854_v44  ;;  %13501 = vmatprep.mubr.msk.bf16.mxu0 %vm16165_vm0, %v16164_v51 }
0x1793   :  { %13486 = vmatpush3.bf16.msra.mxu0 %v14732_v36  ;;  %9038 = vmatpush1.bf16.msra.mxu1 %v14740_v54  ;;  %v14743_v36 = vld [vmem:[#allocation14 + $0x8] ss:$16 sps:$4 sm:$0xff]  }
0x1794   :  { %13487 = vmatprep.subr.bf16.mxu0 %v16164_v51  ;;  %9039 = vmatprep.subr.bf16.mxu1 %v14748_v61  ;;  %v14767_v54 = vld [vmem:[#allocation14 + $0x88] ss:$16 sps:$4 sm:$0xff]  }
0x1795   :  { %v14779_v61 = vld [vmem:[#allocation14 + $0xc8] ss:$16 sps:$4 sm:$0xff]  }
0x1797   :  { %13488 = vmatpush3.bf16.msra.mxu0 %v14733_v47  ;;  %9040 = vmatpush1.bf16.msra.mxu1 %v14746_v60  ;;  %v14787_v60 = vld [vmem:[#allocation14 + $0xec] ss:$16 sps:$4 sm:$0xff]  }
0x1798   :  { %13489 = vmatprep.subr.bf16.mxu0 %v16164_v51  ;;  %9041 = vmatprep.subr.bf16.mxu1 %v14754_v63  ;;  %v14785_v63 = vld [vmem:[#allocation14 + $0xe8] ss:$16 sps:$4 sm:$0xff]  }
0x179b   :  { %13490 = vmatpush3.bf16.msra.mxu0 %v14734_v30  ;;  %9042 = vmatpush1.bf16.msra.mxu1 %v14752_v13  ;;  %v14751_v30 = vld [vmem:[#allocation14 + $0x2c] ss:$16 sps:$4 sm:$0xff]   ;;  %v14790_v13 = vld [vmem:[#allocation14 + $0x104] ss:$16 sps:$4 sm:$0xff]  }
0x179c   :  { %13491 = vmatprep.subr.bf16.mxu0 %v16164_v51  ;;  %9043 = vmatprep.subr.bf16.mxu1 %v14760_v14  ;;  %v14793_v14 = vld [vmem:[#allocation14 + $0x10c] ss:$16 sps:$4 sm:$0xff]  }
0x179f   :  { %13492 = vmatpush3.bf16.msra.mxu0 %v14735_v57  ;;  %9044 = vmatpush1.bf16.msra.mxu1 %v14758_v5  ;;  %v14749_v57 = vld [vmem:[#allocation14 + $0x28] ss:$16 sps:$4 sm:$0xff]   ;;  %v14788_v5 = vld [vmem:[#allocation14 + $0x100] ss:$16 sps:$4 sm:$0xff]  }
0x17a0   :  { %13493 = vmatprep.subr.bf16.mxu0 %v16164_v51  ;;  %9045 = vmatprep.subr.bf16.mxu1 %v14766_v15  ;;  %v14791_v15 = vld [vmem:[#allocation14 + $0x108] ss:$16 sps:$4 sm:$0xff]  }
0x17a3   :  { %13494 = vmatpush3.bf16.msra.mxu0 %v14736_v62  ;;  %9046 = vmatpush1.bf16.msra.mxu1 %v14764_v3  ;;  %v14757_v62 = vld [vmem:[#allocation14 + $0x4c] ss:$16 sps:$4 sm:$0xff]   ;;  %v14796_v3 = vld [vmem:[#allocation14 + $0x124] ss:$16 sps:$4 sm:$0xff]  }
0x17a4   :  { %13495 = vmatprep.subr.bf16.mxu0 %v16164_v51  ;;  %9047 = vmatprep.subr.bf16.mxu1 %v14772_v39  ;;  %v14799_v39 = vld [vmem:[#allocation14 + $0x12c] ss:$16 sps:$4 sm:$0xff]  }
0x17a7   :  { %13496 = vmatpush3.bf16.msra.mxu0 %v14737_v23  ;;  %9048 = vmatpush1.bf16.msra.mxu1 %v14770_v32  ;;  %v14763_v23 = vld [vmem:[#allocation14 + $0x6c] ss:$16 sps:$4 sm:$0xff]   ;;  %v14794_v32 = vld [vmem:[#allocation14 + $0x120] ss:$16 sps:$4 sm:$0xff]  }
0x17a8   :  { %13497 = vmatprep.subr.bf16.mxu0 %v16164_v51  ;;  %9049 = vmatprep.subr.bf16.mxu1 %v14778_v34  ;;  %v14797_v34 = vld [vmem:[#allocation14 + $0x128] ss:$16 sps:$4 sm:$0xff]  }
0x17ab   :  { %13498 = vmatpush3.bf16.msra.mxu0 %v14738_v46  ;;  %9050 = vmatpush1.bf16.msra.mxu1 %v14776_v35  ;;  %v14761_v46 = vld [vmem:[#allocation14 + $0x68] ss:$16 sps:$4 sm:$0xff]   ;;  %v14802_v35 = vld [vmem:[#allocation14 + $0x144] ss:$16 sps:$4 sm:$0xff]  }
0x17ac   :  { %13499 = vmatprep.subr.bf16.mxu0 %v16164_v51  ;;  %9051 = vmatprep.subr.bf16.mxu1 %v14784_v45  ;;  %v14805_v45 = vld [vmem:[#allocation14 + $0x14c] ss:$16 sps:$4 sm:$0xff]  }
0x17af   :  { %13500 = vmatpush3.bf16.msra.mxu0 %v14739_v52  ;;  %9052 = vmatpush1.bf16.msra.mxu1 %v14782_v33  ;;  %v14769_v52 = vld [vmem:[#allocation14 + $0x8c] ss:$16 sps:$4 sm:$0xff]   ;;  %v14800_v33 = vld [vmem:[#allocation14 + $0x140] ss:$16 sps:$4 sm:$0xff]  }
0x17b0   :  { %9078 = vmatprep.subr.bf16.mxu0 %v14745_v43  ;;  %v14773_v43 = vld [vmem:[#allocation14 + $0xa8] ss:$16 sps:$4 sm:$0xff]   ;;  %9053 = vmatprep.subr.bf16.mxu1 %v14790_v13  ;;  %v14853_v13 = vld [vmem:[#allocation16 + $0x4c] ss:$16 sps:$4 sm:$0xff]  }
0x17b3   :  { %9054 = vmatpush1.bf16.msra.mxu1 %v14788_v5  ;;  %v14851_v5 = vld [vmem:[#allocation16 + $0x48] ss:$16 sps:$4 sm:$0xff]  }
0x17b4   :  { %9055 = vmatprep.subr.bf16.mxu1 %v14796_v3  ;;  %v14859_v3 = vld [vmem:[#allocation16 + $0x6c] ss:$16 sps:$4 sm:$0xff]  }
0x17b7   :  { %9056 = vmatpush1.bf16.msra.mxu1 %v14794_v32  ;;  %v14862_v32 = vld [vmem:[#allocation16 + $0x84] ss:$16 sps:$4 sm:$0xff]  }
0x17b8   :  { %9057 = vmatprep.subr.bf16.mxu1 %v14802_v35  ;;  %v14860_v35 = vld [vmem:[#allocation16 + $0x80] ss:$16 sps:$4 sm:$0xff]  }
0x17bb   :  { %9058 = vmatpush1.bf16.msra.mxu1 %v14800_v33  ;;  %v14868_v33 = vld [vmem:[#allocation16 + $0xa4] ss:$16 sps:$4 sm:$0xff]  }
0x1864   :  { %v8443_v1 = vpop.f32.mrb[112].mxu0  ;;  %v8484_v17 = vpop.f32.mrb[112].mxu1 }
0x1865   :  { %v8444_v4 = vadd.f32 %v8443_v1, %v8392_v6  ;;  %v8445_v2 = vpop.f32.mrb[113].mxu0  ;;  %v8486_v19 = vpop.f32.mrb[113].mxu1  ;;  %v8485_v8 = vadd.f32 %v8484_v17, %v8400_v50  ;;  %v14808_v6 = vld [vmem:[#allocation14 + $0x164] ss:$16 sps:$4 sm:$0xff]   ;;  %v14811_v1 = vld [vmem:[#allocation14 + $0x16c] ss:$16 sps:$4 sm:$0xff]  }
0x1866   :  { %v8447_v10 = vpop.f32.mrb[114].mxu0  ;;  %v8488_v9 = vpop.f32.mrb[114].mxu1  ;;  %v8446_v29 = vadd.f32 %v8445_v2, %v8396_v27  ;;  %v8487_v12 = vadd.f32 %v8486_v19, %v8404_v31  ;;  %v14806_v17 = vld [vmem:[#allocation14 + $0x160] ss:$16 sps:$4 sm:$0xff]   ;;  %9059 = vmatprep.subr.bf16.mxu1 %v14808_v6  ;;  %v14814_v2 = vld [vmem:[#allocation14 + $0x184] ss:$16 sps:$4 sm:$0xff]  }
0x1867   :  { %v12896_v18 = vmul.f32 -1.442695, %v8444_v4  ;;  %v8448_v28 = vpop.f32.mrb[115].mxu0  ;;  %v8489_v58 = vpop.f32.mrb[115].mxu1  ;;  %v14809_v4 = vld [vmem:[#allocation14 + $0x168] ss:$16 sps:$4 sm:$0xff]   ;;  %9060 = vmatpush1.bf16.msra.mxu1 %v14806_v17 }
0x1868   :  { %v12897_v20 = vmul.f32 -1.442695, %v8446_v29  ;;  %v14817_v19 = vld [vmem:[#allocation14 + $0x18c] ss:$16 sps:$4 sm:$0xff]   ;;  %v14812_v10 = vld [vmem:[#allocation14 + $0x180] ss:$16 sps:$4 sm:$0xff]   ;;  %9061 = vmatprep.subr.bf16.mxu1 %v14814_v2 }
0x1869   :  { %15574 = vpow2.f32 %v12896_v18  ;;  %v14815_v9 = vld [vmem:[#allocation14 + $0x188] ss:$16 sps:$4 sm:$0xff]   ;;  %v14820_v18 = vld [vmem:[#allocation14 + $0x1a4] ss:$16 sps:$4 sm:$0xff]   ;;  %v14823_v28 = vld [vmem:[#allocation14 + $0x1ac] ss:$16 sps:$4 sm:$0xff]  }
0x186a   :  { %15576 = vpow2.f32 %v12897_v20  ;;  %v14818_v58 = vld [vmem:[#allocation14 + $0x1a0] ss:$16 sps:$4 sm:$0xff]   ;;  %v14821_v27 = vld [vmem:[#allocation14 + $0x1a8] ss:$16 sps:$4 sm:$0xff]   ;;  %v14826_v29 = vld [vmem:[#allocation14 + $0x1c4] ss:$16 sps:$4 sm:$0xff]  }
0x186b   :  { %9062 = vmatpush1.bf16.msra.mxu1 %v14812_v10  ;;  %v14829_v20 = vld [vmem:[#allocation14 + $0x1cc] ss:$16 sps:$4 sm:$0xff]   ;;  %v14832_v31 = vld [vmem:[#allocation14 + $0x1e4] ss:$16 sps:$4 sm:$0xff]   ;;  %v14866_v6 = vld [vmem:[#allocation16 + $0xa0] ss:$16 sps:$4 sm:$0xff]  }
0x186c   :  { %9063 = vmatprep.subr.bf16.mxu1 %v14820_v18  ;;  %v14835_v50 = vld [vmem:[#allocation14 + $0x1ec] ss:$16 sps:$4 sm:$0xff]   ;;  %v14874_v17 = vld [vmem:[#allocation16 + $0xc4] ss:$16 sps:$4 sm:$0xff]   ;;  %v14872_v2 = vld [vmem:[#allocation16 + $0xc0] ss:$16 sps:$4 sm:$0xff]  }
0x186d   :  { %v14880_v10 = vld [vmem:[#allocation16 + $0xe4] ss:$16 sps:$4 sm:$0xff]   ;;  %v14878_v18 = vld [vmem:[#allocation16 + $0xe0] ss:$16 sps:$4 sm:$0xff]  }
0x186f   :  { %9064 = vmatpush1.bf16.msra.mxu1 %v14818_v58  ;;  %v14886_v58 = vld [vmem:[#allocation16 + $0x104] ss:$16 sps:$4 sm:$0xff]  }
0x1870   :  { %9065 = vmatprep.subr.bf16.mxu1 %v14826_v29  ;;  %v14884_v29 = vld [vmem:[#allocation16 + $0x100] ss:$16 sps:$4 sm:$0xff]  }
0x1873   :  { %v15575_v21 = vpop.eup %15574 }
0x1874   :  { %v8497_v37 = vadd.f32 1.0, %v15575_v21  ;;  %v15577_v49 = vpop.eup %15576  ;;  %v14824_v21 = vld [vmem:[#allocation14 + $0x1c0] ss:$16 sps:$4 sm:$0xff]  }
0x1875   :  { %v8498_v55 = vadd.f32 1.0, %v15577_v49  ;;  %9066 = vmatpush1.bf16.msra.mxu1 %v14824_v21  ;;  %v14830_v49 = vld [vmem:[#allocation14 + $0x1e0] ss:$16 sps:$4 sm:$0xff]   ;;  %v14892_v21 = vld [vmem:[#allocation16 + $0x124] ss:$16 sps:$4 sm:$0xff]  }
0x1876   :  { %15578 = vrcp.f32 %v8497_v37  ;;  %v14827_v37 = vld [vmem:[#allocation14 + $0x1c8] ss:$16 sps:$4 sm:$0xff]   ;;  %9067 = vmatprep.subr.bf16.mxu1 %v14832_v31  ;;  %v14890_v31 = vld [vmem:[#allocation16 + $0x120] ss:$16 sps:$4 sm:$0xff]  }
0x1879   :  { %9068 = vmatpush1.bf16.msra.mxu1 %v14830_v49  ;;  %v14898_v49 = vld [vmem:[#allocation16 + $0x144] ss:$16 sps:$4 sm:$0xff]  }
0x1880   :  { %v15579_v25 = vpop.eup %15578 }
0x1881   :  { %v8503_v22 = vmul.f32 %v15579_v25, %v8487_v12  ;;  %v14833_v12 = vld [vmem:[#allocation14 + $0x1e8] ss:$16 sps:$4 sm:$0xff]   ;;  %v14838_v25 = vld [vmem:[#allocation16 + $0x4] ss:$16 sps:$4 sm:$0xff]  }
0x1882   :  { %9544 = vmatprep.subr.bf16.mxu1 %v14838_v25  ;;  %v14896_v25 = vld [vmem:[#allocation16 + $0x140] ss:$16 sps:$4 sm:$0xff]  }
0x1883   :  { %v8504_v53 = vadd.f32 %v8503_v22, %v8485_v8  ;;  %v14841_v8 = vld [vmem:[#allocation16 + $0xc] ss:$16 sps:$4 sm:$0xff]   ;;  %v8526_v22 = vld [vmem:[%s18039_s13] sm:$0x1] }
0x1885   :  { %15580 = vtanh.f32 %v8504_v53 }
0x1886   :  { %15582 = vrcp.f32 %v8498_v55 }
0x188f   :  { %v15581_v59 = vpop.eup %15580 }
0x1890   :  { %v8506_v0 = vsub.f32 %v17828_v42, %v15581_v59  ;;  %v15583_v16 = vpop.eup %15582  ;;  %v14755_v42 = vld [vmem:[#allocation14 + $0x48] ss:$16 sps:$4 sm:$0xff]  }
0x1892   :  { %v8507_v48 = vmul.f32 %v15583_v16, %v8506_v0 }
0x1894   :  { %v17876_v41 = vadd.f32 %v15581_v59, %v8507_v48 }
0x1896   :  { %v17880_v47 = vpack.c.bf16 %v17876_v41, %v17876_v41 }
0x1898   :  { %13502 = vmatmul.mubr.bf16.vlgmr.msra.gmra.mrb[116].mxu0 %v17880_v47 }
0x1899   :  { %9110 = vmatprep.mubr.bf16.mxu0 %v17854_v44  ;;  %9079 = vmatpush1.bf16.msra.mxu0 %v14743_v36  ;;  %v14781_v44 = vld [vmem:[#allocation14 + $0xcc] ss:$16 sps:$4 sm:$0xff]  }
0x189a   :  { %9080 = vmatprep.subr.bf16.mxu0 %v14751_v30 }
0x189d   :  { %9081 = vmatpush1.bf16.msra.mxu0 %v14749_v57  ;;  %v8626_v57 = vstv %s8625_s24 }
0x189e   :  { %9082 = vmatprep.subr.bf16.mxu0 %v14757_v62  ;;  %v8624_v62 = vld [vmem:[#allocation8 + $0x4] sm:$0x1]  ;;  %vm8627_vm5 = vcmp.eq.s32.totalorder %v8626_v57, 1 }
0x189f   :  { %v14919_v57 = vld [vmem:[#allocation16 + $0x1ac] ss:$16 sps:$4 sm:$0xff]  }
0x18a1   :  { %9083 = vmatpush1.bf16.msra.mxu0 %v14755_v42 }
0x18a2   :  { %9084 = vmatprep.subr.bf16.mxu0 %v14763_v23 }
0x18a5   :  { %9085 = vmatpush1.bf16.msra.mxu0 %v14761_v46 }
0x18a6   :  { %9086 = vmatprep.subr.bf16.mxu0 %v14769_v52 }
0x18a9   :  { %9087 = vmatpush1.bf16.msra.mxu0 %v14767_v54  ;;  %v14836_v54 = vld [vmem:[#allocation16] ss:$16 sps:$4 sm:$0xff]  }
0x18aa   :  { %9088 = vmatprep.subr.bf16.mxu0 %v14775_v26  ;;  %v14839_v26 = vld [vmem:[#allocation16 + $0x8] ss:$16 sps:$4 sm:$0xff]  }
0x18ad   :  { %9089 = vmatpush1.bf16.msra.mxu0 %v14773_v43  ;;  %v14844_v43 = vld [vmem:[#allocation16 + $0x24] ss:$16 sps:$4 sm:$0xff]  }
0x18ae   :  { %9090 = vmatprep.subr.bf16.mxu0 %v14781_v44  ;;  %v14847_v44 = vld [vmem:[#allocation16 + $0x2c] ss:$16 sps:$4 sm:$0xff]  }
0x18b1   :  { %9091 = vmatpush1.bf16.msra.mxu0 %v14779_v61  ;;  %v14842_v61 = vld [vmem:[#allocation16 + $0x20] ss:$16 sps:$4 sm:$0xff]  }
0x18b2   :  { %9092 = vmatprep.subr.bf16.mxu0 %v14787_v60  ;;  %v14845_v60 = vld [vmem:[#allocation16 + $0x28] ss:$16 sps:$4 sm:$0xff]  }
0x18b5   :  { %9093 = vmatpush1.bf16.msra.mxu0 %v14785_v63  ;;  %v14850_v63 = vld [vmem:[#allocation16 + $0x44] ss:$16 sps:$4 sm:$0xff]  }
0x18b6   :  { %9094 = vmatprep.subr.bf16.mxu0 %v14793_v14  ;;  %v14848_v14 = vld [vmem:[#allocation16 + $0x40] ss:$16 sps:$4 sm:$0xff]  }
0x18b9   :  { %9095 = vmatpush1.bf16.msra.mxu0 %v14791_v15  ;;  %v14856_v15 = vld [vmem:[#allocation16 + $0x64] ss:$16 sps:$4 sm:$0xff]  }
0x18ba   :  { %9096 = vmatprep.subr.bf16.mxu0 %v14799_v39  ;;  %v14854_v39 = vld [vmem:[#allocation16 + $0x60] ss:$16 sps:$4 sm:$0xff]  }
0x18bd   :  { %9097 = vmatpush1.bf16.msra.mxu0 %v14797_v34  ;;  %v14865_v34 = vld [vmem:[#allocation16 + $0x8c] ss:$16 sps:$4 sm:$0xff]  }
0x18be   :  { %9098 = vmatprep.subr.bf16.mxu0 %v14805_v45  ;;  %v14863_v45 = vld [vmem:[#allocation16 + $0x88] ss:$16 sps:$4 sm:$0xff]  }
0x18c1   :  { %9099 = vmatpush1.bf16.msra.mxu0 %v14803_v38  ;;  %v14871_v38 = vld [vmem:[#allocation16 + $0xac] ss:$16 sps:$4 sm:$0xff]  }
0x18c2   :  { %9100 = vmatprep.subr.bf16.mxu0 %v14811_v1  ;;  %v14869_v1 = vld [vmem:[#allocation16 + $0xa8] ss:$16 sps:$4 sm:$0xff]  }
0x18c5   :  { %9101 = vmatpush1.bf16.msra.mxu0 %v14809_v4  ;;  %v14877_v4 = vld [vmem:[#allocation16 + $0xcc] ss:$16 sps:$4 sm:$0xff]  }
0x18c6   :  { %9102 = vmatprep.subr.bf16.mxu0 %v14817_v19  ;;  %v14875_v19 = vld [vmem:[#allocation16 + $0xc8] ss:$16 sps:$4 sm:$0xff]  }
0x18c9   :  { %9103 = vmatpush1.bf16.msra.mxu0 %v14815_v9  ;;  %v14883_v9 = vld [vmem:[#allocation16 + $0xec] ss:$16 sps:$4 sm:$0xff]  }
0x18ca   :  { %9104 = vmatprep.subr.bf16.mxu0 %v14823_v28  ;;  %v14881_v28 = vld [vmem:[#allocation16 + $0xe8] ss:$16 sps:$4 sm:$0xff]  }
0x18cd   :  { %9105 = vmatpush1.bf16.msra.mxu0 %v14821_v27  ;;  %v14889_v27 = vld [vmem:[#allocation16 + $0x10c] ss:$16 sps:$4 sm:$0xff]  }
0x18ce   :  { %9106 = vmatprep.subr.bf16.mxu0 %v14829_v20  ;;  %v14887_v20 = vld [vmem:[#allocation16 + $0x108] ss:$16 sps:$4 sm:$0xff]  }
0x18d1   :  { %9107 = vmatpush1.bf16.msra.mxu0 %v14827_v37  ;;  %v14895_v37 = vld [vmem:[#allocation16 + $0x12c] ss:$16 sps:$4 sm:$0xff]  }
0x18d2   :  { %9108 = vmatprep.subr.bf16.mxu0 %v14835_v50  ;;  %v14893_v50 = vld [vmem:[#allocation16 + $0x128] ss:$16 sps:$4 sm:$0xff]  }
0x18d5   :  { %9109 = vmatpush1.bf16.msra.mxu0 %v14833_v12  ;;  %v14901_v12 = vld [vmem:[#allocation16 + $0x14c] ss:$16 sps:$4 sm:$0xff]  }
0x18d6   :  { %9585 = vmatprep.subr.bf16.mxu0 %v14841_v8  ;;  %v14899_v8 = vld [vmem:[#allocation16 + $0x148] ss:$16 sps:$4 sm:$0xff]  }
0x196b   :  { %v8609_v55 = vpop.f32.mrb[116].mxu0 }
0x196c   :  { %v8610_v53 = vadd.f32 %v8609_v55, %v8526_v22  ;;  %v13503_v59 = vpop.f32.mrb[117].mxu0  ;;  %v14904_v22 = vld [vmem:[#allocation16 + $0x164] ss:$16 sps:$4 sm:$0xff]   ;;  %v14907_v55 = vld [vmem:[#allocation16 + $0x16c] ss:$16 sps:$4 sm:$0xff]  }
0x196d   :  { %v8612_v0 = vpop.f32.mrb[118].mxu0  ;;  %v14905_v59 = vld [vmem:[#allocation16 + $0x168] ss:$16 sps:$4 sm:$0xff]  }
0x196e   :  { %v12906_v16 = vmul.f32 -1.442695, %v8610_v53  ;;  %v13504_v48 = vpop.f32.mrb[119].mxu0  ;;  %v14902_v53 = vld [vmem:[#allocation16 + $0x160] ss:$16 sps:$4 sm:$0xff]  }
0x196f   :  { %v14908_v0 = vld [vmem:[#allocation16 + $0x180] ss:$16 sps:$4 sm:$0xff]   ;;  %v14911_v48 = vld [vmem:[#allocation16 + $0x188] ss:$16 sps:$4 sm:$0xff]  }
0x1970   :  { %15584 = vpow2.f32 %v12906_v16  ;;  %v14910_v16 = vld [vmem:[#allocation16 + $0x184] ss:$16 sps:$4 sm:$0xff]  }
0x197a   :  { %v15585_v36 = vpop.eup %15584 }
0x197b   :  { %v8618_v30 = vadd.f32 1.0, %v15585_v36  ;;  %v14913_v36 = vld [vmem:[#allocation16 + $0x18c] ss:$16 sps:$4 sm:$0xff]  }
0x197d   :  { %15586 = vrcp.f32 %v8618_v30  ;;  %v14916_v30 = vld [vmem:[#allocation16 + $0x1a4] ss:$16 sps:$4 sm:$0xff]  }
0x1987   :  { %v15587_v42 = vpop.eup %15586 }
0x1988   :  { %8621 = vst [vmem:[#allocation19 + $0x4] sm:$0x1] %v15587_v42  ;;  %v8628_v23 = vsel %vm8627_vm5, %v8624_v62, %v15587_v42  ;;  %v14914_v62 = vld [vmem:[#allocation16 + $0x1a0] ss:$16 sps:$4 sm:$0xff]   ;;  %v14917_v42 = vld [vmem:[#allocation16 + $0x1a8] ss:$16 sps:$4 sm:$0xff]  }
0x1989   :  { %v8629_v46 = vmax.f32 %v8628_v23, 0.0  ;;  %v14922_v23 = vld [vmem:[#allocation16 + $0x1c4] ss:$16 sps:$4 sm:$0xff]  }
0x198b   :  { %v8630_v52 = vpack.c.bf16 %v8629_v46, %v8629_v46  ;;  %v14925_v46 = vld [vmem:[#allocation16 + $0x1cc] ss:$16 sps:$4 sm:$0xff]  }
0x198d   :  { %9070 = vmatmul.mubr.bf16.vlgmr.msra.gmra.mrb[116].mxu1 %v8630_v52  ;;  %9111 = vmatmul.mubr.bf16.vlgmr.msra.gmra.mrb[120].mxu0 %v8630_v52  ;;  %v14920_v52 = vld [vmem:[#allocation16 + $0x1c0] ss:$16 sps:$4 sm:$0xff]  }
0x198e   :  { %9576 = vmatprep.mubr.bf16.mxu1 %v17880_v47  ;;  %9617 = vmatprep.mubr.bf16.mxu0 %v17880_v47  ;;  %v14857_v47 = vld [vmem:[#allocation16 + $0x68] ss:$16 sps:$4 sm:$0xff]  }
0x198f   :  { %9545 = vmatpush1.bf16.msra.mxu1 %v14836_v54  ;;  %9586 = vmatpush1.bf16.msra.mxu0 %v14839_v26  ;;  %v14923_v54 = vld [vmem:[#allocation16 + $0x1c8] ss:$16 sps:$4 sm:$0xff]   ;;  %v14928_v26 = vld [vmem:[#allocation16 + $0x1e4] ss:$16 sps:$4 sm:$0xff]  }
0x1990   :  { %9546 = vmatprep.subr.bf16.mxu1 %v14844_v43  ;;  %9587 = vmatprep.subr.bf16.mxu0 %v14847_v44  ;;  %v14931_v43 = vld [vmem:[#allocation16 + $0x1ec] ss:$16 sps:$4 sm:$0xff]   ;;  %v14926_v44 = vld [vmem:[#allocation16 + $0x1e0] ss:$16 sps:$4 sm:$0xff]  }
0x1993   :  { %9547 = vmatpush1.bf16.msra.mxu1 %v14842_v61  ;;  %9588 = vmatpush1.bf16.msra.mxu0 %v14845_v60  ;;  %v14929_v61 = vld [vmem:[#allocation16 + $0x1e8] ss:$16 sps:$4 sm:$0xff]   ;;  %v8695_v60 = vld [vmem:[%s18035_s9] sm:$0xf] }
0x1994   :  { %9548 = vmatprep.subr.bf16.mxu1 %v14850_v63  ;;  %9589 = vmatprep.subr.bf16.mxu0 %v14853_v13  ;;  %v9020_v63 = vrot.slane %v8695_v60, %v18560_v11 }
0x1997   :  { %9549 = vmatpush1.bf16.msra.mxu1 %v14848_v14  ;;  %9590 = vmatpush1.bf16.msra.mxu0 %v14851_v5 }
0x1998   :  { %9550 = vmatprep.subr.bf16.mxu1 %v14856_v15  ;;  %9591 = vmatprep.subr.bf16.mxu0 %v14859_v3 }
0x199b   :  { %9551 = vmatpush1.bf16.msra.mxu1 %v14854_v39  ;;  %9592 = vmatpush1.bf16.msra.mxu0 %v14857_v47 }
0x199c   :  { %9552 = vmatprep.subr.bf16.mxu1 %v14862_v32  ;;  %9593 = vmatprep.subr.bf16.mxu0 %v14865_v34 }
0x199f   :  { %9553 = vmatpush1.bf16.msra.mxu1 %v14860_v35  ;;  %9594 = vmatpush1.bf16.msra.mxu0 %v14863_v45  ;;  %v9024_v45 = vrot.slane %v8695_v60, %v18561_v7 }
0x19a0   :  { %9554 = vmatprep.subr.bf16.mxu1 %v14868_v33  ;;  %9595 = vmatprep.subr.bf16.mxu0 %v14871_v38 }
0x19a3   :  { %9555 = vmatpush1.bf16.msra.mxu1 %v14866_v6  ;;  %9596 = vmatpush1.bf16.msra.mxu0 %v14869_v1 }
0x19a4   :  { %9556 = vmatprep.subr.bf16.mxu1 %v14874_v17  ;;  %9597 = vmatprep.subr.bf16.mxu0 %v14877_v4  ;;  %v9032_v17 = vrot.slane %v8695_v60, %v18562_v56  ;;  %v9028_v4 = vrot.slane %v8695_v60, %v18563_v24 }
0x19a7   :  { %9557 = vmatpush1.bf16.msra.mxu1 %v14872_v2  ;;  %9598 = vmatpush1.bf16.msra.mxu0 %v14875_v19 }
0x19a8   :  { %9558 = vmatprep.subr.bf16.mxu1 %v14880_v10  ;;  %9599 = vmatprep.subr.bf16.mxu0 %v14883_v9 }
0x19ab   :  { %9559 = vmatpush1.bf16.msra.mxu1 %v14878_v18  ;;  %9600 = vmatpush1.bf16.msra.mxu0 %v14881_v28 }
0x19ac   :  { %9560 = vmatprep.subr.bf16.mxu1 %v14886_v58  ;;  %9601 = vmatprep.subr.bf16.mxu0 %v14889_v27 }
0x19af   :  { %9561 = vmatpush1.bf16.msra.mxu1 %v14884_v29  ;;  %9602 = vmatpush1.bf16.msra.mxu0 %v14887_v20 }
0x19b0   :  { %9562 = vmatprep.subr.bf16.mxu1 %v14892_v21  ;;  %9603 = vmatprep.subr.bf16.mxu0 %v14895_v37 }
0x19b3   :  { %9563 = vmatpush1.bf16.msra.mxu1 %v14890_v31  ;;  %9604 = vmatpush1.bf16.msra.mxu0 %v14893_v50  ;;  %v14932_v50 = vld [vmem:[#allocation17] sm:$0xff]  }
0x19b4   :  { %9564 = vmatprep.subr.bf16.mxu1 %v14898_v49  ;;  %9605 = vmatprep.subr.bf16.mxu0 %v14901_v12  ;;  %v14934_v49 = vld [vmem:[#allocation17 + $0x10] sm:$0xff]   ;;  %v14935_v12 = vld [vmem:[#allocation17 + $0x18] sm:$0xff]  }
0x19b7   :  { %9565 = vmatpush1.bf16.msra.mxu1 %v14896_v25  ;;  %9606 = vmatpush1.bf16.msra.mxu0 %v14899_v8  ;;  %v14936_v25 = vld [vmem:[#allocation17 + $0x20] sm:$0xff]   ;;  %v14937_v8 = vld [vmem:[#allocation17 + $0x28] sm:$0xff]  }
0x19b8   :  { %9566 = vmatprep.subr.bf16.mxu1 %v14904_v22  ;;  %9607 = vmatprep.subr.bf16.mxu0 %v14907_v55  ;;  %v14938_v22 = vld [vmem:[#allocation17 + $0x30] sm:$0xff]   ;;  %v14939_v55 = vld [vmem:[#allocation17 + $0x38] sm:$0xff]  }
0x19bb   :  { %9567 = vmatpush1.bf16.msra.mxu1 %v14902_v53  ;;  %9608 = vmatpush1.bf16.msra.mxu0 %v14905_v59  ;;  %v14940_v53 = vld [vmem:[#allocation14] ss:$16 sps:$4 sm:$0xff]   ;;  %v14942_v59 = vld [vmem:[#allocation14 + $0x4] ss:$16 sps:$4 sm:$0xff]  }
0x19bc   :  { %9568 = vmatprep.subr.bf16.mxu1 %v14910_v16  ;;  %9609 = vmatprep.subr.bf16.mxu0 %v14913_v36  ;;  %v14948_v16 = vld [vmem:[#allocation14 + $0x24] ss:$16 sps:$4 sm:$0xff]  }
0x19bd   :  { %v14954_v36 = vld [vmem:[#allocation14 + $0x44] ss:$16 sps:$4 sm:$0xff]  }
0x19bf   :  { %9569 = vmatpush1.bf16.msra.mxu1 %v14908_v0  ;;  %9610 = vmatpush1.bf16.msra.mxu0 %v14911_v48  ;;  %v14945_v0 = vld [vmem:[#allocation14 + $0xc] ss:$16 sps:$4 sm:$0xff]   ;;  %v14946_v48 = vld [vmem:[#allocation14 + $0x20] ss:$16 sps:$4 sm:$0xff]  }
0x19c0   :  { %9570 = vmatprep.subr.bf16.mxu1 %v14916_v30  ;;  %9611 = vmatprep.subr.bf16.mxu0 %v14919_v57  ;;  %v14952_v30 = vld [vmem:[#allocation14 + $0x40] ss:$16 sps:$4 sm:$0xff]   ;;  %v14960_v57 = vld [vmem:[#allocation14 + $0x64] ss:$16 sps:$4 sm:$0xff]  }
0x19c3   :  { %9571 = vmatpush1.bf16.msra.mxu1 %v14914_v62  ;;  %9612 = vmatpush1.bf16.msra.mxu0 %v14917_v42  ;;  %v14958_v62 = vld [vmem:[#allocation14 + $0x60] ss:$16 sps:$4 sm:$0xff]   ;;  %v14966_v42 = vld [vmem:[#allocation14 + $0x84] ss:$16 sps:$4 sm:$0xff]  }
0x19c4   :  { %9572 = vmatprep.subr.bf16.mxu1 %v14922_v23  ;;  %9613 = vmatprep.subr.bf16.mxu0 %v14925_v46  ;;  %v14964_v23 = vld [vmem:[#allocation14 + $0x80] ss:$16 sps:$4 sm:$0xff]   ;;  %v14972_v46 = vld [vmem:[#allocation14 + $0xa4] ss:$16 sps:$4 sm:$0xff]  }
0x19c7   :  { %9573 = vmatpush1.bf16.msra.mxu1 %v14920_v52  ;;  %9614 = vmatpush1.bf16.msra.mxu0 %v14923_v54  ;;  %v14970_v52 = vld [vmem:[#allocation14 + $0xa0] ss:$16 sps:$4 sm:$0xff]   ;;  %v14978_v54 = vld [vmem:[#allocation14 + $0xc4] ss:$16 sps:$4 sm:$0xff]  }
0x19c8   :  { %9574 = vmatprep.subr.bf16.mxu1 %v14928_v26  ;;  %9615 = vmatprep.subr.bf16.mxu0 %v14931_v43  ;;  %v14976_v26 = vld [vmem:[#allocation14 + $0xc0] ss:$16 sps:$4 sm:$0xff]   ;;  %v14984_v43 = vld [vmem:[#allocation14 + $0xe4] ss:$16 sps:$4 sm:$0xff]  }
0x19cb   :  { %9575 = vmatpush1.bf16.msra.mxu1 %v14926_v44  ;;  %9616 = vmatpush1.bf16.msra.mxu0 %v14929_v61  ;;  %v14982_v44 = vld [vmem:[#allocation14 + $0xe0] ss:$16 sps:$4 sm:$0xff]  }
0x19cc   :  { %13505 = vmatprep.subr.bf16.mxu1 %v16164_v51  ;;  %10172 = vmatprep.subr.bf16.mxu0 %v14942_v59  ;;  %v9202_v61 = vld [vmem:[%s18037_s11] sm:$0xf]  ;;  %v14975_v59 = vld [vmem:[#allocation14 + $0xac] ss:$16 sps:$4 sm:$0xff]  }
0x19cd   :  { %v9527_v60 = vrot.slane %v9202_v61, %v18560_v11 }
0x1a60   :  { %v9071_v13 = vpop.f32.mrb[116].mxu1  ;;  %v9112_v14 = vpop.f32.mrb[120].mxu0 }
0x1a61   :  { %v9072_v5 = vadd.f32 %v9071_v13, %v9020_v63  ;;  %v9073_v15 = vpop.f32.mrb[117].mxu1  ;;  %v9114_v3 = vpop.f32.mrb[121].mxu0  ;;  %v9113_v9 = vadd.f32 %v9112_v14, %v9028_v4 }
0x1a62   :  { %v9075_v39 = vpop.f32.mrb[118].mxu1  ;;  %v9116_v47 = vpop.f32.mrb[122].mxu0  ;;  %v9074_v33 = vadd.f32 %v9073_v15, %v9024_v45  ;;  %v9115_v19 = vadd.f32 %v9114_v3, %v9032_v17  ;;  %v9535_v17 = vrot.slane %v9202_v61, %v18563_v24 }
0x1a63   :  { %v12972_v32 = vmul.f32 -1.442695, %v9072_v5  ;;  %v9076_v34 = vpop.f32.mrb[119].mxu1  ;;  %v9117_v35 = vpop.f32.mrb[123].mxu0 }
0x1a64   :  { %v12973_v38 = vmul.f32 -1.442695, %v9074_v33  ;;  %v9531_v35 = vrot.slane %v9202_v61, %v18561_v7 }
0x1a65   :  { %15588 = vpow2.f32 %v12972_v32 }
0x1a66   :  { %15590 = vpow2.f32 %v12973_v38 }
0x1a6f   :  { %v15589_v6 = vpop.eup %15588 }
0x1a70   :  { %v9125_v1 = vadd.f32 1.0, %v15589_v6  ;;  %v15591_v2 = vpop.eup %15590 }
0x1a71   :  { %v9126_v28 = vadd.f32 1.0, %v15591_v2 }
0x1a72   :  { %15592 = vrcp.f32 %v9125_v1  ;;  %v9539_v1 = vrot.slane %v9202_v61, %v18562_v56  ;;  %v15003_v61 = vld [vmem:[#allocation14 + $0x148] ss:$16 sps:$4 sm:$0xff]  }
0x1a7c   :  { %v15593_v10 = vpop.eup %15592 }
0x1a7d   :  { %v9131_v18 = vmul.f32 %v15593_v10, %v9115_v19 }
0x1a7f   :  { %v9132_v58 = vadd.f32 %v9131_v18, %v9113_v9 }
0x1a81   :  { %15594 = vtanh.f32 %v9132_v58 }
0x1a82   :  { %15596 = vrcp.f32 %v9126_v28 }
0x1a8b   :  { %v15595_v27 = vpop.eup %15594 }
0x1a8c   :  { %v9134_v29 = vsub.f32 %v17850_v40, %v15595_v27  ;;  %v15597_v20 = vpop.eup %15596  ;;  %v14933_v40 = vld [vmem:[#allocation17 + $0x8] sm:$0xff]  }
0x1a8e   :  { %v9135_v21 = vmul.f32 %v15597_v20, %v9134_v29 }
0x1a90   :  { %v17898_v37 = vadd.f32 %v15595_v27, %v9135_v21 }
0x1a92   :  { %v17902_v31 = vpack.c.bf16 %v17898_v37, %v17898_v37 }
0x1a94   :  { %9577 = vmatmul.mubr.bf16.vlgmr.msra.gmra.mrb[120].mxu1 %v17902_v31  ;;  %9618 = vmatmul.mubr.bf16.vlgmr.msra.gmra.mrb[124].mxu0 %v17902_v31 }
0x1a95   :  { %10204 = vmatprep.mubr.bf16.mxu0 %v17902_v31  ;;  %13521 = vmatprep.mubr.msk.bf16.mxu1 %vm16165_vm0, %v16164_v51 }
0x1a96   :  { %13506 = vmatpush3.bf16.msra.mxu1 %v14932_v50  ;;  %10173 = vmatpush1.bf16.msra.mxu0 %v14940_v53  ;;  %v14943_v50 = vld [vmem:[#allocation14 + $0x8] ss:$16 sps:$4 sm:$0xff]  }
0x1a97   :  { %13507 = vmatprep.subr.bf16.mxu1 %v16164_v51  ;;  %10174 = vmatprep.subr.bf16.mxu0 %v14948_v16  ;;  %v14967_v53 = vld [vmem:[#allocation14 + $0x88] ss:$16 sps:$4 sm:$0xff]  }
0x1a98   :  { %v14979_v16 = vld [vmem:[#allocation14 + $0xc8] ss:$16 sps:$4 sm:$0xff]  }
0x1a9a   :  { %13508 = vmatpush3.bf16.msra.mxu1 %v14933_v40  ;;  %10175 = vmatpush1.bf16.msra.mxu0 %v14946_v48  ;;  %v14987_v48 = vld [vmem:[#allocation14 + $0xec] ss:$16 sps:$4 sm:$0xff]  }
0x1a9b   :  { %13509 = vmatprep.subr.bf16.mxu1 %v16164_v51  ;;  %10176 = vmatprep.subr.bf16.mxu0 %v14954_v36  ;;  %v14985_v36 = vld [vmem:[#allocation14 + $0xe8] ss:$16 sps:$4 sm:$0xff]  }
0x1a9e   :  { %13510 = vmatpush3.bf16.msra.mxu1 %v14934_v49  ;;  %10177 = vmatpush1.bf16.msra.mxu0 %v14952_v30  ;;  %v14951_v49 = vld [vmem:[#allocation14 + $0x2c] ss:$16 sps:$4 sm:$0xff]   ;;  %v14990_v30 = vld [vmem:[#allocation14 + $0x104] ss:$16 sps:$4 sm:$0xff]  }
0x1a9f   :  { %13511 = vmatprep.subr.bf16.mxu1 %v16164_v51  ;;  %10178 = vmatprep.subr.bf16.mxu0 %v14960_v57  ;;  %v14993_v57 = vld [vmem:[#allocation14 + $0x10c] ss:$16 sps:$4 sm:$0xff]  }
0x1aa2   :  { %13512 = vmatpush3.bf16.msra.mxu1 %v14935_v12  ;;  %10179 = vmatpush1.bf16.msra.mxu0 %v14958_v62  ;;  %v14949_v12 = vld [vmem:[#allocation14 + $0x28] ss:$16 sps:$4 sm:$0xff]   ;;  %v14988_v62 = vld [vmem:[#allocation14 + $0x100] ss:$16 sps:$4 sm:$0xff]  }
0x1aa3   :  { %13513 = vmatprep.subr.bf16.mxu1 %v16164_v51  ;;  %10180 = vmatprep.subr.bf16.mxu0 %v14966_v42  ;;  %v14991_v42 = vld [vmem:[#allocation14 + $0x108] ss:$16 sps:$4 sm:$0xff]  }
0x1aa6   :  { %13514 = vmatpush3.bf16.msra.mxu1 %v14936_v25  ;;  %10181 = vmatpush1.bf16.msra.mxu0 %v14964_v23  ;;  %v14957_v25 = vld [vmem:[#allocation14 + $0x4c] ss:$16 sps:$4 sm:$0xff]   ;;  %v14996_v23 = vld [vmem:[#allocation14 + $0x124] ss:$16 sps:$4 sm:$0xff]  }
0x1aa7   :  { %13515 = vmatprep.subr.bf16.mxu1 %v16164_v51  ;;  %10182 = vmatprep.subr.bf16.mxu0 %v14972_v46  ;;  %v14999_v46 = vld [vmem:[#allocation14 + $0x12c] ss:$16 sps:$4 sm:$0xff]  }
0x1aaa   :  { %13516 = vmatpush3.bf16.msra.mxu1 %v14937_v8  ;;  %10183 = vmatpush1.bf16.msra.mxu0 %v14970_v52  ;;  %v14963_v8 = vld [vmem:[#allocation14 + $0x6c] ss:$16 sps:$4 sm:$0xff]   ;;  %v14994_v52 = vld [vmem:[#allocation14 + $0x120] ss:$16 sps:$4 sm:$0xff]  }
0x1aab   :  { %13517 = vmatprep.subr.bf16.mxu1 %v16164_v51  ;;  %10184 = vmatprep.subr.bf16.mxu0 %v14978_v54  ;;  %v14997_v54 = vld [vmem:[#allocation14 + $0x128] ss:$16 sps:$4 sm:$0xff]  }
0x1aae   :  { %13518 = vmatpush3.bf16.msra.mxu1 %v14938_v22  ;;  %10185 = vmatpush1.bf16.msra.mxu0 %v14976_v26  ;;  %v14961_v22 = vld [vmem:[#allocation14 + $0x68] ss:$16 sps:$4 sm:$0xff]   ;;  %v15002_v26 = vld [vmem:[#allocation14 + $0x144] ss:$16 sps:$4 sm:$0xff]  }
0x1aaf   :  { %13519 = vmatprep.subr.bf16.mxu1 %v16164_v51  ;;  %10186 = vmatprep.subr.bf16.mxu0 %v14984_v43  ;;  %v15005_v43 = vld [vmem:[#allocation14 + $0x14c] ss:$16 sps:$4 sm:$0xff]  }
0x1ab2   :  { %13520 = vmatpush3.bf16.msra.mxu1 %v14939_v55  ;;  %10187 = vmatpush1.bf16.msra.mxu0 %v14982_v44  ;;  %v14969_v55 = vld [vmem:[#allocation14 + $0x8c] ss:$16 sps:$4 sm:$0xff]   ;;  %v15000_v44 = vld [vmem:[#allocation14 + $0x140] ss:$16 sps:$4 sm:$0xff]  }
0x1ab3   :  { %10213 = vmatprep.subr.bf16.mxu1 %v14945_v0  ;;  %v14973_v0 = vld [vmem:[#allocation14 + $0xa8] ss:$16 sps:$4 sm:$0xff]   ;;  %10188 = vmatprep.subr.bf16.mxu0 %v14990_v30  ;;  %v15053_v30 = vld [vmem:[#allocation16 + $0x4c] ss:$16 sps:$4 sm:$0xff]  }
0x1ab6   :  { %10189 = vmatpush1.bf16.msra.mxu0 %v14988_v62  ;;  %v15051_v62 = vld [vmem:[#allocation16 + $0x48] ss:$16 sps:$4 sm:$0xff]  }
0x1ab7   :  { %10190 = vmatprep.subr.bf16.mxu0 %v14996_v23  ;;  %v15059_v23 = vld [vmem:[#allocation16 + $0x6c] ss:$16 sps:$4 sm:$0xff]  }
0x1aba   :  { %10191 = vmatpush1.bf16.msra.mxu0 %v14994_v52  ;;  %v15062_v52 = vld [vmem:[#allocation16 + $0x84] ss:$16 sps:$4 sm:$0xff]  }
0x1abb   :  { %10192 = vmatprep.subr.bf16.mxu0 %v15002_v26  ;;  %v15060_v26 = vld [vmem:[#allocation16 + $0x80] ss:$16 sps:$4 sm:$0xff]  }
0x1abe   :  { %10193 = vmatpush1.bf16.msra.mxu0 %v15000_v44  ;;  %v15068_v44 = vld [vmem:[#allocation16 + $0xa4] ss:$16 sps:$4 sm:$0xff]  }
0x1b67   :  { %v9578_v63 = vpop.f32.mrb[120].mxu1  ;;  %v9619_v13 = vpop.f32.mrb[124].mxu0 }
0x1b68   :  { %v9579_v14 = vadd.f32 %v9578_v63, %v9527_v60  ;;  %v9580_v5 = vpop.f32.mrb[121].mxu1  ;;  %v9621_v15 = vpop.f32.mrb[125].mxu0  ;;  %v9620_v10 = vadd.f32 %v9619_v13, %v9535_v17  ;;  %v15008_v60 = vld [vmem:[#allocation14 + $0x164] ss:$16 sps:$4 sm:$0xff]   ;;  %v15011_v63 = vld [vmem:[#allocation14 + $0x16c] ss:$16 sps:$4 sm:$0xff]  }
0x1b69   :  { %v9582_v3 = vpop.f32.mrb[122].mxu1  ;;  %v9623_v39 = vpop.f32.mrb[126].mxu0  ;;  %v9581_v45 = vadd.f32 %v9580_v5, %v9531_v35  ;;  %v9622_v2 = vadd.f32 %v9621_v15, %v9539_v1  ;;  %v15006_v13 = vld [vmem:[#allocation14 + $0x160] ss:$16 sps:$4 sm:$0xff]   ;;  %10194 = vmatprep.subr.bf16.mxu0 %v15008_v60  ;;  %v15014_v5 = vld [vmem:[#allocation14 + $0x184] ss:$16 sps:$4 sm:$0xff]  }
0x1b6a   :  { %v13038_v47 = vmul.f32 -1.442695, %v9579_v14  ;;  %v9583_v32 = vpop.f32.mrb[123].mxu1  ;;  %v9624_v34 = vpop.f32.mrb[127].mxu0  ;;  %v15009_v14 = vld [vmem:[#allocation14 + $0x168] ss:$16 sps:$4 sm:$0xff]   ;;  %10195 = vmatpush1.bf16.msra.mxu0 %v15006_v13 }
0x1b6b   :  { %v13039_v33 = vmul.f32 -1.442695, %v9581_v45  ;;  %v15017_v15 = vld [vmem:[#allocation14 + $0x18c] ss:$16 sps:$4 sm:$0xff]   ;;  %v15012_v3 = vld [vmem:[#allocation14 + $0x180] ss:$16 sps:$4 sm:$0xff]   ;;  %10196 = vmatprep.subr.bf16.mxu0 %v15014_v5 }
0x1b6c   :  { %15598 = vpow2.f32 %v13038_v47  ;;  %v15015_v39 = vld [vmem:[#allocation14 + $0x188] ss:$16 sps:$4 sm:$0xff]   ;;  %v15020_v47 = vld [vmem:[#allocation14 + $0x1a4] ss:$16 sps:$4 sm:$0xff]   ;;  %v15023_v32 = vld [vmem:[#allocation14 + $0x1ac] ss:$16 sps:$4 sm:$0xff]  }
0x1b6d   :  { %15600 = vpow2.f32 %v13039_v33  ;;  %v15018_v34 = vld [vmem:[#allocation14 + $0x1a0] ss:$16 sps:$4 sm:$0xff]   ;;  %v15021_v35 = vld [vmem:[#allocation14 + $0x1a8] ss:$16 sps:$4 sm:$0xff]   ;;  %v15026_v45 = vld [vmem:[#allocation14 + $0x1c4] ss:$16 sps:$4 sm:$0xff]  }
0x1b6e   :  { %10197 = vmatpush1.bf16.msra.mxu0 %v15012_v3  ;;  %v15029_v33 = vld [vmem:[#allocation14 + $0x1cc] ss:$16 sps:$4 sm:$0xff]   ;;  %v15032_v1 = vld [vmem:[#allocation14 + $0x1e4] ss:$16 sps:$4 sm:$0xff]   ;;  %v15066_v60 = vld [vmem:[#allocation16 + $0xa0] ss:$16 sps:$4 sm:$0xff]  }
0x1b6f   :  { %10198 = vmatprep.subr.bf16.mxu0 %v15020_v47  ;;  %v15035_v17 = vld [vmem:[#allocation14 + $0x1ec] ss:$16 sps:$4 sm:$0xff]   ;;  %v15074_v13 = vld [vmem:[#allocation16 + $0xc4] ss:$16 sps:$4 sm:$0xff]   ;;  %v15072_v5 = vld [vmem:[#allocation16 + $0xc0] ss:$16 sps:$4 sm:$0xff]  }
0x1b70   :  { %v15080_v3 = vld [vmem:[#allocation16 + $0xe4] ss:$16 sps:$4 sm:$0xff]   ;;  %v15078_v47 = vld [vmem:[#allocation16 + $0xe0] ss:$16 sps:$4 sm:$0xff]  }
0x1b72   :  { %10199 = vmatpush1.bf16.msra.mxu0 %v15018_v34  ;;  %v15086_v34 = vld [vmem:[#allocation16 + $0x104] ss:$16 sps:$4 sm:$0xff]  }
0x1b73   :  { %10200 = vmatprep.subr.bf16.mxu0 %v15026_v45  ;;  %v15084_v45 = vld [vmem:[#allocation16 + $0x100] ss:$16 sps:$4 sm:$0xff]  }
0x1b76   :  { %v15599_v38 = vpop.eup %15598 }
0x1b77   :  { %v9632_v6 = vadd.f32 1.0, %v15599_v38  ;;  %v15601_v4 = vpop.eup %15600  ;;  %v15024_v38 = vld [vmem:[#allocation14 + $0x1c0] ss:$16 sps:$4 sm:$0xff]  }
0x1b78   :  { %v9633_v18 = vadd.f32 1.0, %v15601_v4  ;;  %10201 = vmatpush1.bf16.msra.mxu0 %v15024_v38  ;;  %v15030_v4 = vld [vmem:[#allocation14 + $0x1e0] ss:$16 sps:$4 sm:$0xff]   ;;  %v15092_v38 = vld [vmem:[#allocation16 + $0x124] ss:$16 sps:$4 sm:$0xff]  }
0x1b79   :  { %15602 = vrcp.f32 %v9632_v6  ;;  %v15027_v6 = vld [vmem:[#allocation14 + $0x1c8] ss:$16 sps:$4 sm:$0xff]   ;;  %10202 = vmatprep.subr.bf16.mxu0 %v15032_v1  ;;  %v15090_v1 = vld [vmem:[#allocation16 + $0x120] ss:$16 sps:$4 sm:$0xff]  }
0x1b7c   :  { %10203 = vmatpush1.bf16.msra.mxu0 %v15030_v4  ;;  %v15098_v4 = vld [vmem:[#allocation16 + $0x144] ss:$16 sps:$4 sm:$0xff]  }
0x1b83   :  { %v15603_v19 = vpop.eup %15602 }
0x1b84   :  { %v9638_v9 = vmul.f32 %v15603_v19, %v9622_v2  ;;  %v15033_v2 = vld [vmem:[#allocation14 + $0x1e8] ss:$16 sps:$4 sm:$0xff]   ;;  %v15038_v19 = vld [vmem:[#allocation16 + $0x4] ss:$16 sps:$4 sm:$0xff]  }
0x1b85   :  { %10679 = vmatprep.subr.bf16.mxu0 %v15038_v19  ;;  %v15096_v19 = vld [vmem:[#allocation16 + $0x140] ss:$16 sps:$4 sm:$0xff]  }
0x1b86   :  { %v9639_v28 = vadd.f32 %v9638_v9, %v9620_v10  ;;  %v15041_v10 = vld [vmem:[#allocation16 + $0xc] ss:$16 sps:$4 sm:$0xff]   ;;  %v9661_v9 = vld [vmem:[%s18039_s13] sm:$0x1] }
0x1b88   :  { %15604 = vtanh.f32 %v9639_v28 }
0x1b89   :  { %15606 = vrcp.f32 %v9633_v18 }
0x1b92   :  { %v15605_v58 = vpop.eup %15604 }
0x1b93   :  { %v9641_v27 = vsub.f32 %v17876_v41, %v15605_v58  ;;  %v15607_v29 = vpop.eup %15606  ;;  %v14955_v41 = vld [vmem:[#allocation14 + $0x48] ss:$16 sps:$4 sm:$0xff]  }
0x1b95   :  { %v9642_v20 = vmul.f32 %v15607_v29, %v9641_v27 }
0x1b97   :  { %v17924_v21 = vadd.f32 %v15605_v58, %v9642_v20 }
0x1b99   :  { %v17928_v40 = vpack.c.bf16 %v17924_v21, %v17924_v21 }
0x1b9b   :  { %13522 = vmatmul.mubr.bf16.vlgmr.msra.gmra.mrb[124].mxu1 %v17928_v40 }
0x1b9c   :  { %10245 = vmatprep.mubr.bf16.mxu1 %v17902_v31  ;;  %10214 = vmatpush1.bf16.msra.mxu1 %v14943_v50  ;;  %v14981_v31 = vld [vmem:[#allocation14 + $0xcc] ss:$16 sps:$4 sm:$0xff]  }
0x1b9d   :  { %10215 = vmatprep.subr.bf16.mxu1 %v14951_v49 }
0x1ba0   :  { %10216 = vmatpush1.bf16.msra.mxu1 %v14949_v12  ;;  %v9761_v12 = vstv %s9760_s30 }
0x1ba1   :  { %10217 = vmatprep.subr.bf16.mxu1 %v14957_v25  ;;  %v9759_v25 = vld [vmem:[#allocation8 + $0x5] sm:$0x1]  ;;  %vm9762_vm6 = vcmp.eq.s32.totalorder %v9761_v12, 1 }
0x1ba2   :  { %v15119_v12 = vld [vmem:[#allocation16 + $0x1ac] ss:$16 sps:$4 sm:$0xff]  }
0x1ba4   :  { %10218 = vmatpush1.bf16.msra.mxu1 %v14955_v41 }
0x1ba5   :  { %10219 = vmatprep.subr.bf16.mxu1 %v14963_v8 }
0x1ba8   :  { %10220 = vmatpush1.bf16.msra.mxu1 %v14961_v22 }
0x1ba9   :  { %10221 = vmatprep.subr.bf16.mxu1 %v14969_v55 }
0x1bac   :  { %10222 = vmatpush1.bf16.msra.mxu1 %v14967_v53  ;;  %v15036_v53 = vld [vmem:[#allocation16] ss:$16 sps:$4 sm:$0xff]  }
0x1bad   :  { %10223 = vmatprep.subr.bf16.mxu1 %v14975_v59  ;;  %v15039_v59 = vld [vmem:[#allocation16 + $0x8] ss:$16 sps:$4 sm:$0xff]  }
0x1bb0   :  { %10224 = vmatpush1.bf16.msra.mxu1 %v14973_v0  ;;  %v15044_v0 = vld [vmem:[#allocation16 + $0x24] ss:$16 sps:$4 sm:$0xff]  }
0x1bb1   :  { %10225 = vmatprep.subr.bf16.mxu1 %v14981_v31  ;;  %v15047_v31 = vld [vmem:[#allocation16 + $0x2c] ss:$16 sps:$4 sm:$0xff]  }
0x1bb4   :  { %10226 = vmatpush1.bf16.msra.mxu1 %v14979_v16  ;;  %v15042_v16 = vld [vmem:[#allocation16 + $0x20] ss:$16 sps:$4 sm:$0xff]  }
0x1bb5   :  { %10227 = vmatprep.subr.bf16.mxu1 %v14987_v48  ;;  %v15045_v48 = vld [vmem:[#allocation16 + $0x28] ss:$16 sps:$4 sm:$0xff]  }
0x1bb8   :  { %10228 = vmatpush1.bf16.msra.mxu1 %v14985_v36  ;;  %v15050_v36 = vld [vmem:[#allocation16 + $0x44] ss:$16 sps:$4 sm:$0xff]  }
0x1bb9   :  { %10229 = vmatprep.subr.bf16.mxu1 %v14993_v57  ;;  %v15048_v57 = vld [vmem:[#allocation16 + $0x40] ss:$16 sps:$4 sm:$0xff]  }
0x1bbc   :  { %10230 = vmatpush1.bf16.msra.mxu1 %v14991_v42  ;;  %v15056_v42 = vld [vmem:[#allocation16 + $0x64] ss:$16 sps:$4 sm:$0xff]  }
0x1bbd   :  { %10231 = vmatprep.subr.bf16.mxu1 %v14999_v46  ;;  %v15054_v46 = vld [vmem:[#allocation16 + $0x60] ss:$16 sps:$4 sm:$0xff]  }
0x1bc0   :  { %10232 = vmatpush1.bf16.msra.mxu1 %v14997_v54  ;;  %v15065_v54 = vld [vmem:[#allocation16 + $0x8c] ss:$16 sps:$4 sm:$0xff]  }
0x1bc1   :  { %10233 = vmatprep.subr.bf16.mxu1 %v15005_v43  ;;  %v15063_v43 = vld [vmem:[#allocation16 + $0x88] ss:$16 sps:$4 sm:$0xff]  }
0x1bc4   :  { %10234 = vmatpush1.bf16.msra.mxu1 %v15003_v61  ;;  %v15071_v61 = vld [vmem:[#allocation16 + $0xac] ss:$16 sps:$4 sm:$0xff]  }
0x1bc5   :  { %10235 = vmatprep.subr.bf16.mxu1 %v15011_v63  ;;  %v15069_v63 = vld [vmem:[#allocation16 + $0xa8] ss:$16 sps:$4 sm:$0xff]  }
0x1bc8   :  { %10236 = vmatpush1.bf16.msra.mxu1 %v15009_v14  ;;  %v15077_v14 = vld [vmem:[#allocation16 + $0xcc] ss:$16 sps:$4 sm:$0xff]  }
0x1bc9   :  { %10237 = vmatprep.subr.bf16.mxu1 %v15017_v15  ;;  %v15075_v15 = vld [vmem:[#allocation16 + $0xc8] ss:$16 sps:$4 sm:$0xff]  }
0x1bcc   :  { %10238 = vmatpush1.bf16.msra.mxu1 %v15015_v39  ;;  %v15083_v39 = vld [vmem:[#allocation16 + $0xec] ss:$16 sps:$4 sm:$0xff]  }
0x1bcd   :  { %10239 = vmatprep.subr.bf16.mxu1 %v15023_v32  ;;  %v15081_v32 = vld [vmem:[#allocation16 + $0xe8] ss:$16 sps:$4 sm:$0xff]  }
0x1bd0   :  { %10240 = vmatpush1.bf16.msra.mxu1 %v15021_v35  ;;  %v15089_v35 = vld [vmem:[#allocation16 + $0x10c] ss:$16 sps:$4 sm:$0xff]  }
0x1bd1   :  { %10241 = vmatprep.subr.bf16.mxu1 %v15029_v33  ;;  %v15087_v33 = vld [vmem:[#allocation16 + $0x108] ss:$16 sps:$4 sm:$0xff]  }
0x1bd4   :  { %10242 = vmatpush1.bf16.msra.mxu1 %v15027_v6  ;;  %v15095_v6 = vld [vmem:[#allocation16 + $0x12c] ss:$16 sps:$4 sm:$0xff]  }
0x1bd5   :  { %10243 = vmatprep.subr.bf16.mxu1 %v15035_v17  ;;  %v15093_v17 = vld [vmem:[#allocation16 + $0x128] ss:$16 sps:$4 sm:$0xff]  }
0x1bd8   :  { %10244 = vmatpush1.bf16.msra.mxu1 %v15033_v2  ;;  %v15101_v2 = vld [vmem:[#allocation16 + $0x14c] ss:$16 sps:$4 sm:$0xff]  }
0x1bd9   :  { %10720 = vmatprep.subr.bf16.mxu1 %v15041_v10  ;;  %v15099_v10 = vld [vmem:[#allocation16 + $0x148] ss:$16 sps:$4 sm:$0xff]  }
0x1c6e   :  { %v9744_v18 = vpop.f32.mrb[124].mxu1 }
0x1c6f   :  { %v9745_v28 = vadd.f32 %v9744_v18, %v9661_v9  ;;  %v13523_v58 = vpop.f32.mrb[125].mxu1  ;;  %v15104_v9 = vld [vmem:[#allocation16 + $0x164] ss:$16 sps:$4 sm:$0xff]   ;;  %v15107_v18 = vld [vmem:[#allocation16 + $0x16c] ss:$16 sps:$4 sm:$0xff]  }
0x1c70   :  { %v9747_v27 = vpop.f32.mrb[126].mxu1  ;;  %v15105_v58 = vld [vmem:[#allocation16 + $0x168] ss:$16 sps:$4 sm:$0xff]  }
0x1c71   :  { %v13048_v29 = vmul.f32 -1.442695, %v9745_v28  ;;  %v13524_v20 = vpop.f32.mrb[127].mxu1  ;;  %v15102_v28 = vld [vmem:[#allocation16 + $0x160] ss:$16 sps:$4 sm:$0xff]  }
0x1c72   :  { %v15108_v27 = vld [vmem:[#allocation16 + $0x180] ss:$16 sps:$4 sm:$0xff]   ;;  %v15111_v20 = vld [vmem:[#allocation16 + $0x188] ss:$16 sps:$4 sm:$0xff]  }
0x1c73   :  { %15608 = vpow2.f32 %v13048_v29  ;;  %v15110_v29 = vld [vmem:[#allocation16 + $0x184] ss:$16 sps:$4 sm:$0xff]  }
0x1c7d   :  { %v15609_v50 = vpop.eup %15608 }
0x1c7e   :  { %v9753_v49 = vadd.f32 1.0, %v15609_v50  ;;  %v15113_v50 = vld [vmem:[#allocation16 + $0x18c] ss:$16 sps:$4 sm:$0xff]  }
0x1c80   :  { %15610 = vrcp.f32 %v9753_v49  ;;  %v15116_v49 = vld [vmem:[#allocation16 + $0x1a4] ss:$16 sps:$4 sm:$0xff]  }
0x1c8a   :  { %v15611_v41 = vpop.eup %15610 }
0x1c8b   :  { %9756 = vst [vmem:[#allocation19 + $0x5] sm:$0x1] %v15611_v41  ;;  %v9763_v8 = vsel %vm9762_vm6, %v9759_v25, %v15611_v41  ;;  %v15114_v25 = vld [vmem:[#allocation16 + $0x1a0] ss:$16 sps:$4 sm:$0xff]   ;;  %v15117_v41 = vld [vmem:[#allocation16 + $0x1a8] ss:$16 sps:$4 sm:$0xff]  }
0x1c8c   :  { %v9764_v22 = vmax.f32 %v9763_v8, 0.0  ;;  %v15122_v8 = vld [vmem:[#allocation16 + $0x1c4] ss:$16 sps:$4 sm:$0xff]  }
0x1c8e   :  { %v9765_v55 = vpack.c.bf16 %v9764_v22, %v9764_v22  ;;  %v15125_v22 = vld [vmem:[#allocation16 + $0x1cc] ss:$16 sps:$4 sm:$0xff]  }
0x1c90   :  { %10205 = vmatmul.mubr.bf16.vlgmr.msra.gmra.mrb[128].mxu0 %v9765_v55  ;;  %10246 = vmatmul.mubr.bf16.vlgmr.msra.gmra.mrb[128].mxu1 %v9765_v55  ;;  %v15120_v55 = vld [vmem:[#allocation16 + $0x1c0] ss:$16 sps:$4 sm:$0xff]  }
0x1c91   :  { %10711 = vmatprep.mubr.bf16.mxu0 %v17928_v40  ;;  %10752 = vmatprep.mubr.bf16.mxu1 %v17928_v40  ;;  %v15057_v40 = vld [vmem:[#allocation16 + $0x68] ss:$16 sps:$4 sm:$0xff]  }
0x1c92   :  { %10680 = vmatpush1.bf16.msra.mxu0 %v15036_v53  ;;  %10721 = vmatpush1.bf16.msra.mxu1 %v15039_v59  ;;  %v15123_v53 = vld [vmem:[#allocation16 + $0x1c8] ss:$16 sps:$4 sm:$0xff]   ;;  %v15128_v59 = vld [vmem:[#allocation16 + $0x1e4] ss:$16 sps:$4 sm:$0xff]  }
0x1c93   :  { %10681 = vmatprep.subr.bf16.mxu0 %v15044_v0  ;;  %10722 = vmatprep.subr.bf16.mxu1 %v15047_v31  ;;  %v15131_v0 = vld [vmem:[#allocation16 + $0x1ec] ss:$16 sps:$4 sm:$0xff]   ;;  %v15126_v31 = vld [vmem:[#allocation16 + $0x1e0] ss:$16 sps:$4 sm:$0xff]  }
0x1c96   :  { %10682 = vmatpush1.bf16.msra.mxu0 %v15042_v16  ;;  %10723 = vmatpush1.bf16.msra.mxu1 %v15045_v48  ;;  %v15129_v16 = vld [vmem:[#allocation16 + $0x1e8] ss:$16 sps:$4 sm:$0xff]   ;;  %v9830_v48 = vld [vmem:[%s18035_s9] sm:$0xf] }
0x1c97   :  { %10683 = vmatprep.subr.bf16.mxu0 %v15050_v36  ;;  %10724 = vmatprep.subr.bf16.mxu1 %v15053_v30  ;;  %v10155_v36 = vrot.slane %v9830_v48, %v18560_v11 }
0x1c9a   :  { %10684 = vmatpush1.bf16.msra.mxu0 %v15048_v57  ;;  %10725 = vmatpush1.bf16.msra.mxu1 %v15051_v62 }
0x1c9b   :  { %10685 = vmatprep.subr.bf16.mxu0 %v15056_v42  ;;  %10726 = vmatprep.subr.bf16.mxu1 %v15059_v23 }
0x1c9e   :  { %10686 = vmatpush1.bf16.msra.mxu0 %v15054_v46  ;;  %10727 = vmatpush1.bf16.msra.mxu1 %v15057_v40 }
0x1c9f   :  { %10687 = vmatprep.subr.bf16.mxu0 %v15062_v52  ;;  %10728 = vmatprep.subr.bf16.mxu1 %v15065_v54 }
0x1ca2   :  { %10688 = vmatpush1.bf16.msra.mxu0 %v15060_v26  ;;  %10729 = vmatpush1.bf16.msra.mxu1 %v15063_v43  ;;  %v10159_v43 = vrot.slane %v9830_v48, %v18561_v7 }
0x1ca3   :  { %10689 = vmatprep.subr.bf16.mxu0 %v15068_v44  ;;  %10730 = vmatprep.subr.bf16.mxu1 %v15071_v61 }
0x1ca6   :  { %10690 = vmatpush1.bf16.msra.mxu0 %v15066_v60  ;;  %10731 = vmatpush1.bf16.msra.mxu1 %v15069_v63 }
0x1ca7   :  { %10691 = vmatprep.subr.bf16.mxu0 %v15074_v13  ;;  %10732 = vmatprep.subr.bf16.mxu1 %v15077_v14  ;;  %v10167_v13 = vrot.slane %v9830_v48, %v18562_v56  ;;  %v10163_v14 = vrot.slane %v9830_v48, %v18563_v24 }
0x1caa   :  { %10692 = vmatpush1.bf16.msra.mxu0 %v15072_v5  ;;  %10733 = vmatpush1.bf16.msra.mxu1 %v15075_v15 }
0x1cab   :  { %10693 = vmatprep.subr.bf16.mxu0 %v15080_v3  ;;  %10734 = vmatprep.subr.bf16.mxu1 %v15083_v39 }
0x1cae   :  { %10694 = vmatpush1.bf16.msra.mxu0 %v15078_v47  ;;  %10735 = vmatpush1.bf16.msra.mxu1 %v15081_v32 }
0x1caf   :  { %10695 = vmatprep.subr.bf16.mxu0 %v15086_v34  ;;  %10736 = vmatprep.subr.bf16.mxu1 %v15089_v35 }
0x1cb2   :  { %10696 = vmatpush1.bf16.msra.mxu0 %v15084_v45  ;;  %10737 = vmatpush1.bf16.msra.mxu1 %v15087_v33 }
0x1cb3   :  { %10697 = vmatprep.subr.bf16.mxu0 %v15092_v38  ;;  %10738 = vmatprep.subr.bf16.mxu1 %v15095_v6 }
0x1cb6   :  { %10698 = vmatpush1.bf16.msra.mxu0 %v15090_v1  ;;  %10739 = vmatpush1.bf16.msra.mxu1 %v15093_v17  ;;  %v15132_v17 = vld [vmem:[#allocation17] sm:$0xff]  }
0x1cb7   :  { %10699 = vmatprep.subr.bf16.mxu0 %v15098_v4  ;;  %10740 = vmatprep.subr.bf16.mxu1 %v15101_v2  ;;  %v15134_v4 = vld [vmem:[#allocation17 + $0x10] sm:$0xff]   ;;  %v15135_v2 = vld [vmem:[#allocation17 + $0x18] sm:$0xff]  }
0x1cba   :  { %10700 = vmatpush1.bf16.msra.mxu0 %v15096_v19  ;;  %10741 = vmatpush1.bf16.msra.mxu1 %v15099_v10  ;;  %v15136_v19 = vld [vmem:[#allocation17 + $0x20] sm:$0xff]   ;;  %v15137_v10 = vld [vmem:[#allocation17 + $0x28] sm:$0xff]  }
0x1cbb   :  { %10701 = vmatprep.subr.bf16.mxu0 %v15104_v9  ;;  %10742 = vmatprep.subr.bf16.mxu1 %v15107_v18  ;;  %v15138_v9 = vld [vmem:[#allocation17 + $0x30] sm:$0xff]   ;;  %v15139_v18 = vld [vmem:[#allocation17 + $0x38] sm:$0xff]  }
0x1cbe   :  { %10702 = vmatpush1.bf16.msra.mxu0 %v15102_v28  ;;  %10743 = vmatpush1.bf16.msra.mxu1 %v15105_v58  ;;  %v15140_v28 = vld [vmem:[#allocation14] ss:$16 sps:$4 sm:$0xff]   ;;  %v15142_v58 = vld [vmem:[#allocation14 + $0x4] ss:$16 sps:$4 sm:$0xff]  }
0x1cbf   :  { %10703 = vmatprep.subr.bf16.mxu0 %v15110_v29  ;;  %10744 = vmatprep.subr.bf16.mxu1 %v15113_v50  ;;  %v15148_v29 = vld [vmem:[#allocation14 + $0x24] ss:$16 sps:$4 sm:$0xff]  }
0x1cc0   :  { %v15154_v50 = vld [vmem:[#allocation14 + $0x44] ss:$16 sps:$4 sm:$0xff]  }
0x1cc2   :  { %10704 = vmatpush1.bf16.msra.mxu0 %v15108_v27  ;;  %10745 = vmatpush1.bf16.msra.mxu1 %v15111_v20  ;;  %v15145_v27 = vld [vmem:[#allocation14 + $0xc] ss:$16 sps:$4 sm:$0xff]   ;;  %v15146_v20 = vld [vmem:[#allocation14 + $0x20] ss:$16 sps:$4 sm:$0xff]  }
0x1cc3   :  { %10705 = vmatprep.subr.bf16.mxu0 %v15116_v49  ;;  %10746 = vmatprep.subr.bf16.mxu1 %v15119_v12  ;;  %v15152_v49 = vld [vmem:[#allocation14 + $0x40] ss:$16 sps:$4 sm:$0xff]   ;;  %v15160_v12 = vld [vmem:[#allocation14 + $0x64] ss:$16 sps:$4 sm:$0xff]  }
0x1cc6   :  { %10706 = vmatpush1.bf16.msra.mxu0 %v15114_v25  ;;  %10747 = vmatpush1.bf16.msra.mxu1 %v15117_v41  ;;  %v15158_v25 = vld [vmem:[#allocation14 + $0x60] ss:$16 sps:$4 sm:$0xff]   ;;  %v15166_v41 = vld [vmem:[#allocation14 + $0x84] ss:$16 sps:$4 sm:$0xff]  }
0x1cc7   :  { %10707 = vmatprep.subr.bf16.mxu0 %v15122_v8  ;;  %10748 = vmatprep.subr.bf16.mxu1 %v15125_v22  ;;  %v15164_v8 = vld [vmem:[#allocation14 + $0x80] ss:$16 sps:$4 sm:$0xff]   ;;  %v15172_v22 = vld [vmem:[#allocation14 + $0xa4] ss:$16 sps:$4 sm:$0xff]  }
0x1cca   :  { %10708 = vmatpush1.bf16.msra.mxu0 %v15120_v55  ;;  %10749 = vmatpush1.bf16.msra.mxu1 %v15123_v53  ;;  %v15170_v55 = vld [vmem:[#allocation14 + $0xa0] ss:$16 sps:$4 sm:$0xff]   ;;  %v15178_v53 = vld [vmem:[#allocation14 + $0xc4] ss:$16 sps:$4 sm:$0xff]  }
0x1ccb   :  { %10709 = vmatprep.subr.bf16.mxu0 %v15128_v59  ;;  %10750 = vmatprep.subr.bf16.mxu1 %v15131_v0  ;;  %v15176_v59 = vld [vmem:[#allocation14 + $0xc0] ss:$16 sps:$4 sm:$0xff]   ;;  %v15184_v0 = vld [vmem:[#allocation14 + $0xe4] ss:$16 sps:$4 sm:$0xff]  }
0x1cce   :  { %10710 = vmatpush1.bf16.msra.mxu0 %v15126_v31  ;;  %10751 = vmatpush1.bf16.msra.mxu1 %v15129_v16  ;;  %v15182_v31 = vld [vmem:[#allocation14 + $0xe0] ss:$16 sps:$4 sm:$0xff]  }
0x1ccf   :  { %13525 = vmatprep.subr.bf16.mxu0 %v16164_v51  ;;  %11307 = vmatprep.subr.bf16.mxu1 %v15142_v58  ;;  %v10337_v16 = vld [vmem:[%s18037_s11] sm:$0xf]  ;;  %v15175_v58 = vld [vmem:[#allocation14 + $0xac] ss:$16 sps:$4 sm:$0xff]  }
0x1cd0   :  { %v10662_v48 = vrot.slane %v10337_v16, %v18560_v11 }
0x1d63   :  { %v10206_v30 = vpop.f32.mrb[128].mxu0  ;;  %v10247_v57 = vpop.f32.mrb[128].mxu1 }
0x1d64   :  { %v10207_v62 = vadd.f32 %v10206_v30, %v10155_v36  ;;  %v10208_v42 = vpop.f32.mrb[129].mxu0  ;;  %v10249_v23 = vpop.f32.mrb[129].mxu1  ;;  %v10248_v39 = vadd.f32 %v10247_v57, %v10163_v14 }
0x1d65   :  { %v10210_v46 = vpop.f32.mrb[130].mxu0  ;;  %v10251_v40 = vpop.f32.mrb[130].mxu1  ;;  %v10209_v44 = vadd.f32 %v10208_v42, %v10159_v43  ;;  %v10250_v15 = vadd.f32 %v10249_v23, %v10167_v13  ;;  %v10670_v13 = vrot.slane %v10337_v16, %v18563_v24 }
0x1d66   :  { %v13114_v52 = vmul.f32 -1.442695, %v10207_v62  ;;  %v10211_v54 = vpop.f32.mrb[131].mxu0  ;;  %v10252_v26 = vpop.f32.mrb[131].mxu1 }
0x1d67   :  { %v13115_v61 = vmul.f32 -1.442695, %v10209_v44  ;;  %v10666_v26 = vrot.slane %v10337_v16, %v18561_v7 }
0x1d68   :  { %15612 = vpow2.f32 %v13114_v52 }
0x1d69   :  { %15614 = vpow2.f32 %v13115_v61 }
0x1d72   :  { %v15613_v60 = vpop.eup %15612 }
0x1d73   :  { %v10260_v63 = vadd.f32 1.0, %v15613_v60  ;;  %v15615_v5 = vpop.eup %15614 }
0x1d74   :  { %v10261_v32 = vadd.f32 1.0, %v15615_v5 }
0x1d75   :  { %15616 = vrcp.f32 %v10260_v63  ;;  %v10674_v63 = vrot.slane %v10337_v16, %v18562_v56  ;;  %v15203_v16 = vld [vmem:[#allocation14 + $0x148] ss:$16 sps:$4 sm:$0xff]  }
0x1d7f   :  { %v15617_v3 = vpop.eup %15616 }
0x1d80   :  { %v10266_v47 = vmul.f32 %v15617_v3, %v10250_v15 }
0x1d82   :  { %v10267_v34 = vadd.f32 %v10266_v47, %v10248_v39 }
0x1d84   :  { %15618 = vtanh.f32 %v10267_v34 }
0x1d85   :  { %15620 = vrcp.f32 %v10261_v32 }
0x1d8e   :  { %v15619_v35 = vpop.eup %15618 }
0x1d8f   :  { %v10269_v45 = vsub.f32 %v17898_v37, %v15619_v35  ;;  %v15621_v33 = vpop.eup %15620  ;;  %v15133_v37 = vld [vmem:[#allocation17 + $0x8] sm:$0xff]  }
0x1d91   :  { %v10270_v38 = vmul.f32 %v15621_v33, %v10269_v45 }
0x1d93   :  { %v17946_v6 = vadd.f32 %v15619_v35, %v10270_v38 }
0x1d95   :  { %v17950_v1 = vpack.c.bf16 %v17946_v6, %v17946_v6 }
0x1d97   :  { %10712 = vmatmul.mubr.bf16.vlgmr.msra.gmra.mrb[132].mxu0 %v17950_v1  ;;  %10753 = vmatmul.mubr.bf16.vlgmr.msra.gmra.mrb[132].mxu1 %v17950_v1 }
0x1d98   :  { %11339 = vmatprep.mubr.bf16.mxu1 %v17950_v1  ;;  %13541 = vmatprep.mubr.msk.bf16.mxu0 %vm16165_vm0, %v16164_v51 }
0x1d99   :  { %13526 = vmatpush3.bf16.msra.mxu0 %v15132_v17  ;;  %11308 = vmatpush1.bf16.msra.mxu1 %v15140_v28  ;;  %v15143_v17 = vld [vmem:[#allocation14 + $0x8] ss:$16 sps:$4 sm:$0xff]  }
0x1d9a   :  { %13527 = vmatprep.subr.bf16.mxu0 %v16164_v51  ;;  %11309 = vmatprep.subr.bf16.mxu1 %v15148_v29  ;;  %v15167_v28 = vld [vmem:[#allocation14 + $0x88] ss:$16 sps:$4 sm:$0xff]  }
0x1d9b   :  { %v15179_v29 = vld [vmem:[#allocation14 + $0xc8] ss:$16 sps:$4 sm:$0xff]  }
0x1d9d   :  { %13528 = vmatpush3.bf16.msra.mxu0 %v15133_v37  ;;  %11310 = vmatpush1.bf16.msra.mxu1 %v15146_v20  ;;  %v15187_v20 = vld [vmem:[#allocation14 + $0xec] ss:$16 sps:$4 sm:$0xff]  }
0x1d9e   :  { %13529 = vmatprep.subr.bf16.mxu0 %v16164_v51  ;;  %11311 = vmatprep.subr.bf16.mxu1 %v15154_v50  ;;  %v15185_v50 = vld [vmem:[#allocation14 + $0xe8] ss:$16 sps:$4 sm:$0xff]  }
0x1da1   :  { %13530 = vmatpush3.bf16.msra.mxu0 %v15134_v4  ;;  %11312 = vmatpush1.bf16.msra.mxu1 %v15152_v49  ;;  %v15151_v4 = vld [vmem:[#allocation14 + $0x2c] ss:$16 sps:$4 sm:$0xff]   ;;  %v15190_v49 = vld [vmem:[#allocation14 + $0x104] ss:$16 sps:$4 sm:$0xff]  }
0x1da2   :  { %13531 = vmatprep.subr.bf16.mxu0 %v16164_v51  ;;  %11313 = vmatprep.subr.bf16.mxu1 %v15160_v12  ;;  %v15193_v12 = vld [vmem:[#allocation14 + $0x10c] ss:$16 sps:$4 sm:$0xff]  }
0x1da5   :  { %13532 = vmatpush3.bf16.msra.mxu0 %v15135_v2  ;;  %11314 = vmatpush1.bf16.msra.mxu1 %v15158_v25  ;;  %v15149_v2 = vld [vmem:[#allocation14 + $0x28] ss:$16 sps:$4 sm:$0xff]   ;;  %v15188_v25 = vld [vmem:[#allocation14 + $0x100] ss:$16 sps:$4 sm:$0xff]  }
0x1da6   :  { %13533 = vmatprep.subr.bf16.mxu0 %v16164_v51  ;;  %11315 = vmatprep.subr.bf16.mxu1 %v15166_v41  ;;  %v15191_v41 = vld [vmem:[#allocation14 + $0x108] ss:$16 sps:$4 sm:$0xff]  }
0x1da9   :  { %13534 = vmatpush3.bf16.msra.mxu0 %v15136_v19  ;;  %11316 = vmatpush1.bf16.msra.mxu1 %v15164_v8  ;;  %v15157_v19 = vld [vmem:[#allocation14 + $0x4c] ss:$16 sps:$4 sm:$0xff]   ;;  %v15196_v8 = vld [vmem:[#allocation14 + $0x124] ss:$16 sps:$4 sm:$0xff]  }
0x1daa   :  { %13535 = vmatprep.subr.bf16.mxu0 %v16164_v51  ;;  %11317 = vmatprep.subr.bf16.mxu1 %v15172_v22  ;;  %v15199_v22 = vld [vmem:[#allocation14 + $0x12c] ss:$16 sps:$4 sm:$0xff]  }
0x1dad   :  { %13536 = vmatpush3.bf16.msra.mxu0 %v15137_v10  ;;  %11318 = vmatpush1.bf16.msra.mxu1 %v15170_v55  ;;  %v15163_v10 = vld [vmem:[#allocation14 + $0x6c] ss:$16 sps:$4 sm:$0xff]   ;;  %v15194_v55 = vld [vmem:[#allocation14 + $0x120] ss:$16 sps:$4 sm:$0xff]  }
0x1dae   :  { %13537 = vmatprep.subr.bf16.mxu0 %v16164_v51  ;;  %11319 = vmatprep.subr.bf16.mxu1 %v15178_v53  ;;  %v15197_v53 = vld [vmem:[#allocation14 + $0x128] ss:$16 sps:$4 sm:$0xff]  }
0x1db1   :  { %13538 = vmatpush3.bf16.msra.mxu0 %v15138_v9  ;;  %11320 = vmatpush1.bf16.msra.mxu1 %v15176_v59  ;;  %v15161_v9 = vld [vmem:[#allocation14 + $0x68] ss:$16 sps:$4 sm:$0xff]   ;;  %v15202_v59 = vld [vmem:[#allocation14 + $0x144] ss:$16 sps:$4 sm:$0xff]  }
0x1db2   :  { %13539 = vmatprep.subr.bf16.mxu0 %v16164_v51  ;;  %11321 = vmatprep.subr.bf16.mxu1 %v15184_v0  ;;  %v15205_v0 = vld [vmem:[#allocation14 + $0x14c] ss:$16 sps:$4 sm:$0xff]  }
0x1db5   :  { %13540 = vmatpush3.bf16.msra.mxu0 %v15139_v18  ;;  %11322 = vmatpush1.bf16.msra.mxu1 %v15182_v31  ;;  %v15169_v18 = vld [vmem:[#allocation14 + $0x8c] ss:$16 sps:$4 sm:$0xff]   ;;  %v15200_v31 = vld [vmem:[#allocation14 + $0x140] ss:$16 sps:$4 sm:$0xff]  }
0x1db6   :  { %11348 = vmatprep.subr.bf16.mxu0 %v15145_v27  ;;  %v15173_v27 = vld [vmem:[#allocation14 + $0xa8] ss:$16 sps:$4 sm:$0xff]   ;;  %11323 = vmatprep.subr.bf16.mxu1 %v15190_v49  ;;  %v15253_v49 = vld [vmem:[#allocation16 + $0x4c] ss:$16 sps:$4 sm:$0xff]  }
0x1db9   :  { %11324 = vmatpush1.bf16.msra.mxu1 %v15188_v25  ;;  %v15251_v25 = vld [vmem:[#allocation16 + $0x48] ss:$16 sps:$4 sm:$0xff]  }
0x1dba   :  { %11325 = vmatprep.subr.bf16.mxu1 %v15196_v8  ;;  %v15259_v8 = vld [vmem:[#allocation16 + $0x6c] ss:$16 sps:$4 sm:$0xff]  }
0x1dbd   :  { %11326 = vmatpush1.bf16.msra.mxu1 %v15194_v55  ;;  %v15262_v55 = vld [vmem:[#allocation16 + $0x84] ss:$16 sps:$4 sm:$0xff]  }
0x1dbe   :  { %11327 = vmatprep.subr.bf16.mxu1 %v15202_v59  ;;  %v15260_v59 = vld [vmem:[#allocation16 + $0x80] ss:$16 sps:$4 sm:$0xff]  }
0x1dc1   :  { %11328 = vmatpush1.bf16.msra.mxu1 %v15200_v31  ;;  %v15268_v31 = vld [vmem:[#allocation16 + $0xa4] ss:$16 sps:$4 sm:$0xff]  }
0x1e6a   :  { %v10713_v36 = vpop.f32.mrb[132].mxu0  ;;  %v10754_v30 = vpop.f32.mrb[132].mxu1 }
0x1e6b   :  { %v10714_v57 = vadd.f32 %v10713_v36, %v10662_v48  ;;  %v10715_v62 = vpop.f32.mrb[133].mxu0  ;;  %v10756_v42 = vpop.f32.mrb[133].mxu1  ;;  %v10755_v3 = vadd.f32 %v10754_v30, %v10670_v13  ;;  %v15208_v48 = vld [vmem:[#allocation14 + $0x164] ss:$16 sps:$4 sm:$0xff]   ;;  %v15211_v36 = vld [vmem:[#allocation14 + $0x16c] ss:$16 sps:$4 sm:$0xff]  }
0x1e6c   :  { %v10717_v23 = vpop.f32.mrb[134].mxu0  ;;  %v10758_v46 = vpop.f32.mrb[134].mxu1  ;;  %v10716_v43 = vadd.f32 %v10715_v62, %v10666_v26  ;;  %v10757_v5 = vadd.f32 %v10756_v42, %v10674_v63  ;;  %v15206_v30 = vld [vmem:[#allocation14 + $0x160] ss:$16 sps:$4 sm:$0xff]   ;;  %11329 = vmatprep.subr.bf16.mxu1 %v15208_v48  ;;  %v15214_v62 = vld [vmem:[#allocation14 + $0x184] ss:$16 sps:$4 sm:$0xff]  }
0x1e6d   :  { %v13180_v40 = vmul.f32 -1.442695, %v10714_v57  ;;  %v10718_v52 = vpop.f32.mrb[135].mxu0  ;;  %v10759_v54 = vpop.f32.mrb[135].mxu1  ;;  %v15209_v57 = vld [vmem:[#allocation14 + $0x168] ss:$16 sps:$4 sm:$0xff]   ;;  %11330 = vmatpush1.bf16.msra.mxu1 %v15206_v30 }
0x1e6e   :  { %v13181_v44 = vmul.f32 -1.442695, %v10716_v43  ;;  %v15217_v42 = vld [vmem:[#allocation14 + $0x18c] ss:$16 sps:$4 sm:$0xff]   ;;  %v15212_v23 = vld [vmem:[#allocation14 + $0x180] ss:$16 sps:$4 sm:$0xff]   ;;  %11331 = vmatprep.subr.bf16.mxu1 %v15214_v62 }
0x1e6f   :  { %15622 = vpow2.f32 %v13180_v40  ;;  %v15215_v46 = vld [vmem:[#allocation14 + $0x188] ss:$16 sps:$4 sm:$0xff]   ;;  %v15220_v40 = vld [vmem:[#allocation14 + $0x1a4] ss:$16 sps:$4 sm:$0xff]   ;;  %v15223_v52 = vld [vmem:[#allocation14 + $0x1ac] ss:$16 sps:$4 sm:$0xff]  }
0x1e70   :  { %15624 = vpow2.f32 %v13181_v44  ;;  %v15218_v54 = vld [vmem:[#allocation14 + $0x1a0] ss:$16 sps:$4 sm:$0xff]   ;;  %v15221_v26 = vld [vmem:[#allocation14 + $0x1a8] ss:$16 sps:$4 sm:$0xff]   ;;  %v15226_v43 = vld [vmem:[#allocation14 + $0x1c4] ss:$16 sps:$4 sm:$0xff]  }
0x1e71   :  { %11332 = vmatpush1.bf16.msra.mxu1 %v15212_v23  ;;  %v15229_v44 = vld [vmem:[#allocation14 + $0x1cc] ss:$16 sps:$4 sm:$0xff]   ;;  %v15232_v63 = vld [vmem:[#allocation14 + $0x1e4] ss:$16 sps:$4 sm:$0xff]   ;;  %v15266_v48 = vld [vmem:[#allocation16 + $0xa0] ss:$16 sps:$4 sm:$0xff]  }
0x1e72   :  { %11333 = vmatprep.subr.bf16.mxu1 %v15220_v40  ;;  %v15235_v13 = vld [vmem:[#allocation14 + $0x1ec] ss:$16 sps:$4 sm:$0xff]   ;;  %v15274_v30 = vld [vmem:[#allocation16 + $0xc4] ss:$16 sps:$4 sm:$0xff]   ;;  %v15272_v62 = vld [vmem:[#allocation16 + $0xc0] ss:$16 sps:$4 sm:$0xff]  }
0x1e73   :  { %v15280_v23 = vld [vmem:[#allocation16 + $0xe4] ss:$16 sps:$4 sm:$0xff]   ;;  %v15278_v40 = vld [vmem:[#allocation16 + $0xe0] ss:$16 sps:$4 sm:$0xff]  }
0x1e75   :  { %11334 = vmatpush1.bf16.msra.mxu1 %v15218_v54  ;;  %v15286_v54 = vld [vmem:[#allocation16 + $0x104] ss:$16 sps:$4 sm:$0xff]  }
0x1e76   :  { %11335 = vmatprep.subr.bf16.mxu1 %v15226_v43  ;;  %v15284_v43 = vld [vmem:[#allocation16 + $0x100] ss:$16 sps:$4 sm:$0xff]  }
0x1e79   :  { %v15623_v61 = vpop.eup %15622 }
0x1e7a   :  { %v10767_v60 = vadd.f32 1.0, %v15623_v61  ;;  %v15625_v14 = vpop.eup %15624  ;;  %v15224_v61 = vld [vmem:[#allocation14 + $0x1c0] ss:$16 sps:$4 sm:$0xff]  }
0x1e7b   :  { %v10768_v47 = vadd.f32 1.0, %v15625_v14  ;;  %11336 = vmatpush1.bf16.msra.mxu1 %v15224_v61  ;;  %v15230_v14 = vld [vmem:[#allocation14 + $0x1e0] ss:$16 sps:$4 sm:$0xff]   ;;  %v15292_v61 = vld [vmem:[#allocation16 + $0x124] ss:$16 sps:$4 sm:$0xff]  }
0x1e7c   :  { %15626 = vrcp.f32 %v10767_v60  ;;  %v15227_v60 = vld [vmem:[#allocation14 + $0x1c8] ss:$16 sps:$4 sm:$0xff]   ;;  %11337 = vmatprep.subr.bf16.mxu1 %v15232_v63  ;;  %v15290_v63 = vld [vmem:[#allocation16 + $0x120] ss:$16 sps:$4 sm:$0xff]  }
0x1e7f   :  { %11338 = vmatpush1.bf16.msra.mxu1 %v15230_v14  ;;  %v15298_v14 = vld [vmem:[#allocation16 + $0x144] ss:$16 sps:$4 sm:$0xff]  }
0x1e86   :  { %v15627_v15 = vpop.eup %15626 }
0x1e87   :  { %v10773_v39 = vmul.f32 %v15627_v15, %v10757_v5  ;;  %v15233_v5 = vld [vmem:[#allocation14 + $0x1e8] ss:$16 sps:$4 sm:$0xff]   ;;  %v15238_v15 = vld [vmem:[#allocation16 + $0x4] ss:$16 sps:$4 sm:$0xff]  }
0x1e88   :  { %11814 = vmatprep.subr.bf16.mxu1 %v15238_v15  ;;  %v15296_v15 = vld [vmem:[#allocation16 + $0x140] ss:$16 sps:$4 sm:$0xff]  }
0x1e89   :  { %v10774_v32 = vadd.f32 %v10773_v39, %v10755_v3  ;;  %v15241_v3 = vld [vmem:[#allocation16 + $0xc] ss:$16 sps:$4 sm:$0xff]   ;;  %v10796_v39 = vld [vmem:[%s18039_s13] sm:$0x1] }
0x1e8b   :  { %15628 = vtanh.f32 %v10774_v32 }
0x1e8c   :  { %15630 = vrcp.f32 %v10768_v47 }
0x1e95   :  { %v15629_v34 = vpop.eup %15628 }
0x1e96   :  { %v10776_v35 = vsub.f32 %v17924_v21, %v15629_v34  ;;  %v15631_v45 = vpop.eup %15630  ;;  %v15155_v21 = vld [vmem:[#allocation14 + $0x48] ss:$16 sps:$4 sm:$0xff]  }
0x1e98   :  { %v10777_v33 = vmul.f32 %v15631_v45, %v10776_v35 }
0x1e9a   :  { %v17972_v38 = vadd.f32 %v15629_v34, %v10777_v33 }
0x1e9c   :  { %v17976_v37 = vpack.c.bf16 %v17972_v38, %v17972_v38 }
0x1e9e   :  { %13542 = vmatmul.mubr.bf16.vlgmr.msra.gmra.mrb[136].mxu0 %v17976_v37 }
0x1e9f   :  { %11380 = vmatprep.mubr.bf16.mxu0 %v17950_v1  ;;  %11349 = vmatpush1.bf16.msra.mxu0 %v15143_v17  ;;  %v15181_v1 = vld [vmem:[#allocation14 + $0xcc] ss:$16 sps:$4 sm:$0xff]  }
0x1ea0   :  { %11350 = vmatprep.subr.bf16.mxu0 %v15151_v4 }
0x1ea3   :  { %11351 = vmatpush1.bf16.msra.mxu0 %v15149_v2  ;;  %v10896_v2 = vstv %s10895_s18 }
0x1ea4   :  { %11352 = vmatprep.subr.bf16.mxu0 %v15157_v19  ;;  %v10894_v19 = vld [vmem:[#allocation8 + $0x6] sm:$0x1]  ;;  %vm10897_vm7 = vcmp.eq.s32.totalorder %v10896_v2, 1 }
0x1ea5   :  { %v15319_v2 = vld [vmem:[#allocation16 + $0x1ac] ss:$16 sps:$4 sm:$0xff]  }
0x1ea7   :  { %11353 = vmatpush1.bf16.msra.mxu0 %v15155_v21 }
0x1ea8   :  { %11354 = vmatprep.subr.bf16.mxu0 %v15163_v10 }
0x1eab   :  { %11355 = vmatpush1.bf16.msra.mxu0 %v15161_v9 }
0x1eac   :  { %11356 = vmatprep.subr.bf16.mxu0 %v15169_v18 }
0x1eaf   :  { %11357 = vmatpush1.bf16.msra.mxu0 %v15167_v28  ;;  %v15236_v28 = vld [vmem:[#allocation16] ss:$16 sps:$4 sm:$0xff]  }
0x1eb0   :  { %11358 = vmatprep.subr.bf16.mxu0 %v15175_v58  ;;  %v15239_v58 = vld [vmem:[#allocation16 + $0x8] ss:$16 sps:$4 sm:$0xff]  }
0x1eb3   :  { %11359 = vmatpush1.bf16.msra.mxu0 %v15173_v27  ;;  %v15244_v27 = vld [vmem:[#allocation16 + $0x24] ss:$16 sps:$4 sm:$0xff]  }
0x1eb4   :  { %11360 = vmatprep.subr.bf16.mxu0 %v15181_v1  ;;  %v15247_v1 = vld [vmem:[#allocation16 + $0x2c] ss:$16 sps:$4 sm:$0xff]  }
0x1eb7   :  { %11361 = vmatpush1.bf16.msra.mxu0 %v15179_v29  ;;  %v15242_v29 = vld [vmem:[#allocation16 + $0x20] ss:$16 sps:$4 sm:$0xff]  }
0x1eb8   :  { %11362 = vmatprep.subr.bf16.mxu0 %v15187_v20  ;;  %v15245_v20 = vld [vmem:[#allocation16 + $0x28] ss:$16 sps:$4 sm:$0xff]  }
0x1ebb   :  { %11363 = vmatpush1.bf16.msra.mxu0 %v15185_v50  ;;  %v15250_v50 = vld [vmem:[#allocation16 + $0x44] ss:$16 sps:$4 sm:$0xff]  }
0x1ebc   :  { %11364 = vmatprep.subr.bf16.mxu0 %v15193_v12  ;;  %v15248_v12 = vld [vmem:[#allocation16 + $0x40] ss:$16 sps:$4 sm:$0xff]  }
0x1ebf   :  { %11365 = vmatpush1.bf16.msra.mxu0 %v15191_v41  ;;  %v15256_v41 = vld [vmem:[#allocation16 + $0x64] ss:$16 sps:$4 sm:$0xff]  }
0x1ec0   :  { %11366 = vmatprep.subr.bf16.mxu0 %v15199_v22  ;;  %v15254_v22 = vld [vmem:[#allocation16 + $0x60] ss:$16 sps:$4 sm:$0xff]  }
0x1ec3   :  { %11367 = vmatpush1.bf16.msra.mxu0 %v15197_v53  ;;  %v15265_v53 = vld [vmem:[#allocation16 + $0x8c] ss:$16 sps:$4 sm:$0xff]  }
0x1ec4   :  { %11368 = vmatprep.subr.bf16.mxu0 %v15205_v0  ;;  %v15263_v0 = vld [vmem:[#allocation16 + $0x88] ss:$16 sps:$4 sm:$0xff]  }
0x1ec7   :  { %11369 = vmatpush1.bf16.msra.mxu0 %v15203_v16  ;;  %v15271_v16 = vld [vmem:[#allocation16 + $0xac] ss:$16 sps:$4 sm:$0xff]  }
0x1ec8   :  { %11370 = vmatprep.subr.bf16.mxu0 %v15211_v36  ;;  %v15269_v36 = vld [vmem:[#allocation16 + $0xa8] ss:$16 sps:$4 sm:$0xff]  }
0x1ecb   :  { %11371 = vmatpush1.bf16.msra.mxu0 %v15209_v57  ;;  %v15277_v57 = vld [vmem:[#allocation16 + $0xcc] ss:$16 sps:$4 sm:$0xff]  }
0x1ecc   :  { %11372 = vmatprep.subr.bf16.mxu0 %v15217_v42  ;;  %v15275_v42 = vld [vmem:[#allocation16 + $0xc8] ss:$16 sps:$4 sm:$0xff]  }
0x1ecf   :  { %11373 = vmatpush1.bf16.msra.mxu0 %v15215_v46  ;;  %v15283_v46 = vld [vmem:[#allocation16 + $0xec] ss:$16 sps:$4 sm:$0xff]  }
0x1ed0   :  { %11374 = vmatprep.subr.bf16.mxu0 %v15223_v52  ;;  %v15281_v52 = vld [vmem:[#allocation16 + $0xe8] ss:$16 sps:$4 sm:$0xff]  }
0x1ed3   :  { %11375 = vmatpush1.bf16.msra.mxu0 %v15221_v26  ;;  %v15289_v26 = vld [vmem:[#allocation16 + $0x10c] ss:$16 sps:$4 sm:$0xff]  }
0x1ed4   :  { %11376 = vmatprep.subr.bf16.mxu0 %v15229_v44  ;;  %v15287_v44 = vld [vmem:[#allocation16 + $0x108] ss:$16 sps:$4 sm:$0xff]  }
0x1ed7   :  { %11377 = vmatpush1.bf16.msra.mxu0 %v15227_v60  ;;  %v15295_v60 = vld [vmem:[#allocation16 + $0x12c] ss:$16 sps:$4 sm:$0xff]  }
0x1ed8   :  { %11378 = vmatprep.subr.bf16.mxu0 %v15235_v13  ;;  %v15293_v13 = vld [vmem:[#allocation16 + $0x128] ss:$16 sps:$4 sm:$0xff]  }
0x1edb   :  { %11379 = vmatpush1.bf16.msra.mxu0 %v15233_v5  ;;  %v15301_v5 = vld [vmem:[#allocation16 + $0x14c] ss:$16 sps:$4 sm:$0xff]  }
0x1edc   :  { %11855 = vmatprep.subr.bf16.mxu0 %v15241_v3  ;;  %v15299_v3 = vld [vmem:[#allocation16 + $0x148] ss:$16 sps:$4 sm:$0xff]  }
0x1f71   :  { %v10879_v47 = vpop.f32.mrb[136].mxu0 }
0x1f72   :  { %v10880_v32 = vadd.f32 %v10879_v47, %v10796_v39  ;;  %v13543_v34 = vpop.f32.mrb[137].mxu0  ;;  %v15304_v39 = vld [vmem:[#allocation16 + $0x164] ss:$16 sps:$4 sm:$0xff]   ;;  %v15307_v47 = vld [vmem:[#allocation16 + $0x16c] ss:$16 sps:$4 sm:$0xff]  }
0x1f73   :  { %v10882_v35 = vpop.f32.mrb[138].mxu0  ;;  %v15305_v34 = vld [vmem:[#allocation16 + $0x168] ss:$16 sps:$4 sm:$0xff]  }
0x1f74   :  { %v13190_v45 = vmul.f32 -1.442695, %v10880_v32  ;;  %v13544_v33 = vpop.f32.mrb[139].mxu0  ;;  %v15302_v32 = vld [vmem:[#allocation16 + $0x160] ss:$16 sps:$4 sm:$0xff]  }
0x1f75   :  { %v15308_v35 = vld [vmem:[#allocation16 + $0x180] ss:$16 sps:$4 sm:$0xff]   ;;  %v15311_v33 = vld [vmem:[#allocation16 + $0x188] ss:$16 sps:$4 sm:$0xff]  }
0x1f76   :  { %15632 = vpow2.f32 %v13190_v45  ;;  %v15310_v45 = vld [vmem:[#allocation16 + $0x184] ss:$16 sps:$4 sm:$0xff]  }
0x1f80   :  { %v15633_v17 = vpop.eup %15632 }
0x1f81   :  { %v10888_v4 = vadd.f32 1.0, %v15633_v17  ;;  %v15313_v17 = vld [vmem:[#allocation16 + $0x18c] ss:$16 sps:$4 sm:$0xff]  }
0x1f83   :  { %15634 = vrcp.f32 %v10888_v4  ;;  %v15316_v4 = vld [vmem:[#allocation16 + $0x1a4] ss:$16 sps:$4 sm:$0xff]  }
0x1f8d   :  { %v15635_v21 = vpop.eup %15634 }
0x1f8e   :  { %10891 = vst [vmem:[#allocation19 + $0x6] sm:$0x1] %v15635_v21  ;;  %v10898_v10 = vsel %vm10897_vm7, %v10894_v19, %v15635_v21  ;;  %v15314_v19 = vld [vmem:[#allocation16 + $0x1a0] ss:$16 sps:$4 sm:$0xff]   ;;  %v15317_v21 = vld [vmem:[#allocation16 + $0x1a8] ss:$16 sps:$4 sm:$0xff]  }
0x1f8f   :  { %v10899_v9 = vmax.f32 %v10898_v10, 0.0  ;;  %v15322_v10 = vld [vmem:[#allocation16 + $0x1c4] ss:$16 sps:$4 sm:$0xff]  }
0x1f91   :  { %v10900_v18 = vpack.c.bf16 %v10899_v9, %v10899_v9  ;;  %v15325_v9 = vld [vmem:[#allocation16 + $0x1cc] ss:$16 sps:$4 sm:$0xff]  }
0x1f93   :  { %11340 = vmatmul.mubr.bf16.vlgmr.msra.gmra.mrb[136].mxu1 %v10900_v18  ;;  %11381 = vmatmul.mubr.bf16.vlgmr.msra.gmra.mrb[140].mxu0 %v10900_v18  ;;  %v15320_v18 = vld [vmem:[#allocation16 + $0x1c0] ss:$16 sps:$4 sm:$0xff]  }
0x1f94   :  { %11846 = vmatprep.mubr.bf16.mxu1 %v17976_v37  ;;  %11887 = vmatprep.mubr.bf16.mxu0 %v17976_v37  ;;  %v15257_v37 = vld [vmem:[#allocation16 + $0x68] ss:$16 sps:$4 sm:$0xff]  }
0x1f95   :  { %11815 = vmatpush1.bf16.msra.mxu1 %v15236_v28  ;;  %11856 = vmatpush1.bf16.msra.mxu0 %v15239_v58  ;;  %v15323_v28 = vld [vmem:[#allocation16 + $0x1c8] ss:$16 sps:$4 sm:$0xff]   ;;  %v15328_v58 = vld [vmem:[#allocation16 + $0x1e4] ss:$16 sps:$4 sm:$0xff]  }
0x1f96   :  { %11816 = vmatprep.subr.bf16.mxu1 %v15244_v27  ;;  %11857 = vmatprep.subr.bf16.mxu0 %v15247_v1  ;;  %v15331_v27 = vld [vmem:[#allocation16 + $0x1ec] ss:$16 sps:$4 sm:$0xff]   ;;  %v15326_v1 = vld [vmem:[#allocation16 + $0x1e0] ss:$16 sps:$4 sm:$0xff]  }
0x1f99   :  { %11817 = vmatpush1.bf16.msra.mxu1 %v15242_v29  ;;  %11858 = vmatpush1.bf16.msra.mxu0 %v15245_v20  ;;  %v15329_v29 = vld [vmem:[#allocation16 + $0x1e8] ss:$16 sps:$4 sm:$0xff]   ;;  %v10965_v20 = vld [vmem:[%s18035_s9] sm:$0xf] }
0x1f9a   :  { %11818 = vmatprep.subr.bf16.mxu1 %v15250_v50  ;;  %11859 = vmatprep.subr.bf16.mxu0 %v15253_v49  ;;  %v11290_v50 = vrot.slane %v10965_v20, %v18560_v11 }
0x1f9d   :  { %11819 = vmatpush1.bf16.msra.mxu1 %v15248_v12  ;;  %11860 = vmatpush1.bf16.msra.mxu0 %v15251_v25 }
0x1f9e   :  { %11820 = vmatprep.subr.bf16.mxu1 %v15256_v41  ;;  %11861 = vmatprep.subr.bf16.mxu0 %v15259_v8 }
0x1fa1   :  { %11821 = vmatpush1.bf16.msra.mxu1 %v15254_v22  ;;  %11862 = vmatpush1.bf16.msra.mxu0 %v15257_v37 }
0x1fa2   :  { %11822 = vmatprep.subr.bf16.mxu1 %v15262_v55  ;;  %11863 = vmatprep.subr.bf16.mxu0 %v15265_v53 }
0x1fa5   :  { %11823 = vmatpush1.bf16.msra.mxu1 %v15260_v59  ;;  %11864 = vmatpush1.bf16.msra.mxu0 %v15263_v0  ;;  %v11294_v0 = vrot.slane %v10965_v20, %v18561_v7 }
0x1fa6   :  { %11824 = vmatprep.subr.bf16.mxu1 %v15268_v31  ;;  %11865 = vmatprep.subr.bf16.mxu0 %v15271_v16 }
0x1fa9   :  { %11825 = vmatpush1.bf16.msra.mxu1 %v15266_v48  ;;  %11866 = vmatpush1.bf16.msra.mxu0 %v15269_v36 }
0x1faa   :  { %11826 = vmatprep.subr.bf16.mxu1 %v15274_v30  ;;  %11867 = vmatprep.subr.bf16.mxu0 %v15277_v57  ;;  %v11302_v30 = vrot.slane %v10965_v20, %v18562_v56  ;;  %v11298_v57 = vrot.slane %v10965_v20, %v18563_v24 }
0x1fad   :  { %11827 = vmatpush1.bf16.msra.mxu1 %v15272_v62  ;;  %11868 = vmatpush1.bf16.msra.mxu0 %v15275_v42 }
0x1fae   :  { %11828 = vmatprep.subr.bf16.mxu1 %v15280_v23  ;;  %11869 = vmatprep.subr.bf16.mxu0 %v15283_v46 }
0x1fb1   :  { %11829 = vmatpush1.bf16.msra.mxu1 %v15278_v40  ;;  %11870 = vmatpush1.bf16.msra.mxu0 %v15281_v52 }
0x1fb2   :  { %11830 = vmatprep.subr.bf16.mxu1 %v15286_v54  ;;  %11871 = vmatprep.subr.bf16.mxu0 %v15289_v26 }
0x1fb5   :  { %11831 = vmatpush1.bf16.msra.mxu1 %v15284_v43  ;;  %11872 = vmatpush1.bf16.msra.mxu0 %v15287_v44 }
0x1fb6   :  { %11832 = vmatprep.subr.bf16.mxu1 %v15292_v61  ;;  %11873 = vmatprep.subr.bf16.mxu0 %v15295_v60 }
0x1fb9   :  { %11833 = vmatpush1.bf16.msra.mxu1 %v15290_v63  ;;  %11874 = vmatpush1.bf16.msra.mxu0 %v15293_v13  ;;  %v15332_v13 = vld [vmem:[#allocation17] sm:$0xff]  }
0x1fba   :  { %11834 = vmatprep.subr.bf16.mxu1 %v15298_v14  ;;  %11875 = vmatprep.subr.bf16.mxu0 %v15301_v5  ;;  %v15333_v14 = vld [vmem:[#allocation17 + $0x8] sm:$0xff]   ;;  %v15334_v5 = vld [vmem:[#allocation17 + $0x10] sm:$0xff]  }
0x1fbd   :  { %11835 = vmatpush1.bf16.msra.mxu1 %v15296_v15  ;;  %11876 = vmatpush1.bf16.msra.mxu0 %v15299_v3  ;;  %v15336_v15 = vld [vmem:[#allocation17 + $0x20] sm:$0xff]   ;;  %v15337_v3 = vld [vmem:[#allocation17 + $0x28] sm:$0xff]  }
0x1fbe   :  { %11836 = vmatprep.subr.bf16.mxu1 %v15304_v39  ;;  %11877 = vmatprep.subr.bf16.mxu0 %v15307_v47  ;;  %v15338_v39 = vld [vmem:[#allocation17 + $0x30] sm:$0xff]   ;;  %v15339_v47 = vld [vmem:[#allocation17 + $0x38] sm:$0xff]  }
0x1fc1   :  { %11837 = vmatpush1.bf16.msra.mxu1 %v15302_v32  ;;  %11878 = vmatpush1.bf16.msra.mxu0 %v15305_v34  ;;  %v11472_v32 = vld [vmem:[%s18037_s11] sm:$0xf] }
0x1fc2   :  { %11838 = vmatprep.subr.bf16.mxu1 %v15310_v45  ;;  %11879 = vmatprep.subr.bf16.mxu0 %v15313_v17  ;;  %v11797_v34 = vrot.slane %v11472_v32, %v18560_v11  ;;  %v11809_v11 = vrot.slane %v11472_v32, %v18562_v56  ;;  %v11931_v56 = vld [vmem:[%s18039_s13] sm:$0x1] }
0x1fc5   :  { %11839 = vmatpush1.bf16.msra.mxu1 %v15308_v35  ;;  %11880 = vmatpush1.bf16.msra.mxu0 %v15311_v33 }
0x1fc6   :  { %11840 = vmatprep.subr.bf16.mxu1 %v15316_v4  ;;  %11881 = vmatprep.subr.bf16.mxu0 %v15319_v2 }
0x1fc9   :  { %11841 = vmatpush1.bf16.msra.mxu1 %v15314_v19  ;;  %11882 = vmatpush1.bf16.msra.mxu0 %v15317_v21 }
0x1fca   :  { %11842 = vmatprep.subr.bf16.mxu1 %v15322_v10  ;;  %11883 = vmatprep.subr.bf16.mxu0 %v15325_v9 }
0x1fcd   :  { %11843 = vmatpush1.bf16.msra.mxu1 %v15320_v18  ;;  %11884 = vmatpush1.bf16.msra.mxu0 %v15323_v28 }
0x1fce   :  { %11844 = vmatprep.subr.bf16.mxu1 %v15328_v58  ;;  %11885 = vmatprep.subr.bf16.mxu0 %v15331_v27 }
0x1fd1   :  { %11845 = vmatpush1.bf16.msra.mxu1 %v15326_v1  ;;  %11886 = vmatpush1.bf16.msra.mxu0 %v15329_v29  ;;  %v11805_v1 = vrot.slane %v11472_v32, %v18563_v24 }
0x1fd2   :  { %13545 = vmatprep.subr.bf16.mxu1 %v16164_v51 }
0x2066   :  { %v11341_v49 = vpop.f32.mrb[136].mxu1  ;;  %v11382_v12 = vpop.f32.mrb[140].mxu0 }
0x2067   :  { %v11342_v25 = vadd.f32 %v11341_v49, %v11290_v50  ;;  %v11343_v41 = vpop.f32.mrb[137].mxu1  ;;  %v11384_v8 = vpop.f32.mrb[141].mxu0  ;;  %v11383_v46 = vadd.f32 %v11382_v12, %v11298_v57 }
0x2068   :  { %v11345_v22 = vpop.f32.mrb[138].mxu1  ;;  %v11386_v37 = vpop.f32.mrb[142].mxu0  ;;  %v11344_v31 = vadd.f32 %v11343_v41, %v11294_v0  ;;  %v11385_v42 = vadd.f32 %v11384_v8, %v11302_v30 }
0x2069   :  { %v13256_v55 = vmul.f32 -1.442695, %v11342_v25  ;;  %v11346_v53 = vpop.f32.mrb[139].mxu1  ;;  %v11387_v59 = vpop.f32.mrb[143].mxu0 }
0x206a   :  { %v13257_v16 = vmul.f32 -1.442695, %v11344_v31 }
0x206b   :  { %15636 = vpow2.f32 %v13256_v55 }
0x206c   :  { %15638 = vpow2.f32 %v13257_v16 }
0x2075   :  { %v15637_v48 = vpop.eup %15636 }
0x2076   :  { %v11395_v36 = vadd.f32 1.0, %v15637_v48  ;;  %v15639_v62 = vpop.eup %15638 }
0x2077   :  { %v11396_v52 = vadd.f32 1.0, %v15639_v62 }
0x2078   :  { %15640 = vrcp.f32 %v11395_v36 }
0x2082   :  { %v15641_v23 = vpop.eup %15640 }
0x2083   :  { %v11401_v40 = vmul.f32 %v15641_v23, %v11385_v42 }
0x2085   :  { %v11402_v54 = vadd.f32 %v11401_v40, %v11383_v46 }
0x2087   :  { %15642 = vtanh.f32 %v11402_v54 }
0x2088   :  { %15644 = vrcp.f32 %v11396_v52 }
0x2091   :  { %v15643_v26 = vpop.eup %15642 }
0x2092   :  { %v11404_v43 = vsub.f32 %v17946_v6, %v15643_v26  ;;  %v15645_v44 = vpop.eup %15644  ;;  %v15335_v6 = vld [vmem:[#allocation17 + $0x18] sm:$0xff]  }
0x2094   :  { %v11405_v61 = vmul.f32 %v15645_v44, %v11404_v43 }
0x2096   :  { %v11406_v60 = vadd.f32 %v15643_v26, %v11405_v61 }
0x2098   :  { %v11407_v63 = vpack.c.bf16 %v11406_v60, %v11406_v60 }
0x209a   :  { %11847 = vmatmul.mubr.bf16.vlgmr.msra.gmra.mrb[140].mxu1 %v11407_v63  ;;  %11888 = vmatmul.mubr.bf16.vlgmr.msra.gmra.mrb[144].mxu0 %v11407_v63 }
0x209b   :  { %13561 = vmatprep.mubr.msk.bf16.mxu1 %vm16165_vm0, %v16164_v51  ;;  %13546 = vmatpush3.bf16.msra.mxu1 %v15332_v13 }
0x209c   :  { %13547 = vmatprep.subr.bf16.mxu1 %v16164_v51 }
0x209f   :  { %13548 = vmatpush3.bf16.msra.mxu1 %v15333_v14 }
0x20a0   :  { %13549 = vmatprep.subr.bf16.mxu1 %v16164_v51 }
0x20a3   :  { %13550 = vmatpush3.bf16.msra.mxu1 %v15334_v5 }
0x20a4   :  { %13551 = vmatprep.subr.bf16.mxu1 %v16164_v51 }
0x20a7   :  { %13552 = vmatpush3.bf16.msra.mxu1 %v15335_v6 }
0x20a8   :  { %13553 = vmatprep.subr.bf16.mxu1 %v16164_v51 }
0x20ab   :  { %13554 = vmatpush3.bf16.msra.mxu1 %v15336_v15 }
0x20ac   :  { %13555 = vmatprep.subr.bf16.mxu1 %v16164_v51 }
0x20af   :  { %13556 = vmatpush3.bf16.msra.mxu1 %v15337_v3 }
0x20b0   :  { %13557 = vmatprep.subr.bf16.mxu1 %v16164_v51 }
0x20b3   :  { %13558 = vmatpush3.bf16.msra.mxu1 %v15338_v39 }
0x20b4   :  { %13559 = vmatprep.subr.bf16.mxu1 %v16164_v51  ;;  %v11801_v51 = vrot.slane %v11472_v32, %v18561_v7 }
0x20b7   :  { %13560 = vmatpush3.bf16.msra.mxu1 %v15339_v47 }
0x216d   :  { %v11848_v35 = vpop.f32.mrb[140].mxu1  ;;  %v11889_v45 = vpop.f32.mrb[144].mxu0 }
0x216e   :  { %v11849_v33 = vadd.f32 %v11848_v35, %v11797_v34  ;;  %v11850_v17 = vpop.f32.mrb[141].mxu1  ;;  %v11891_v4 = vpop.f32.mrb[145].mxu0  ;;  %v11890_v49 = vadd.f32 %v11889_v45, %v11805_v1 }
0x216f   :  { %v11852_v2 = vpop.f32.mrb[142].mxu1  ;;  %v11893_v19 = vpop.f32.mrb[146].mxu0  ;;  %v11851_v18 = vadd.f32 %v11850_v17, %v11801_v51  ;;  %v11892_v20 = vadd.f32 %v11891_v4, %v11809_v11 }
0x2170   :  { %v13322_v21 = vmul.f32 -1.442695, %v11849_v33  ;;  %v11853_v10 = vpop.f32.mrb[143].mxu1  ;;  %v11894_v9 = vpop.f32.mrb[147].mxu0 }
0x2171   :  { %v13323_v28 = vmul.f32 -1.442695, %v11851_v18 }
0x2172   :  { %15646 = vpow2.f32 %v13322_v21 }
0x2173   :  { %15648 = vpow2.f32 %v13323_v28 }
0x217c   :  { %v15647_v58 = vpop.eup %15646 }
0x217d   :  { %v11902_v27 = vadd.f32 1.0, %v15647_v58  ;;  %v15649_v29 = vpop.eup %15648 }
0x217e   :  { %v11903_v25 = vadd.f32 1.0, %v15649_v29 }
0x217f   :  { %15650 = vrcp.f32 %v11902_v27 }
0x2189   :  { %v15651_v50 = vpop.eup %15650 }
0x218a   :  { %v11908_v12 = vmul.f32 %v15651_v50, %v11892_v20 }
0x218c   :  { %v11909_v41 = vadd.f32 %v11908_v12, %v11890_v49 }
0x218e   :  { %15652 = vtanh.f32 %v11909_v41 }
0x218f   :  { %15654 = vrcp.f32 %v11903_v25 }
0x2198   :  { %v15653_v7 = vpop.eup %15652 }
0x2199   :  { %v11911_v8 = vsub.f32 %v17972_v38, %v15653_v7  ;;  %v15655_v22 = vpop.eup %15654 }
0x219b   :  { %v11912_v37 = vmul.f32 %v15655_v22, %v11911_v8 }
0x219d   :  { %v11913_v55 = vadd.f32 %v15653_v7, %v11912_v37 }
0x219f   :  { %v11914_v53 = vpack.c.bf16 %v11913_v55, %v11913_v55 }
0x21a1   :  { %13562 = vmatmul.mubr.bf16.vlgmr.msra.gmra.mrb[144].mxu1 %v11914_v53 }
0x2274   :  { %v12014_v24 = vpop.f32.mrb[144].mxu1 }
0x2275   :  { %v12015_v59 = vadd.f32 %v12014_v24, %v11931_v56  ;;  %v13563_v0 = vpop.f32.mrb[145].mxu1 }
0x2276   :  { %v12017_v31 = vpop.f32.mrb[146].mxu1 }
0x2277   :  { %v13332_v16 = vmul.f32 -1.442695, %v12015_v59  ;;  %v13564_v48 = vpop.f32.mrb[147].mxu1 }
0x2279   :  { %15656 = vpow2.f32 %v13332_v16 }
0x2283   :  { %v15657_v36 = vpop.eup %15656 }
0x2284   :  { %v12023_v30 = vadd.f32 1.0, %v15657_v36 }
0x2286   :  { %15658 = vrcp.f32 %v12023_v30 }
0x2290   :  { %v15659_v38 = vpop.eup %15658 }
0x2291   :  { %12026 = vst [vmem:[#allocation19 + $0x7] sm:$0x1] %v15659_v38 }
0x2292   :  { %16123 = shalt.err (!%p16120_p8)
}
0x2293   :  { %s16124_s0 = scalar_lea.hbm %s18040_s14, 128 }
0x2294   :  { %p16125_p9 = scmp.ne.s32.totalorder %s18040_s14, %s16124_s0  ;;  %p16128_p10 = scmp.lt.u32.totalorder %s16124_s0, %s18040_s14 }
0x2296   :  { %p16130_p11 = pnand %p16128_p10, %p16125_p9 }
0x2298   :  { %16133 = shalt.err (!%p16130_p11)
}
0x2299   :  { %12036 = dma.vmem_to_hbm [thread:$0]  %s12034_s6, 128, %s18040_s14, [#allocation5]  }
0x229a   :  { %16146 = dma.done.wait [#allocation5], 128  }
0x229b   :  { %16147 = vsyncadd [#allocation5], 4294967168 }
0x229c   :  { %12040 = vsyncpa [#allocation4], 1 }
0x229d   :  { %12041 = vsyncpa [#allocation9], 1 }
0x229e   :  { %12042 = vsyncpa [#allocation12], 1 }
0x229f   :  { %12043 = vsyncpa [#allocation15], 1 }
0x22a0   :  { %12044 = vsyncpa [#allocation18], 1 }
0x22a1   :  { %12045 = vsyncpa [#allocation5], 1 }
0x22a2   :  { %12046 = vsyncpa [#allocation6], 1 }

</bundles_post_ra>
